<compile_context>
chip_gen: v7x
topology: tpu7x:2x2x1
jax: 0.10.0
libtpu: 0.0.40
codegen_flags: <defaults>
</compile_context>

<pallas_src>
import functools

import jax
import jax.numpy as jnp
from jax.experimental import pallas as pl
from jax.experimental.pallas import tpu as pltpu


# Static layer geometry (LeNet on 32x32 DVS frames).
_H0 = 32                       # conv1 input height (rows streamed per step)
_CIN = 2                       # DVS polarity channels
_KW = 5                        # all convs are 5x5
_WG1 = 14                      # conv1 output width per lane group (2 x 14 = 28)
_COLS1 = _WG1 + _KW - 1        # 18 input columns per group window
_K1 = 64                       # conv1 K lanes (2*18 = 36 real, padded to 64)
_CH = 4                        # conv1 output H rows per fused chunk (7 chunks)


# ----------------------------------------------------------------------------
# Fused kernel: one grid step == one SNN timestep (all 7 layers) for one
# batch block.  Lane layouts (per batch block, rows always end in the batch
# index, bp a multiple of 8 sublanes):
#   L1 (28x28x6):  rows (h, g, b), 2 groups of 14 W;  lane = w_local*6  + c
#   L2 (14x14x6):  rows (h, b);                        lane = w*6        + c
#   L3 (10x10x16): rows (g, h, b), 2 groups of 5 W;   lane = w_local*16 + c
#   L4 (5x5x16):   rows (h, b);                        lane = w*16       + c
#   L5/L6/L7:      rows (b);                           lane = feature
# ----------------------------------------------------------------------------
def _lenet_step_kernel(x_ref, w1_ref, m1_ref, w2_ref, m2_ref, w3_ref,
                       wf1_ref, wf2_ref,
                       sum_ref,
                       h1m, h1s, h2m, h2s, h3m, h3s, h4m, h4s,
                       h5m, h5s, h6m, h6s, h7m, h7s,
                       *, bp, decay1, decay2, const, thresh):
    f32 = jnp.float32
    bf16 = jnp.bfloat16

    def lif(cur, m1, m2, s_prev):
        # dual-compartment LIF membrane update (see TODO at top of file)
        r = 1.0 - s_prev
        m1n = m1 * (decay1 * r) + cur
        m2n = m2 * (decay2 * r) + const * cur
        sn = ((m1n + m2n) > thresh).astype(f32)
        return m1n, m2n, sn

    def lif_layer(cur, m_ref, s_ref):
        m1n, m2n, sn = lif(cur, m_ref[0], m_ref[1], s_ref[...].astype(f32))
        m_ref[0] = m1n
        m_ref[1] = m2n
        s_ref[...] = sn.astype(bf16)          # spikes stored bf16 (exact 0/1)
        return sn

    # -------- t == 0: reset all persistent LIF state and the spike accumulator
    @pl.when(pl.program_id(1) == 0)
    def _():
        for r in (h1m, h2m, h3m, h4m, h5m, h6m, h7m,
                  h1s, h2s, h3s, h4s, h5s, h6s, h7s):
            r[...] = jnp.zeros_like(r)
        sum_ref[...] = jnp.zeros_like(sum_ref)

    rg = 2 * bp                                # rows per H line: (group, batch)

    # -------- conv1 + LIF1: 7 fully unrolled chunks of 4 output H rows,
    # each chunk = 5 shifted-slice MXU matmuls straight off the frame slab.
    m1v, m2v = h1m.at[0], h1m.at[1]
    for c in range(28 // _CH):
        h0 = _CH * c
        acc = jnp.zeros((_CH * rg, 128), f32)
        for ki in range(_KW):
            xs = x_ref[(h0 + ki) * rg:(h0 + ki + _CH) * rg, :]
            acc = acc + jnp.dot(xs, w1_ref[ki], preferred_element_type=f32)
        sl = slice(h0 * rg, (h0 + _CH) * rg)
        m1n, m2n, sn = lif(acc, m1v[sl, :], m2v[sl, :], h1s[sl, :].astype(f32))
        m1v[sl, :] = m1n
        m2v[sl, :] = m2n
        h1s[sl, :] = sn.astype(bf16)

    # -------- pool1 + LIF2  (28x28 -> 14x14): VPU H-add + 2 tiny constant
    # matmuls that do the W-pool + lane compaction + group merge.
    s1 = h1s[...]                                          # (28*2*bp,128) bf16
    t1 = s1.reshape(14, 2, rg, 128)
    hs = (t1[:, 0] + t1[:, 1]).reshape(14, 2, bp, 128)     # (h_out, g, b)
    i2 = (jnp.dot(hs[:, 0].reshape(14 * bp, 128), m1_ref[0],
                  preferred_element_type=f32)
          + jnp.dot(hs[:, 1].reshape(14 * bp, 128), m1_ref[1],
                    preferred_element_type=f32))
    s2 = lif_layer(i2, h2m, h2s)                           # (14*bp, 128) f32

    # -------- conv2 + LIF3  (5x5 conv as 5 H-tap matmuls per output W-group)
    m3a, m3b = h3m.at[0], h3m.at[1]
    acc_g = [jnp.zeros((10 * bp, 128), f32) for _ in range(2)]
    for ki in range(_KW):
        blk = s2[ki * bp:(ki + 10) * bp, :].astype(bf16)
        for g in range(2):
            acc_g[g] = acc_g[g] + jnp.dot(blk, w2_ref[g * _KW + ki],
                                          preferred_element_type=f32)
    s3_g = []
    for g in range(2):
        sl = slice(g * 10 * bp, (g + 1) * 10 * bp)
        m1n, m2n, sn = lif(acc_g[g], m3a[sl, :], m3b[sl, :],
                           h3s[sl, :].astype(f32))
        m3a[sl, :] = m1n
        m3b[sl, :] = m2n
        h3s[sl, :] = sn.astype(bf16)
        s3_g.append(sn)

    # -------- pool2 + LIF4  (10x10 -> 5x5): H-add + 2 constant matmuls
    i4 = jnp.zeros((5 * bp, 128), f32)
    for g in range(2):
        hp = s3_g[g].reshape(5, 2, bp, 128)
        hsum = (hp[:, 0] + hp[:, 1]).reshape(5 * bp, 128).astype(bf16)
        i4 = i4 + jnp.dot(hsum, m2_ref[g], preferred_element_type=f32)
    s4 = lif_layer(i4, h4m, h4s)                           # (5*bp, 128) f32

    # -------- conv3 + LIF5  (valid 5x5 on the 5x5 map -> 120-d vector)
    i5 = jnp.zeros((bp, 128), f32)
    for ki in range(_KW):
        i5 = i5 + jnp.dot(s4[ki * bp:(ki + 1) * bp, :].astype(bf16),
                          w3_ref[ki], preferred_element_type=f32)
    s5 = lif_layer(i5, h5m, h5s)

    # -------- fc1 + LIF6, fc2 + LIF7 (tiny epilogue, data already in VMEM)
    i6 = jnp.dot(s5.astype(bf16), wf1_ref[...], preferred_element_type=f32)
    s6 = lif_layer(i6, h6m, h6s)
    i7 = jnp.dot(s6.astype(bf16), wf2_ref[...], preferred_element_type=f32)
    s7 = lif_layer(i7, h7m, h7s)

    # -------- accumulate output spikes across all timesteps
    sum_ref[...] = sum_ref[...] + s7


def _make_call(T, nb, bp, decay1, decay2, const, thresh):
    rows_x = _H0 * 2 * bp                      # frame-slab rows per batch block
    kern = functools.partial(
        _lenet_step_kernel, bp=bp, decay1=float(decay1), decay2=float(decay2),
        const=float(const), thresh=float(thresh))
    grid_spec = pltpu.PrefetchScalarGridSpec(
        num_scalar_prefetch=0,
        grid=(nb, T),
        in_specs=[
            # per-(batch block, timestep) packed frame slab: the only stream
            pl.BlockSpec((None, rows_x, _K1), lambda b, t: (t, b, 0)),
            # weights / pooling matrices: constant index -> VMEM-resident
            pl.BlockSpec((5, _K1, 128), lambda b, t: (0, 0, 0)),
            pl.BlockSpec((2, 128, 128), lambda b, t: (0, 0, 0)),
            pl.BlockSpec((10, 128, 128), lambda b, t: (0, 0, 0)),
            pl.BlockSpec((2, 128, 128), lambda b, t: (0, 0, 0)),
            pl.BlockSpec((5, 128, 128), lambda b, t: (0, 0, 0)),
            pl.BlockSpec((128, 128), lambda b, t: (0, 0)),
            pl.BlockSpec((128, 128), lambda b, t: (0, 0)),
        ],
        # sumspike accumulator: resident across the whole time axis
        out_specs=pl.BlockSpec((bp, 128), lambda b, t: (b, 0)),
        scratch_shapes=[
            pltpu.VMEM((2, 28 * 2 * bp, 128), jnp.float32),   # h1 mem1/mem2
            pltpu.VMEM((28 * 2 * bp, 128), jnp.bfloat16),     # h1 spike
            pltpu.VMEM((2, 14 * bp, 128), jnp.float32),       # h2
            pltpu.VMEM((14 * bp, 128), jnp.bfloat16),
            pltpu.VMEM((2, 2 * 10 * bp, 128), jnp.float32),   # h3
            pltpu.VMEM((2 * 10 * bp, 128), jnp.bfloat16),
            pltpu.VMEM((2, 5 * bp, 128), jnp.float32),        # h4
            pltpu.VMEM((5 * bp, 128), jnp.bfloat16),
            pltpu.VMEM((2, bp, 128), jnp.float32),            # h5
            pltpu.VMEM((bp, 128), jnp.bfloat16),
            pltpu.VMEM((2, bp, 128), jnp.float32),            # h6
            pltpu.VMEM((bp, 128), jnp.bfloat16),
            pltpu.VMEM((2, bp, 128), jnp.float32),            # h7
            pltpu.VMEM((bp, 128), jnp.bfloat16),
        ],
    )
    return pl.pallas_call(
        kern,
        grid_spec=grid_spec,
        out_shape=jax.ShapeDtypeStruct((nb * bp, 128), jnp.float32),
        compiler_params=pltpu.CompilerParams(
            # batch blocks fan out across TensorCores (v7x megacore); the time
            # axis is a sequential loop carrying LIF state in scratch.
            dimension_semantics=("parallel", "arbitrary"),
            vmem_limit_bytes=48 * 1024 * 1024),
    )


# ----------------------------------------------------------------------------
# Host-side (plain XLA) glue: hoisted permute/clamp, packed frame slabs and
# lane-packed weight / pooling matrices.
# ----------------------------------------------------------------------------
def _pack_frames(xt, nb, bp):
    """xt: (T, B, 2, 32, 32) clamped f32 -> (T, nb*32*2*bp, 64) bf16 slabs.

    Per batch block: rows ordered (h, group, batch); lanes = cin*18 + col,
    where col indexes the 18-wide input-column window of the W group
    (group 0: cols 0..17, group 1: cols 14..31).  Zero-padded 36 -> 64."""
    T, B = xt.shape[0], xt.shape[1]
    BP = nb * bp
    xg = jnp.stack([xt[..., 0:_COLS1], xt[..., _WG1:_WG1 + _COLS1]], axis=2)
    # (T, B, g, cin, h, col) -> (T, h, g, B, cin, col)
    xg = jnp.transpose(xg, (0, 4, 2, 1, 3, 5))
    xg = xg.reshape(T, _H0, 2, B, _CIN * _COLS1)
    xg = jnp.pad(xg, ((0, 0), (0, 0), (0, 0), (0, BP - B),
                      (0, _K1 - _CIN * _COLS1)))
    xg = xg.reshape(T, _H0, 2, nb, bp, _K1)
    xg = jnp.transpose(xg, (0, 3, 1, 2, 4, 5))            # (T, nb, h, g, b, K)
    return xg.reshape(T, nb * _H0 * 2 * bp, _K1).astype(jnp.bfloat16)


def pack_params(c1, c2, c3, f1, f2):
    """Pack PyTorch-layout weights into lane-dense MXU matrices (bf16).

    c1: (6,2,5,5), c2: (16,6,5,5), c3: (120,16,5,5), f1: (84,120), f2: (11,84).
    Also builds the constant pooling matrices (0.25 coefficients) that perform
    the 2x2 average pool's W-reduction / lane compaction on the MXU."""
    f32 = jnp.float32
    ar = jnp.arange

    # conv1: (5 ki, 64, 128); row = cin*18 + (w_local + kj), col = w_local*6+co
    ki, co, ci, kj, wl = jnp.meshgrid(ar(5), ar(6), ar(2), ar(5), ar(14),
                                      indexing='ij')
    w1 = jnp.zeros((5, _K1, 128), f32).at[
        ki, ci * _COLS1 + wl + kj, wl * 6 + co].set(c1[co, ci, ki, kj])

    # pool1 (W avg + group merge): (2 g, 128, 128)
    g, wl, c = jnp.meshgrid(ar(2), ar(14), ar(6), indexing='ij')
    m1 = jnp.zeros((2, 128, 128), f32).at[
        g, wl * 6 + c, (g * 7 + wl // 2) * 6 + c].set(0.25)

    # conv2: (2 g, 5 ki, 128, 128); row = (g*5+w_local+kj)*6 + cin,
    # col = w_local*16 + cout  -> stored as (10, 128, 128)
    g, ki, co, ci, kj, wl = jnp.meshgrid(ar(2), ar(5), ar(16), ar(6), ar(5),
                                         ar(5), indexing='ij')
    w2 = jnp.zeros((2, 5, 128, 128), f32).at[
        g, ki, (g * 5 + wl + kj) * 6 + ci, wl * 16 + co].set(c2[co, ci, ki, kj])
    w2 = w2.reshape(10, 128, 128)

    # pool2 (W avg + group merge): (2 g, 128, 128)
    g, wl, c = jnp.meshgrid(ar(2), ar(5), ar(16), indexing='ij')
    m2 = jnp.zeros((2, 128, 128), f32).at[
        g, wl * 16 + c, ((g * 5 + wl) // 2) * 16 + c].set(0.25)

    # conv3: (5 ki, 128, 128); row = kj*16 + cin, col = cout
    ki, co, ci, kj = jnp.meshgrid(ar(5), ar(120), ar(16), ar(5), indexing='ij')
    w3 = jnp.zeros((5, 128, 128), f32).at[ki, kj * 16 + ci, co].set(
        c3[co, ci, ki, kj])

    wf1 = jnp.zeros((128, 128), f32).at[:120, :84].set(f1.T)
    wf2 = jnp.zeros((128, 128), f32).at[:84, :11].set(f2.T)

    bf = jnp.bfloat16
    return dict(w1=w1.astype(bf), m1=m1.astype(bf), w2=w2.astype(bf),
                m2=m2.astype(bf), w3=w3.astype(bf), wf1=wf1.astype(bf),
                wf2=wf2.astype(bf))


def make_params(key):
    ks = jax.random.split(key, 5)
    s = 0.1
    c1 = s * jax.random.normal(ks[0], (6, 2, 5, 5), jnp.float32)
    c2 = s * jax.random.normal(ks[1], (16, 6, 5, 5), jnp.float32)
    c3 = s * jax.random.normal(ks[2], (120, 16, 5, 5), jnp.float32)
    f1 = s * jax.random.normal(ks[3], (84, 120), jnp.float32)
    f2 = s * jax.random.normal(ks[4], (11, 84), jnp.float32)
    return pack_params(c1, c2, c3, f1, f2)


def lenet_dvs_forward(inp, params, *, decay1=0.0, decay2=0.0, const=0.0,
                      thresh=0.0, bp=8):
    """inp: (B, T, 2, 32, 32) float, like the torch module's `input`."""
    B, T = inp.shape[0], inp.shape[1]
    nb = -(-B // bp)                           # batch blocks (parallel axis)
    # torch: input.permute(1, 0, 2, 4, 3) (swaps H/W) then clamp(0, 1) — hoisted
    xt = jnp.clip(jnp.transpose(inp, (1, 0, 2, 4, 3)).astype(jnp.float32),
                  0.0, 1.0)
    frames = _pack_frames(xt, nb, bp)
    call = _make_call(T, nb, bp, decay1, decay2, const, thresh)
    sumspike = call(frames, params['w1'], params['m1'], params['w2'],
                    params['m2'], params['w3'], params['wf1'], params['wf2'])
    # NOTE: padded lanes / padded batch rows can spike if thresh <= 0, but
    # their weight rows are zero and they are sliced off here.
    return sumspike[:B, :11] / T               # drop batch/class padding


# ----------------------------------------------------------------------------
if __name__ == "__main__":
    key = jax.random.PRNGKey(0)
    kp, kx = jax.random.split(key)

    B, T = 2, 8                                # small T (module default 300)
    params = make_params(kp)
    # DVS-style input: (B, T, 2, 32, 32); values exercise the clamp(0, 1).
    x = jax.random.uniform(kx, (B, T, 2, 32, 32), jnp.float32, -0.5, 1.5)

    # non-zero LIF hyperparameters so the full membrane datapath is exercised
    fwd = jax.jit(functools.partial(lenet_dvs_forward,
                                    decay1=0.25, decay2=0.15,
                                    const=0.4, thresh=0.3))
    out = jax.block_until_ready(fwd(x, params))
    assert out.shape == (B, 11)
    assert bool(jnp.all(jnp.isfinite(out)))
    assert bool(jnp.all((out >= 0.0) & (out <= 1.0)))    # mean spike rate
    print("KERNEL_OK")
</pallas_src>

<mosaic_0001>
module attributes {stable_mosaic.version = 11 : i64} {
  func.func @_lenet_step_kernel(%arg0: i32, %arg1: i32, %arg2: memref<1x512x64xbf16, #tpu.memory_space<vmem>>, %arg3: memref<5x64x128xbf16, #tpu.memory_space<vmem>>, %arg4: memref<2x128x128xbf16, #tpu.memory_space<vmem>>, %arg5: memref<10x128x128xbf16, #tpu.memory_space<vmem>>, %arg6: memref<2x128x128xbf16, #tpu.memory_space<vmem>>, %arg7: memref<5x128x128xbf16, #tpu.memory_space<vmem>>, %arg8: memref<128x128xbf16, #tpu.memory_space<vmem>>, %arg9: memref<128x128xbf16, #tpu.memory_space<vmem>>, %arg10: memref<8x128xf32, #tpu.memory_space<vmem>>, %arg11: memref<2x448x128xf32, #tpu.memory_space<vmem>>, %arg12: memref<448x128xbf16, #tpu.memory_space<vmem>>, %arg13: memref<2x112x128xf32, #tpu.memory_space<vmem>>, %arg14: memref<112x128xbf16, #tpu.memory_space<vmem>>, %arg15: memref<2x160x128xf32, #tpu.memory_space<vmem>>, %arg16: memref<160x128xbf16, #tpu.memory_space<vmem>>, %arg17: memref<2x40x128xf32, #tpu.memory_space<vmem>>, %arg18: memref<40x128xbf16, #tpu.memory_space<vmem>>, %arg19: memref<2x8x128xf32, #tpu.memory_space<vmem>>, %arg20: memref<8x128xbf16, #tpu.memory_space<vmem>>, %arg21: memref<2x8x128xf32, #tpu.memory_space<vmem>>, %arg22: memref<8x128xbf16, #tpu.memory_space<vmem>>, %arg23: memref<2x8x128xf32, #tpu.memory_space<vmem>>, %arg24: memref<8x128xbf16, #tpu.memory_space<vmem>>) attributes {dimension_semantics = [#tpu.dimension_semantics<parallel>, #tpu.dimension_semantics<arbitrary>], iteration_bounds = array<i64: 1, 8>, scalar_prefetch = 0 : i64, scratch_operands = 14 : i64, tpu.core_type = #tpu.core_type<tc>, window_params = [{transform_indices = @transform_0, window_bounds = array<i64: 1, 512, 64>}, {pipeline_mode = #tpu.pipeline_mode<synchronous>, transform_indices = @transform_1, window_bounds = array<i64: 5, 64, 128>}, {pipeline_mode = #tpu.pipeline_mode<synchronous>, transform_indices = @transform_2, window_bounds = array<i64: 2, 128, 128>}, {pipeline_mode = #tpu.pipeline_mode<synchronous>, transform_indices = @transform_3, window_bounds = array<i64: 10, 128, 128>}, {pipeline_mode = #tpu.pipeline_mode<synchronous>, transform_indices = @transform_4, window_bounds = array<i64: 2, 128, 128>}, {pipeline_mode = #tpu.pipeline_mode<synchronous>, transform_indices = @transform_5, window_bounds = array<i64: 5, 128, 128>}, {pipeline_mode = #tpu.pipeline_mode<synchronous>, transform_indices = @transform_6, window_bounds = array<i64: 128, 128>}, {pipeline_mode = #tpu.pipeline_mode<synchronous>, transform_indices = @transform_7, window_bounds = array<i64: 128, 128>}, {transform_indices = @transform_8, window_bounds = array<i64: 8, 128>}]} {
    %c0_i32 = arith.constant 0 : i32
    %0 = arith.cmpi eq, %arg1, %c0_i32 : i32
    %1 = arith.extui %0 : i1 to i32
    %c0_i32_0 = arith.constant 0 : i32
    %2 = arith.cmpi ne, %1, %c0_i32_0 : i32
    scf.if %2 {
      %cst_671 = arith.constant 0.000000e+00 : f32
      %810 = vector.broadcast %cst_671 : f32 to vector<2x448x128xf32>
      %c0_672 = arith.constant 0 : index
      %c0_673 = arith.constant 0 : index
      %c0_674 = arith.constant 0 : index
      %811 = vector.load %arg11[%c0_672, %c0_673, %c0_674] : memref<2x448x128xf32, #tpu.memory_space<vmem>>, vector<2x448x128xf32>
      tpu.vector_store %arg11[%c0_672, %c0_673, %c0_674], %810 {strides = array<i32>} : memref<2x448x128xf32, #tpu.memory_space<vmem>>, vector<2x448x128xf32>,
      %cst_675 = arith.constant 0.000000e+00 : f32
      %812 = vector.broadcast %cst_675 : f32 to vector<2x112x128xf32>
      %c0_676 = arith.constant 0 : index
      %c0_677 = arith.constant 0 : index
      %c0_678 = arith.constant 0 : index
      %813 = vector.load %arg13[%c0_676, %c0_677, %c0_678] : memref<2x112x128xf32, #tpu.memory_space<vmem>>, vector<2x112x128xf32>
      tpu.vector_store %arg13[%c0_676, %c0_677, %c0_678], %812 {strides = array<i32>} : memref<2x112x128xf32, #tpu.memory_space<vmem>>, vector<2x112x128xf32>,
      %cst_679 = arith.constant 0.000000e+00 : f32
      %814 = vector.broadcast %cst_679 : f32 to vector<2x160x128xf32>
      %c0_680 = arith.constant 0 : index
      %c0_681 = arith.constant 0 : index
      %c0_682 = arith.constant 0 : index
      %815 = vector.load %arg15[%c0_680, %c0_681, %c0_682] : memref<2x160x128xf32, #tpu.memory_space<vmem>>, vector<2x160x128xf32>
      tpu.vector_store %arg15[%c0_680, %c0_681, %c0_682], %814 {strides = array<i32>} : memref<2x160x128xf32, #tpu.memory_space<vmem>>, vector<2x160x128xf32>,
      %cst_683 = arith.constant 0.000000e+00 : f32
      %816 = vector.broadcast %cst_683 : f32 to vector<2x40x128xf32>
      %c0_684 = arith.constant 0 : index
      %c0_685 = arith.constant 0 : index
      %c0_686 = arith.constant 0 : index
      %817 = vector.load %arg17[%c0_684, %c0_685, %c0_686] : memref<2x40x128xf32, #tpu.memory_space<vmem>>, vector<2x40x128xf32>
      tpu.vector_store %arg17[%c0_684, %c0_685, %c0_686], %816 {strides = array<i32>} : memref<2x40x128xf32, #tpu.memory_space<vmem>>, vector<2x40x128xf32>,
      %cst_687 = arith.constant 0.000000e+00 : f32
      %818 = vector.broadcast %cst_687 : f32 to vector<2x8x128xf32>
      %c0_688 = arith.constant 0 : index
      %c0_689 = arith.constant 0 : index
      %c0_690 = arith.constant 0 : index
      %819 = vector.load %arg19[%c0_688, %c0_689, %c0_690] : memref<2x8x128xf32, #tpu.memory_space<vmem>>, vector<2x8x128xf32>
      tpu.vector_store %arg19[%c0_688, %c0_689, %c0_690], %818 {strides = array<i32>} : memref<2x8x128xf32, #tpu.memory_space<vmem>>, vector<2x8x128xf32>,
      %cst_691 = arith.constant 0.000000e+00 : f32
      %820 = vector.broadcast %cst_691 : f32 to vector<2x8x128xf32>
      %c0_692 = arith.constant 0 : index
      %c0_693 = arith.constant 0 : index
      %c0_694 = arith.constant 0 : index
      %821 = vector.load %arg21[%c0_692, %c0_693, %c0_694] : memref<2x8x128xf32, #tpu.memory_space<vmem>>, vector<2x8x128xf32>
      tpu.vector_store %arg21[%c0_692, %c0_693, %c0_694], %820 {strides = array<i32>} : memref<2x8x128xf32, #tpu.memory_space<vmem>>, vector<2x8x128xf32>,
      %cst_695 = arith.constant 0.000000e+00 : f32
      %822 = vector.broadcast %cst_695 : f32 to vector<2x8x128xf32>
      %c0_696 = arith.constant 0 : index
      %c0_697 = arith.constant 0 : index
      %c0_698 = arith.constant 0 : index
      %823 = vector.load %arg23[%c0_696, %c0_697, %c0_698] : memref<2x8x128xf32, #tpu.memory_space<vmem>>, vector<2x8x128xf32>
      tpu.vector_store %arg23[%c0_696, %c0_697, %c0_698], %822 {strides = array<i32>} : memref<2x8x128xf32, #tpu.memory_space<vmem>>, vector<2x8x128xf32>,
      %cst_699 = arith.constant 0.000000e+00 : bf16
      %824 = vector.broadcast %cst_699 : bf16 to vector<448x128xbf16>
      %c0_700 = arith.constant 0 : index
      %c0_701 = arith.constant 0 : index
      %825 = vector.load %arg12[%c0_700, %c0_701] : memref<448x128xbf16, #tpu.memory_space<vmem>>, vector<448x128xbf16>
      tpu.vector_store %arg12[%c0_700, %c0_701], %824 {strides = array<i32>} : memref<448x128xbf16, #tpu.memory_space<vmem>>, vector<448x128xbf16>,
      %cst_702 = arith.constant 0.000000e+00 : bf16
      %826 = vector.broadcast %cst_702 : bf16 to vector<112x128xbf16>
      %c0_703 = arith.constant 0 : index
      %c0_704 = arith.constant 0 : index
      %827 = vector.load %arg14[%c0_703, %c0_704] : memref<112x128xbf16, #tpu.memory_space<vmem>>, vector<112x128xbf16>
      tpu.vector_store %arg14[%c0_703, %c0_704], %826 {strides = array<i32>} : memref<112x128xbf16, #tpu.memory_space<vmem>>, vector<112x128xbf16>,
      %cst_705 = arith.constant 0.000000e+00 : bf16
      %828 = vector.broadcast %cst_705 : bf16 to vector<160x128xbf16>
      %c0_706 = arith.constant 0 : index
      %c0_707 = arith.constant 0 : index
      %829 = vector.load %arg16[%c0_706, %c0_707] : memref<160x128xbf16, #tpu.memory_space<vmem>>, vector<160x128xbf16>
      tpu.vector_store %arg16[%c0_706, %c0_707], %828 {strides = array<i32>} : memref<160x128xbf16, #tpu.memory_space<vmem>>, vector<160x128xbf16>,
      %cst_708 = arith.constant 0.000000e+00 : bf16
      %830 = vector.broadcast %cst_708 : bf16 to vector<40x128xbf16>
      %c0_709 = arith.constant 0 : index
      %c0_710 = arith.constant 0 : index
      %831 = vector.load %arg18[%c0_709, %c0_710] : memref<40x128xbf16, #tpu.memory_space<vmem>>, vector<40x128xbf16>
      tpu.vector_store %arg18[%c0_709, %c0_710], %830 {strides = array<i32>} : memref<40x128xbf16, #tpu.memory_space<vmem>>, vector<40x128xbf16>,
      %cst_711 = arith.constant 0.000000e+00 : bf16
      %832 = vector.broadcast %cst_711 : bf16 to vector<8x128xbf16>
      %c0_712 = arith.constant 0 : index
      %c0_713 = arith.constant 0 : index
      %833 = vector.load %arg20[%c0_712, %c0_713] : memref<8x128xbf16, #tpu.memory_space<vmem>>, vector<8x128xbf16>
      tpu.vector_store %arg20[%c0_712, %c0_713], %832 {strides = array<i32>} : memref<8x128xbf16, #tpu.memory_space<vmem>>, vector<8x128xbf16>,
      %cst_714 = arith.constant 0.000000e+00 : bf16
      %834 = vector.broadcast %cst_714 : bf16 to vector<8x128xbf16>
      %c0_715 = arith.constant 0 : index
      %c0_716 = arith.constant 0 : index
      %835 = vector.load %arg22[%c0_715, %c0_716] : memref<8x128xbf16, #tpu.memory_space<vmem>>, vector<8x128xbf16>
      tpu.vector_store %arg22[%c0_715, %c0_716], %834 {strides = array<i32>} : memref<8x128xbf16, #tpu.memory_space<vmem>>, vector<8x128xbf16>,
      %cst_717 = arith.constant 0.000000e+00 : bf16
      %836 = vector.broadcast %cst_717 : bf16 to vector<8x128xbf16>
      %c0_718 = arith.constant 0 : index
      %c0_719 = arith.constant 0 : index
      %837 = vector.load %arg24[%c0_718, %c0_719] : memref<8x128xbf16, #tpu.memory_space<vmem>>, vector<8x128xbf16>
      tpu.vector_store %arg24[%c0_718, %c0_719], %836 {strides = array<i32>} : memref<8x128xbf16, #tpu.memory_space<vmem>>, vector<8x128xbf16>,
      %cst_720 = arith.constant 0.000000e+00 : f32
      %838 = vector.broadcast %cst_720 : f32 to vector<8x128xf32>
      %c0_721 = arith.constant 0 : index
      %c0_722 = arith.constant 0 : index
      %839 = vector.load %arg10[%c0_721, %c0_722] : memref<8x128xf32, #tpu.memory_space<vmem>>, vector<8x128xf32>
      tpu.vector_store %arg10[%c0_721, %c0_722], %838 {strides = array<i32>} : memref<8x128xf32, #tpu.memory_space<vmem>>, vector<8x128xf32>,
    } else {
    }
    %cst = arith.constant 0.000000e+00 : f32
    %3 = vector.broadcast %cst : f32 to vector<64x128xf32>
    %c0 = arith.constant 0 : index
    %c0_1 = arith.constant 0 : index
    %c0_2 = arith.constant 0 : index
    %4 = vector.load %arg2[%c0, %c0_1, %c0_2] : memref<1x512x64xbf16, #tpu.memory_space<vmem>>, vector<1x64x64xbf16>
    %5 = vector.shape_cast %4 : vector<1x64x64xbf16> to vector<64x64xbf16>
    %c0_3 = arith.constant 0 : index
    %c0_4 = arith.constant 0 : index
    %c0_5 = arith.constant 0 : index
    %6 = vector.load %arg3[%c0_3, %c0_4, %c0_5] : memref<5x64x128xbf16, #tpu.memory_space<vmem>>, vector<1x64x128xbf16>
    %7 = vector.shape_cast %6 : vector<1x64x128xbf16> to vector<64x128xbf16>
    %cst_6 = arith.constant dense<0.000000e+00> : vector<64x128xf32>
    %8 = tpu.matmul %5, %7, %cst_6 {dimension_numbers = #tpu.dot_dimension_numbers<[1], [0], [0], [1], [0, 0, 1, 1], [], []>} : vector<64x64xbf16>, vector<64x128xbf16>, vector<64x128xf32> -> vector<64x128xf32>
    %9 = arith.addf %3, %8 : vector<64x128xf32>
    %c0_7 = arith.constant 0 : index
    %c16 = arith.constant 16 : index
    %c0_8 = arith.constant 0 : index
    %10 = vector.load %arg2[%c0_7, %c16, %c0_8] : memref<1x512x64xbf16, #tpu.memory_space<vmem>>, vector<1x64x64xbf16>
    %11 = vector.shape_cast %10 : vector<1x64x64xbf16> to vector<64x64xbf16>
    %c1 = arith.constant 1 : index
    %c0_9 = arith.constant 0 : index
    %c0_10 = arith.constant 0 : index
    %12 = vector.load %arg3[%c1, %c0_9, %c0_10] : memref<5x64x128xbf16, #tpu.memory_space<vmem>>, vector<1x64x128xbf16>
    %13 = vector.shape_cast %12 : vector<1x64x128xbf16> to vector<64x128xbf16>
    %cst_11 = arith.constant dense<0.000000e+00> : vector<64x128xf32>
    %14 = tpu.matmul %11, %13, %cst_11 {dimension_numbers = #tpu.dot_dimension_numbers<[1], [0], [0], [1], [0, 0, 1, 1], [], []>} : vector<64x64xbf16>, vector<64x128xbf16>, vector<64x128xf32> -> vector<64x128xf32>
    %15 = arith.addf %9, %14 : vector<64x128xf32>
    %c0_12 = arith.constant 0 : index
    %c32 = arith.constant 32 : index
    %c0_13 = arith.constant 0 : index
    %16 = vector.load %arg2[%c0_12, %c32, %c0_13] : memref<1x512x64xbf16, #tpu.memory_space<vmem>>, vector<1x64x64xbf16>
    %17 = vector.shape_cast %16 : vector<1x64x64xbf16> to vector<64x64xbf16>
    %c2 = arith.constant 2 : index
    %c0_14 = arith.constant 0 : index
    %c0_15 = arith.constant 0 : index
    %18 = vector.load %arg3[%c2, %c0_14, %c0_15] : memref<5x64x128xbf16, #tpu.memory_space<vmem>>, vector<1x64x128xbf16>
    %19 = vector.shape_cast %18 : vector<1x64x128xbf16> to vector<64x128xbf16>
    %cst_16 = arith.constant dense<0.000000e+00> : vector<64x128xf32>
    %20 = tpu.matmul %17, %19, %cst_16 {dimension_numbers = #tpu.dot_dimension_numbers<[1], [0], [0], [1], [0, 0, 1, 1], [], []>} : vector<64x64xbf16>, vector<64x128xbf16>, vector<64x128xf32> -> vector<64x128xf32>
    %21 = arith.addf %15, %20 : vector<64x128xf32>
    %c0_17 = arith.constant 0 : index
    %c48 = arith.constant 48 : index
    %c0_18 = arith.constant 0 : index
    %22 = vector.load %arg2[%c0_17, %c48, %c0_18] : memref<1x512x64xbf16, #tpu.memory_space<vmem>>, vector<1x64x64xbf16>
    %23 = vector.shape_cast %22 : vector<1x64x64xbf16> to vector<64x64xbf16>
    %c3 = arith.constant 3 : index
    %c0_19 = arith.constant 0 : index
    %c0_20 = arith.constant 0 : index
    %24 = vector.load %arg3[%c3, %c0_19, %c0_20] : memref<5x64x128xbf16, #tpu.memory_space<vmem>>, vector<1x64x128xbf16>
    %25 = vector.shape_cast %24 : vector<1x64x128xbf16> to vector<64x128xbf16>
    %cst_21 = arith.constant dense<0.000000e+00> : vector<64x128xf32>
    %26 = tpu.matmul %23, %25, %cst_21 {dimension_numbers = #tpu.dot_dimension_numbers<[1], [0], [0], [1], [0, 0, 1, 1], [], []>} : vector<64x64xbf16>, vector<64x128xbf16>, vector<64x128xf32> -> vector<64x128xf32>
    %27 = arith.addf %21, %26 : vector<64x128xf32>
    %c0_22 = arith.constant 0 : index
    %c64 = arith.constant 64 : index
    %c0_23 = arith.constant 0 : index
    %28 = vector.load %arg2[%c0_22, %c64, %c0_23] : memref<1x512x64xbf16, #tpu.memory_space<vmem>>, vector<1x64x64xbf16>
    %29 = vector.shape_cast %28 : vector<1x64x64xbf16> to vector<64x64xbf16>
    %c4 = arith.constant 4 : index
    %c0_24 = arith.constant 0 : index
    %c0_25 = arith.constant 0 : index
    %30 = vector.load %arg3[%c4, %c0_24, %c0_25] : memref<5x64x128xbf16, #tpu.memory_space<vmem>>, vector<1x64x128xbf16>
    %31 = vector.shape_cast %30 : vector<1x64x128xbf16> to vector<64x128xbf16>
    %cst_26 = arith.constant dense<0.000000e+00> : vector<64x128xf32>
    %32 = tpu.matmul %29, %31, %cst_26 {dimension_numbers = #tpu.dot_dimension_numbers<[1], [0], [0], [1], [0, 0, 1, 1], [], []>} : vector<64x64xbf16>, vector<64x128xbf16>, vector<64x128xf32> -> vector<64x128xf32>
    %33 = arith.addf %27, %32 : vector<64x128xf32>
    %c0_i32_27 = arith.constant 0 : i32
    %c0_i32_28 = arith.constant 0 : i32
    %c0_i32_29 = arith.constant 0 : i32
    %34 = tpu.memref_slice %arg11[%c0_i32_27, %c0_i32_28, %c0_i32_29] : memref<2x448x128xf32, #tpu.memory_space<vmem>> -> memref<1x448x128xf32, #tpu.memory_space<vmem>>
    %35 = tpu.memref_squeeze %34 : memref<1x448x128xf32, #tpu.memory_space<vmem>> -> memref<448x128xf32, #tpu.memory_space<vmem>>
    %c0_30 = arith.constant 0 : index
    %c0_31 = arith.constant 0 : index
    %36 = vector.load %35[%c0_30, %c0_31] : memref<448x128xf32, #tpu.memory_space<vmem>>, vector<64x128xf32>
    %c1_i32 = arith.constant 1 : i32
    %c0_i32_32 = arith.constant 0 : i32
    %c0_i32_33 = arith.constant 0 : i32
    %37 = tpu.memref_slice %arg11[%c1_i32, %c0_i32_32, %c0_i32_33] : memref<2x448x128xf32, #tpu.memory_space<vmem>> -> memref<1x448x128xf32, #tpu.memory_space<vmem>>
    %38 = tpu.memref_squeeze %37 : memref<1x448x128xf32, #tpu.memory_space<vmem>> -> memref<448x128xf32, #tpu.memory_space<vmem>>
    %c0_34 = arith.constant 0 : index
    %c0_35 = arith.constant 0 : index
    %39 = vector.load %38[%c0_34, %c0_35] : memref<448x128xf32, #tpu.memory_space<vmem>>, vector<64x128xf32>
    %c0_36 = arith.constant 0 : index
    %c0_37 = arith.constant 0 : index
    %40 = vector.load %arg12[%c0_36, %c0_37] : memref<448x128xbf16, #tpu.memory_space<vmem>>, vector<64x128xbf16>
    %41 = arith.extf %40 : vector<64x128xbf16> to vector<64x128xf32>
    %cst_38 = arith.constant 1.000000e+00 : f32
    %42 = vector.broadcast %cst_38 : f32 to vector<64x128xf32>
    %43 = arith.subf %42, %41 : vector<64x128xf32>
    %cst_39 = arith.constant 2.500000e-01 : f32
    %44 = vector.broadcast %cst_39 : f32 to vector<64x128xf32>
    %45 = arith.mulf %44, %43 : vector<64x128xf32>
    %46 = arith.mulf %36, %45 : vector<64x128xf32>
    %47 = arith.addf %46, %33 : vector<64x128xf32>
    %cst_40 = arith.constant 1.500000e-01 : f32
    %48 = vector.broadcast %cst_40 : f32 to vector<64x128xf32>
    %49 = arith.mulf %48, %43 : vector<64x128xf32>
    %50 = arith.mulf %39, %49 : vector<64x128xf32>
    %cst_41 = arith.constant 4.000000e-01 : f32
    %51 = vector.broadcast %cst_41 : f32 to vector<64x128xf32>
    %52 = arith.mulf %51, %33 : vector<64x128xf32>
    %53 = arith.addf %50, %52 : vector<64x128xf32>
    %54 = arith.addf %47, %53 : vector<64x128xf32>
    %cst_42 = arith.constant 3.000000e-01 : f32
    %55 = vector.broadcast %cst_42 : f32 to vector<64x128xf32>
    %56 = arith.cmpf ogt, %54, %55 : vector<64x128xf32>
    %57 = arith.extui %56 : vector<64x128xi1> to vector<64x128xi32>
    %58 = arith.sitofp %57 : vector<64x128xi32> to vector<64x128xf32>
    %c0_i32_43 = arith.constant 0 : i32
    %c0_i32_44 = arith.constant 0 : i32
    %c0_i32_45 = arith.constant 0 : i32
    %59 = tpu.memref_slice %arg11[%c0_i32_43, %c0_i32_44, %c0_i32_45] : memref<2x448x128xf32, #tpu.memory_space<vmem>> -> memref<1x448x128xf32, #tpu.memory_space<vmem>>
    %60 = tpu.memref_squeeze %59 : memref<1x448x128xf32, #tpu.memory_space<vmem>> -> memref<448x128xf32, #tpu.memory_space<vmem>>
    %c0_46 = arith.constant 0 : index
    %c0_47 = arith.constant 0 : index
    %61 = vector.load %60[%c0_46, %c0_47] : memref<448x128xf32, #tpu.memory_space<vmem>>, vector<64x128xf32>
    tpu.vector_store %60[%c0_46, %c0_47], %47 {strides = array<i32>} : memref<448x128xf32, #tpu.memory_space<vmem>>, vector<64x128xf32>,
    %c1_i32_48 = arith.constant 1 : i32
    %c0_i32_49 = arith.constant 0 : i32
    %c0_i32_50 = arith.constant 0 : i32
    %62 = tpu.memref_slice %arg11[%c1_i32_48, %c0_i32_49, %c0_i32_50] : memref<2x448x128xf32, #tpu.memory_space<vmem>> -> memref<1x448x128xf32, #tpu.memory_space<vmem>>
    %63 = tpu.memref_squeeze %62 : memref<1x448x128xf32, #tpu.memory_space<vmem>> -> memref<448x128xf32, #tpu.memory_space<vmem>>
    %c0_51 = arith.constant 0 : index
    %c0_52 = arith.constant 0 : index
    %64 = vector.load %63[%c0_51, %c0_52] : memref<448x128xf32, #tpu.memory_space<vmem>>, vector<64x128xf32>
    tpu.vector_store %63[%c0_51, %c0_52], %53 {strides = array<i32>} : memref<448x128xf32, #tpu.memory_space<vmem>>, vector<64x128xf32>,
    %65 = arith.truncf %58 : vector<64x128xf32> to vector<64x128xbf16>
    %c0_53 = arith.constant 0 : index
    %c0_54 = arith.constant 0 : index
    %66 = vector.load %arg12[%c0_53, %c0_54] : memref<448x128xbf16, #tpu.memory_space<vmem>>, vector<64x128xbf16>
    tpu.vector_store %arg12[%c0_53, %c0_54], %65 {strides = array<i32>} : memref<448x128xbf16, #tpu.memory_space<vmem>>, vector<64x128xbf16>,
    %cst_55 = arith.constant 0.000000e+00 : f32
    %67 = vector.broadcast %cst_55 : f32 to vector<64x128xf32>
    %c0_56 = arith.constant 0 : index
    %c64_57 = arith.constant 64 : index
    %c0_58 = arith.constant 0 : index
    %68 = vector.load %arg2[%c0_56, %c64_57, %c0_58] : memref<1x512x64xbf16, #tpu.memory_space<vmem>>, vector<1x64x64xbf16>
    %69 = vector.shape_cast %68 : vector<1x64x64xbf16> to vector<64x64xbf16>
    %c0_59 = arith.constant 0 : index
    %c0_60 = arith.constant 0 : index
    %c0_61 = arith.constant 0 : index
    %70 = vector.load %arg3[%c0_59, %c0_60, %c0_61] : memref<5x64x128xbf16, #tpu.memory_space<vmem>>, vector<1x64x128xbf16>
    %71 = vector.shape_cast %70 : vector<1x64x128xbf16> to vector<64x128xbf16>
    %cst_62 = arith.constant dense<0.000000e+00> : vector<64x128xf32>
    %72 = tpu.matmul %69, %71, %cst_62 {dimension_numbers = #tpu.dot_dimension_numbers<[1], [0], [0], [1], [0, 0, 1, 1], [], []>} : vector<64x64xbf16>, vector<64x128xbf16>, vector<64x128xf32> -> vector<64x128xf32>
    %73 = arith.addf %67, %72 : vector<64x128xf32>
    %c0_63 = arith.constant 0 : index
    %c80 = arith.constant 80 : index
    %c0_64 = arith.constant 0 : index
    %74 = vector.load %arg2[%c0_63, %c80, %c0_64] : memref<1x512x64xbf16, #tpu.memory_space<vmem>>, vector<1x64x64xbf16>
    %75 = vector.shape_cast %74 : vector<1x64x64xbf16> to vector<64x64xbf16>
    %c1_65 = arith.constant 1 : index
    %c0_66 = arith.constant 0 : index
    %c0_67 = arith.constant 0 : index
    %76 = vector.load %arg3[%c1_65, %c0_66, %c0_67] : memref<5x64x128xbf16, #tpu.memory_space<vmem>>, vector<1x64x128xbf16>
    %77 = vector.shape_cast %76 : vector<1x64x128xbf16> to vector<64x128xbf16>
    %cst_68 = arith.constant dense<0.000000e+00> : vector<64x128xf32>
    %78 = tpu.matmul %75, %77, %cst_68 {dimension_numbers = #tpu.dot_dimension_numbers<[1], [0], [0], [1], [0, 0, 1, 1], [], []>} : vector<64x64xbf16>, vector<64x128xbf16>, vector<64x128xf32> -> vector<64x128xf32>
    %79 = arith.addf %73, %78 : vector<64x128xf32>
    %c0_69 = arith.constant 0 : index
    %c96 = arith.constant 96 : index
    %c0_70 = arith.constant 0 : index
    %80 = vector.load %arg2[%c0_69, %c96, %c0_70] : memref<1x512x64xbf16, #tpu.memory_space<vmem>>, vector<1x64x64xbf16>
    %81 = vector.shape_cast %80 : vector<1x64x64xbf16> to vector<64x64xbf16>
    %c2_71 = arith.constant 2 : index
    %c0_72 = arith.constant 0 : index
    %c0_73 = arith.constant 0 : index
    %82 = vector.load %arg3[%c2_71, %c0_72, %c0_73] : memref<5x64x128xbf16, #tpu.memory_space<vmem>>, vector<1x64x128xbf16>
    %83 = vector.shape_cast %82 : vector<1x64x128xbf16> to vector<64x128xbf16>
    %cst_74 = arith.constant dense<0.000000e+00> : vector<64x128xf32>
    %84 = tpu.matmul %81, %83, %cst_74 {dimension_numbers = #tpu.dot_dimension_numbers<[1], [0], [0], [1], [0, 0, 1, 1], [], []>} : vector<64x64xbf16>, vector<64x128xbf16>, vector<64x128xf32> -> vector<64x128xf32>
    %85 = arith.addf %79, %84 : vector<64x128xf32>
    %c0_75 = arith.constant 0 : index
    %c112 = arith.constant 112 : index
    %c0_76 = arith.constant 0 : index
    %86 = vector.load %arg2[%c0_75, %c112, %c0_76] : memref<1x512x64xbf16, #tpu.memory_space<vmem>>, vector<1x64x64xbf16>
    %87 = vector.shape_cast %86 : vector<1x64x64xbf16> to vector<64x64xbf16>
    %c3_77 = arith.constant 3 : index
    %c0_78 = arith.constant 0 : index
    %c0_79 = arith.constant 0 : index
    %88 = vector.load %arg3[%c3_77, %c0_78, %c0_79] : memref<5x64x128xbf16, #tpu.memory_space<vmem>>, vector<1x64x128xbf16>
    %89 = vector.shape_cast %88 : vector<1x64x128xbf16> to vector<64x128xbf16>
    %cst_80 = arith.constant dense<0.000000e+00> : vector<64x128xf32>
    %90 = tpu.matmul %87, %89, %cst_80 {dimension_numbers = #tpu.dot_dimension_numbers<[1], [0], [0], [1], [0, 0, 1, 1], [], []>} : vector<64x64xbf16>, vector<64x128xbf16>, vector<64x128xf32> -> vector<64x128xf32>
    %91 = arith.addf %85, %90 : vector<64x128xf32>
    %c0_81 = arith.constant 0 : index
    %c128 = arith.constant 128 : index
    %c0_82 = arith.constant 0 : index
    %92 = vector.load %arg2[%c0_81, %c128, %c0_82] : memref<1x512x64xbf16, #tpu.memory_space<vmem>>, vector<1x64x64xbf16>
    %93 = vector.shape_cast %92 : vector<1x64x64xbf16> to vector<64x64xbf16>
    %c4_83 = arith.constant 4 : index
    %c0_84 = arith.constant 0 : index
    %c0_85 = arith.constant 0 : index
    %94 = vector.load %arg3[%c4_83, %c0_84, %c0_85] : memref<5x64x128xbf16, #tpu.memory_space<vmem>>, vector<1x64x128xbf16>
    %95 = vector.shape_cast %94 : vector<1x64x128xbf16> to vector<64x128xbf16>
    %cst_86 = arith.constant dense<0.000000e+00> : vector<64x128xf32>
    %96 = tpu.matmul %93, %95, %cst_86 {dimension_numbers = #tpu.dot_dimension_numbers<[1], [0], [0], [1], [0, 0, 1, 1], [], []>} : vector<64x64xbf16>, vector<64x128xbf16>, vector<64x128xf32> -> vector<64x128xf32>
    %97 = arith.addf %91, %96 : vector<64x128xf32>
    %c0_i32_87 = arith.constant 0 : i32
    %c0_i32_88 = arith.constant 0 : i32
    %c0_i32_89 = arith.constant 0 : i32
    %98 = tpu.memref_slice %arg11[%c0_i32_87, %c0_i32_88, %c0_i32_89] : memref<2x448x128xf32, #tpu.memory_space<vmem>> -> memref<1x448x128xf32, #tpu.memory_space<vmem>>
    %99 = tpu.memref_squeeze %98 : memref<1x448x128xf32, #tpu.memory_space<vmem>> -> memref<448x128xf32, #tpu.memory_space<vmem>>
    %c64_90 = arith.constant 64 : index
    %c0_91 = arith.constant 0 : index
    %100 = vector.load %99[%c64_90, %c0_91] : memref<448x128xf32, #tpu.memory_space<vmem>>, vector<64x128xf32>
    %c1_i32_92 = arith.constant 1 : i32
    %c0_i32_93 = arith.constant 0 : i32
    %c0_i32_94 = arith.constant 0 : i32
    %101 = tpu.memref_slice %arg11[%c1_i32_92, %c0_i32_93, %c0_i32_94] : memref<2x448x128xf32, #tpu.memory_space<vmem>> -> memref<1x448x128xf32, #tpu.memory_space<vmem>>
    %102 = tpu.memref_squeeze %101 : memref<1x448x128xf32, #tpu.memory_space<vmem>> -> memref<448x128xf32, #tpu.memory_space<vmem>>
    %c64_95 = arith.constant 64 : index
    %c0_96 = arith.constant 0 : index
    %103 = vector.load %102[%c64_95, %c0_96] : memref<448x128xf32, #tpu.memory_space<vmem>>, vector<64x128xf32>
    %c64_97 = arith.constant 64 : index
    %c0_98 = arith.constant 0 : index
    %104 = vector.load %arg12[%c64_97, %c0_98] : memref<448x128xbf16, #tpu.memory_space<vmem>>, vector<64x128xbf16>
    %105 = arith.extf %104 : vector<64x128xbf16> to vector<64x128xf32>
    %cst_99 = arith.constant 1.000000e+00 : f32
    %106 = vector.broadcast %cst_99 : f32 to vector<64x128xf32>
    %107 = arith.subf %106, %105 : vector<64x128xf32>
    %cst_100 = arith.constant 2.500000e-01 : f32
    %108 = vector.broadcast %cst_100 : f32 to vector<64x128xf32>
    %109 = arith.mulf %108, %107 : vector<64x128xf32>
    %110 = arith.mulf %100, %109 : vector<64x128xf32>
    %111 = arith.addf %110, %97 : vector<64x128xf32>
    %cst_101 = arith.constant 1.500000e-01 : f32
    %112 = vector.broadcast %cst_101 : f32 to vector<64x128xf32>
    %113 = arith.mulf %112, %107 : vector<64x128xf32>
    %114 = arith.mulf %103, %113 : vector<64x128xf32>
    %cst_102 = arith.constant 4.000000e-01 : f32
    %115 = vector.broadcast %cst_102 : f32 to vector<64x128xf32>
    %116 = arith.mulf %115, %97 : vector<64x128xf32>
    %117 = arith.addf %114, %116 : vector<64x128xf32>
    %118 = arith.addf %111, %117 : vector<64x128xf32>
    %cst_103 = arith.constant 3.000000e-01 : f32
    %119 = vector.broadcast %cst_103 : f32 to vector<64x128xf32>
    %120 = arith.cmpf ogt, %118, %119 : vector<64x128xf32>
    %121 = arith.extui %120 : vector<64x128xi1> to vector<64x128xi32>
    %122 = arith.sitofp %121 : vector<64x128xi32> to vector<64x128xf32>
    %c0_i32_104 = arith.constant 0 : i32
    %c0_i32_105 = arith.constant 0 : i32
    %c0_i32_106 = arith.constant 0 : i32
    %123 = tpu.memref_slice %arg11[%c0_i32_104, %c0_i32_105, %c0_i32_106] : memref<2x448x128xf32, #tpu.memory_space<vmem>> -> memref<1x448x128xf32, #tpu.memory_space<vmem>>
    %124 = tpu.memref_squeeze %123 : memref<1x448x128xf32, #tpu.memory_space<vmem>> -> memref<448x128xf32, #tpu.memory_space<vmem>>
    %c64_107 = arith.constant 64 : index
    %c0_108 = arith.constant 0 : index
    %125 = vector.load %124[%c64_107, %c0_108] : memref<448x128xf32, #tpu.memory_space<vmem>>, vector<64x128xf32>
    tpu.vector_store %124[%c64_107, %c0_108], %111 {strides = array<i32>} : memref<448x128xf32, #tpu.memory_space<vmem>>, vector<64x128xf32>,
    %c1_i32_109 = arith.constant 1 : i32
    %c0_i32_110 = arith.constant 0 : i32
    %c0_i32_111 = arith.constant 0 : i32
    %126 = tpu.memref_slice %arg11[%c1_i32_109, %c0_i32_110, %c0_i32_111] : memref<2x448x128xf32, #tpu.memory_space<vmem>> -> memref<1x448x128xf32, #tpu.memory_space<vmem>>
    %127 = tpu.memref_squeeze %126 : memref<1x448x128xf32, #tpu.memory_space<vmem>> -> memref<448x128xf32, #tpu.memory_space<vmem>>
    %c64_112 = arith.constant 64 : index
    %c0_113 = arith.constant 0 : index
    %128 = vector.load %127[%c64_112, %c0_113] : memref<448x128xf32, #tpu.memory_space<vmem>>, vector<64x128xf32>
    tpu.vector_store %127[%c64_112, %c0_113], %117 {strides = array<i32>} : memref<448x128xf32, #tpu.memory_space<vmem>>, vector<64x128xf32>,
    %129 = arith.truncf %122 : vector<64x128xf32> to vector<64x128xbf16>
    %c64_114 = arith.constant 64 : index
    %c0_115 = arith.constant 0 : index
    %130 = vector.load %arg12[%c64_114, %c0_115] : memref<448x128xbf16, #tpu.memory_space<vmem>>, vector<64x128xbf16>
    tpu.vector_store %arg12[%c64_114, %c0_115], %129 {strides = array<i32>} : memref<448x128xbf16, #tpu.memory_space<vmem>>, vector<64x128xbf16>,
    %cst_116 = arith.constant 0.000000e+00 : f32
    %131 = vector.broadcast %cst_116 : f32 to vector<64x128xf32>
    %c0_117 = arith.constant 0 : index
    %c128_118 = arith.constant 128 : index
    %c0_119 = arith.constant 0 : index
    %132 = vector.load %arg2[%c0_117, %c128_118, %c0_119] : memref<1x512x64xbf16, #tpu.memory_space<vmem>>, vector<1x64x64xbf16>
    %133 = vector.shape_cast %132 : vector<1x64x64xbf16> to vector<64x64xbf16>
    %c0_120 = arith.constant 0 : index
    %c0_121 = arith.constant 0 : index
    %c0_122 = arith.constant 0 : index
    %134 = vector.load %arg3[%c0_120, %c0_121, %c0_122] : memref<5x64x128xbf16, #tpu.memory_space<vmem>>, vector<1x64x128xbf16>
    %135 = vector.shape_cast %134 : vector<1x64x128xbf16> to vector<64x128xbf16>
    %cst_123 = arith.constant dense<0.000000e+00> : vector<64x128xf32>
    %136 = tpu.matmul %133, %135, %cst_123 {dimension_numbers = #tpu.dot_dimension_numbers<[1], [0], [0], [1], [0, 0, 1, 1], [], []>} : vector<64x64xbf16>, vector<64x128xbf16>, vector<64x128xf32> -> vector<64x128xf32>
    %137 = arith.addf %131, %136 : vector<64x128xf32>
    %c0_124 = arith.constant 0 : index
    %c144 = arith.constant 144 : index
    %c0_125 = arith.constant 0 : index
    %138 = vector.load %arg2[%c0_124, %c144, %c0_125] : memref<1x512x64xbf16, #tpu.memory_space<vmem>>, vector<1x64x64xbf16>
    %139 = vector.shape_cast %138 : vector<1x64x64xbf16> to vector<64x64xbf16>
    %c1_126 = arith.constant 1 : index
    %c0_127 = arith.constant 0 : index
    %c0_128 = arith.constant 0 : index
    %140 = vector.load %arg3[%c1_126, %c0_127, %c0_128] : memref<5x64x128xbf16, #tpu.memory_space<vmem>>, vector<1x64x128xbf16>
    %141 = vector.shape_cast %140 : vector<1x64x128xbf16> to vector<64x128xbf16>
    %cst_129 = arith.constant dense<0.000000e+00> : vector<64x128xf32>
    %142 = tpu.matmul %139, %141, %cst_129 {dimension_numbers = #tpu.dot_dimension_numbers<[1], [0], [0], [1], [0, 0, 1, 1], [], []>} : vector<64x64xbf16>, vector<64x128xbf16>, vector<64x128xf32> -> vector<64x128xf32>
    %143 = arith.addf %137, %142 : vector<64x128xf32>
    %c0_130 = arith.constant 0 : index
    %c160 = arith.constant 160 : index
    %c0_131 = arith.constant 0 : index
    %144 = vector.load %arg2[%c0_130, %c160, %c0_131] : memref<1x512x64xbf16, #tpu.memory_space<vmem>>, vector<1x64x64xbf16>
    %145 = vector.shape_cast %144 : vector<1x64x64xbf16> to vector<64x64xbf16>
    %c2_132 = arith.constant 2 : index
    %c0_133 = arith.constant 0 : index
    %c0_134 = arith.constant 0 : index
    %146 = vector.load %arg3[%c2_132, %c0_133, %c0_134] : memref<5x64x128xbf16, #tpu.memory_space<vmem>>, vector<1x64x128xbf16>
    %147 = vector.shape_cast %146 : vector<1x64x128xbf16> to vector<64x128xbf16>
    %cst_135 = arith.constant dense<0.000000e+00> : vector<64x128xf32>
    %148 = tpu.matmul %145, %147, %cst_135 {dimension_numbers = #tpu.dot_dimension_numbers<[1], [0], [0], [1], [0, 0, 1, 1], [], []>} : vector<64x64xbf16>, vector<64x128xbf16>, vector<64x128xf32> -> vector<64x128xf32>
    %149 = arith.addf %143, %148 : vector<64x128xf32>
    %c0_136 = arith.constant 0 : index
    %c176 = arith.constant 176 : index
    %c0_137 = arith.constant 0 : index
    %150 = vector.load %arg2[%c0_136, %c176, %c0_137] : memref<1x512x64xbf16, #tpu.memory_space<vmem>>, vector<1x64x64xbf16>
    %151 = vector.shape_cast %150 : vector<1x64x64xbf16> to vector<64x64xbf16>
    %c3_138 = arith.constant 3 : index
    %c0_139 = arith.constant 0 : index
    %c0_140 = arith.constant 0 : index
    %152 = vector.load %arg3[%c3_138, %c0_139, %c0_140] : memref<5x64x128xbf16, #tpu.memory_space<vmem>>, vector<1x64x128xbf16>
    %153 = vector.shape_cast %152 : vector<1x64x128xbf16> to vector<64x128xbf16>
    %cst_141 = arith.constant dense<0.000000e+00> : vector<64x128xf32>
    %154 = tpu.matmul %151, %153, %cst_141 {dimension_numbers = #tpu.dot_dimension_numbers<[1], [0], [0], [1], [0, 0, 1, 1], [], []>} : vector<64x64xbf16>, vector<64x128xbf16>, vector<64x128xf32> -> vector<64x128xf32>
    %155 = arith.addf %149, %154 : vector<64x128xf32>
    %c0_142 = arith.constant 0 : index
    %c192 = arith.constant 192 : index
    %c0_143 = arith.constant 0 : index
    %156 = vector.load %arg2[%c0_142, %c192, %c0_143] : memref<1x512x64xbf16, #tpu.memory_space<vmem>>, vector<1x64x64xbf16>
    %157 = vector.shape_cast %156 : vector<1x64x64xbf16> to vector<64x64xbf16>
    %c4_144 = arith.constant 4 : index
    %c0_145 = arith.constant 0 : index
    %c0_146 = arith.constant 0 : index
    %158 = vector.load %arg3[%c4_144, %c0_145, %c0_146] : memref<5x64x128xbf16, #tpu.memory_space<vmem>>, vector<1x64x128xbf16>
    %159 = vector.shape_cast %158 : vector<1x64x128xbf16> to vector<64x128xbf16>
    %cst_147 = arith.constant dense<0.000000e+00> : vector<64x128xf32>
    %160 = tpu.matmul %157, %159, %cst_147 {dimension_numbers = #tpu.dot_dimension_numbers<[1], [0], [0], [1], [0, 0, 1, 1], [], []>} : vector<64x64xbf16>, vector<64x128xbf16>, vector<64x128xf32> -> vector<64x128xf32>
    %161 = arith.addf %155, %160 : vector<64x128xf32>
    %c0_i32_148 = arith.constant 0 : i32
    %c0_i32_149 = arith.constant 0 : i32
    %c0_i32_150 = arith.constant 0 : i32
    %162 = tpu.memref_slice %arg11[%c0_i32_148, %c0_i32_149, %c0_i32_150] : memref<2x448x128xf32, #tpu.memory_space<vmem>> -> memref<1x448x128xf32, #tpu.memory_space<vmem>>
    %163 = tpu.memref_squeeze %162 : memref<1x448x128xf32, #tpu.memory_space<vmem>> -> memref<448x128xf32, #tpu.memory_space<vmem>>
    %c128_151 = arith.constant 128 : index
    %c0_152 = arith.constant 0 : index
    %164 = vector.load %163[%c128_151, %c0_152] : memref<448x128xf32, #tpu.memory_space<vmem>>, vector<64x128xf32>
    %c1_i32_153 = arith.constant 1 : i32
    %c0_i32_154 = arith.constant 0 : i32
    %c0_i32_155 = arith.constant 0 : i32
    %165 = tpu.memref_slice %arg11[%c1_i32_153, %c0_i32_154, %c0_i32_155] : memref<2x448x128xf32, #tpu.memory_space<vmem>> -> memref<1x448x128xf32, #tpu.memory_space<vmem>>
    %166 = tpu.memref_squeeze %165 : memref<1x448x128xf32, #tpu.memory_space<vmem>> -> memref<448x128xf32, #tpu.memory_space<vmem>>
    %c128_156 = arith.constant 128 : index
    %c0_157 = arith.constant 0 : index
    %167 = vector.load %166[%c128_156, %c0_157] : memref<448x128xf32, #tpu.memory_space<vmem>>, vector<64x128xf32>
    %c128_158 = arith.constant 128 : index
    %c0_159 = arith.constant 0 : index
    %168 = vector.load %arg12[%c128_158, %c0_159] : memref<448x128xbf16, #tpu.memory_space<vmem>>, vector<64x128xbf16>
    %169 = arith.extf %168 : vector<64x128xbf16> to vector<64x128xf32>
    %cst_160 = arith.constant 1.000000e+00 : f32
    %170 = vector.broadcast %cst_160 : f32 to vector<64x128xf32>
    %171 = arith.subf %170, %169 : vector<64x128xf32>
    %cst_161 = arith.constant 2.500000e-01 : f32
    %172 = vector.broadcast %cst_161 : f32 to vector<64x128xf32>
    %173 = arith.mulf %172, %171 : vector<64x128xf32>
    %174 = arith.mulf %164, %173 : vector<64x128xf32>
    %175 = arith.addf %174, %161 : vector<64x128xf32>
    %cst_162 = arith.constant 1.500000e-01 : f32
    %176 = vector.broadcast %cst_162 : f32 to vector<64x128xf32>
    %177 = arith.mulf %176, %171 : vector<64x128xf32>
    %178 = arith.mulf %167, %177 : vector<64x128xf32>
    %cst_163 = arith.constant 4.000000e-01 : f32
    %179 = vector.broadcast %cst_163 : f32 to vector<64x128xf32>
    %180 = arith.mulf %179, %161 : vector<64x128xf32>
    %181 = arith.addf %178, %180 : vector<64x128xf32>
    %182 = arith.addf %175, %181 : vector<64x128xf32>
    %cst_164 = arith.constant 3.000000e-01 : f32
    %183 = vector.broadcast %cst_164 : f32 to vector<64x128xf32>
    %184 = arith.cmpf ogt, %182, %183 : vector<64x128xf32>
    %185 = arith.extui %184 : vector<64x128xi1> to vector<64x128xi32>
    %186 = arith.sitofp %185 : vector<64x128xi32> to vector<64x128xf32>
    %c0_i32_165 = arith.constant 0 : i32
    %c0_i32_166 = arith.constant 0 : i32
    %c0_i32_167 = arith.constant 0 : i32
    %187 = tpu.memref_slice %arg11[%c0_i32_165, %c0_i32_166, %c0_i32_167] : memref<2x448x128xf32, #tpu.memory_space<vmem>> -> memref<1x448x128xf32, #tpu.memory_space<vmem>>
    %188 = tpu.memref_squeeze %187 : memref<1x448x128xf32, #tpu.memory_space<vmem>> -> memref<448x128xf32, #tpu.memory_space<vmem>>
    %c128_168 = arith.constant 128 : index
    %c0_169 = arith.constant 0 : index
    %189 = vector.load %188[%c128_168, %c0_169] : memref<448x128xf32, #tpu.memory_space<vmem>>, vector<64x128xf32>
    tpu.vector_store %188[%c128_168, %c0_169], %175 {strides = array<i32>} : memref<448x128xf32, #tpu.memory_space<vmem>>, vector<64x128xf32>,
    %c1_i32_170 = arith.constant 1 : i32
    %c0_i32_171 = arith.constant 0 : i32
    %c0_i32_172 = arith.constant 0 : i32
    %190 = tpu.memref_slice %arg11[%c1_i32_170, %c0_i32_171, %c0_i32_172] : memref<2x448x128xf32, #tpu.memory_space<vmem>> -> memref<1x448x128xf32, #tpu.memory_space<vmem>>
    %191 = tpu.memref_squeeze %190 : memref<1x448x128xf32, #tpu.memory_space<vmem>> -> memref<448x128xf32, #tpu.memory_space<vmem>>
    %c128_173 = arith.constant 128 : index
    %c0_174 = arith.constant 0 : index
    %192 = vector.load %191[%c128_173, %c0_174] : memref<448x128xf32, #tpu.memory_space<vmem>>, vector<64x128xf32>
    tpu.vector_store %191[%c128_173, %c0_174], %181 {strides = array<i32>} : memref<448x128xf32, #tpu.memory_space<vmem>>, vector<64x128xf32>,
    %193 = arith.truncf %186 : vector<64x128xf32> to vector<64x128xbf16>
    %c128_175 = arith.constant 128 : index
    %c0_176 = arith.constant 0 : index
    %194 = vector.load %arg12[%c128_175, %c0_176] : memref<448x128xbf16, #tpu.memory_space<vmem>>, vector<64x128xbf16>
    tpu.vector_store %arg12[%c128_175, %c0_176], %193 {strides = array<i32>} : memref<448x128xbf16, #tpu.memory_space<vmem>>, vector<64x128xbf16>,
    %cst_177 = arith.constant 0.000000e+00 : f32
    %195 = vector.broadcast %cst_177 : f32 to vector<64x128xf32>
    %c0_178 = arith.constant 0 : index
    %c192_179 = arith.constant 192 : index
    %c0_180 = arith.constant 0 : index
    %196 = vector.load %arg2[%c0_178, %c192_179, %c0_180] : memref<1x512x64xbf16, #tpu.memory_space<vmem>>, vector<1x64x64xbf16>
    %197 = vector.shape_cast %196 : vector<1x64x64xbf16> to vector<64x64xbf16>
    %c0_181 = arith.constant 0 : index
    %c0_182 = arith.constant 0 : index
    %c0_183 = arith.constant 0 : index
    %198 = vector.load %arg3[%c0_181, %c0_182, %c0_183] : memref<5x64x128xbf16, #tpu.memory_space<vmem>>, vector<1x64x128xbf16>
    %199 = vector.shape_cast %198 : vector<1x64x128xbf16> to vector<64x128xbf16>
    %cst_184 = arith.constant dense<0.000000e+00> : vector<64x128xf32>
    %200 = tpu.matmul %197, %199, %cst_184 {dimension_numbers = #tpu.dot_dimension_numbers<[1], [0], [0], [1], [0, 0, 1, 1], [], []>} : vector<64x64xbf16>, vector<64x128xbf16>, vector<64x128xf32> -> vector<64x128xf32>
    %201 = arith.addf %195, %200 : vector<64x128xf32>
    %c0_185 = arith.constant 0 : index
    %c208 = arith.constant 208 : index
    %c0_186 = arith.constant 0 : index
    %202 = vector.load %arg2[%c0_185, %c208, %c0_186] : memref<1x512x64xbf16, #tpu.memory_space<vmem>>, vector<1x64x64xbf16>
    %203 = vector.shape_cast %202 : vector<1x64x64xbf16> to vector<64x64xbf16>
    %c1_187 = arith.constant 1 : index
    %c0_188 = arith.constant 0 : index
    %c0_189 = arith.constant 0 : index
    %204 = vector.load %arg3[%c1_187, %c0_188, %c0_189] : memref<5x64x128xbf16, #tpu.memory_space<vmem>>, vector<1x64x128xbf16>
    %205 = vector.shape_cast %204 : vector<1x64x128xbf16> to vector<64x128xbf16>
    %cst_190 = arith.constant dense<0.000000e+00> : vector<64x128xf32>
    %206 = tpu.matmul %203, %205, %cst_190 {dimension_numbers = #tpu.dot_dimension_numbers<[1], [0], [0], [1], [0, 0, 1, 1], [], []>} : vector<64x64xbf16>, vector<64x128xbf16>, vector<64x128xf32> -> vector<64x128xf32>
    %207 = arith.addf %201, %206 : vector<64x128xf32>
    %c0_191 = arith.constant 0 : index
    %c224 = arith.constant 224 : index
    %c0_192 = arith.constant 0 : index
    %208 = vector.load %arg2[%c0_191, %c224, %c0_192] : memref<1x512x64xbf16, #tpu.memory_space<vmem>>, vector<1x64x64xbf16>
    %209 = vector.shape_cast %208 : vector<1x64x64xbf16> to vector<64x64xbf16>
    %c2_193 = arith.constant 2 : index
    %c0_194 = arith.constant 0 : index
    %c0_195 = arith.constant 0 : index
    %210 = vector.load %arg3[%c2_193, %c0_194, %c0_195] : memref<5x64x128xbf16, #tpu.memory_space<vmem>>, vector<1x64x128xbf16>
    %211 = vector.shape_cast %210 : vector<1x64x128xbf16> to vector<64x128xbf16>
    %cst_196 = arith.constant dense<0.000000e+00> : vector<64x128xf32>
    %212 = tpu.matmul %209, %211, %cst_196 {dimension_numbers = #tpu.dot_dimension_numbers<[1], [0], [0], [1], [0, 0, 1, 1], [], []>} : vector<64x64xbf16>, vector<64x128xbf16>, vector<64x128xf32> -> vector<64x128xf32>
    %213 = arith.addf %207, %212 : vector<64x128xf32>
    %c0_197 = arith.constant 0 : index
    %c240 = arith.constant 240 : index
    %c0_198 = arith.constant 0 : index
    %214 = vector.load %arg2[%c0_197, %c240, %c0_198] : memref<1x512x64xbf16, #tpu.memory_space<vmem>>, vector<1x64x64xbf16>
    %215 = vector.shape_cast %214 : vector<1x64x64xbf16> to vector<64x64xbf16>
    %c3_199 = arith.constant 3 : index
    %c0_200 = arith.constant 0 : index
    %c0_201 = arith.constant 0 : index
    %216 = vector.load %arg3[%c3_199, %c0_200, %c0_201] : memref<5x64x128xbf16, #tpu.memory_space<vmem>>, vector<1x64x128xbf16>
    %217 = vector.shape_cast %216 : vector<1x64x128xbf16> to vector<64x128xbf16>
    %cst_202 = arith.constant dense<0.000000e+00> : vector<64x128xf32>
    %218 = tpu.matmul %215, %217, %cst_202 {dimension_numbers = #tpu.dot_dimension_numbers<[1], [0], [0], [1], [0, 0, 1, 1], [], []>} : vector<64x64xbf16>, vector<64x128xbf16>, vector<64x128xf32> -> vector<64x128xf32>
    %219 = arith.addf %213, %218 : vector<64x128xf32>
    %c0_203 = arith.constant 0 : index
    %c256 = arith.constant 256 : index
    %c0_204 = arith.constant 0 : index
    %220 = vector.load %arg2[%c0_203, %c256, %c0_204] : memref<1x512x64xbf16, #tpu.memory_space<vmem>>, vector<1x64x64xbf16>
    %221 = vector.shape_cast %220 : vector<1x64x64xbf16> to vector<64x64xbf16>
    %c4_205 = arith.constant 4 : index
    %c0_206 = arith.constant 0 : index
    %c0_207 = arith.constant 0 : index
    %222 = vector.load %arg3[%c4_205, %c0_206, %c0_207] : memref<5x64x128xbf16, #tpu.memory_space<vmem>>, vector<1x64x128xbf16>
    %223 = vector.shape_cast %222 : vector<1x64x128xbf16> to vector<64x128xbf16>
    %cst_208 = arith.constant dense<0.000000e+00> : vector<64x128xf32>
    %224 = tpu.matmul %221, %223, %cst_208 {dimension_numbers = #tpu.dot_dimension_numbers<[1], [0], [0], [1], [0, 0, 1, 1], [], []>} : vector<64x64xbf16>, vector<64x128xbf16>, vector<64x128xf32> -> vector<64x128xf32>
    %225 = arith.addf %219, %224 : vector<64x128xf32>
    %c0_i32_209 = arith.constant 0 : i32
    %c0_i32_210 = arith.constant 0 : i32
    %c0_i32_211 = arith.constant 0 : i32
    %226 = tpu.memref_slice %arg11[%c0_i32_209, %c0_i32_210, %c0_i32_211] : memref<2x448x128xf32, #tpu.memory_space<vmem>> -> memref<1x448x128xf32, #tpu.memory_space<vmem>>
    %227 = tpu.memref_squeeze %226 : memref<1x448x128xf32, #tpu.memory_space<vmem>> -> memref<448x128xf32, #tpu.memory_space<vmem>>
    %c192_212 = arith.constant 192 : index
    %c0_213 = arith.constant 0 : index
    %228 = vector.load %227[%c192_212, %c0_213] : memref<448x128xf32, #tpu.memory_space<vmem>>, vector<64x128xf32>
    %c1_i32_214 = arith.constant 1 : i32
    %c0_i32_215 = arith.constant 0 : i32
    %c0_i32_216 = arith.constant 0 : i32
    %229 = tpu.memref_slice %arg11[%c1_i32_214, %c0_i32_215, %c0_i32_216] : memref<2x448x128xf32, #tpu.memory_space<vmem>> -> memref<1x448x128xf32, #tpu.memory_space<vmem>>
    %230 = tpu.memref_squeeze %229 : memref<1x448x128xf32, #tpu.memory_space<vmem>> -> memref<448x128xf32, #tpu.memory_space<vmem>>
    %c192_217 = arith.constant 192 : index
    %c0_218 = arith.constant 0 : index
    %231 = vector.load %230[%c192_217, %c0_218] : memref<448x128xf32, #tpu.memory_space<vmem>>, vector<64x128xf32>
    %c192_219 = arith.constant 192 : index
    %c0_220 = arith.constant 0 : index
    %232 = vector.load %arg12[%c192_219, %c0_220] : memref<448x128xbf16, #tpu.memory_space<vmem>>, vector<64x128xbf16>
    %233 = arith.extf %232 : vector<64x128xbf16> to vector<64x128xf32>
    %cst_221 = arith.constant 1.000000e+00 : f32
    %234 = vector.broadcast %cst_221 : f32 to vector<64x128xf32>
    %235 = arith.subf %234, %233 : vector<64x128xf32>
    %cst_222 = arith.constant 2.500000e-01 : f32
    %236 = vector.broadcast %cst_222 : f32 to vector<64x128xf32>
    %237 = arith.mulf %236, %235 : vector<64x128xf32>
    %238 = arith.mulf %228, %237 : vector<64x128xf32>
    %239 = arith.addf %238, %225 : vector<64x128xf32>
    %cst_223 = arith.constant 1.500000e-01 : f32
    %240 = vector.broadcast %cst_223 : f32 to vector<64x128xf32>
    %241 = arith.mulf %240, %235 : vector<64x128xf32>
    %242 = arith.mulf %231, %241 : vector<64x128xf32>
    %cst_224 = arith.constant 4.000000e-01 : f32
    %243 = vector.broadcast %cst_224 : f32 to vector<64x128xf32>
    %244 = arith.mulf %243, %225 : vector<64x128xf32>
    %245 = arith.addf %242, %244 : vector<64x128xf32>
    %246 = arith.addf %239, %245 : vector<64x128xf32>
    %cst_225 = arith.constant 3.000000e-01 : f32
    %247 = vector.broadcast %cst_225 : f32 to vector<64x128xf32>
    %248 = arith.cmpf ogt, %246, %247 : vector<64x128xf32>
    %249 = arith.extui %248 : vector<64x128xi1> to vector<64x128xi32>
    %250 = arith.sitofp %249 : vector<64x128xi32> to vector<64x128xf32>
    %c0_i32_226 = arith.constant 0 : i32
    %c0_i32_227 = arith.constant 0 : i32
    %c0_i32_228 = arith.constant 0 : i32
    %251 = tpu.memref_slice %arg11[%c0_i32_226, %c0_i32_227, %c0_i32_228] : memref<2x448x128xf32, #tpu.memory_space<vmem>> -> memref<1x448x128xf32, #tpu.memory_space<vmem>>
    %252 = tpu.memref_squeeze %251 : memref<1x448x128xf32, #tpu.memory_space<vmem>> -> memref<448x128xf32, #tpu.memory_space<vmem>>
    %c192_229 = arith.constant 192 : index
    %c0_230 = arith.constant 0 : index
    %253 = vector.load %252[%c192_229, %c0_230] : memref<448x128xf32, #tpu.memory_space<vmem>>, vector<64x128xf32>
    tpu.vector_store %252[%c192_229, %c0_230], %239 {strides = array<i32>} : memref<448x128xf32, #tpu.memory_space<vmem>>, vector<64x128xf32>,
    %c1_i32_231 = arith.constant 1 : i32
    %c0_i32_232 = arith.constant 0 : i32
    %c0_i32_233 = arith.constant 0 : i32
    %254 = tpu.memref_slice %arg11[%c1_i32_231, %c0_i32_232, %c0_i32_233] : memref<2x448x128xf32, #tpu.memory_space<vmem>> -> memref<1x448x128xf32, #tpu.memory_space<vmem>>
    %255 = tpu.memref_squeeze %254 : memref<1x448x128xf32, #tpu.memory_space<vmem>> -> memref<448x128xf32, #tpu.memory_space<vmem>>
    %c192_234 = arith.constant 192 : index
    %c0_235 = arith.constant 0 : index
    %256 = vector.load %255[%c192_234, %c0_235] : memref<448x128xf32, #tpu.memory_space<vmem>>, vector<64x128xf32>
    tpu.vector_store %255[%c192_234, %c0_235], %245 {strides = array<i32>} : memref<448x128xf32, #tpu.memory_space<vmem>>, vector<64x128xf32>,
    %257 = arith.truncf %250 : vector<64x128xf32> to vector<64x128xbf16>
    %c192_236 = arith.constant 192 : index
    %c0_237 = arith.constant 0 : index
    %258 = vector.load %arg12[%c192_236, %c0_237] : memref<448x128xbf16, #tpu.memory_space<vmem>>, vector<64x128xbf16>
    tpu.vector_store %arg12[%c192_236, %c0_237], %257 {strides = array<i32>} : memref<448x128xbf16, #tpu.memory_space<vmem>>, vector<64x128xbf16>,
    %cst_238 = arith.constant 0.000000e+00 : f32
    %259 = vector.broadcast %cst_238 : f32 to vector<64x128xf32>
    %c0_239 = arith.constant 0 : index
    %c256_240 = arith.constant 256 : index
    %c0_241 = arith.constant 0 : index
    %260 = vector.load %arg2[%c0_239, %c256_240, %c0_241] : memref<1x512x64xbf16, #tpu.memory_space<vmem>>, vector<1x64x64xbf16>
    %261 = vector.shape_cast %260 : vector<1x64x64xbf16> to vector<64x64xbf16>
    %c0_242 = arith.constant 0 : index
    %c0_243 = arith.constant 0 : index
    %c0_244 = arith.constant 0 : index
    %262 = vector.load %arg3[%c0_242, %c0_243, %c0_244] : memref<5x64x128xbf16, #tpu.memory_space<vmem>>, vector<1x64x128xbf16>
    %263 = vector.shape_cast %262 : vector<1x64x128xbf16> to vector<64x128xbf16>
    %cst_245 = arith.constant dense<0.000000e+00> : vector<64x128xf32>
    %264 = tpu.matmul %261, %263, %cst_245 {dimension_numbers = #tpu.dot_dimension_numbers<[1], [0], [0], [1], [0, 0, 1, 1], [], []>} : vector<64x64xbf16>, vector<64x128xbf16>, vector<64x128xf32> -> vector<64x128xf32>
    %265 = arith.addf %259, %264 : vector<64x128xf32>
    %c0_246 = arith.constant 0 : index
    %c272 = arith.constant 272 : index
    %c0_247 = arith.constant 0 : index
    %266 = vector.load %arg2[%c0_246, %c272, %c0_247] : memref<1x512x64xbf16, #tpu.memory_space<vmem>>, vector<1x64x64xbf16>
    %267 = vector.shape_cast %266 : vector<1x64x64xbf16> to vector<64x64xbf16>
    %c1_248 = arith.constant 1 : index
    %c0_249 = arith.constant 0 : index
    %c0_250 = arith.constant 0 : index
    %268 = vector.load %arg3[%c1_248, %c0_249, %c0_250] : memref<5x64x128xbf16, #tpu.memory_space<vmem>>, vector<1x64x128xbf16>
    %269 = vector.shape_cast %268 : vector<1x64x128xbf16> to vector<64x128xbf16>
    %cst_251 = arith.constant dense<0.000000e+00> : vector<64x128xf32>
    %270 = tpu.matmul %267, %269, %cst_251 {dimension_numbers = #tpu.dot_dimension_numbers<[1], [0], [0], [1], [0, 0, 1, 1], [], []>} : vector<64x64xbf16>, vector<64x128xbf16>, vector<64x128xf32> -> vector<64x128xf32>
    %271 = arith.addf %265, %270 : vector<64x128xf32>
    %c0_252 = arith.constant 0 : index
    %c288 = arith.constant 288 : index
    %c0_253 = arith.constant 0 : index
    %272 = vector.load %arg2[%c0_252, %c288, %c0_253] : memref<1x512x64xbf16, #tpu.memory_space<vmem>>, vector<1x64x64xbf16>
    %273 = vector.shape_cast %272 : vector<1x64x64xbf16> to vector<64x64xbf16>
    %c2_254 = arith.constant 2 : index
    %c0_255 = arith.constant 0 : index
    %c0_256 = arith.constant 0 : index
    %274 = vector.load %arg3[%c2_254, %c0_255, %c0_256] : memref<5x64x128xbf16, #tpu.memory_space<vmem>>, vector<1x64x128xbf16>
    %275 = vector.shape_cast %274 : vector<1x64x128xbf16> to vector<64x128xbf16>
    %cst_257 = arith.constant dense<0.000000e+00> : vector<64x128xf32>
    %276 = tpu.matmul %273, %275, %cst_257 {dimension_numbers = #tpu.dot_dimension_numbers<[1], [0], [0], [1], [0, 0, 1, 1], [], []>} : vector<64x64xbf16>, vector<64x128xbf16>, vector<64x128xf32> -> vector<64x128xf32>
    %277 = arith.addf %271, %276 : vector<64x128xf32>
    %c0_258 = arith.constant 0 : index
    %c304 = arith.constant 304 : index
    %c0_259 = arith.constant 0 : index
    %278 = vector.load %arg2[%c0_258, %c304, %c0_259] : memref<1x512x64xbf16, #tpu.memory_space<vmem>>, vector<1x64x64xbf16>
    %279 = vector.shape_cast %278 : vector<1x64x64xbf16> to vector<64x64xbf16>
    %c3_260 = arith.constant 3 : index
    %c0_261 = arith.constant 0 : index
    %c0_262 = arith.constant 0 : index
    %280 = vector.load %arg3[%c3_260, %c0_261, %c0_262] : memref<5x64x128xbf16, #tpu.memory_space<vmem>>, vector<1x64x128xbf16>
    %281 = vector.shape_cast %280 : vector<1x64x128xbf16> to vector<64x128xbf16>
    %cst_263 = arith.constant dense<0.000000e+00> : vector<64x128xf32>
    %282 = tpu.matmul %279, %281, %cst_263 {dimension_numbers = #tpu.dot_dimension_numbers<[1], [0], [0], [1], [0, 0, 1, 1], [], []>} : vector<64x64xbf16>, vector<64x128xbf16>, vector<64x128xf32> -> vector<64x128xf32>
    %283 = arith.addf %277, %282 : vector<64x128xf32>
    %c0_264 = arith.constant 0 : index
    %c320 = arith.constant 320 : index
    %c0_265 = arith.constant 0 : index
    %284 = vector.load %arg2[%c0_264, %c320, %c0_265] : memref<1x512x64xbf16, #tpu.memory_space<vmem>>, vector<1x64x64xbf16>
    %285 = vector.shape_cast %284 : vector<1x64x64xbf16> to vector<64x64xbf16>
    %c4_266 = arith.constant 4 : index
    %c0_267 = arith.constant 0 : index
    %c0_268 = arith.constant 0 : index
    %286 = vector.load %arg3[%c4_266, %c0_267, %c0_268] : memref<5x64x128xbf16, #tpu.memory_space<vmem>>, vector<1x64x128xbf16>
    %287 = vector.shape_cast %286 : vector<1x64x128xbf16> to vector<64x128xbf16>
    %cst_269 = arith.constant dense<0.000000e+00> : vector<64x128xf32>
    %288 = tpu.matmul %285, %287, %cst_269 {dimension_numbers = #tpu.dot_dimension_numbers<[1], [0], [0], [1], [0, 0, 1, 1], [], []>} : vector<64x64xbf16>, vector<64x128xbf16>, vector<64x128xf32> -> vector<64x128xf32>
    %289 = arith.addf %283, %288 : vector<64x128xf32>
    %c0_i32_270 = arith.constant 0 : i32
    %c0_i32_271 = arith.constant 0 : i32
    %c0_i32_272 = arith.constant 0 : i32
    %290 = tpu.memref_slice %arg11[%c0_i32_270, %c0_i32_271, %c0_i32_272] : memref<2x448x128xf32, #tpu.memory_space<vmem>> -> memref<1x448x128xf32, #tpu.memory_space<vmem>>
    %291 = tpu.memref_squeeze %290 : memref<1x448x128xf32, #tpu.memory_space<vmem>> -> memref<448x128xf32, #tpu.memory_space<vmem>>
    %c256_273 = arith.constant 256 : index
    %c0_274 = arith.constant 0 : index
    %292 = vector.load %291[%c256_273, %c0_274] : memref<448x128xf32, #tpu.memory_space<vmem>>, vector<64x128xf32>
    %c1_i32_275 = arith.constant 1 : i32
    %c0_i32_276 = arith.constant 0 : i32
    %c0_i32_277 = arith.constant 0 : i32
    %293 = tpu.memref_slice %arg11[%c1_i32_275, %c0_i32_276, %c0_i32_277] : memref<2x448x128xf32, #tpu.memory_space<vmem>> -> memref<1x448x128xf32, #tpu.memory_space<vmem>>
    %294 = tpu.memref_squeeze %293 : memref<1x448x128xf32, #tpu.memory_space<vmem>> -> memref<448x128xf32, #tpu.memory_space<vmem>>
    %c256_278 = arith.constant 256 : index
    %c0_279 = arith.constant 0 : index
    %295 = vector.load %294[%c256_278, %c0_279] : memref<448x128xf32, #tpu.memory_space<vmem>>, vector<64x128xf32>
    %c256_280 = arith.constant 256 : index
    %c0_281 = arith.constant 0 : index
    %296 = vector.load %arg12[%c256_280, %c0_281] : memref<448x128xbf16, #tpu.memory_space<vmem>>, vector<64x128xbf16>
    %297 = arith.extf %296 : vector<64x128xbf16> to vector<64x128xf32>
    %cst_282 = arith.constant 1.000000e+00 : f32
    %298 = vector.broadcast %cst_282 : f32 to vector<64x128xf32>
    %299 = arith.subf %298, %297 : vector<64x128xf32>
    %cst_283 = arith.constant 2.500000e-01 : f32
    %300 = vector.broadcast %cst_283 : f32 to vector<64x128xf32>
    %301 = arith.mulf %300, %299 : vector<64x128xf32>
    %302 = arith.mulf %292, %301 : vector<64x128xf32>
    %303 = arith.addf %302, %289 : vector<64x128xf32>
    %cst_284 = arith.constant 1.500000e-01 : f32
    %304 = vector.broadcast %cst_284 : f32 to vector<64x128xf32>
    %305 = arith.mulf %304, %299 : vector<64x128xf32>
    %306 = arith.mulf %295, %305 : vector<64x128xf32>
    %cst_285 = arith.constant 4.000000e-01 : f32
    %307 = vector.broadcast %cst_285 : f32 to vector<64x128xf32>
    %308 = arith.mulf %307, %289 : vector<64x128xf32>
    %309 = arith.addf %306, %308 : vector<64x128xf32>
    %310 = arith.addf %303, %309 : vector<64x128xf32>
    %cst_286 = arith.constant 3.000000e-01 : f32
    %311 = vector.broadcast %cst_286 : f32 to vector<64x128xf32>
    %312 = arith.cmpf ogt, %310, %311 : vector<64x128xf32>
    %313 = arith.extui %312 : vector<64x128xi1> to vector<64x128xi32>
    %314 = arith.sitofp %313 : vector<64x128xi32> to vector<64x128xf32>
    %c0_i32_287 = arith.constant 0 : i32
    %c0_i32_288 = arith.constant 0 : i32
    %c0_i32_289 = arith.constant 0 : i32
    %315 = tpu.memref_slice %arg11[%c0_i32_287, %c0_i32_288, %c0_i32_289] : memref<2x448x128xf32, #tpu.memory_space<vmem>> -> memref<1x448x128xf32, #tpu.memory_space<vmem>>
    %316 = tpu.memref_squeeze %315 : memref<1x448x128xf32, #tpu.memory_space<vmem>> -> memref<448x128xf32, #tpu.memory_space<vmem>>
    %c256_290 = arith.constant 256 : index
    %c0_291 = arith.constant 0 : index
    %317 = vector.load %316[%c256_290, %c0_291] : memref<448x128xf32, #tpu.memory_space<vmem>>, vector<64x128xf32>
    tpu.vector_store %316[%c256_290, %c0_291], %303 {strides = array<i32>} : memref<448x128xf32, #tpu.memory_space<vmem>>, vector<64x128xf32>,
    %c1_i32_292 = arith.constant 1 : i32
    %c0_i32_293 = arith.constant 0 : i32
    %c0_i32_294 = arith.constant 0 : i32
    %318 = tpu.memref_slice %arg11[%c1_i32_292, %c0_i32_293, %c0_i32_294] : memref<2x448x128xf32, #tpu.memory_space<vmem>> -> memref<1x448x128xf32, #tpu.memory_space<vmem>>
    %319 = tpu.memref_squeeze %318 : memref<1x448x128xf32, #tpu.memory_space<vmem>> -> memref<448x128xf32, #tpu.memory_space<vmem>>
    %c256_295 = arith.constant 256 : index
    %c0_296 = arith.constant 0 : index
    %320 = vector.load %319[%c256_295, %c0_296] : memref<448x128xf32, #tpu.memory_space<vmem>>, vector<64x128xf32>
    tpu.vector_store %319[%c256_295, %c0_296], %309 {strides = array<i32>} : memref<448x128xf32, #tpu.memory_space<vmem>>, vector<64x128xf32>,
    %321 = arith.truncf %314 : vector<64x128xf32> to vector<64x128xbf16>
    %c256_297 = arith.constant 256 : index
    %c0_298 = arith.constant 0 : index
    %322 = vector.load %arg12[%c256_297, %c0_298] : memref<448x128xbf16, #tpu.memory_space<vmem>>, vector<64x128xbf16>
    tpu.vector_store %arg12[%c256_297, %c0_298], %321 {strides = array<i32>} : memref<448x128xbf16, #tpu.memory_space<vmem>>, vector<64x128xbf16>,
    %cst_299 = arith.constant 0.000000e+00 : f32
    %323 = vector.broadcast %cst_299 : f32 to vector<64x128xf32>
    %c0_300 = arith.constant 0 : index
    %c320_301 = arith.constant 320 : index
    %c0_302 = arith.constant 0 : index
    %324 = vector.load %arg2[%c0_300, %c320_301, %c0_302] : memref<1x512x64xbf16, #tpu.memory_space<vmem>>, vector<1x64x64xbf16>
    %325 = vector.shape_cast %324 : vector<1x64x64xbf16> to vector<64x64xbf16>
    %c0_303 = arith.constant 0 : index
    %c0_304 = arith.constant 0 : index
    %c0_305 = arith.constant 0 : index
    %326 = vector.load %arg3[%c0_303, %c0_304, %c0_305] : memref<5x64x128xbf16, #tpu.memory_space<vmem>>, vector<1x64x128xbf16>
    %327 = vector.shape_cast %326 : vector<1x64x128xbf16> to vector<64x128xbf16>
    %cst_306 = arith.constant dense<0.000000e+00> : vector<64x128xf32>
    %328 = tpu.matmul %325, %327, %cst_306 {dimension_numbers = #tpu.dot_dimension_numbers<[1], [0], [0], [1], [0, 0, 1, 1], [], []>} : vector<64x64xbf16>, vector<64x128xbf16>, vector<64x128xf32> -> vector<64x128xf32>
    %329 = arith.addf %323, %328 : vector<64x128xf32>
    %c0_307 = arith.constant 0 : index
    %c336 = arith.constant 336 : index
    %c0_308 = arith.constant 0 : index
    %330 = vector.load %arg2[%c0_307, %c336, %c0_308] : memref<1x512x64xbf16, #tpu.memory_space<vmem>>, vector<1x64x64xbf16>
    %331 = vector.shape_cast %330 : vector<1x64x64xbf16> to vector<64x64xbf16>
    %c1_309 = arith.constant 1 : index
    %c0_310 = arith.constant 0 : index
    %c0_311 = arith.constant 0 : index
    %332 = vector.load %arg3[%c1_309, %c0_310, %c0_311] : memref<5x64x128xbf16, #tpu.memory_space<vmem>>, vector<1x64x128xbf16>
    %333 = vector.shape_cast %332 : vector<1x64x128xbf16> to vector<64x128xbf16>
    %cst_312 = arith.constant dense<0.000000e+00> : vector<64x128xf32>
    %334 = tpu.matmul %331, %333, %cst_312 {dimension_numbers = #tpu.dot_dimension_numbers<[1], [0], [0], [1], [0, 0, 1, 1], [], []>} : vector<64x64xbf16>, vector<64x128xbf16>, vector<64x128xf32> -> vector<64x128xf32>
    %335 = arith.addf %329, %334 : vector<64x128xf32>
    %c0_313 = arith.constant 0 : index
    %c352 = arith.constant 352 : index
    %c0_314 = arith.constant 0 : index
    %336 = vector.load %arg2[%c0_313, %c352, %c0_314] : memref<1x512x64xbf16, #tpu.memory_space<vmem>>, vector<1x64x64xbf16>
    %337 = vector.shape_cast %336 : vector<1x64x64xbf16> to vector<64x64xbf16>
    %c2_315 = arith.constant 2 : index
    %c0_316 = arith.constant 0 : index
    %c0_317 = arith.constant 0 : index
    %338 = vector.load %arg3[%c2_315, %c0_316, %c0_317] : memref<5x64x128xbf16, #tpu.memory_space<vmem>>, vector<1x64x128xbf16>
    %339 = vector.shape_cast %338 : vector<1x64x128xbf16> to vector<64x128xbf16>
    %cst_318 = arith.constant dense<0.000000e+00> : vector<64x128xf32>
    %340 = tpu.matmul %337, %339, %cst_318 {dimension_numbers = #tpu.dot_dimension_numbers<[1], [0], [0], [1], [0, 0, 1, 1], [], []>} : vector<64x64xbf16>, vector<64x128xbf16>, vector<64x128xf32> -> vector<64x128xf32>
    %341 = arith.addf %335, %340 : vector<64x128xf32>
    %c0_319 = arith.constant 0 : index
    %c368 = arith.constant 368 : index
    %c0_320 = arith.constant 0 : index
    %342 = vector.load %arg2[%c0_319, %c368, %c0_320] : memref<1x512x64xbf16, #tpu.memory_space<vmem>>, vector<1x64x64xbf16>
    %343 = vector.shape_cast %342 : vector<1x64x64xbf16> to vector<64x64xbf16>
    %c3_321 = arith.constant 3 : index
    %c0_322 = arith.constant 0 : index
    %c0_323 = arith.constant 0 : index
    %344 = vector.load %arg3[%c3_321, %c0_322, %c0_323] : memref<5x64x128xbf16, #tpu.memory_space<vmem>>, vector<1x64x128xbf16>
    %345 = vector.shape_cast %344 : vector<1x64x128xbf16> to vector<64x128xbf16>
    %cst_324 = arith.constant dense<0.000000e+00> : vector<64x128xf32>
    %346 = tpu.matmul %343, %345, %cst_324 {dimension_numbers = #tpu.dot_dimension_numbers<[1], [0], [0], [1], [0, 0, 1, 1], [], []>} : vector<64x64xbf16>, vector<64x128xbf16>, vector<64x128xf32> -> vector<64x128xf32>
    %347 = arith.addf %341, %346 : vector<64x128xf32>
    %c0_325 = arith.constant 0 : index
    %c384 = arith.constant 384 : index
    %c0_326 = arith.constant 0 : index
    %348 = vector.load %arg2[%c0_325, %c384, %c0_326] : memref<1x512x64xbf16, #tpu.memory_space<vmem>>, vector<1x64x64xbf16>
    %349 = vector.shape_cast %348 : vector<1x64x64xbf16> to vector<64x64xbf16>
    %c4_327 = arith.constant 4 : index
    %c0_328 = arith.constant 0 : index
    %c0_329 = arith.constant 0 : index
    %350 = vector.load %arg3[%c4_327, %c0_328, %c0_329] : memref<5x64x128xbf16, #tpu.memory_space<vmem>>, vector<1x64x128xbf16>
    %351 = vector.shape_cast %350 : vector<1x64x128xbf16> to vector<64x128xbf16>
    %cst_330 = arith.constant dense<0.000000e+00> : vector<64x128xf32>
    %352 = tpu.matmul %349, %351, %cst_330 {dimension_numbers = #tpu.dot_dimension_numbers<[1], [0], [0], [1], [0, 0, 1, 1], [], []>} : vector<64x64xbf16>, vector<64x128xbf16>, vector<64x128xf32> -> vector<64x128xf32>
    %353 = arith.addf %347, %352 : vector<64x128xf32>
    %c0_i32_331 = arith.constant 0 : i32
    %c0_i32_332 = arith.constant 0 : i32
    %c0_i32_333 = arith.constant 0 : i32
    %354 = tpu.memref_slice %arg11[%c0_i32_331, %c0_i32_332, %c0_i32_333] : memref<2x448x128xf32, #tpu.memory_space<vmem>> -> memref<1x448x128xf32, #tpu.memory_space<vmem>>
    %355 = tpu.memref_squeeze %354 : memref<1x448x128xf32, #tpu.memory_space<vmem>> -> memref<448x128xf32, #tpu.memory_space<vmem>>
    %c320_334 = arith.constant 320 : index
    %c0_335 = arith.constant 0 : index
    %356 = vector.load %355[%c320_334, %c0_335] : memref<448x128xf32, #tpu.memory_space<vmem>>, vector<64x128xf32>
    %c1_i32_336 = arith.constant 1 : i32
    %c0_i32_337 = arith.constant 0 : i32
    %c0_i32_338 = arith.constant 0 : i32
    %357 = tpu.memref_slice %arg11[%c1_i32_336, %c0_i32_337, %c0_i32_338] : memref<2x448x128xf32, #tpu.memory_space<vmem>> -> memref<1x448x128xf32, #tpu.memory_space<vmem>>
    %358 = tpu.memref_squeeze %357 : memref<1x448x128xf32, #tpu.memory_space<vmem>> -> memref<448x128xf32, #tpu.memory_space<vmem>>
    %c320_339 = arith.constant 320 : index
    %c0_340 = arith.constant 0 : index
    %359 = vector.load %358[%c320_339, %c0_340] : memref<448x128xf32, #tpu.memory_space<vmem>>, vector<64x128xf32>
    %c320_341 = arith.constant 320 : index
    %c0_342 = arith.constant 0 : index
    %360 = vector.load %arg12[%c320_341, %c0_342] : memref<448x128xbf16, #tpu.memory_space<vmem>>, vector<64x128xbf16>
    %361 = arith.extf %360 : vector<64x128xbf16> to vector<64x128xf32>
    %cst_343 = arith.constant 1.000000e+00 : f32
    %362 = vector.broadcast %cst_343 : f32 to vector<64x128xf32>
    %363 = arith.subf %362, %361 : vector<64x128xf32>
    %cst_344 = arith.constant 2.500000e-01 : f32
    %364 = vector.broadcast %cst_344 : f32 to vector<64x128xf32>
    %365 = arith.mulf %364, %363 : vector<64x128xf32>
    %366 = arith.mulf %356, %365 : vector<64x128xf32>
    %367 = arith.addf %366, %353 : vector<64x128xf32>
    %cst_345 = arith.constant 1.500000e-01 : f32
    %368 = vector.broadcast %cst_345 : f32 to vector<64x128xf32>
    %369 = arith.mulf %368, %363 : vector<64x128xf32>
    %370 = arith.mulf %359, %369 : vector<64x128xf32>
    %cst_346 = arith.constant 4.000000e-01 : f32
    %371 = vector.broadcast %cst_346 : f32 to vector<64x128xf32>
    %372 = arith.mulf %371, %353 : vector<64x128xf32>
    %373 = arith.addf %370, %372 : vector<64x128xf32>
    %374 = arith.addf %367, %373 : vector<64x128xf32>
    %cst_347 = arith.constant 3.000000e-01 : f32
    %375 = vector.broadcast %cst_347 : f32 to vector<64x128xf32>
    %376 = arith.cmpf ogt, %374, %375 : vector<64x128xf32>
    %377 = arith.extui %376 : vector<64x128xi1> to vector<64x128xi32>
    %378 = arith.sitofp %377 : vector<64x128xi32> to vector<64x128xf32>
    %c0_i32_348 = arith.constant 0 : i32
    %c0_i32_349 = arith.constant 0 : i32
    %c0_i32_350 = arith.constant 0 : i32
    %379 = tpu.memref_slice %arg11[%c0_i32_348, %c0_i32_349, %c0_i32_350] : memref<2x448x128xf32, #tpu.memory_space<vmem>> -> memref<1x448x128xf32, #tpu.memory_space<vmem>>
    %380 = tpu.memref_squeeze %379 : memref<1x448x128xf32, #tpu.memory_space<vmem>> -> memref<448x128xf32, #tpu.memory_space<vmem>>
    %c320_351 = arith.constant 320 : index
    %c0_352 = arith.constant 0 : index
    %381 = vector.load %380[%c320_351, %c0_352] : memref<448x128xf32, #tpu.memory_space<vmem>>, vector<64x128xf32>
    tpu.vector_store %380[%c320_351, %c0_352], %367 {strides = array<i32>} : memref<448x128xf32, #tpu.memory_space<vmem>>, vector<64x128xf32>,
    %c1_i32_353 = arith.constant 1 : i32
    %c0_i32_354 = arith.constant 0 : i32
    %c0_i32_355 = arith.constant 0 : i32
    %382 = tpu.memref_slice %arg11[%c1_i32_353, %c0_i32_354, %c0_i32_355] : memref<2x448x128xf32, #tpu.memory_space<vmem>> -> memref<1x448x128xf32, #tpu.memory_space<vmem>>
    %383 = tpu.memref_squeeze %382 : memref<1x448x128xf32, #tpu.memory_space<vmem>> -> memref<448x128xf32, #tpu.memory_space<vmem>>
    %c320_356 = arith.constant 320 : index
    %c0_357 = arith.constant 0 : index
    %384 = vector.load %383[%c320_356, %c0_357] : memref<448x128xf32, #tpu.memory_space<vmem>>, vector<64x128xf32>
    tpu.vector_store %383[%c320_356, %c0_357], %373 {strides = array<i32>} : memref<448x128xf32, #tpu.memory_space<vmem>>, vector<64x128xf32>,
    %385 = arith.truncf %378 : vector<64x128xf32> to vector<64x128xbf16>
    %c320_358 = arith.constant 320 : index
    %c0_359 = arith.constant 0 : index
    %386 = vector.load %arg12[%c320_358, %c0_359] : memref<448x128xbf16, #tpu.memory_space<vmem>>, vector<64x128xbf16>
    tpu.vector_store %arg12[%c320_358, %c0_359], %385 {strides = array<i32>} : memref<448x128xbf16, #tpu.memory_space<vmem>>, vector<64x128xbf16>,
    %cst_360 = arith.constant 0.000000e+00 : f32
    %387 = vector.broadcast %cst_360 : f32 to vector<64x128xf32>
    %c0_361 = arith.constant 0 : index
    %c384_362 = arith.constant 384 : index
    %c0_363 = arith.constant 0 : index
    %388 = vector.load %arg2[%c0_361, %c384_362, %c0_363] : memref<1x512x64xbf16, #tpu.memory_space<vmem>>, vector<1x64x64xbf16>
    %389 = vector.shape_cast %388 : vector<1x64x64xbf16> to vector<64x64xbf16>
    %c0_364 = arith.constant 0 : index
    %c0_365 = arith.constant 0 : index
    %c0_366 = arith.constant 0 : index
    %390 = vector.load %arg3[%c0_364, %c0_365, %c0_366] : memref<5x64x128xbf16, #tpu.memory_space<vmem>>, vector<1x64x128xbf16>
    %391 = vector.shape_cast %390 : vector<1x64x128xbf16> to vector<64x128xbf16>
    %cst_367 = arith.constant dense<0.000000e+00> : vector<64x128xf32>
    %392 = tpu.matmul %389, %391, %cst_367 {dimension_numbers = #tpu.dot_dimension_numbers<[1], [0], [0], [1], [0, 0, 1, 1], [], []>} : vector<64x64xbf16>, vector<64x128xbf16>, vector<64x128xf32> -> vector<64x128xf32>
    %393 = arith.addf %387, %392 : vector<64x128xf32>
    %c0_368 = arith.constant 0 : index
    %c400 = arith.constant 400 : index
    %c0_369 = arith.constant 0 : index
    %394 = vector.load %arg2[%c0_368, %c400, %c0_369] : memref<1x512x64xbf16, #tpu.memory_space<vmem>>, vector<1x64x64xbf16>
    %395 = vector.shape_cast %394 : vector<1x64x64xbf16> to vector<64x64xbf16>
    %c1_370 = arith.constant 1 : index
    %c0_371 = arith.constant 0 : index
    %c0_372 = arith.constant 0 : index
    %396 = vector.load %arg3[%c1_370, %c0_371, %c0_372] : memref<5x64x128xbf16, #tpu.memory_space<vmem>>, vector<1x64x128xbf16>
    %397 = vector.shape_cast %396 : vector<1x64x128xbf16> to vector<64x128xbf16>
    %cst_373 = arith.constant dense<0.000000e+00> : vector<64x128xf32>
    %398 = tpu.matmul %395, %397, %cst_373 {dimension_numbers = #tpu.dot_dimension_numbers<[1], [0], [0], [1], [0, 0, 1, 1], [], []>} : vector<64x64xbf16>, vector<64x128xbf16>, vector<64x128xf32> -> vector<64x128xf32>
    %399 = arith.addf %393, %398 : vector<64x128xf32>
    %c0_374 = arith.constant 0 : index
    %c416 = arith.constant 416 : index
    %c0_375 = arith.constant 0 : index
    %400 = vector.load %arg2[%c0_374, %c416, %c0_375] : memref<1x512x64xbf16, #tpu.memory_space<vmem>>, vector<1x64x64xbf16>
    %401 = vector.shape_cast %400 : vector<1x64x64xbf16> to vector<64x64xbf16>
    %c2_376 = arith.constant 2 : index
    %c0_377 = arith.constant 0 : index
    %c0_378 = arith.constant 0 : index
    %402 = vector.load %arg3[%c2_376, %c0_377, %c0_378] : memref<5x64x128xbf16, #tpu.memory_space<vmem>>, vector<1x64x128xbf16>
    %403 = vector.shape_cast %402 : vector<1x64x128xbf16> to vector<64x128xbf16>
    %cst_379 = arith.constant dense<0.000000e+00> : vector<64x128xf32>
    %404 = tpu.matmul %401, %403, %cst_379 {dimension_numbers = #tpu.dot_dimension_numbers<[1], [0], [0], [1], [0, 0, 1, 1], [], []>} : vector<64x64xbf16>, vector<64x128xbf16>, vector<64x128xf32> -> vector<64x128xf32>
    %405 = arith.addf %399, %404 : vector<64x128xf32>
    %c0_380 = arith.constant 0 : index
    %c432 = arith.constant 432 : index
    %c0_381 = arith.constant 0 : index
    %406 = vector.load %arg2[%c0_380, %c432, %c0_381] : memref<1x512x64xbf16, #tpu.memory_space<vmem>>, vector<1x64x64xbf16>
    %407 = vector.shape_cast %406 : vector<1x64x64xbf16> to vector<64x64xbf16>
    %c3_382 = arith.constant 3 : index
    %c0_383 = arith.constant 0 : index
    %c0_384 = arith.constant 0 : index
    %408 = vector.load %arg3[%c3_382, %c0_383, %c0_384] : memref<5x64x128xbf16, #tpu.memory_space<vmem>>, vector<1x64x128xbf16>
    %409 = vector.shape_cast %408 : vector<1x64x128xbf16> to vector<64x128xbf16>
    %cst_385 = arith.constant dense<0.000000e+00> : vector<64x128xf32>
    %410 = tpu.matmul %407, %409, %cst_385 {dimension_numbers = #tpu.dot_dimension_numbers<[1], [0], [0], [1], [0, 0, 1, 1], [], []>} : vector<64x64xbf16>, vector<64x128xbf16>, vector<64x128xf32> -> vector<64x128xf32>
    %411 = arith.addf %405, %410 : vector<64x128xf32>
    %c0_386 = arith.constant 0 : index
    %c448 = arith.constant 448 : index
    %c0_387 = arith.constant 0 : index
    %412 = vector.load %arg2[%c0_386, %c448, %c0_387] : memref<1x512x64xbf16, #tpu.memory_space<vmem>>, vector<1x64x64xbf16>
    %413 = vector.shape_cast %412 : vector<1x64x64xbf16> to vector<64x64xbf16>
    %c4_388 = arith.constant 4 : index
    %c0_389 = arith.constant 0 : index
    %c0_390 = arith.constant 0 : index
    %414 = vector.load %arg3[%c4_388, %c0_389, %c0_390] : memref<5x64x128xbf16, #tpu.memory_space<vmem>>, vector<1x64x128xbf16>
    %415 = vector.shape_cast %414 : vector<1x64x128xbf16> to vector<64x128xbf16>
    %cst_391 = arith.constant dense<0.000000e+00> : vector<64x128xf32>
    %416 = tpu.matmul %413, %415, %cst_391 {dimension_numbers = #tpu.dot_dimension_numbers<[1], [0], [0], [1], [0, 0, 1, 1], [], []>} : vector<64x64xbf16>, vector<64x128xbf16>, vector<64x128xf32> -> vector<64x128xf32>
    %417 = arith.addf %411, %416 : vector<64x128xf32>
    %c0_i32_392 = arith.constant 0 : i32
    %c0_i32_393 = arith.constant 0 : i32
    %c0_i32_394 = arith.constant 0 : i32
    %418 = tpu.memref_slice %arg11[%c0_i32_392, %c0_i32_393, %c0_i32_394] : memref<2x448x128xf32, #tpu.memory_space<vmem>> -> memref<1x448x128xf32, #tpu.memory_space<vmem>>
    %419 = tpu.memref_squeeze %418 : memref<1x448x128xf32, #tpu.memory_space<vmem>> -> memref<448x128xf32, #tpu.memory_space<vmem>>
    %c384_395 = arith.constant 384 : index
    %c0_396 = arith.constant 0 : index
    %420 = vector.load %419[%c384_395, %c0_396] : memref<448x128xf32, #tpu.memory_space<vmem>>, vector<64x128xf32>
    %c1_i32_397 = arith.constant 1 : i32
    %c0_i32_398 = arith.constant 0 : i32
    %c0_i32_399 = arith.constant 0 : i32
    %421 = tpu.memref_slice %arg11[%c1_i32_397, %c0_i32_398, %c0_i32_399] : memref<2x448x128xf32, #tpu.memory_space<vmem>> -> memref<1x448x128xf32, #tpu.memory_space<vmem>>
    %422 = tpu.memref_squeeze %421 : memref<1x448x128xf32, #tpu.memory_space<vmem>> -> memref<448x128xf32, #tpu.memory_space<vmem>>
    %c384_400 = arith.constant 384 : index
    %c0_401 = arith.constant 0 : index
    %423 = vector.load %422[%c384_400, %c0_401] : memref<448x128xf32, #tpu.memory_space<vmem>>, vector<64x128xf32>
    %c384_402 = arith.constant 384 : index
    %c0_403 = arith.constant 0 : index
    %424 = vector.load %arg12[%c384_402, %c0_403] : memref<448x128xbf16, #tpu.memory_space<vmem>>, vector<64x128xbf16>
    %425 = arith.extf %424 : vector<64x128xbf16> to vector<64x128xf32>
    %cst_404 = arith.constant 1.000000e+00 : f32
    %426 = vector.broadcast %cst_404 : f32 to vector<64x128xf32>
    %427 = arith.subf %426, %425 : vector<64x128xf32>
    %cst_405 = arith.constant 2.500000e-01 : f32
    %428 = vector.broadcast %cst_405 : f32 to vector<64x128xf32>
    %429 = arith.mulf %428, %427 : vector<64x128xf32>
    %430 = arith.mulf %420, %429 : vector<64x128xf32>
    %431 = arith.addf %430, %417 : vector<64x128xf32>
    %cst_406 = arith.constant 1.500000e-01 : f32
    %432 = vector.broadcast %cst_406 : f32 to vector<64x128xf32>
    %433 = arith.mulf %432, %427 : vector<64x128xf32>
    %434 = arith.mulf %423, %433 : vector<64x128xf32>
    %cst_407 = arith.constant 4.000000e-01 : f32
    %435 = vector.broadcast %cst_407 : f32 to vector<64x128xf32>
    %436 = arith.mulf %435, %417 : vector<64x128xf32>
    %437 = arith.addf %434, %436 : vector<64x128xf32>
    %438 = arith.addf %431, %437 : vector<64x128xf32>
    %cst_408 = arith.constant 3.000000e-01 : f32
    %439 = vector.broadcast %cst_408 : f32 to vector<64x128xf32>
    %440 = arith.cmpf ogt, %438, %439 : vector<64x128xf32>
    %441 = arith.extui %440 : vector<64x128xi1> to vector<64x128xi32>
    %442 = arith.sitofp %441 : vector<64x128xi32> to vector<64x128xf32>
    %c0_i32_409 = arith.constant 0 : i32
    %c0_i32_410 = arith.constant 0 : i32
    %c0_i32_411 = arith.constant 0 : i32
    %443 = tpu.memref_slice %arg11[%c0_i32_409, %c0_i32_410, %c0_i32_411] : memref<2x448x128xf32, #tpu.memory_space<vmem>> -> memref<1x448x128xf32, #tpu.memory_space<vmem>>
    %444 = tpu.memref_squeeze %443 : memref<1x448x128xf32, #tpu.memory_space<vmem>> -> memref<448x128xf32, #tpu.memory_space<vmem>>
    %c384_412 = arith.constant 384 : index
    %c0_413 = arith.constant 0 : index
    %445 = vector.load %444[%c384_412, %c0_413] : memref<448x128xf32, #tpu.memory_space<vmem>>, vector<64x128xf32>
    tpu.vector_store %444[%c384_412, %c0_413], %431 {strides = array<i32>} : memref<448x128xf32, #tpu.memory_space<vmem>>, vector<64x128xf32>,
    %c1_i32_414 = arith.constant 1 : i32
    %c0_i32_415 = arith.constant 0 : i32
    %c0_i32_416 = arith.constant 0 : i32
    %446 = tpu.memref_slice %arg11[%c1_i32_414, %c0_i32_415, %c0_i32_416] : memref<2x448x128xf32, #tpu.memory_space<vmem>> -> memref<1x448x128xf32, #tpu.memory_space<vmem>>
    %447 = tpu.memref_squeeze %446 : memref<1x448x128xf32, #tpu.memory_space<vmem>> -> memref<448x128xf32, #tpu.memory_space<vmem>>
    %c384_417 = arith.constant 384 : index
    %c0_418 = arith.constant 0 : index
    %448 = vector.load %447[%c384_417, %c0_418] : memref<448x128xf32, #tpu.memory_space<vmem>>, vector<64x128xf32>
    tpu.vector_store %447[%c384_417, %c0_418], %437 {strides = array<i32>} : memref<448x128xf32, #tpu.memory_space<vmem>>, vector<64x128xf32>,
    %449 = arith.truncf %442 : vector<64x128xf32> to vector<64x128xbf16>
    %c384_419 = arith.constant 384 : index
    %c0_420 = arith.constant 0 : index
    %450 = vector.load %arg12[%c384_419, %c0_420] : memref<448x128xbf16, #tpu.memory_space<vmem>>, vector<64x128xbf16>
    tpu.vector_store %arg12[%c384_419, %c0_420], %449 {strides = array<i32>} : memref<448x128xbf16, #tpu.memory_space<vmem>>, vector<64x128xbf16>,
    %c0_421 = arith.constant 0 : index
    %c0_422 = arith.constant 0 : index
    %451 = vector.load %arg12[%c0_421, %c0_422] : memref<448x128xbf16, #tpu.memory_space<vmem>>, vector<448x128xbf16>
    %452 = vector.shape_cast %451 : vector<448x128xbf16> to vector<14x2x16x128xbf16>
    %453 = vector.extract_strided_slice %452 {offsets = [0, 0, 0, 0], sizes = [14, 1, 16, 128], strides = [1, 1, 1, 1]} : vector<14x2x16x128xbf16> to vector<14x1x16x128xbf16>
    %454 = vector.shape_cast %453 : vector<14x1x16x128xbf16> to vector<14x16x128xbf16>
    %455 = vector.extract_strided_slice %452 {offsets = [0, 1, 0, 0], sizes = [14, 1, 16, 128], strides = [1, 1, 1, 1]} : vector<14x2x16x128xbf16> to vector<14x1x16x128xbf16>
    %456 = vector.shape_cast %455 : vector<14x1x16x128xbf16> to vector<14x16x128xbf16>
    %457 = arith.addf %454, %456 : vector<14x16x128xbf16>
    %458 = vector.shape_cast %457 : vector<14x16x128xbf16> to vector<14x2x8x128xbf16>
    %459 = vector.extract_strided_slice %458 {offsets = [0, 0, 0, 0], sizes = [14, 1, 8, 128], strides = [1, 1, 1, 1]} : vector<14x2x8x128xbf16> to vector<14x1x8x128xbf16>
    %460 = vector.shape_cast %459 : vector<14x1x8x128xbf16> to vector<14x8x128xbf16>
    %461 = vector.shape_cast %460 : vector<14x8x128xbf16> to vector<112x128xbf16>
    %c0_423 = arith.constant 0 : index
    %c0_424 = arith.constant 0 : index
    %c0_425 = arith.constant 0 : index
    %462 = vector.load %arg4[%c0_423, %c0_424, %c0_425] : memref<2x128x128xbf16, #tpu.memory_space<vmem>>, vector<1x128x128xbf16>
    %463 = vector.shape_cast %462 : vector<1x128x128xbf16> to vector<128x128xbf16>
    %cst_426 = arith.constant dense<0.000000e+00> : vector<112x128xf32>
    %464 = tpu.matmul %461, %463, %cst_426 {dimension_numbers = #tpu.dot_dimension_numbers<[1], [0], [0], [1], [0, 0, 1, 1], [], []>} : vector<112x128xbf16>, vector<128x128xbf16>, vector<112x128xf32> -> vector<112x128xf32>
    %465 = vector.extract_strided_slice %458 {offsets = [0, 1, 0, 0], sizes = [14, 1, 8, 128], strides = [1, 1, 1, 1]} : vector<14x2x8x128xbf16> to vector<14x1x8x128xbf16>
    %466 = vector.shape_cast %465 : vector<14x1x8x128xbf16> to vector<14x8x128xbf16>
    %467 = vector.shape_cast %466 : vector<14x8x128xbf16> to vector<112x128xbf16>
    %c1_427 = arith.constant 1 : index
    %c0_428 = arith.constant 0 : index
    %c0_429 = arith.constant 0 : index
    %468 = vector.load %arg4[%c1_427, %c0_428, %c0_429] : memref<2x128x128xbf16, #tpu.memory_space<vmem>>, vector<1x128x128xbf16>
    %469 = vector.shape_cast %468 : vector<1x128x128xbf16> to vector<128x128xbf16>
    %cst_430 = arith.constant dense<0.000000e+00> : vector<112x128xf32>
    %470 = tpu.matmul %467, %469, %cst_430 {dimension_numbers = #tpu.dot_dimension_numbers<[1], [0], [0], [1], [0, 0, 1, 1], [], []>} : vector<112x128xbf16>, vector<128x128xbf16>, vector<112x128xf32> -> vector<112x128xf32>
    %471 = arith.addf %464, %470 : vector<112x128xf32>
    %c0_431 = arith.constant 0 : index
    %c0_432 = arith.constant 0 : index
    %c0_433 = arith.constant 0 : index
    %472 = vector.load %arg13[%c0_431, %c0_432, %c0_433] : memref<2x112x128xf32, #tpu.memory_space<vmem>>, vector<1x112x128xf32>
    %473 = vector.shape_cast %472 : vector<1x112x128xf32> to vector<112x128xf32>
    %c1_434 = arith.constant 1 : index
    %c0_435 = arith.constant 0 : index
    %c0_436 = arith.constant 0 : index
    %474 = vector.load %arg13[%c1_434, %c0_435, %c0_436] : memref<2x112x128xf32, #tpu.memory_space<vmem>>, vector<1x112x128xf32>
    %475 = vector.shape_cast %474 : vector<1x112x128xf32> to vector<112x128xf32>
    %c0_437 = arith.constant 0 : index
    %c0_438 = arith.constant 0 : index
    %476 = vector.load %arg14[%c0_437, %c0_438] : memref<112x128xbf16, #tpu.memory_space<vmem>>, vector<112x128xbf16>
    %477 = arith.extf %476 : vector<112x128xbf16> to vector<112x128xf32>
    %cst_439 = arith.constant 1.000000e+00 : f32
    %478 = vector.broadcast %cst_439 : f32 to vector<112x128xf32>
    %479 = arith.subf %478, %477 : vector<112x128xf32>
    %cst_440 = arith.constant 2.500000e-01 : f32
    %480 = vector.broadcast %cst_440 : f32 to vector<112x128xf32>
    %481 = arith.mulf %480, %479 : vector<112x128xf32>
    %482 = arith.mulf %473, %481 : vector<112x128xf32>
    %483 = arith.addf %482, %471 : vector<112x128xf32>
    %cst_441 = arith.constant 1.500000e-01 : f32
    %484 = vector.broadcast %cst_441 : f32 to vector<112x128xf32>
    %485 = arith.mulf %484, %479 : vector<112x128xf32>
    %486 = arith.mulf %475, %485 : vector<112x128xf32>
    %cst_442 = arith.constant 4.000000e-01 : f32
    %487 = vector.broadcast %cst_442 : f32 to vector<112x128xf32>
    %488 = arith.mulf %487, %471 : vector<112x128xf32>
    %489 = arith.addf %486, %488 : vector<112x128xf32>
    %490 = arith.addf %483, %489 : vector<112x128xf32>
    %cst_443 = arith.constant 3.000000e-01 : f32
    %491 = vector.broadcast %cst_443 : f32 to vector<112x128xf32>
    %492 = arith.cmpf ogt, %490, %491 : vector<112x128xf32>
    %493 = arith.extui %492 : vector<112x128xi1> to vector<112x128xi32>
    %494 = arith.sitofp %493 : vector<112x128xi32> to vector<112x128xf32>
    %c0_444 = arith.constant 0 : index
    %c0_445 = arith.constant 0 : index
    %c0_446 = arith.constant 0 : index
    %495 = vector.load %arg13[%c0_444, %c0_445, %c0_446] : memref<2x112x128xf32, #tpu.memory_space<vmem>>, vector<1x112x128xf32>
    %496 = vector.shape_cast %495 : vector<1x112x128xf32> to vector<112x128xf32>
    %497 = vector.shape_cast %483 : vector<112x128xf32> to vector<1x112x128xf32>
    tpu.vector_store %arg13[%c0_444, %c0_445, %c0_446], %497 {strides = array<i32>} : memref<2x112x128xf32, #tpu.memory_space<vmem>>, vector<1x112x128xf32>,
    %c1_447 = arith.constant 1 : index
    %c0_448 = arith.constant 0 : index
    %c0_449 = arith.constant 0 : index
    %498 = vector.load %arg13[%c1_447, %c0_448, %c0_449] : memref<2x112x128xf32, #tpu.memory_space<vmem>>, vector<1x112x128xf32>
    %499 = vector.shape_cast %498 : vector<1x112x128xf32> to vector<112x128xf32>
    %500 = vector.shape_cast %489 : vector<112x128xf32> to vector<1x112x128xf32>
    tpu.vector_store %arg13[%c1_447, %c0_448, %c0_449], %500 {strides = array<i32>} : memref<2x112x128xf32, #tpu.memory_space<vmem>>, vector<1x112x128xf32>,
    %501 = arith.truncf %494 : vector<112x128xf32> to vector<112x128xbf16>
    %c0_450 = arith.constant 0 : index
    %c0_451 = arith.constant 0 : index
    %502 = vector.load %arg14[%c0_450, %c0_451] : memref<112x128xbf16, #tpu.memory_space<vmem>>, vector<112x128xbf16>
    tpu.vector_store %arg14[%c0_450, %c0_451], %501 {strides = array<i32>} : memref<112x128xbf16, #tpu.memory_space<vmem>>, vector<112x128xbf16>,
    %cst_452 = arith.constant 0.000000e+00 : f32
    %503 = vector.broadcast %cst_452 : f32 to vector<80x128xf32>
    %cst_453 = arith.constant 0.000000e+00 : f32
    %504 = vector.broadcast %cst_453 : f32 to vector<80x128xf32>
    %505 = vector.extract_strided_slice %494 {offsets = [0, 0], sizes = [80, 128], strides = [1, 1]} : vector<112x128xf32> to vector<80x128xf32>
    %506 = arith.truncf %505 : vector<80x128xf32> to vector<80x128xbf16>
    %c0_454 = arith.constant 0 : index
    %c0_455 = arith.constant 0 : index
    %c0_456 = arith.constant 0 : index
    %507 = vector.load %arg5[%c0_454, %c0_455, %c0_456] : memref<10x128x128xbf16, #tpu.memory_space<vmem>>, vector<1x128x128xbf16>
    %508 = vector.shape_cast %507 : vector<1x128x128xbf16> to vector<128x128xbf16>
    %cst_457 = arith.constant dense<0.000000e+00> : vector<80x128xf32>
    %509 = tpu.matmul %506, %508, %cst_457 {dimension_numbers = #tpu.dot_dimension_numbers<[1], [0], [0], [1], [0, 0, 1, 1], [], []>} : vector<80x128xbf16>, vector<128x128xbf16>, vector<80x128xf32> -> vector<80x128xf32>
    %510 = arith.addf %503, %509 : vector<80x128xf32>
    %c5 = arith.constant 5 : index
    %c0_458 = arith.constant 0 : index
    %c0_459 = arith.constant 0 : index
    %511 = vector.load %arg5[%c5, %c0_458, %c0_459] : memref<10x128x128xbf16, #tpu.memory_space<vmem>>, vector<1x128x128xbf16>
    %512 = vector.shape_cast %511 : vector<1x128x128xbf16> to vector<128x128xbf16>
    %cst_460 = arith.constant dense<0.000000e+00> : vector<80x128xf32>
    %513 = tpu.matmul %506, %512, %cst_460 {dimension_numbers = #tpu.dot_dimension_numbers<[1], [0], [0], [1], [0, 0, 1, 1], [], []>} : vector<80x128xbf16>, vector<128x128xbf16>, vector<80x128xf32> -> vector<80x128xf32>
    %514 = arith.addf %504, %513 : vector<80x128xf32>
    %515 = vector.extract_strided_slice %494 {offsets = [8, 0], sizes = [80, 128], strides = [1, 1]} : vector<112x128xf32> to vector<80x128xf32>
    %516 = arith.truncf %515 : vector<80x128xf32> to vector<80x128xbf16>
    %c1_461 = arith.constant 1 : index
    %c0_462 = arith.constant 0 : index
    %c0_463 = arith.constant 0 : index
    %517 = vector.load %arg5[%c1_461, %c0_462, %c0_463] : memref<10x128x128xbf16, #tpu.memory_space<vmem>>, vector<1x128x128xbf16>
    %518 = vector.shape_cast %517 : vector<1x128x128xbf16> to vector<128x128xbf16>
    %cst_464 = arith.constant dense<0.000000e+00> : vector<80x128xf32>
    %519 = tpu.matmul %516, %518, %cst_464 {dimension_numbers = #tpu.dot_dimension_numbers<[1], [0], [0], [1], [0, 0, 1, 1], [], []>} : vector<80x128xbf16>, vector<128x128xbf16>, vector<80x128xf32> -> vector<80x128xf32>
    %520 = arith.addf %510, %519 : vector<80x128xf32>
    %c6 = arith.constant 6 : index
    %c0_465 = arith.constant 0 : index
    %c0_466 = arith.constant 0 : index
    %521 = vector.load %arg5[%c6, %c0_465, %c0_466] : memref<10x128x128xbf16, #tpu.memory_space<vmem>>, vector<1x128x128xbf16>
    %522 = vector.shape_cast %521 : vector<1x128x128xbf16> to vector<128x128xbf16>
    %cst_467 = arith.constant dense<0.000000e+00> : vector<80x128xf32>
    %523 = tpu.matmul %516, %522, %cst_467 {dimension_numbers = #tpu.dot_dimension_numbers<[1], [0], [0], [1], [0, 0, 1, 1], [], []>} : vector<80x128xbf16>, vector<128x128xbf16>, vector<80x128xf32> -> vector<80x128xf32>
    %524 = arith.addf %514, %523 : vector<80x128xf32>
    %525 = vector.extract_strided_slice %494 {offsets = [16, 0], sizes = [80, 128], strides = [1, 1]} : vector<112x128xf32> to vector<80x128xf32>
    %526 = arith.truncf %525 : vector<80x128xf32> to vector<80x128xbf16>
    %c2_468 = arith.constant 2 : index
    %c0_469 = arith.constant 0 : index
    %c0_470 = arith.constant 0 : index
    %527 = vector.load %arg5[%c2_468, %c0_469, %c0_470] : memref<10x128x128xbf16, #tpu.memory_space<vmem>>, vector<1x128x128xbf16>
    %528 = vector.shape_cast %527 : vector<1x128x128xbf16> to vector<128x128xbf16>
    %cst_471 = arith.constant dense<0.000000e+00> : vector<80x128xf32>
    %529 = tpu.matmul %526, %528, %cst_471 {dimension_numbers = #tpu.dot_dimension_numbers<[1], [0], [0], [1], [0, 0, 1, 1], [], []>} : vector<80x128xbf16>, vector<128x128xbf16>, vector<80x128xf32> -> vector<80x128xf32>
    %530 = arith.addf %520, %529 : vector<80x128xf32>
    %c7 = arith.constant 7 : index
    %c0_472 = arith.constant 0 : index
    %c0_473 = arith.constant 0 : index
    %531 = vector.load %arg5[%c7, %c0_472, %c0_473] : memref<10x128x128xbf16, #tpu.memory_space<vmem>>, vector<1x128x128xbf16>
    %532 = vector.shape_cast %531 : vector<1x128x128xbf16> to vector<128x128xbf16>
    %cst_474 = arith.constant dense<0.000000e+00> : vector<80x128xf32>
    %533 = tpu.matmul %526, %532, %cst_474 {dimension_numbers = #tpu.dot_dimension_numbers<[1], [0], [0], [1], [0, 0, 1, 1], [], []>} : vector<80x128xbf16>, vector<128x128xbf16>, vector<80x128xf32> -> vector<80x128xf32>
    %534 = arith.addf %524, %533 : vector<80x128xf32>
    %535 = vector.extract_strided_slice %494 {offsets = [24, 0], sizes = [80, 128], strides = [1, 1]} : vector<112x128xf32> to vector<80x128xf32>
    %536 = arith.truncf %535 : vector<80x128xf32> to vector<80x128xbf16>
    %c3_475 = arith.constant 3 : index
    %c0_476 = arith.constant 0 : index
    %c0_477 = arith.constant 0 : index
    %537 = vector.load %arg5[%c3_475, %c0_476, %c0_477] : memref<10x128x128xbf16, #tpu.memory_space<vmem>>, vector<1x128x128xbf16>
    %538 = vector.shape_cast %537 : vector<1x128x128xbf16> to vector<128x128xbf16>
    %cst_478 = arith.constant dense<0.000000e+00> : vector<80x128xf32>
    %539 = tpu.matmul %536, %538, %cst_478 {dimension_numbers = #tpu.dot_dimension_numbers<[1], [0], [0], [1], [0, 0, 1, 1], [], []>} : vector<80x128xbf16>, vector<128x128xbf16>, vector<80x128xf32> -> vector<80x128xf32>
    %540 = arith.addf %530, %539 : vector<80x128xf32>
    %c8 = arith.constant 8 : index
    %c0_479 = arith.constant 0 : index
    %c0_480 = arith.constant 0 : index
    %541 = vector.load %arg5[%c8, %c0_479, %c0_480] : memref<10x128x128xbf16, #tpu.memory_space<vmem>>, vector<1x128x128xbf16>
    %542 = vector.shape_cast %541 : vector<1x128x128xbf16> to vector<128x128xbf16>
    %cst_481 = arith.constant dense<0.000000e+00> : vector<80x128xf32>
    %543 = tpu.matmul %536, %542, %cst_481 {dimension_numbers = #tpu.dot_dimension_numbers<[1], [0], [0], [1], [0, 0, 1, 1], [], []>} : vector<80x128xbf16>, vector<128x128xbf16>, vector<80x128xf32> -> vector<80x128xf32>
    %544 = arith.addf %534, %543 : vector<80x128xf32>
    %545 = vector.extract_strided_slice %494 {offsets = [32, 0], sizes = [80, 128], strides = [1, 1]} : vector<112x128xf32> to vector<80x128xf32>
    %546 = arith.truncf %545 : vector<80x128xf32> to vector<80x128xbf16>
    %c4_482 = arith.constant 4 : index
    %c0_483 = arith.constant 0 : index
    %c0_484 = arith.constant 0 : index
    %547 = vector.load %arg5[%c4_482, %c0_483, %c0_484] : memref<10x128x128xbf16, #tpu.memory_space<vmem>>, vector<1x128x128xbf16>
    %548 = vector.shape_cast %547 : vector<1x128x128xbf16> to vector<128x128xbf16>
    %cst_485 = arith.constant dense<0.000000e+00> : vector<80x128xf32>
    %549 = tpu.matmul %546, %548, %cst_485 {dimension_numbers = #tpu.dot_dimension_numbers<[1], [0], [0], [1], [0, 0, 1, 1], [], []>} : vector<80x128xbf16>, vector<128x128xbf16>, vector<80x128xf32> -> vector<80x128xf32>
    %550 = arith.addf %540, %549 : vector<80x128xf32>
    %c9 = arith.constant 9 : index
    %c0_486 = arith.constant 0 : index
    %c0_487 = arith.constant 0 : index
    %551 = vector.load %arg5[%c9, %c0_486, %c0_487] : memref<10x128x128xbf16, #tpu.memory_space<vmem>>, vector<1x128x128xbf16>
    %552 = vector.shape_cast %551 : vector<1x128x128xbf16> to vector<128x128xbf16>
    %cst_488 = arith.constant dense<0.000000e+00> : vector<80x128xf32>
    %553 = tpu.matmul %546, %552, %cst_488 {dimension_numbers = #tpu.dot_dimension_numbers<[1], [0], [0], [1], [0, 0, 1, 1], [], []>} : vector<80x128xbf16>, vector<128x128xbf16>, vector<80x128xf32> -> vector<80x128xf32>
    %554 = arith.addf %544, %553 : vector<80x128xf32>
    %c0_i32_489 = arith.constant 0 : i32
    %c0_i32_490 = arith.constant 0 : i32
    %c0_i32_491 = arith.constant 0 : i32
    %555 = tpu.memref_slice %arg15[%c0_i32_489, %c0_i32_490, %c0_i32_491] : memref<2x160x128xf32, #tpu.memory_space<vmem>> -> memref<1x160x128xf32, #tpu.memory_space<vmem>>
    %556 = tpu.memref_squeeze %555 : memref<1x160x128xf32, #tpu.memory_space<vmem>> -> memref<160x128xf32, #tpu.memory_space<vmem>>
    %c0_492 = arith.constant 0 : index
    %c0_493 = arith.constant 0 : index
    %557 = vector.load %556[%c0_492, %c0_493] : memref<160x128xf32, #tpu.memory_space<vmem>>, vector<80x128xf32>
    %c1_i32_494 = arith.constant 1 : i32
    %c0_i32_495 = arith.constant 0 : i32
    %c0_i32_496 = arith.constant 0 : i32
    %558 = tpu.memref_slice %arg15[%c1_i32_494, %c0_i32_495, %c0_i32_496] : memref<2x160x128xf32, #tpu.memory_space<vmem>> -> memref<1x160x128xf32, #tpu.memory_space<vmem>>
    %559 = tpu.memref_squeeze %558 : memref<1x160x128xf32, #tpu.memory_space<vmem>> -> memref<160x128xf32, #tpu.memory_space<vmem>>
    %c0_497 = arith.constant 0 : index
    %c0_498 = arith.constant 0 : index
    %560 = vector.load %559[%c0_497, %c0_498] : memref<160x128xf32, #tpu.memory_space<vmem>>, vector<80x128xf32>
    %c0_499 = arith.constant 0 : index
    %c0_500 = arith.constant 0 : index
    %561 = vector.load %arg16[%c0_499, %c0_500] : memref<160x128xbf16, #tpu.memory_space<vmem>>, vector<80x128xbf16>
    %562 = arith.extf %561 : vector<80x128xbf16> to vector<80x128xf32>
    %cst_501 = arith.constant 1.000000e+00 : f32
    %563 = vector.broadcast %cst_501 : f32 to vector<80x128xf32>
    %564 = arith.subf %563, %562 : vector<80x128xf32>
    %cst_502 = arith.constant 2.500000e-01 : f32
    %565 = vector.broadcast %cst_502 : f32 to vector<80x128xf32>
    %566 = arith.mulf %565, %564 : vector<80x128xf32>
    %567 = arith.mulf %557, %566 : vector<80x128xf32>
    %568 = arith.addf %567, %550 : vector<80x128xf32>
    %cst_503 = arith.constant 1.500000e-01 : f32
    %569 = vector.broadcast %cst_503 : f32 to vector<80x128xf32>
    %570 = arith.mulf %569, %564 : vector<80x128xf32>
    %571 = arith.mulf %560, %570 : vector<80x128xf32>
    %cst_504 = arith.constant 4.000000e-01 : f32
    %572 = vector.broadcast %cst_504 : f32 to vector<80x128xf32>
    %573 = arith.mulf %572, %550 : vector<80x128xf32>
    %574 = arith.addf %571, %573 : vector<80x128xf32>
    %575 = arith.addf %568, %574 : vector<80x128xf32>
    %cst_505 = arith.constant 3.000000e-01 : f32
    %576 = vector.broadcast %cst_505 : f32 to vector<80x128xf32>
    %577 = arith.cmpf ogt, %575, %576 : vector<80x128xf32>
    %578 = arith.extui %577 : vector<80x128xi1> to vector<80x128xi32>
    %579 = arith.sitofp %578 : vector<80x128xi32> to vector<80x128xf32>
    %c0_i32_506 = arith.constant 0 : i32
    %c0_i32_507 = arith.constant 0 : i32
    %c0_i32_508 = arith.constant 0 : i32
    %580 = tpu.memref_slice %arg15[%c0_i32_506, %c0_i32_507, %c0_i32_508] : memref<2x160x128xf32, #tpu.memory_space<vmem>> -> memref<1x160x128xf32, #tpu.memory_space<vmem>>
    %581 = tpu.memref_squeeze %580 : memref<1x160x128xf32, #tpu.memory_space<vmem>> -> memref<160x128xf32, #tpu.memory_space<vmem>>
    %c0_509 = arith.constant 0 : index
    %c0_510 = arith.constant 0 : index
    %582 = vector.load %581[%c0_509, %c0_510] : memref<160x128xf32, #tpu.memory_space<vmem>>, vector<80x128xf32>
    tpu.vector_store %581[%c0_509, %c0_510], %568 {strides = array<i32>} : memref<160x128xf32, #tpu.memory_space<vmem>>, vector<80x128xf32>,
    %c1_i32_511 = arith.constant 1 : i32
    %c0_i32_512 = arith.constant 0 : i32
    %c0_i32_513 = arith.constant 0 : i32
    %583 = tpu.memref_slice %arg15[%c1_i32_511, %c0_i32_512, %c0_i32_513] : memref<2x160x128xf32, #tpu.memory_space<vmem>> -> memref<1x160x128xf32, #tpu.memory_space<vmem>>
    %584 = tpu.memref_squeeze %583 : memref<1x160x128xf32, #tpu.memory_space<vmem>> -> memref<160x128xf32, #tpu.memory_space<vmem>>
    %c0_514 = arith.constant 0 : index
    %c0_515 = arith.constant 0 : index
    %585 = vector.load %584[%c0_514, %c0_515] : memref<160x128xf32, #tpu.memory_space<vmem>>, vector<80x128xf32>
    tpu.vector_store %584[%c0_514, %c0_515], %574 {strides = array<i32>} : memref<160x128xf32, #tpu.memory_space<vmem>>, vector<80x128xf32>,
    %586 = arith.truncf %579 : vector<80x128xf32> to vector<80x128xbf16>
    %c0_516 = arith.constant 0 : index
    %c0_517 = arith.constant 0 : index
    %587 = vector.load %arg16[%c0_516, %c0_517] : memref<160x128xbf16, #tpu.memory_space<vmem>>, vector<80x128xbf16>
    tpu.vector_store %arg16[%c0_516, %c0_517], %586 {strides = array<i32>} : memref<160x128xbf16, #tpu.memory_space<vmem>>, vector<80x128xbf16>,
    %c0_i32_518 = arith.constant 0 : i32
    %c0_i32_519 = arith.constant 0 : i32
    %c0_i32_520 = arith.constant 0 : i32
    %588 = tpu.memref_slice %arg15[%c0_i32_518, %c0_i32_519, %c0_i32_520] : memref<2x160x128xf32, #tpu.memory_space<vmem>> -> memref<1x160x128xf32, #tpu.memory_space<vmem>>
    %589 = tpu.memref_squeeze %588 : memref<1x160x128xf32, #tpu.memory_space<vmem>> -> memref<160x128xf32, #tpu.memory_space<vmem>>
    %c80_521 = arith.constant 80 : index
    %c0_522 = arith.constant 0 : index
    %590 = vector.load %589[%c80_521, %c0_522] : memref<160x128xf32, #tpu.memory_space<vmem>>, vector<80x128xf32>
    %c1_i32_523 = arith.constant 1 : i32
    %c0_i32_524 = arith.constant 0 : i32
    %c0_i32_525 = arith.constant 0 : i32
    %591 = tpu.memref_slice %arg15[%c1_i32_523, %c0_i32_524, %c0_i32_525] : memref<2x160x128xf32, #tpu.memory_space<vmem>> -> memref<1x160x128xf32, #tpu.memory_space<vmem>>
    %592 = tpu.memref_squeeze %591 : memref<1x160x128xf32, #tpu.memory_space<vmem>> -> memref<160x128xf32, #tpu.memory_space<vmem>>
    %c80_526 = arith.constant 80 : index
    %c0_527 = arith.constant 0 : index
    %593 = vector.load %592[%c80_526, %c0_527] : memref<160x128xf32, #tpu.memory_space<vmem>>, vector<80x128xf32>
    %c80_528 = arith.constant 80 : index
    %c0_529 = arith.constant 0 : index
    %594 = vector.load %arg16[%c80_528, %c0_529] : memref<160x128xbf16, #tpu.memory_space<vmem>>, vector<80x128xbf16>
    %595 = arith.extf %594 : vector<80x128xbf16> to vector<80x128xf32>
    %cst_530 = arith.constant 1.000000e+00 : f32
    %596 = vector.broadcast %cst_530 : f32 to vector<80x128xf32>
    %597 = arith.subf %596, %595 : vector<80x128xf32>
    %cst_531 = arith.constant 2.500000e-01 : f32
    %598 = vector.broadcast %cst_531 : f32 to vector<80x128xf32>
    %599 = arith.mulf %598, %597 : vector<80x128xf32>
    %600 = arith.mulf %590, %599 : vector<80x128xf32>
    %601 = arith.addf %600, %554 : vector<80x128xf32>
    %cst_532 = arith.constant 1.500000e-01 : f32
    %602 = vector.broadcast %cst_532 : f32 to vector<80x128xf32>
    %603 = arith.mulf %602, %597 : vector<80x128xf32>
    %604 = arith.mulf %593, %603 : vector<80x128xf32>
    %cst_533 = arith.constant 4.000000e-01 : f32
    %605 = vector.broadcast %cst_533 : f32 to vector<80x128xf32>
    %606 = arith.mulf %605, %554 : vector<80x128xf32>
    %607 = arith.addf %604, %606 : vector<80x128xf32>
    %608 = arith.addf %601, %607 : vector<80x128xf32>
    %cst_534 = arith.constant 3.000000e-01 : f32
    %609 = vector.broadcast %cst_534 : f32 to vector<80x128xf32>
    %610 = arith.cmpf ogt, %608, %609 : vector<80x128xf32>
    %611 = arith.extui %610 : vector<80x128xi1> to vector<80x128xi32>
    %612 = arith.sitofp %611 : vector<80x128xi32> to vector<80x128xf32>
    %c0_i32_535 = arith.constant 0 : i32
    %c0_i32_536 = arith.constant 0 : i32
    %c0_i32_537 = arith.constant 0 : i32
    %613 = tpu.memref_slice %arg15[%c0_i32_535, %c0_i32_536, %c0_i32_537] : memref<2x160x128xf32, #tpu.memory_space<vmem>> -> memref<1x160x128xf32, #tpu.memory_space<vmem>>
    %614 = tpu.memref_squeeze %613 : memref<1x160x128xf32, #tpu.memory_space<vmem>> -> memref<160x128xf32, #tpu.memory_space<vmem>>
    %c80_538 = arith.constant 80 : index
    %c0_539 = arith.constant 0 : index
    %615 = vector.load %614[%c80_538, %c0_539] : memref<160x128xf32, #tpu.memory_space<vmem>>, vector<80x128xf32>
    tpu.vector_store %614[%c80_538, %c0_539], %601 {strides = array<i32>} : memref<160x128xf32, #tpu.memory_space<vmem>>, vector<80x128xf32>,
    %c1_i32_540 = arith.constant 1 : i32
    %c0_i32_541 = arith.constant 0 : i32
    %c0_i32_542 = arith.constant 0 : i32
    %616 = tpu.memref_slice %arg15[%c1_i32_540, %c0_i32_541, %c0_i32_542] : memref<2x160x128xf32, #tpu.memory_space<vmem>> -> memref<1x160x128xf32, #tpu.memory_space<vmem>>
    %617 = tpu.memref_squeeze %616 : memref<1x160x128xf32, #tpu.memory_space<vmem>> -> memref<160x128xf32, #tpu.memory_space<vmem>>
    %c80_543 = arith.constant 80 : index
    %c0_544 = arith.constant 0 : index
    %618 = vector.load %617[%c80_543, %c0_544] : memref<160x128xf32, #tpu.memory_space<vmem>>, vector<80x128xf32>
    tpu.vector_store %617[%c80_543, %c0_544], %607 {strides = array<i32>} : memref<160x128xf32, #tpu.memory_space<vmem>>, vector<80x128xf32>,
    %619 = arith.truncf %612 : vector<80x128xf32> to vector<80x128xbf16>
    %c80_545 = arith.constant 80 : index
    %c0_546 = arith.constant 0 : index
    %620 = vector.load %arg16[%c80_545, %c0_546] : memref<160x128xbf16, #tpu.memory_space<vmem>>, vector<80x128xbf16>
    tpu.vector_store %arg16[%c80_545, %c0_546], %619 {strides = array<i32>} : memref<160x128xbf16, #tpu.memory_space<vmem>>, vector<80x128xbf16>,
    %cst_547 = arith.constant 0.000000e+00 : f32
    %621 = vector.broadcast %cst_547 : f32 to vector<40x128xf32>
    %622 = vector.shape_cast %579 : vector<80x128xf32> to vector<5x2x8x128xf32>
    %623 = vector.extract_strided_slice %622 {offsets = [0, 0, 0, 0], sizes = [5, 1, 8, 128], strides = [1, 1, 1, 1]} : vector<5x2x8x128xf32> to vector<5x1x8x128xf32>
    %624 = vector.shape_cast %623 : vector<5x1x8x128xf32> to vector<5x8x128xf32>
    %625 = vector.extract_strided_slice %622 {offsets = [0, 1, 0, 0], sizes = [5, 1, 8, 128], strides = [1, 1, 1, 1]} : vector<5x2x8x128xf32> to vector<5x1x8x128xf32>
    %626 = vector.shape_cast %625 : vector<5x1x8x128xf32> to vector<5x8x128xf32>
    %627 = arith.addf %624, %626 : vector<5x8x128xf32>
    %628 = vector.shape_cast %627 : vector<5x8x128xf32> to vector<40x128xf32>
    %629 = arith.truncf %628 : vector<40x128xf32> to vector<40x128xbf16>
    %c0_548 = arith.constant 0 : index
    %c0_549 = arith.constant 0 : index
    %c0_550 = arith.constant 0 : index
    %630 = vector.load %arg6[%c0_548, %c0_549, %c0_550] : memref<2x128x128xbf16, #tpu.memory_space<vmem>>, vector<1x128x128xbf16>
    %631 = vector.shape_cast %630 : vector<1x128x128xbf16> to vector<128x128xbf16>
    %cst_551 = arith.constant dense<0.000000e+00> : vector<40x128xf32>
    %632 = tpu.matmul %629, %631, %cst_551 {dimension_numbers = #tpu.dot_dimension_numbers<[1], [0], [0], [1], [0, 0, 1, 1], [], []>} : vector<40x128xbf16>, vector<128x128xbf16>, vector<40x128xf32> -> vector<40x128xf32>
    %633 = arith.addf %621, %632 : vector<40x128xf32>
    %634 = vector.shape_cast %612 : vector<80x128xf32> to vector<5x2x8x128xf32>
    %635 = vector.extract_strided_slice %634 {offsets = [0, 0, 0, 0], sizes = [5, 1, 8, 128], strides = [1, 1, 1, 1]} : vector<5x2x8x128xf32> to vector<5x1x8x128xf32>
    %636 = vector.shape_cast %635 : vector<5x1x8x128xf32> to vector<5x8x128xf32>
    %637 = vector.extract_strided_slice %634 {offsets = [0, 1, 0, 0], sizes = [5, 1, 8, 128], strides = [1, 1, 1, 1]} : vector<5x2x8x128xf32> to vector<5x1x8x128xf32>
    %638 = vector.shape_cast %637 : vector<5x1x8x128xf32> to vector<5x8x128xf32>
    %639 = arith.addf %636, %638 : vector<5x8x128xf32>
    %640 = vector.shape_cast %639 : vector<5x8x128xf32> to vector<40x128xf32>
    %641 = arith.truncf %640 : vector<40x128xf32> to vector<40x128xbf16>
    %c1_552 = arith.constant 1 : index
    %c0_553 = arith.constant 0 : index
    %c0_554 = arith.constant 0 : index
    %642 = vector.load %arg6[%c1_552, %c0_553, %c0_554] : memref<2x128x128xbf16, #tpu.memory_space<vmem>>, vector<1x128x128xbf16>
    %643 = vector.shape_cast %642 : vector<1x128x128xbf16> to vector<128x128xbf16>
    %cst_555 = arith.constant dense<0.000000e+00> : vector<40x128xf32>
    %644 = tpu.matmul %641, %643, %cst_555 {dimension_numbers = #tpu.dot_dimension_numbers<[1], [0], [0], [1], [0, 0, 1, 1], [], []>} : vector<40x128xbf16>, vector<128x128xbf16>, vector<40x128xf32> -> vector<40x128xf32>
    %645 = arith.addf %633, %644 : vector<40x128xf32>
    %c0_556 = arith.constant 0 : index
    %c0_557 = arith.constant 0 : index
    %c0_558 = arith.constant 0 : index
    %646 = vector.load %arg17[%c0_556, %c0_557, %c0_558] : memref<2x40x128xf32, #tpu.memory_space<vmem>>, vector<1x40x128xf32>
    %647 = vector.shape_cast %646 : vector<1x40x128xf32> to vector<40x128xf32>
    %c1_559 = arith.constant 1 : index
    %c0_560 = arith.constant 0 : index
    %c0_561 = arith.constant 0 : index
    %648 = vector.load %arg17[%c1_559, %c0_560, %c0_561] : memref<2x40x128xf32, #tpu.memory_space<vmem>>, vector<1x40x128xf32>
    %649 = vector.shape_cast %648 : vector<1x40x128xf32> to vector<40x128xf32>
    %c0_562 = arith.constant 0 : index
    %c0_563 = arith.constant 0 : index
    %650 = vector.load %arg18[%c0_562, %c0_563] : memref<40x128xbf16, #tpu.memory_space<vmem>>, vector<40x128xbf16>
    %651 = arith.extf %650 : vector<40x128xbf16> to vector<40x128xf32>
    %cst_564 = arith.constant 1.000000e+00 : f32
    %652 = vector.broadcast %cst_564 : f32 to vector<40x128xf32>
    %653 = arith.subf %652, %651 : vector<40x128xf32>
    %cst_565 = arith.constant 2.500000e-01 : f32
    %654 = vector.broadcast %cst_565 : f32 to vector<40x128xf32>
    %655 = arith.mulf %654, %653 : vector<40x128xf32>
    %656 = arith.mulf %647, %655 : vector<40x128xf32>
    %657 = arith.addf %656, %645 : vector<40x128xf32>
    %cst_566 = arith.constant 1.500000e-01 : f32
    %658 = vector.broadcast %cst_566 : f32 to vector<40x128xf32>
    %659 = arith.mulf %658, %653 : vector<40x128xf32>
    %660 = arith.mulf %649, %659 : vector<40x128xf32>
    %cst_567 = arith.constant 4.000000e-01 : f32
    %661 = vector.broadcast %cst_567 : f32 to vector<40x128xf32>
    %662 = arith.mulf %661, %645 : vector<40x128xf32>
    %663 = arith.addf %660, %662 : vector<40x128xf32>
    %664 = arith.addf %657, %663 : vector<40x128xf32>
    %cst_568 = arith.constant 3.000000e-01 : f32
    %665 = vector.broadcast %cst_568 : f32 to vector<40x128xf32>
    %666 = arith.cmpf ogt, %664, %665 : vector<40x128xf32>
    %667 = arith.extui %666 : vector<40x128xi1> to vector<40x128xi32>
    %668 = arith.sitofp %667 : vector<40x128xi32> to vector<40x128xf32>
    %c0_569 = arith.constant 0 : index
    %c0_570 = arith.constant 0 : index
    %c0_571 = arith.constant 0 : index
    %669 = vector.load %arg17[%c0_569, %c0_570, %c0_571] : memref<2x40x128xf32, #tpu.memory_space<vmem>>, vector<1x40x128xf32>
    %670 = vector.shape_cast %669 : vector<1x40x128xf32> to vector<40x128xf32>
    %671 = vector.shape_cast %657 : vector<40x128xf32> to vector<1x40x128xf32>
    tpu.vector_store %arg17[%c0_569, %c0_570, %c0_571], %671 {strides = array<i32>} : memref<2x40x128xf32, #tpu.memory_space<vmem>>, vector<1x40x128xf32>,
    %c1_572 = arith.constant 1 : index
    %c0_573 = arith.constant 0 : index
    %c0_574 = arith.constant 0 : index
    %672 = vector.load %arg17[%c1_572, %c0_573, %c0_574] : memref<2x40x128xf32, #tpu.memory_space<vmem>>, vector<1x40x128xf32>
    %673 = vector.shape_cast %672 : vector<1x40x128xf32> to vector<40x128xf32>
    %674 = vector.shape_cast %663 : vector<40x128xf32> to vector<1x40x128xf32>
    tpu.vector_store %arg17[%c1_572, %c0_573, %c0_574], %674 {strides = array<i32>} : memref<2x40x128xf32, #tpu.memory_space<vmem>>, vector<1x40x128xf32>,
    %675 = arith.truncf %668 : vector<40x128xf32> to vector<40x128xbf16>
    %c0_575 = arith.constant 0 : index
    %c0_576 = arith.constant 0 : index
    %676 = vector.load %arg18[%c0_575, %c0_576] : memref<40x128xbf16, #tpu.memory_space<vmem>>, vector<40x128xbf16>
    tpu.vector_store %arg18[%c0_575, %c0_576], %675 {strides = array<i32>} : memref<40x128xbf16, #tpu.memory_space<vmem>>, vector<40x128xbf16>,
    %cst_577 = arith.constant 0.000000e+00 : f32
    %677 = vector.broadcast %cst_577 : f32 to vector<8x128xf32>
    %678 = vector.extract_strided_slice %668 {offsets = [0, 0], sizes = [8, 128], strides = [1, 1]} : vector<40x128xf32> to vector<8x128xf32>
    %679 = arith.truncf %678 : vector<8x128xf32> to vector<8x128xbf16>
    %c0_578 = arith.constant 0 : index
    %c0_579 = arith.constant 0 : index
    %c0_580 = arith.constant 0 : index
    %680 = vector.load %arg7[%c0_578, %c0_579, %c0_580] : memref<5x128x128xbf16, #tpu.memory_space<vmem>>, vector<1x128x128xbf16>
    %681 = vector.shape_cast %680 : vector<1x128x128xbf16> to vector<128x128xbf16>
    %cst_581 = arith.constant dense<0.000000e+00> : vector<8x128xf32>
    %682 = tpu.matmul %679, %681, %cst_581 {dimension_numbers = #tpu.dot_dimension_numbers<[1], [0], [0], [1], [0, 0, 1, 1], [], []>} : vector<8x128xbf16>, vector<128x128xbf16>, vector<8x128xf32> -> vector<8x128xf32>
    %683 = arith.addf %677, %682 : vector<8x128xf32>
    %684 = vector.extract_strided_slice %668 {offsets = [8, 0], sizes = [8, 128], strides = [1, 1]} : vector<40x128xf32> to vector<8x128xf32>
    %685 = arith.truncf %684 : vector<8x128xf32> to vector<8x128xbf16>
    %c1_582 = arith.constant 1 : index
    %c0_583 = arith.constant 0 : index
    %c0_584 = arith.constant 0 : index
    %686 = vector.load %arg7[%c1_582, %c0_583, %c0_584] : memref<5x128x128xbf16, #tpu.memory_space<vmem>>, vector<1x128x128xbf16>
    %687 = vector.shape_cast %686 : vector<1x128x128xbf16> to vector<128x128xbf16>
    %cst_585 = arith.constant dense<0.000000e+00> : vector<8x128xf32>
    %688 = tpu.matmul %685, %687, %cst_585 {dimension_numbers = #tpu.dot_dimension_numbers<[1], [0], [0], [1], [0, 0, 1, 1], [], []>} : vector<8x128xbf16>, vector<128x128xbf16>, vector<8x128xf32> -> vector<8x128xf32>
    %689 = arith.addf %683, %688 : vector<8x128xf32>
    %690 = vector.extract_strided_slice %668 {offsets = [16, 0], sizes = [8, 128], strides = [1, 1]} : vector<40x128xf32> to vector<8x128xf32>
    %691 = arith.truncf %690 : vector<8x128xf32> to vector<8x128xbf16>
    %c2_586 = arith.constant 2 : index
    %c0_587 = arith.constant 0 : index
    %c0_588 = arith.constant 0 : index
    %692 = vector.load %arg7[%c2_586, %c0_587, %c0_588] : memref<5x128x128xbf16, #tpu.memory_space<vmem>>, vector<1x128x128xbf16>
    %693 = vector.shape_cast %692 : vector<1x128x128xbf16> to vector<128x128xbf16>
    %cst_589 = arith.constant dense<0.000000e+00> : vector<8x128xf32>
    %694 = tpu.matmul %691, %693, %cst_589 {dimension_numbers = #tpu.dot_dimension_numbers<[1], [0], [0], [1], [0, 0, 1, 1], [], []>} : vector<8x128xbf16>, vector<128x128xbf16>, vector<8x128xf32> -> vector<8x128xf32>
    %695 = arith.addf %689, %694 : vector<8x128xf32>
    %696 = vector.extract_strided_slice %668 {offsets = [24, 0], sizes = [8, 128], strides = [1, 1]} : vector<40x128xf32> to vector<8x128xf32>
    %697 = arith.truncf %696 : vector<8x128xf32> to vector<8x128xbf16>
    %c3_590 = arith.constant 3 : index
    %c0_591 = arith.constant 0 : index
    %c0_592 = arith.constant 0 : index
    %698 = vector.load %arg7[%c3_590, %c0_591, %c0_592] : memref<5x128x128xbf16, #tpu.memory_space<vmem>>, vector<1x128x128xbf16>
    %699 = vector.shape_cast %698 : vector<1x128x128xbf16> to vector<128x128xbf16>
    %cst_593 = arith.constant dense<0.000000e+00> : vector<8x128xf32>
    %700 = tpu.matmul %697, %699, %cst_593 {dimension_numbers = #tpu.dot_dimension_numbers<[1], [0], [0], [1], [0, 0, 1, 1], [], []>} : vector<8x128xbf16>, vector<128x128xbf16>, vector<8x128xf32> -> vector<8x128xf32>
    %701 = arith.addf %695, %700 : vector<8x128xf32>
    %702 = vector.extract_strided_slice %668 {offsets = [32, 0], sizes = [8, 128], strides = [1, 1]} : vector<40x128xf32> to vector<8x128xf32>
    %703 = arith.truncf %702 : vector<8x128xf32> to vector<8x128xbf16>
    %c4_594 = arith.constant 4 : index
    %c0_595 = arith.constant 0 : index
    %c0_596 = arith.constant 0 : index
    %704 = vector.load %arg7[%c4_594, %c0_595, %c0_596] : memref<5x128x128xbf16, #tpu.memory_space<vmem>>, vector<1x128x128xbf16>
    %705 = vector.shape_cast %704 : vector<1x128x128xbf16> to vector<128x128xbf16>
    %cst_597 = arith.constant dense<0.000000e+00> : vector<8x128xf32>
    %706 = tpu.matmul %703, %705, %cst_597 {dimension_numbers = #tpu.dot_dimension_numbers<[1], [0], [0], [1], [0, 0, 1, 1], [], []>} : vector<8x128xbf16>, vector<128x128xbf16>, vector<8x128xf32> -> vector<8x128xf32>
    %707 = arith.addf %701, %706 : vector<8x128xf32>
    %c0_598 = arith.constant 0 : index
    %c0_599 = arith.constant 0 : index
    %c0_600 = arith.constant 0 : index
    %708 = vector.load %arg19[%c0_598, %c0_599, %c0_600] : memref<2x8x128xf32, #tpu.memory_space<vmem>>, vector<1x8x128xf32>
    %709 = vector.shape_cast %708 : vector<1x8x128xf32> to vector<8x128xf32>
    %c1_601 = arith.constant 1 : index
    %c0_602 = arith.constant 0 : index
    %c0_603 = arith.constant 0 : index
    %710 = vector.load %arg19[%c1_601, %c0_602, %c0_603] : memref<2x8x128xf32, #tpu.memory_space<vmem>>, vector<1x8x128xf32>
    %711 = vector.shape_cast %710 : vector<1x8x128xf32> to vector<8x128xf32>
    %c0_604 = arith.constant 0 : index
    %c0_605 = arith.constant 0 : index
    %712 = vector.load %arg20[%c0_604, %c0_605] : memref<8x128xbf16, #tpu.memory_space<vmem>>, vector<8x128xbf16>
    %713 = arith.extf %712 : vector<8x128xbf16> to vector<8x128xf32>
    %cst_606 = arith.constant 1.000000e+00 : f32
    %714 = vector.broadcast %cst_606 : f32 to vector<8x128xf32>
    %715 = arith.subf %714, %713 : vector<8x128xf32>
    %cst_607 = arith.constant 2.500000e-01 : f32
    %716 = vector.broadcast %cst_607 : f32 to vector<8x128xf32>
    %717 = arith.mulf %716, %715 : vector<8x128xf32>
    %718 = arith.mulf %709, %717 : vector<8x128xf32>
    %719 = arith.addf %718, %707 : vector<8x128xf32>
    %cst_608 = arith.constant 1.500000e-01 : f32
    %720 = vector.broadcast %cst_608 : f32 to vector<8x128xf32>
    %721 = arith.mulf %720, %715 : vector<8x128xf32>
    %722 = arith.mulf %711, %721 : vector<8x128xf32>
    %cst_609 = arith.constant 4.000000e-01 : f32
    %723 = vector.broadcast %cst_609 : f32 to vector<8x128xf32>
    %724 = arith.mulf %723, %707 : vector<8x128xf32>
    %725 = arith.addf %722, %724 : vector<8x128xf32>
    %726 = arith.addf %719, %725 : vector<8x128xf32>
    %cst_610 = arith.constant 3.000000e-01 : f32
    %727 = vector.broadcast %cst_610 : f32 to vector<8x128xf32>
    %728 = arith.cmpf ogt, %726, %727 : vector<8x128xf32>
    %729 = arith.extui %728 : vector<8x128xi1> to vector<8x128xi32>
    %730 = arith.sitofp %729 : vector<8x128xi32> to vector<8x128xf32>
    %c0_611 = arith.constant 0 : index
    %c0_612 = arith.constant 0 : index
    %c0_613 = arith.constant 0 : index
    %731 = vector.load %arg19[%c0_611, %c0_612, %c0_613] : memref<2x8x128xf32, #tpu.memory_space<vmem>>, vector<1x8x128xf32>
    %732 = vector.shape_cast %731 : vector<1x8x128xf32> to vector<8x128xf32>
    %733 = vector.shape_cast %719 : vector<8x128xf32> to vector<1x8x128xf32>
    tpu.vector_store %arg19[%c0_611, %c0_612, %c0_613], %733 {strides = array<i32>} : memref<2x8x128xf32, #tpu.memory_space<vmem>>, vector<1x8x128xf32>,
    %c1_614 = arith.constant 1 : index
    %c0_615 = arith.constant 0 : index
    %c0_616 = arith.constant 0 : index
    %734 = vector.load %arg19[%c1_614, %c0_615, %c0_616] : memref<2x8x128xf32, #tpu.memory_space<vmem>>, vector<1x8x128xf32>
    %735 = vector.shape_cast %734 : vector<1x8x128xf32> to vector<8x128xf32>
    %736 = vector.shape_cast %725 : vector<8x128xf32> to vector<1x8x128xf32>
    tpu.vector_store %arg19[%c1_614, %c0_615, %c0_616], %736 {strides = array<i32>} : memref<2x8x128xf32, #tpu.memory_space<vmem>>, vector<1x8x128xf32>,
    %737 = arith.truncf %730 : vector<8x128xf32> to vector<8x128xbf16>
    %c0_617 = arith.constant 0 : index
    %c0_618 = arith.constant 0 : index
    %738 = vector.load %arg20[%c0_617, %c0_618] : memref<8x128xbf16, #tpu.memory_space<vmem>>, vector<8x128xbf16>
    tpu.vector_store %arg20[%c0_617, %c0_618], %737 {strides = array<i32>} : memref<8x128xbf16, #tpu.memory_space<vmem>>, vector<8x128xbf16>,
    %739 = arith.truncf %730 : vector<8x128xf32> to vector<8x128xbf16>
    %c0_619 = arith.constant 0 : index
    %c0_620 = arith.constant 0 : index
    %740 = vector.load %arg8[%c0_619, %c0_620] : memref<128x128xbf16, #tpu.memory_space<vmem>>, vector<128x128xbf16>
    %cst_621 = arith.constant dense<0.000000e+00> : vector<8x128xf32>
    %741 = tpu.matmul %739, %740, %cst_621 {dimension_numbers = #tpu.dot_dimension_numbers<[1], [0], [0], [1], [0, 0, 1, 1], [], []>} : vector<8x128xbf16>, vector<128x128xbf16>, vector<8x128xf32> -> vector<8x128xf32>
    %c0_622 = arith.constant 0 : index
    %c0_623 = arith.constant 0 : index
    %c0_624 = arith.constant 0 : index
    %742 = vector.load %arg21[%c0_622, %c0_623, %c0_624] : memref<2x8x128xf32, #tpu.memory_space<vmem>>, vector<1x8x128xf32>
    %743 = vector.shape_cast %742 : vector<1x8x128xf32> to vector<8x128xf32>
    %c1_625 = arith.constant 1 : index
    %c0_626 = arith.constant 0 : index
    %c0_627 = arith.constant 0 : index
    %744 = vector.load %arg21[%c1_625, %c0_626, %c0_627] : memref<2x8x128xf32, #tpu.memory_space<vmem>>, vector<1x8x128xf32>
    %745 = vector.shape_cast %744 : vector<1x8x128xf32> to vector<8x128xf32>
    %c0_628 = arith.constant 0 : index
    %c0_629 = arith.constant 0 : index
    %746 = vector.load %arg22[%c0_628, %c0_629] : memref<8x128xbf16, #tpu.memory_space<vmem>>, vector<8x128xbf16>
    %747 = arith.extf %746 : vector<8x128xbf16> to vector<8x128xf32>
    %cst_630 = arith.constant 1.000000e+00 : f32
    %748 = vector.broadcast %cst_630 : f32 to vector<8x128xf32>
    %749 = arith.subf %748, %747 : vector<8x128xf32>
    %cst_631 = arith.constant 2.500000e-01 : f32
    %750 = vector.broadcast %cst_631 : f32 to vector<8x128xf32>
    %751 = arith.mulf %750, %749 : vector<8x128xf32>
    %752 = arith.mulf %743, %751 : vector<8x128xf32>
    %753 = arith.addf %752, %741 : vector<8x128xf32>
    %cst_632 = arith.constant 1.500000e-01 : f32
    %754 = vector.broadcast %cst_632 : f32 to vector<8x128xf32>
    %755 = arith.mulf %754, %749 : vector<8x128xf32>
    %756 = arith.mulf %745, %755 : vector<8x128xf32>
    %cst_633 = arith.constant 4.000000e-01 : f32
    %757 = vector.broadcast %cst_633 : f32 to vector<8x128xf32>
    %758 = arith.mulf %757, %741 : vector<8x128xf32>
    %759 = arith.addf %756, %758 : vector<8x128xf32>
    %760 = arith.addf %753, %759 : vector<8x128xf32>
    %cst_634 = arith.constant 3.000000e-01 : f32
    %761 = vector.broadcast %cst_634 : f32 to vector<8x128xf32>
    %762 = arith.cmpf ogt, %760, %761 : vector<8x128xf32>
    %763 = arith.extui %762 : vector<8x128xi1> to vector<8x128xi32>
    %764 = arith.sitofp %763 : vector<8x128xi32> to vector<8x128xf32>
    %c0_635 = arith.constant 0 : index
    %c0_636 = arith.constant 0 : index
    %c0_637 = arith.constant 0 : index
    %765 = vector.load %arg21[%c0_635, %c0_636, %c0_637] : memref<2x8x128xf32, #tpu.memory_space<vmem>>, vector<1x8x128xf32>
    %766 = vector.shape_cast %765 : vector<1x8x128xf32> to vector<8x128xf32>
    %767 = vector.shape_cast %753 : vector<8x128xf32> to vector<1x8x128xf32>
    tpu.vector_store %arg21[%c0_635, %c0_636, %c0_637], %767 {strides = array<i32>} : memref<2x8x128xf32, #tpu.memory_space<vmem>>, vector<1x8x128xf32>,
    %c1_638 = arith.constant 1 : index
    %c0_639 = arith.constant 0 : index
    %c0_640 = arith.constant 0 : index
    %768 = vector.load %arg21[%c1_638, %c0_639, %c0_640] : memref<2x8x128xf32, #tpu.memory_space<vmem>>, vector<1x8x128xf32>
    %769 = vector.shape_cast %768 : vector<1x8x128xf32> to vector<8x128xf32>
    %770 = vector.shape_cast %759 : vector<8x128xf32> to vector<1x8x128xf32>
    tpu.vector_store %arg21[%c1_638, %c0_639, %c0_640], %770 {strides = array<i32>} : memref<2x8x128xf32, #tpu.memory_space<vmem>>, vector<1x8x128xf32>,
    %771 = arith.truncf %764 : vector<8x128xf32> to vector<8x128xbf16>
    %c0_641 = arith.constant 0 : index
    %c0_642 = arith.constant 0 : index
    %772 = vector.load %arg22[%c0_641, %c0_642] : memref<8x128xbf16, #tpu.memory_space<vmem>>, vector<8x128xbf16>
    tpu.vector_store %arg22[%c0_641, %c0_642], %771 {strides = array<i32>} : memref<8x128xbf16, #tpu.memory_space<vmem>>, vector<8x128xbf16>,
    %773 = arith.truncf %764 : vector<8x128xf32> to vector<8x128xbf16>
    %c0_643 = arith.constant 0 : index
    %c0_644 = arith.constant 0 : index
    %774 = vector.load %arg9[%c0_643, %c0_644] : memref<128x128xbf16, #tpu.memory_space<vmem>>, vector<128x128xbf16>
    %cst_645 = arith.constant dense<0.000000e+00> : vector<8x128xf32>
    %775 = tpu.matmul %773, %774, %cst_645 {dimension_numbers = #tpu.dot_dimension_numbers<[1], [0], [0], [1], [0, 0, 1, 1], [], []>} : vector<8x128xbf16>, vector<128x128xbf16>, vector<8x128xf32> -> vector<8x128xf32>
    %c0_646 = arith.constant 0 : index
    %c0_647 = arith.constant 0 : index
    %c0_648 = arith.constant 0 : index
    %776 = vector.load %arg23[%c0_646, %c0_647, %c0_648] : memref<2x8x128xf32, #tpu.memory_space<vmem>>, vector<1x8x128xf32>
    %777 = vector.shape_cast %776 : vector<1x8x128xf32> to vector<8x128xf32>
    %c1_649 = arith.constant 1 : index
    %c0_650 = arith.constant 0 : index
    %c0_651 = arith.constant 0 : index
    %778 = vector.load %arg23[%c1_649, %c0_650, %c0_651] : memref<2x8x128xf32, #tpu.memory_space<vmem>>, vector<1x8x128xf32>
    %779 = vector.shape_cast %778 : vector<1x8x128xf32> to vector<8x128xf32>
    %c0_652 = arith.constant 0 : index
    %c0_653 = arith.constant 0 : index
    %780 = vector.load %arg24[%c0_652, %c0_653] : memref<8x128xbf16, #tpu.memory_space<vmem>>, vector<8x128xbf16>
    %781 = arith.extf %780 : vector<8x128xbf16> to vector<8x128xf32>
    %cst_654 = arith.constant 1.000000e+00 : f32
    %782 = vector.broadcast %cst_654 : f32 to vector<8x128xf32>
    %783 = arith.subf %782, %781 : vector<8x128xf32>
    %cst_655 = arith.constant 2.500000e-01 : f32
    %784 = vector.broadcast %cst_655 : f32 to vector<8x128xf32>
    %785 = arith.mulf %784, %783 : vector<8x128xf32>
    %786 = arith.mulf %777, %785 : vector<8x128xf32>
    %787 = arith.addf %786, %775 : vector<8x128xf32>
    %cst_656 = arith.constant 1.500000e-01 : f32
    %788 = vector.broadcast %cst_656 : f32 to vector<8x128xf32>
    %789 = arith.mulf %788, %783 : vector<8x128xf32>
    %790 = arith.mulf %779, %789 : vector<8x128xf32>
    %cst_657 = arith.constant 4.000000e-01 : f32
    %791 = vector.broadcast %cst_657 : f32 to vector<8x128xf32>
    %792 = arith.mulf %791, %775 : vector<8x128xf32>
    %793 = arith.addf %790, %792 : vector<8x128xf32>
    %794 = arith.addf %787, %793 : vector<8x128xf32>
    %cst_658 = arith.constant 3.000000e-01 : f32
    %795 = vector.broadcast %cst_658 : f32 to vector<8x128xf32>
    %796 = arith.cmpf ogt, %794, %795 : vector<8x128xf32>
    %797 = arith.extui %796 : vector<8x128xi1> to vector<8x128xi32>
    %798 = arith.sitofp %797 : vector<8x128xi32> to vector<8x128xf32>
    %c0_659 = arith.constant 0 : index
    %c0_660 = arith.constant 0 : index
    %c0_661 = arith.constant 0 : index
    %799 = vector.load %arg23[%c0_659, %c0_660, %c0_661] : memref<2x8x128xf32, #tpu.memory_space<vmem>>, vector<1x8x128xf32>
    %800 = vector.shape_cast %799 : vector<1x8x128xf32> to vector<8x128xf32>
    %801 = vector.shape_cast %787 : vector<8x128xf32> to vector<1x8x128xf32>
    tpu.vector_store %arg23[%c0_659, %c0_660, %c0_661], %801 {strides = array<i32>} : memref<2x8x128xf32, #tpu.memory_space<vmem>>, vector<1x8x128xf32>,
    %c1_662 = arith.constant 1 : index
    %c0_663 = arith.constant 0 : index
    %c0_664 = arith.constant 0 : index
    %802 = vector.load %arg23[%c1_662, %c0_663, %c0_664] : memref<2x8x128xf32, #tpu.memory_space<vmem>>, vector<1x8x128xf32>
    %803 = vector.shape_cast %802 : vector<1x8x128xf32> to vector<8x128xf32>
    %804 = vector.shape_cast %793 : vector<8x128xf32> to vector<1x8x128xf32>
    tpu.vector_store %arg23[%c1_662, %c0_663, %c0_664], %804 {strides = array<i32>} : memref<2x8x128xf32, #tpu.memory_space<vmem>>, vector<1x8x128xf32>,
    %805 = arith.truncf %798 : vector<8x128xf32> to vector<8x128xbf16>
    %c0_665 = arith.constant 0 : index
    %c0_666 = arith.constant 0 : index
    %806 = vector.load %arg24[%c0_665, %c0_666] : memref<8x128xbf16, #tpu.memory_space<vmem>>, vector<8x128xbf16>
    tpu.vector_store %arg24[%c0_665, %c0_666], %805 {strides = array<i32>} : memref<8x128xbf16, #tpu.memory_space<vmem>>, vector<8x128xbf16>,
    %c0_667 = arith.constant 0 : index
    %c0_668 = arith.constant 0 : index
    %807 = vector.load %arg10[%c0_667, %c0_668] : memref<8x128xf32, #tpu.memory_space<vmem>>, vector<8x128xf32>
    %808 = arith.addf %807, %798 : vector<8x128xf32>
    %c0_669 = arith.constant 0 : index
    %c0_670 = arith.constant 0 : index
    %809 = vector.load %arg10[%c0_669, %c0_670] : memref<8x128xf32, #tpu.memory_space<vmem>>, vector<8x128xf32>
    tpu.vector_store %arg10[%c0_669, %c0_670], %808 {strides = array<i32>} : memref<8x128xf32, #tpu.memory_space<vmem>>, vector<8x128xf32>,
    return
  }
  func.func @transform_0(%arg0: i32, %arg1: i32) -> (i32, i32, i32) {
    %c0_i32 = arith.constant 0 : i32
    %c0_i32_0 = arith.constant 0 : i32
    return %arg1, %arg0, %c0_i32 : i32, i32, i32
  }
  func.func @transform_1(%arg0: i32, %arg1: i32) -> (i32, i32, i32) {
    %c0_i32 = arith.constant 0 : i32
    %c0_i32_0 = arith.constant 0 : i32
    %c0_i32_1 = arith.constant 0 : i32
    %c0_i32_2 = arith.constant 0 : i32
    return %c0_i32, %c0_i32_0, %c0_i32_1 : i32, i32, i32
  }
  func.func @transform_2(%arg0: i32, %arg1: i32) -> (i32, i32, i32) {
    %c0_i32 = arith.constant 0 : i32
    %c0_i32_0 = arith.constant 0 : i32
    %c0_i32_1 = arith.constant 0 : i32
    %c0_i32_2 = arith.constant 0 : i32
    return %c0_i32, %c0_i32_0, %c0_i32_1 : i32, i32, i32
  }
  func.func @transform_3(%arg0: i32, %arg1: i32) -> (i32, i32, i32) {
    %c0_i32 = arith.constant 0 : i32
    %c0_i32_0 = arith.constant 0 : i32
    %c0_i32_1 = arith.constant 0 : i32
    %c0_i32_2 = arith.constant 0 : i32
    return %c0_i32, %c0_i32_0, %c0_i32_1 : i32, i32, i32
  }
  func.func @transform_4(%arg0: i32, %arg1: i32) -> (i32, i32, i32) {
    %c0_i32 = arith.constant 0 : i32
    %c0_i32_0 = arith.constant 0 : i32
    %c0_i32_1 = arith.constant 0 : i32
    %c0_i32_2 = arith.constant 0 : i32
    return %c0_i32, %c0_i32_0, %c0_i32_1 : i32, i32, i32
  }
  func.func @transform_5(%arg0: i32, %arg1: i32) -> (i32, i32, i32) {
    %c0_i32 = arith.constant 0 : i32
    %c0_i32_0 = arith.constant 0 : i32
    %c0_i32_1 = arith.constant 0 : i32
    %c0_i32_2 = arith.constant 0 : i32
    return %c0_i32, %c0_i32_0, %c0_i32_1 : i32, i32, i32
  }
  func.func @transform_6(%arg0: i32, %arg1: i32) -> (i32, i32) {
    %c0_i32 = arith.constant 0 : i32
    %c0_i32_0 = arith.constant 0 : i32
    %c0_i32_1 = arith.constant 0 : i32
    return %c0_i32, %c0_i32_0 : i32, i32
  }
  func.func @transform_7(%arg0: i32, %arg1: i32) -> (i32, i32) {
    %c0_i32 = arith.constant 0 : i32
    %c0_i32_0 = arith.constant 0 : i32
    %c0_i32_1 = arith.constant 0 : i32
    return %c0_i32, %c0_i32_0 : i32, i32
  }
  func.func @transform_8(%arg0: i32, %arg1: i32) -> (i32, i32) {
    %c0_i32 = arith.constant 0 : i32
    %c0_i32_0 = arith.constant 0 : i32
    return %arg0, %c0_i32 : i32, i32
  }
}

</mosaic_0001>

<bundles_post_ra>
// kernel: lenet_dvs_forward.1
= control target key start
LH: loop header
LB: loop body
LE: loop exit
PB: predicated region body
PF: predicated region fallthrough
CT: control target
= control target key end

     0   :  { %s14111_s27 = smov 0   ;;  %s14113_s28 = smov 0   ;;  %s16930_s0 = inlined_call_operand.vmem [shape: bf16[8,512,64], index: 0, kind: input, shape index: {}]   ;;  %s16931_s1 = inlined_call_operand.vmem [shape: bf16[5,64,128], index: 1, kind: input, shape index: {}]   ;;  %s16932_s2 = inlined_call_operand.vmem [shape: bf16[2,128,128], index: 2, kind: input, shape index: {}]   ;;  %s16933_s3 = inlined_call_operand.vmem [shape: bf16[10,128,128], index: 3, kind: input, shape index: {}]   ;;  %s16934_s4 = inlined_call_operand.vmem [shape: bf16[2,128,128], index: 4, kind: input, shape index: {}]   ;;  %s16935_s5 = inlined_call_operand.vmem [shape: bf16[5,128,128], index: 5, kind: input, shape index: {}]   ;;  %s16936_s6 = inlined_call_operand.vmem [shape: bf16[128,128], index: 6, kind: input, shape index: {}]   ;;  %s16937_s7 = inlined_call_operand.vmem [shape: bf16[128,128], index: 7, kind: input, shape index: {}]   ;;  %s16938_s8 = inlined_call_operand.vmem [shape: f32[8,128], index: 8, kind: output, shape index: {}]  }
   0x1   :  { %s14115_s29 = smov 0  }
   0x2 LB: > { %s27_s30 = sadd.s32 1, %s14055_s28  ;;  %p10124_p0 = scmp.ge.s32.totalorder %s14059_s29, 1  ;;  %s14059_s29 = sphi %s14115_s29, %s18_s29   ;;  %s14055_s28 = sphi %s14113_s28, %s16999_s28   ;;  %s14051_s27 = sphi %s14111_s27, %s16998_s27  }
   0x3   : > { %p28_p1 = scmp.ge.s32.totalorder %s27_s30, 8  ;;  %p281_p2 = scmp.lt.s32.totalorder %s14059_s29, 9 }
   0x5   : > { %s17001_s30 = smov (%p28_p1, %s27_s30), 0  ;;  %p282_p3 = pnand %p10124_p0, %p281_p2 }
   0x7   : > { %285 = sbr.rel (%p282_p3) target bundleno = 2349 (0x92d), region = 52 }
   0xe   : > { %p319_p4 = scmp.lt.s32.totalorder %s14051_s27, 7  ;;  %p10127_p5 = scmp.ne.s32.totalorder %s14051_s27, 0 }
   0xf   : > { %v14061_v0 = vmov (!%p10127_p5), 0.0   ;;  %v14062_v1 = vmov (!%p10127_p5), 0  }
  0x10   : > { %s320_s9 = scalar_select %p319_p4, %s14051_s27, 7 }
  0x11   : > { %336 = sbr.rel (%p10127_p5) target bundleno = 142 (0x8e), region = 56  ;;  %337 = vst [vmem:[#allocation2] sm:$0xff] (!%p10127_p5), %v14061_v0  ;;  %338 = vst [vmem:[#allocation2 + $0x8] sm:$0xff] (!%p10127_p5), %v14061_v0 }
  0x12   : > { %s11393_s10 = sshll.u32 %s320_s9, 8  ;;  %339 = vst [vmem:[#allocation2 + $0x10] sm:$0xff] (!%p10127_p5), %v14061_v0  ;;  %340 = vst [vmem:[#allocation2 + $0x18] sm:$0xff] (!%p10127_p5), %v14061_v0 }
  0x13   : > { %s14132_s13 = scalar_lea.vmem %s16930_s0, %s11393_s10  ;;  %341 = vst [vmem:[#allocation2 + $0x20] sm:$0xff] (!%p10127_p5), %v14061_v0  ;;  %342 = vst [vmem:[#allocation2 + $0x28] sm:$0xff] (!%p10127_p5), %v14061_v0 }
  0x14   : > { %343 = vst [vmem:[#allocation2 + $0x30] sm:$0xff] (!%p10127_p5), %v14061_v0  ;;  %344 = vst [vmem:[#allocation2 + $0x38] sm:$0xff] (!%p10127_p5), %v14061_v0 }
  0x15   : > { %345 = vst [vmem:[#allocation2 + $0x40] sm:$0xff] (!%p10127_p5), %v14061_v0  ;;  %346 = vst [vmem:[#allocation2 + $0x48] sm:$0xff] (!%p10127_p5), %v14061_v0 }
  0x16   : > { %347 = vst [vmem:[#allocation2 + $0x50] sm:$0xff] (!%p10127_p5), %v14061_v0  ;;  %348 = vst [vmem:[#allocation2 + $0x58] sm:$0xff] (!%p10127_p5), %v14061_v0 }
  0x17   : > { %349 = vst [vmem:[#allocation2 + $0x60] sm:$0xff] (!%p10127_p5), %v14061_v0  ;;  %350 = vst [vmem:[#allocation2 + $0x68] sm:$0xff] (!%p10127_p5), %v14061_v0 }
  0x18   : > { %351 = vst [vmem:[#allocation2 + $0x70] sm:$0xff] %v14061_v0  ;;  %352 = vst [vmem:[#allocation2 + $0x78] sm:$0xff] %v14061_v0 }
  0x19   : > { %353 = vst [vmem:[#allocation2 + $0x80] sm:$0xff] %v14061_v0  ;;  %354 = vst [vmem:[#allocation2 + $0x88] sm:$0xff] %v14061_v0 }
  0x1a   : > { %355 = vst [vmem:[#allocation2 + $0x90] sm:$0xff] %v14061_v0  ;;  %356 = vst [vmem:[#allocation2 + $0x98] sm:$0xff] %v14061_v0 }
  0x1b   : > { %357 = vst [vmem:[#allocation2 + $0xa0] sm:$0xff] %v14061_v0  ;;  %358 = vst [vmem:[#allocation2 + $0xa8] sm:$0xff] %v14061_v0 }
  0x1c   : > { %359 = vst [vmem:[#allocation2 + $0xb0] sm:$0xff] %v14061_v0  ;;  %360 = vst [vmem:[#allocation2 + $0xb8] sm:$0xff] %v14061_v0 }
  0x1d   : > { %361 = vst [vmem:[#allocation2 + $0xc0] sm:$0xff] %v14061_v0  ;;  %362 = vst [vmem:[#allocation2 + $0xc8] sm:$0xff] %v14061_v0 }
  0x1e   : > { %363 = vst [vmem:[#allocation2 + $0xd0] sm:$0xff] %v14061_v0  ;;  %364 = vst [vmem:[#allocation2 + $0xd8] sm:$0xff] %v14061_v0 }
  0x1f   : > { %365 = vst [vmem:[#allocation2 + $0xe0] sm:$0xff] %v14061_v0  ;;  %366 = vst [vmem:[#allocation2 + $0xe8] sm:$0xff] %v14061_v0 }
  0x20   : > { %367 = vst [vmem:[#allocation2 + $0xf0] sm:$0xff] %v14061_v0  ;;  %368 = vst [vmem:[#allocation2 + $0xf8] sm:$0xff] %v14061_v0 }
  0x21   : > { %369 = vst [vmem:[#allocation2 + $0x100] sm:$0xff] %v14061_v0  ;;  %370 = vst [vmem:[#allocation2 + $0x108] sm:$0xff] %v14061_v0 }
  0x22   : > { %371 = vst [vmem:[#allocation2 + $0x110] sm:$0xff] %v14061_v0  ;;  %372 = vst [vmem:[#allocation2 + $0x118] sm:$0xff] %v14061_v0 }
  0x23   : > { %373 = vst [vmem:[#allocation2 + $0x120] sm:$0xff] %v14061_v0  ;;  %374 = vst [vmem:[#allocation2 + $0x128] sm:$0xff] %v14061_v0 }
  0x24   : > { %375 = vst [vmem:[#allocation2 + $0x130] sm:$0xff] %v14061_v0  ;;  %376 = vst [vmem:[#allocation2 + $0x138] sm:$0xff] %v14061_v0 }
  0x25   : > { %377 = vst [vmem:[#allocation2 + $0x140] sm:$0xff] %v14061_v0  ;;  %378 = vst [vmem:[#allocation2 + $0x148] sm:$0xff] %v14061_v0 }
  0x26   : > { %379 = vst [vmem:[#allocation2 + $0x150] sm:$0xff] %v14061_v0  ;;  %380 = vst [vmem:[#allocation2 + $0x158] sm:$0xff] %v14061_v0 }
  0x27   : > { %381 = vst [vmem:[#allocation2 + $0x160] sm:$0xff] %v14061_v0  ;;  %382 = vst [vmem:[#allocation2 + $0x168] sm:$0xff] %v14061_v0 }
  0x28   : > { %383 = vst [vmem:[#allocation2 + $0x170] sm:$0xff] %v14061_v0  ;;  %384 = vst [vmem:[#allocation2 + $0x178] sm:$0xff] %v14061_v0 }
  0x29   : > { %385 = vst [vmem:[#allocation2 + $0x180] sm:$0xff] %v14061_v0  ;;  %386 = vst [vmem:[#allocation2 + $0x188] sm:$0xff] %v14061_v0 }
  0x2a   : > { %387 = vst [vmem:[#allocation2 + $0x190] sm:$0xff] %v14061_v0  ;;  %388 = vst [vmem:[#allocation2 + $0x198] sm:$0xff] %v14061_v0 }
  0x2b   : > { %389 = vst [vmem:[#allocation2 + $0x1a0] sm:$0xff] %v14061_v0  ;;  %390 = vst [vmem:[#allocation2 + $0x1a8] sm:$0xff] %v14061_v0 }
  0x2c   : > { %391 = vst [vmem:[#allocation2 + $0x1b0] sm:$0xff] %v14061_v0  ;;  %392 = vst [vmem:[#allocation2 + $0x1b8] sm:$0xff] %v14061_v0 }
  0x2d   : > { %393 = vst [vmem:[#allocation2 + $0x1c0] sm:$0xff] %v14061_v0  ;;  %394 = vst [vmem:[#allocation2 + $0x1c8] sm:$0xff] %v14061_v0 }
  0x2e   : > { %395 = vst [vmem:[#allocation2 + $0x1d0] sm:$0xff] %v14061_v0  ;;  %396 = vst [vmem:[#allocation2 + $0x1d8] sm:$0xff] %v14061_v0 }
  0x2f   : > { %397 = vst [vmem:[#allocation2 + $0x1e0] sm:$0xff] %v14061_v0  ;;  %398 = vst [vmem:[#allocation2 + $0x1e8] sm:$0xff] %v14061_v0 }
  0x30   : > { %399 = vst [vmem:[#allocation2 + $0x1f0] sm:$0xff] %v14061_v0  ;;  %400 = vst [vmem:[#allocation2 + $0x1f8] sm:$0xff] %v14061_v0 }
  0x31   : > { %401 = vst [vmem:[#allocation2 + $0x200] sm:$0xff] %v14061_v0  ;;  %402 = vst [vmem:[#allocation2 + $0x208] sm:$0xff] %v14061_v0 }
  0x32   : > { %403 = vst [vmem:[#allocation2 + $0x210] sm:$0xff] %v14061_v0  ;;  %404 = vst [vmem:[#allocation2 + $0x218] sm:$0xff] %v14061_v0 }
  0x33   : > { %405 = vst [vmem:[#allocation2 + $0x220] sm:$0xff] %v14061_v0  ;;  %406 = vst [vmem:[#allocation2 + $0x228] sm:$0xff] %v14061_v0 }
  0x34   : > { %407 = vst [vmem:[#allocation2 + $0x230] sm:$0xff] %v14061_v0  ;;  %408 = vst [vmem:[#allocation2 + $0x238] sm:$0xff] %v14061_v0 }
  0x35   : > { %409 = vst [vmem:[#allocation2 + $0x240] sm:$0xff] %v14061_v0  ;;  %410 = vst [vmem:[#allocation2 + $0x248] sm:$0xff] %v14061_v0 }
  0x36   : > { %411 = vst [vmem:[#allocation2 + $0x250] sm:$0xff] %v14061_v0  ;;  %412 = vst [vmem:[#allocation2 + $0x258] sm:$0xff] %v14061_v0 }
  0x37   : > { %413 = vst [vmem:[#allocation2 + $0x260] sm:$0xff] %v14061_v0  ;;  %414 = vst [vmem:[#allocation2 + $0x268] sm:$0xff] %v14061_v0 }
  0x38   : > { %415 = vst [vmem:[#allocation2 + $0x270] sm:$0xff] %v14061_v0  ;;  %416 = vst [vmem:[#allocation2 + $0x278] sm:$0xff] %v14061_v0 }
  0x39   : > { %417 = vst [vmem:[#allocation2 + $0x280] sm:$0xff] %v14061_v0  ;;  %418 = vst [vmem:[#allocation2 + $0x288] sm:$0xff] %v14061_v0 }
  0x3a   : > { %419 = vst [vmem:[#allocation2 + $0x290] sm:$0xff] %v14061_v0  ;;  %420 = vst [vmem:[#allocation2 + $0x298] sm:$0xff] %v14061_v0 }
  0x3b   : > { %421 = vst [vmem:[#allocation2 + $0x2a0] sm:$0xff] %v14061_v0  ;;  %422 = vst [vmem:[#allocation2 + $0x2a8] sm:$0xff] %v14061_v0 }
  0x3c   : > { %423 = vst [vmem:[#allocation2 + $0x2b0] sm:$0xff] %v14061_v0  ;;  %424 = vst [vmem:[#allocation2 + $0x2b8] sm:$0xff] %v14061_v0 }
  0x3d   : > { %425 = vst [vmem:[#allocation2 + $0x2c0] sm:$0xff] %v14061_v0  ;;  %426 = vst [vmem:[#allocation2 + $0x2c8] sm:$0xff] %v14061_v0 }
  0x3e   : > { %427 = vst [vmem:[#allocation2 + $0x2d0] sm:$0xff] %v14061_v0  ;;  %428 = vst [vmem:[#allocation2 + $0x2d8] sm:$0xff] %v14061_v0 }
  0x3f   : > { %429 = vst [vmem:[#allocation2 + $0x2e0] sm:$0xff] %v14061_v0  ;;  %430 = vst [vmem:[#allocation2 + $0x2e8] sm:$0xff] %v14061_v0 }
  0x40   : > { %431 = vst [vmem:[#allocation2 + $0x2f0] sm:$0xff] %v14061_v0  ;;  %432 = vst [vmem:[#allocation2 + $0x2f8] sm:$0xff] %v14061_v0 }
  0x41   : > { %433 = vst [vmem:[#allocation2 + $0x300] sm:$0xff] %v14061_v0  ;;  %434 = vst [vmem:[#allocation2 + $0x308] sm:$0xff] %v14061_v0 }
  0x42   : > { %435 = vst [vmem:[#allocation2 + $0x310] sm:$0xff] %v14061_v0  ;;  %436 = vst [vmem:[#allocation2 + $0x318] sm:$0xff] %v14061_v0 }
  0x43   : > { %437 = vst [vmem:[#allocation2 + $0x320] sm:$0xff] %v14061_v0  ;;  %438 = vst [vmem:[#allocation2 + $0x328] sm:$0xff] %v14061_v0 }
  0x44   : > { %439 = vst [vmem:[#allocation2 + $0x330] sm:$0xff] %v14061_v0  ;;  %440 = vst [vmem:[#allocation2 + $0x338] sm:$0xff] %v14061_v0 }
  0x45   : > { %441 = vst [vmem:[#allocation2 + $0x340] sm:$0xff] %v14061_v0  ;;  %442 = vst [vmem:[#allocation2 + $0x348] sm:$0xff] %v14061_v0 }
  0x46   : > { %443 = vst [vmem:[#allocation2 + $0x350] sm:$0xff] %v14061_v0  ;;  %444 = vst [vmem:[#allocation2 + $0x358] sm:$0xff] %v14061_v0 }
  0x47   : > { %445 = vst [vmem:[#allocation2 + $0x360] sm:$0xff] %v14061_v0  ;;  %446 = vst [vmem:[#allocation2 + $0x368] sm:$0xff] %v14061_v0 }
  0x48   : > { %447 = vst [vmem:[#allocation2 + $0x370] sm:$0xff] %v14061_v0  ;;  %448 = vst [vmem:[#allocation2 + $0x378] sm:$0xff] %v14061_v0 }
  0x49   : > { %449 = vst [vmem:[#allocation4] sm:$0xff] %v14061_v0  ;;  %450 = vst [vmem:[#allocation4 + $0x8] sm:$0xff] %v14061_v0 }
  0x4a   : > { %451 = vst [vmem:[#allocation4 + $0x10] sm:$0xff] %v14061_v0  ;;  %452 = vst [vmem:[#allocation4 + $0x18] sm:$0xff] %v14061_v0 }
  0x4b   : > { %453 = vst [vmem:[#allocation4 + $0x20] sm:$0xff] %v14061_v0  ;;  %454 = vst [vmem:[#allocation4 + $0x28] sm:$0xff] %v14061_v0 }
  0x4c   : > { %455 = vst [vmem:[#allocation4 + $0x30] sm:$0xff] %v14061_v0  ;;  %456 = vst [vmem:[#allocation4 + $0x38] sm:$0xff] %v14061_v0 }
  0x4d   : > { %457 = vst [vmem:[#allocation4 + $0x40] sm:$0xff] %v14061_v0  ;;  %458 = vst [vmem:[#allocation4 + $0x48] sm:$0xff] %v14061_v0 }
  0x4e   : > { %459 = vst [vmem:[#allocation4 + $0x50] sm:$0xff] %v14061_v0  ;;  %460 = vst [vmem:[#allocation4 + $0x58] sm:$0xff] %v14061_v0 }
  0x4f   : > { %461 = vst [vmem:[#allocation4 + $0x60] sm:$0xff] %v14061_v0  ;;  %462 = vst [vmem:[#allocation4 + $0x68] sm:$0xff] %v14061_v0 }
  0x50   : > { %463 = vst [vmem:[#allocation4 + $0x70] sm:$0xff] %v14061_v0  ;;  %464 = vst [vmem:[#allocation4 + $0x78] sm:$0xff] %v14061_v0 }
  0x51   : > { %465 = vst [vmem:[#allocation4 + $0x80] sm:$0xff] %v14061_v0  ;;  %466 = vst [vmem:[#allocation4 + $0x88] sm:$0xff] %v14061_v0 }
  0x52   : > { %467 = vst [vmem:[#allocation4 + $0x90] sm:$0xff] %v14061_v0  ;;  %468 = vst [vmem:[#allocation4 + $0x98] sm:$0xff] %v14061_v0 }
  0x53   : > { %469 = vst [vmem:[#allocation4 + $0xa0] sm:$0xff] %v14061_v0  ;;  %470 = vst [vmem:[#allocation4 + $0xa8] sm:$0xff] %v14061_v0 }
  0x54   : > { %471 = vst [vmem:[#allocation4 + $0xb0] sm:$0xff] %v14061_v0  ;;  %472 = vst [vmem:[#allocation4 + $0xb8] sm:$0xff] %v14061_v0 }
  0x55   : > { %473 = vst [vmem:[#allocation4 + $0xc0] sm:$0xff] %v14061_v0  ;;  %474 = vst [vmem:[#allocation4 + $0xc8] sm:$0xff] %v14061_v0 }
  0x56   : > { %475 = vst [vmem:[#allocation4 + $0xd0] sm:$0xff] %v14061_v0  ;;  %476 = vst [vmem:[#allocation4 + $0xd8] sm:$0xff] %v14061_v0 }
  0x57   : > { %477 = vst [vmem:[#allocation6] sm:$0xff] %v14061_v0  ;;  %478 = vst [vmem:[#allocation6 + $0x8] sm:$0xff] %v14061_v0 }
  0x58   : > { %479 = vst [vmem:[#allocation6 + $0x10] sm:$0xff] %v14061_v0  ;;  %480 = vst [vmem:[#allocation6 + $0x18] sm:$0xff] %v14061_v0 }
  0x59   : > { %481 = vst [vmem:[#allocation6 + $0x20] sm:$0xff] %v14061_v0  ;;  %482 = vst [vmem:[#allocation6 + $0x28] sm:$0xff] %v14061_v0 }
  0x5a   : > { %483 = vst [vmem:[#allocation6 + $0x30] sm:$0xff] %v14061_v0  ;;  %484 = vst [vmem:[#allocation6 + $0x38] sm:$0xff] %v14061_v0 }
  0x5b   : > { %485 = vst [vmem:[#allocation6 + $0x40] sm:$0xff] %v14061_v0  ;;  %486 = vst [vmem:[#allocation6 + $0x48] sm:$0xff] %v14061_v0 }
  0x5c   : > { %487 = vst [vmem:[#allocation6 + $0x50] sm:$0xff] %v14061_v0  ;;  %488 = vst [vmem:[#allocation6 + $0x58] sm:$0xff] %v14061_v0 }
  0x5d   : > { %489 = vst [vmem:[#allocation6 + $0x60] sm:$0xff] %v14061_v0  ;;  %490 = vst [vmem:[#allocation6 + $0x68] sm:$0xff] %v14061_v0 }
  0x5e   : > { %491 = vst [vmem:[#allocation6 + $0x70] sm:$0xff] %v14061_v0  ;;  %492 = vst [vmem:[#allocation6 + $0x78] sm:$0xff] %v14061_v0 }
  0x5f   : > { %493 = vst [vmem:[#allocation6 + $0x80] sm:$0xff] %v14061_v0  ;;  %494 = vst [vmem:[#allocation6 + $0x88] sm:$0xff] %v14061_v0 }
  0x60   : > { %495 = vst [vmem:[#allocation6 + $0x90] sm:$0xff] %v14061_v0  ;;  %496 = vst [vmem:[#allocation6 + $0x98] sm:$0xff] %v14061_v0 }
  0x61   : > { %497 = vst [vmem:[#allocation6 + $0xa0] sm:$0xff] %v14061_v0  ;;  %498 = vst [vmem:[#allocation6 + $0xa8] sm:$0xff] %v14061_v0 }
  0x62   : > { %499 = vst [vmem:[#allocation6 + $0xb0] sm:$0xff] %v14061_v0  ;;  %500 = vst [vmem:[#allocation6 + $0xb8] sm:$0xff] %v14061_v0 }
  0x63   : > { %501 = vst [vmem:[#allocation6 + $0xc0] sm:$0xff] %v14061_v0  ;;  %502 = vst [vmem:[#allocation6 + $0xc8] sm:$0xff] %v14061_v0 }
  0x64   : > { %503 = vst [vmem:[#allocation6 + $0xd0] sm:$0xff] %v14061_v0  ;;  %504 = vst [vmem:[#allocation6 + $0xd8] sm:$0xff] %v14061_v0 }
  0x65   : > { %505 = vst [vmem:[#allocation6 + $0xe0] sm:$0xff] %v14061_v0  ;;  %506 = vst [vmem:[#allocation6 + $0xe8] sm:$0xff] %v14061_v0 }
  0x66   : > { %507 = vst [vmem:[#allocation6 + $0xf0] sm:$0xff] %v14061_v0  ;;  %508 = vst [vmem:[#allocation6 + $0xf8] sm:$0xff] %v14061_v0 }
  0x67   : > { %509 = vst [vmem:[#allocation6 + $0x100] sm:$0xff] %v14061_v0  ;;  %510 = vst [vmem:[#allocation6 + $0x108] sm:$0xff] %v14061_v0 }
  0x68   : > { %511 = vst [vmem:[#allocation6 + $0x110] sm:$0xff] %v14061_v0  ;;  %512 = vst [vmem:[#allocation6 + $0x118] sm:$0xff] %v14061_v0 }
  0x69   : > { %513 = vst [vmem:[#allocation6 + $0x120] sm:$0xff] %v14061_v0  ;;  %514 = vst [vmem:[#allocation6 + $0x128] sm:$0xff] %v14061_v0 }
  0x6a   : > { %515 = vst [vmem:[#allocation6 + $0x130] sm:$0xff] %v14061_v0  ;;  %516 = vst [vmem:[#allocation6 + $0x138] sm:$0xff] %v14061_v0 }
  0x6b   : > { %517 = vst [vmem:[#allocation8] sm:$0xff] %v14061_v0  ;;  %518 = vst [vmem:[#allocation8 + $0x8] sm:$0xff] %v14061_v0 }
  0x6c   : > { %519 = vst [vmem:[#allocation8 + $0x10] sm:$0xff] %v14061_v0  ;;  %520 = vst [vmem:[#allocation8 + $0x18] sm:$0xff] %v14061_v0 }
  0x6d   : > { %521 = vst [vmem:[#allocation8 + $0x20] sm:$0xff] %v14061_v0  ;;  %522 = vst [vmem:[#allocation8 + $0x28] sm:$0xff] %v14061_v0 }
  0x6e   : > { %523 = vst [vmem:[#allocation8 + $0x30] sm:$0xff] %v14061_v0  ;;  %524 = vst [vmem:[#allocation8 + $0x38] sm:$0xff] %v14061_v0 }
  0x6f   : > { %525 = vst [vmem:[#allocation8 + $0x40] sm:$0xff] %v14061_v0  ;;  %526 = vst [vmem:[#allocation8 + $0x48] sm:$0xff] %v14061_v0 }
  0x70   : > { %527 = vst [vmem:[#allocation10] sm:$0xff] %v14061_v0  ;;  %528 = vst [vmem:[#allocation10 + $0x8] sm:$0xff] %v14061_v0 }
  0x71   : > { %529 = vst [vmem:[#allocation12] sm:$0xff] %v14061_v0  ;;  %530 = vst [vmem:[#allocation12 + $0x8] sm:$0xff] %v14061_v0 }
  0x72   : > { %531 = vst [vmem:[#allocation14] sm:$0xff] %v14061_v0  ;;  %532 = vst [vmem:[#allocation14 + $0x8] sm:$0xff] %v14061_v0 }
  0x73   : > { %586 = vst [vmem:[%s16938_s8] sm:$0xff] %v14061_v0  ;;  %533 = vst [vmem:[#allocation3] sm:$0xff] %v14062_v1 }
  0x74   : > { %534 = vst [vmem:[#allocation3 + $0x8] sm:$0xff] %v14062_v1  ;;  %535 = vst [vmem:[#allocation3 + $0x10] sm:$0xff] %v14062_v1 }
  0x75   : > { %536 = vst [vmem:[#allocation3 + $0x18] sm:$0xff] %v14062_v1  ;;  %537 = vst [vmem:[#allocation3 + $0x20] sm:$0xff] %v14062_v1 }
  0x76   : > { %538 = vst [vmem:[#allocation3 + $0x28] sm:$0xff] %v14062_v1  ;;  %539 = vst [vmem:[#allocation3 + $0x30] sm:$0xff] %v14062_v1 }
  0x77   : > { %540 = vst [vmem:[#allocation3 + $0x38] sm:$0xff] %v14062_v1  ;;  %541 = vst [vmem:[#allocation3 + $0x40] sm:$0xff] %v14062_v1 }
  0x78   : > { %542 = vst [vmem:[#allocation3 + $0x48] sm:$0xff] %v14062_v1  ;;  %543 = vst [vmem:[#allocation3 + $0x50] sm:$0xff] %v14062_v1 }
  0x79   : > { %544 = vst [vmem:[#allocation3 + $0x58] sm:$0xff] %v14062_v1  ;;  %545 = vst [vmem:[#allocation3 + $0x60] sm:$0xff] %v14062_v1 }
  0x7a   : > { %546 = vst [vmem:[#allocation3 + $0x68] sm:$0xff] %v14062_v1  ;;  %547 = vst [vmem:[#allocation3 + $0x70] sm:$0xff] %v14062_v1 }
  0x7b   : > { %548 = vst [vmem:[#allocation3 + $0x78] sm:$0xff] %v14062_v1  ;;  %549 = vst [vmem:[#allocation3 + $0x80] sm:$0xff] %v14062_v1 }
  0x7c   : > { %550 = vst [vmem:[#allocation3 + $0x88] sm:$0xff] %v14062_v1  ;;  %551 = vst [vmem:[#allocation3 + $0x90] sm:$0xff] %v14062_v1 }
  0x7d   : > { %552 = vst [vmem:[#allocation3 + $0x98] sm:$0xff] %v14062_v1  ;;  %553 = vst [vmem:[#allocation3 + $0xa0] sm:$0xff] %v14062_v1 }
  0x7e   : > { %554 = vst [vmem:[#allocation3 + $0xa8] sm:$0xff] %v14062_v1  ;;  %555 = vst [vmem:[#allocation3 + $0xb0] sm:$0xff] %v14062_v1 }
  0x7f   : > { %556 = vst [vmem:[#allocation3 + $0xb8] sm:$0xff] %v14062_v1  ;;  %557 = vst [vmem:[#allocation3 + $0xc0] sm:$0xff] %v14062_v1 }
  0x80   : > { %558 = vst [vmem:[#allocation3 + $0xc8] sm:$0xff] %v14062_v1  ;;  %559 = vst [vmem:[#allocation3 + $0xd0] sm:$0xff] %v14062_v1 }
  0x81   : > { %560 = vst [vmem:[#allocation3 + $0xd8] sm:$0xff] %v14062_v1  ;;  %561 = vst [vmem:[#allocation5] sm:$0xff] %v14062_v1 }
  0x82   : > { %562 = vst [vmem:[#allocation5 + $0x8] sm:$0xff] %v14062_v1  ;;  %563 = vst [vmem:[#allocation5 + $0x10] sm:$0xff] %v14062_v1 }
  0x83   : > { %564 = vst [vmem:[#allocation5 + $0x18] sm:$0xff] %v14062_v1  ;;  %565 = vst [vmem:[#allocation5 + $0x20] sm:$0xff] %v14062_v1 }
  0x84   : > { %566 = vst [vmem:[#allocation5 + $0x28] sm:$0xff] %v14062_v1  ;;  %567 = vst [vmem:[#allocation5 + $0x30] sm:$0xff] %v14062_v1 }
  0x85   : > { %568 = vst [vmem:[#allocation7] sm:$0xff] %v14062_v1  ;;  %569 = vst [vmem:[#allocation7 + $0x8] sm:$0xff] %v14062_v1 }
  0x86   : > { %570 = vst [vmem:[#allocation7 + $0x10] sm:$0xff] %v14062_v1  ;;  %571 = vst [vmem:[#allocation7 + $0x18] sm:$0xff] %v14062_v1 }
  0x87   : > { %572 = vst [vmem:[#allocation7 + $0x20] sm:$0xff] %v14062_v1  ;;  %573 = vst [vmem:[#allocation7 + $0x28] sm:$0xff] %v14062_v1 }
  0x88   : > { %574 = vst [vmem:[#allocation7 + $0x30] sm:$0xff] %v14062_v1  ;;  %575 = vst [vmem:[#allocation7 + $0x38] sm:$0xff] %v14062_v1 }
  0x89   : > { %576 = vst [vmem:[#allocation7 + $0x40] sm:$0xff] %v14062_v1  ;;  %577 = vst [vmem:[#allocation7 + $0x48] sm:$0xff] %v14062_v1 }
  0x8a   : > { %578 = vst [vmem:[#allocation9] sm:$0xf] %v14062_v1  ;;  %579 = vst [vmem:[#allocation9 + $0x4] sm:$0xf] %v14062_v1 }
  0x8b   : > { %580 = vst [vmem:[#allocation9 + $0x8] sm:$0xf] %v14062_v1  ;;  %581 = vst [vmem:[#allocation9 + $0xc] sm:$0xf] %v14062_v1 }
  0x8c   : > { %582 = vst [vmem:[#allocation9 + $0x10] sm:$0xf] %v14062_v1  ;;  %583 = vst [vmem:[#allocation11] sm:$0xf] %v14062_v1 }
  0x8d   : > { %584 = vst [vmem:[#allocation13] sm:$0xf] %v14062_v1  ;;  %585 = vst [vmem:[#allocation15] sm:$0xf] %v14062_v1 }
  0x8e PF: > { %v13610_v2 = vld [vmem:[%s16931_s1 + $0x20] sm:$0xff]   ;;  %v13612_v4 = vld [vmem:[%s16931_s1 + $0x28] sm:$0xff]   ;;  %v13614_v6 = vld [vmem:[%s16931_s1 + $0x30] sm:$0xff]   ;;  %vm658_vm0 = vcmask 523264   ;;  %vm14064_vm1 = vmmov 0  }
  0x8f   : > { %v13611_v3 = vld [vmem:[%s16931_s1 + $0x20] sm:$0xff]   ;;  %11940 = vmatprep.subr.bf16.mxu0 %v13610_v2  ;;  %v13613_v5 = vld [vmem:[%s16931_s1 + $0x28] sm:$0xff]   ;;  %v13615_v7 = vld [vmem:[%s16931_s1 + $0x30] sm:$0xff]  }
  0x90   : > { %12020 = vmatprep.subr.bf16.mxu1 %v13611_v3  ;;  %11941 = vmatpush3.bf16.msra.mxu0 %v13610_v2  ;;  %v13616_v8 = vld [vmem:[%s16931_s1 + $0x38] sm:$0xff]   ;;  %v13618_v10 = vld [vmem:[%s14132_s13 + $0x8] sm:$0xff]   ;;  %v13620_v12 = vld [vmem:[%s14132_s13 + $0x10] sm:$0xff]  }
  0x91   : > { %12021 = vmatpush3.bf16.msra.mxu1 %v13611_v3  ;;  %11942 = vmatprep.subr.bf16.mxu0 %v13612_v4  ;;  %v13617_v9 = vld [vmem:[%s16931_s1 + $0x38] sm:$0xff]   ;;  %v13619_v11 = vld [vmem:[%s14132_s13 + $0x28] sm:$0xff]   ;;  %v13621_v13 = vld [vmem:[%s16931_s1] sm:$0xff]  }
  0x92   : > { %12022 = vmatprep.subr.bf16.mxu1 %v13613_v5  ;;  %11948 = vmatprep.mubr.msk.bf16.mxu0 %vm658_vm0, %v13618_v10  ;;  %v13623_v14 = vld [vmem:[%s16931_s1] sm:$0xff]   ;;  %v13622_v15 = vld [vmem:[%s14132_s13 + $0x30] sm:$0xff]   ;;  %v13624_v16 = vld [vmem:[%s16931_s1 + $0x8] sm:$0xff]  }
  0x93   : > { %12028 = vmatprep.mubr.msk.bf16.mxu1 %vm658_vm0, %v13619_v11  ;;  %v13625_v17 = vld [vmem:[%s16931_s1 + $0x8] sm:$0xff]   ;;  %v13626_v18 = vld [vmem:[%s14132_s13 + $0x18] sm:$0xff]   ;;  %v13628_v20 = vld [vmem:[%s14132_s13 + $0x20] sm:$0xff]  }
  0x94   : > { %11943 = vmatpush3.bf16.msra.mxu0 %v13612_v4  ;;  %v13627_v19 = vld [vmem:[%s14132_s13 + $0x38] sm:$0xff]   ;;  %v13629_v21 = vld [vmem:[%s16931_s1 + $0x10] sm:$0xff]   ;;  %v13630_v23 = vld [vmem:[%s14132_s13 + $0x40] sm:$0xff]  }
  0x95   : > { %12023 = vmatpush3.bf16.msra.mxu1 %v13613_v5  ;;  %11944 = vmatprep.subr.bf16.mxu0 %v13614_v6  ;;  %v13631_v22 = vld [vmem:[%s16931_s1 + $0x10] sm:$0xff]   ;;  %v13632_v24 = vld [vmem:[%s16931_s1 + $0x18] sm:$0xff]   ;;  %v13634_v26 = vld [vmem:[%s14132_s13] sm:$0xff]  }
  0x96   : > { %12024 = vmatprep.subr.bf16.mxu1 %v13615_v7  ;;  %v13633_v25 = vld [vmem:[%s16931_s1 + $0x18] sm:$0xff]   ;;  %v13635_v27 = vld [vmem:[%s14132_s13 + $0x20] sm:$0xff]   ;;  %v13638_v30 = vld [vmem:[%s16931_s1 + $0x48] sm:$0xff]  }
  0x97   : > { %v13636_v28 = vld [vmem:[%s16931_s1 + $0x40] sm:$0xff]   ;;  %v13639_v31 = vld [vmem:[%s16931_s1 + $0x48] sm:$0xff]   ;;  %v13640_v32 = vld [vmem:[%s16931_s1 + $0x50] sm:$0xff]  }
  0x98   : > { %11945 = vmatpush3.bf16.msra.mxu0 %v13614_v6  ;;  %v13637_v29 = vld [vmem:[%s16931_s1 + $0x40] sm:$0xff]   ;;  %v13641_v33 = vld [vmem:[%s16931_s1 + $0x50] sm:$0xff]   ;;  %v13642_v34 = vld [vmem:[%s16931_s1 + $0x58] sm:$0xff]  }
  0x99   : > { %12025 = vmatpush3.bf16.msra.mxu1 %v13615_v7  ;;  %11946 = vmatprep.subr.bf16.mxu0 %v13616_v8  ;;  %v13643_v35 = vld [vmem:[%s16931_s1 + $0x58] sm:$0xff]   ;;  %v13644_v36 = vld [vmem:[%s14132_s13 + $0x10] sm:$0xff]   ;;  %v13647_v39 = vld [vmem:[%s16931_s1 + $0x60] sm:$0xff]  }
  0x9a   : > { %12026 = vmatprep.subr.bf16.mxu1 %v13617_v9  ;;  %v13645_v37 = vld [vmem:[%s14132_s13 + $0x30] sm:$0xff]   ;;  %v13646_v38 = vld [vmem:[%s14132_s13 + $0x18] sm:$0xff]   ;;  %v13649_v40 = vld [vmem:[%s16931_s1 + $0x60] sm:$0xff]  }
  0x9b   : > { %v13648_v41 = vld [vmem:[%s14132_s13 + $0x38] sm:$0xff]   ;;  %v13650_v42 = vld [vmem:[%s16931_s1 + $0x68] sm:$0xff]   ;;  %v13652_v44 = vld [vmem:[%s14132_s13 + $0x20] sm:$0xff]  }
  0x9c   : > { %11947 = vmatpush3.bf16.msra.mxu0 %v13616_v8  ;;  %v13651_v43 = vld [vmem:[%s16931_s1 + $0x68] sm:$0xff]   ;;  %v13653_v45 = vld [vmem:[%s14132_s13 + $0x40] sm:$0xff]   ;;  %v13655_v47 = vld [vmem:[%s16931_s1 + $0x70] sm:$0xff]  }
  0x9d   : > { %12027 = vmatpush3.bf16.msra.mxu1 %v13617_v9  ;;  %11956 = vmatprep.subr.bf16.mxu0 %v13621_v13  ;;  %v13654_v46 = vld [vmem:[%s14132_s13 + $0x28] sm:$0xff]   ;;  %v13657_v48 = vld [vmem:[%s16931_s1 + $0x70] sm:$0xff]   ;;  %v13658_v50 = vld [vmem:[%s16931_s1 + $0x78] sm:$0xff]  }
  0x9e   : > { %12036 = vmatprep.subr.bf16.mxu1 %v13623_v14  ;;  %v13656_v49 = vld [vmem:[%s14132_s13 + $0x48] sm:$0xff]   ;;  %v13659_v51 = vld [vmem:[%s16931_s1 + $0x78] sm:$0xff]   ;;  %v13662_v54 = vld [vmem:[%s14132_s13 + $0x20] sm:$0xff]  }
  0x9f   : > { %11949 = vmatmul.mubr.msk.bf16.vlgmr.msra.gmra.mrb[0].mxu0 %vm658_vm0, %v13620_v12  ;;  %v13660_v52 = vld [vmem:[%s14132_s13 + $0x18] sm:$0xff]   ;;  %v13663_v55 = vld [vmem:[%s16931_s1 + $0x80] sm:$0xff]   ;;  %v13666_v58 = vld [vmem:[%s16931_s1 + $0x88] sm:$0xff]  }
  0xa0   : > { %12029 = vmatmul.mubr.msk.bf16.vlgmr.msra.gmra.mrb[0].mxu1 %vm658_vm0, %v13622_v15  ;;  %11957 = vmatpush3.bf16.msra.mxu0 %v13621_v13  ;;  %v13661_v53 = vld [vmem:[%s14132_s13 + $0x38] sm:$0xff]   ;;  %v13665_v56 = vld [vmem:[%s16931_s1 + $0x80] sm:$0xff]   ;;  %v13667_v59 = vld [vmem:[%s16931_s1 + $0x88] sm:$0xff]  }
  0xa1   : > { %12037 = vmatpush3.bf16.msra.mxu1 %v13623_v14  ;;  %11958 = vmatprep.subr.bf16.mxu0 %v13624_v16  ;;  %v13664_v57 = vld [vmem:[%s14132_s13 + $0x40] sm:$0xff]   ;;  %v13668_v60 = vld [vmem:[%s14132_s13 + $0x28] sm:$0xff]   ;;  %v13670_v62 = vld [vmem:[%s14132_s13 + $0x30] sm:$0xff]  }
  0xa2   : > { %12038 = vmatprep.subr.bf16.mxu1 %v13625_v17  ;;  %11952 = vmatprep.mubr.msk.bf16.mxu0 %vm658_vm0, %v13626_v18  ;;  %v13669_v61 = vld [vmem:[%s14132_s13 + $0x48] sm:$0xff]   ;;  %v13671_v63 = vld [vmem:[%s16931_s1 + $0x90] sm:$0xff]   ;;  %v13674_v2 = vld [vmem:[%s16931_s1 + $0x98] sm:$0xff]  }
  0xa3   : > { %12032 = vmatprep.mubr.msk.bf16.mxu1 %vm658_vm0, %v13627_v19  ;;  %v13673_v0 = vld [vmem:[%s16931_s1 + $0x90] sm:$0xff]   ;;  %v13675_v3 = vld [vmem:[%s16931_s1 + $0x98] sm:$0xff]   ;;  %v13676_v4 = vld [vmem:[%s14132_s13 + $0x20] sm:$0xff]  }
  0xa4   : > { %11959 = vmatpush3.bf16.msra.mxu0 %v13624_v16  ;;  %v13672_v1 = vld [vmem:[%s14132_s13 + $0x50] sm:$0xff]   ;;  %v13677_v5 = vld [vmem:[%s14132_s13 + $0x40] sm:$0xff]   ;;  %v13678_v6 = vld [vmem:[%s14132_s13 + $0x28] sm:$0xff]  }
  0xa5   : > { %12039 = vmatpush3.bf16.msra.mxu1 %v13625_v17  ;;  %11960 = vmatprep.subr.bf16.mxu0 %v13629_v21  ;;  %v13680_v7 = vld [vmem:[%s16931_s1 + $0x20] sm:$0xff]   ;;  %v13679_v9 = vld [vmem:[%s14132_s13 + $0x48] sm:$0xff]   ;;  %v13685_v13 = vld [vmem:[%s14132_s13 + $0x50] sm:$0xff]  }
  0xa6   : > { %12040 = vmatprep.subr.bf16.mxu1 %v13631_v22  ;;  %v13681_v8 = vld [vmem:[%s16931_s1 + $0x20] sm:$0xff]   ;;  %v13686_v14 = vld [vmem:[%s14132_s13 + $0x38] sm:$0xff]   ;;  %v13689_v16 = vld [vmem:[%s16931_s1 + $0x30] sm:$0xff]  }
  0xa7   : > { %11953 = vmatmul.mubr.msk.bf16.gmra.mrb[4].mxu0 %vm658_vm0, %v13628_v20  ;;  %v13687_v17 = vld [vmem:[%s14132_s13 + $0x58] sm:$0xff]   ;;  %v13692_v20 = vld [vmem:[%s14132_s13 + $0x48] sm:$0xff]  }
  0xa8   : > { %12033 = vmatmul.mubr.msk.bf16.gmra.mrb[4].mxu1 %vm658_vm0, %v13630_v23  ;;  %11961 = vmatpush3.bf16.msra.mxu0 %v13629_v21  ;;  %v13693_v21 = vld [vmem:[%s14132_s13 + $0x68] sm:$0xff]   ;;  %v13695_v23 = vld [vmem:[%s16931_s1] sm:$0xff]  }
  0xa9   : > { %12041 = vmatpush3.bf16.msra.mxu1 %v13631_v22  ;;  %11962 = vmatprep.subr.bf16.mxu0 %v13632_v24  ;;  %v13694_v22 = vld [vmem:[%s14132_s13 + $0x50] sm:$0xff]  }
  0xaa   : > { %12042 = vmatprep.subr.bf16.mxu1 %v13633_v25  ;;  %11964 = vmatprep.mubr.msk.bf16.mxu0 %vm658_vm0, %v13634_v26  ;;  %v13698_v26 = vld [vmem:[%s16931_s1 + $0x8] sm:$0xff]  }
  0xab   : > { %12044 = vmatprep.mubr.msk.bf16.mxu1 %vm658_vm0, %v13635_v27  ;;  %v13699_v27 = vld [vmem:[%s16931_s1 + $0x8] sm:$0xff]  }
  0xac   : > { %11963 = vmatpush3.bf16.msra.mxu0 %v13632_v24  ;;  %v13697_v24 = vld [vmem:[%s16931_s1] sm:$0xff]  }
  0xad   : > { %12043 = vmatpush3.bf16.msra.mxu1 %v13633_v25  ;;  %11972 = vmatprep.subr.bf16.mxu0 %v13636_v28  ;;  %v13696_v25 = vld [vmem:[%s14132_s13 + $0x70] sm:$0xff]  }
  0xae   : > { %12052 = vmatprep.subr.bf16.mxu1 %v13637_v29 }
  0xaf   : > { %11965 = vmatmul.mubr.msk.bf16.vlgmr.msra.gmra.mrb[0].mxu0 %vm658_vm0, %v13618_v10  ;;  %v13682_v10 = vld [vmem:[%s16931_s1 + $0x28] sm:$0xff]  }
  0xb0   : > { %12045 = vmatmul.mubr.msk.bf16.vlgmr.msra.gmra.mrb[0].mxu1 %vm658_vm0, %v13619_v11  ;;  %11973 = vmatpush3.bf16.msra.mxu0 %v13636_v28  ;;  %v13683_v11 = vld [vmem:[%s16931_s1 + $0x28] sm:$0xff]   ;;  %v13700_v28 = vld [vmem:[%s14132_s13 + $0x58] sm:$0xff]  }
  0xb1   : > { %12053 = vmatpush3.bf16.msra.mxu1 %v13637_v29  ;;  %11974 = vmatprep.subr.bf16.mxu0 %v13638_v30  ;;  %v13701_v29 = vld [vmem:[%s14132_s13 + $0x78] sm:$0xff]  }
  0xb2   : > { %12054 = vmatprep.subr.bf16.mxu1 %v13639_v31  ;;  %11968 = vmatprep.mubr.msk.bf16.mxu0 %vm658_vm0, %v13620_v12  ;;  %v13684_v12 = vld [vmem:[%s14132_s13 + $0x30] sm:$0xff]  }
  0xb3   : > { %12048 = vmatprep.mubr.msk.bf16.mxu1 %vm658_vm0, %v13622_v15  ;;  %v13688_v15 = vld [vmem:[%s16931_s1 + $0x30] sm:$0xff]  }
  0xb4   : > { %11975 = vmatpush3.bf16.msra.mxu0 %v13638_v30  ;;  %v13702_v30 = vld [vmem:[%s14132_s13 + $0x60] sm:$0xff]  }
  0xb5   : > { %12055 = vmatpush3.bf16.msra.mxu1 %v13639_v31  ;;  %11976 = vmatprep.subr.bf16.mxu0 %v13640_v32  ;;  %v13703_v31 = vld [vmem:[%s16931_s1 + $0x10] sm:$0xff]  }
  0xb6   : > { %12056 = vmatprep.subr.bf16.mxu1 %v13641_v33 }
  0xb7   : > { %11969 = vmatmul.mubr.msk.bf16.gmra.mrb[4].mxu0 %vm658_vm0, %v13626_v18  ;;  %v13690_v18 = vld [vmem:[%s16931_s1 + $0x38] sm:$0xff]  }
  0xb8   : > { %12049 = vmatmul.mubr.msk.bf16.gmra.mrb[4].mxu1 %vm658_vm0, %v13627_v19  ;;  %11977 = vmatpush3.bf16.msra.mxu0 %v13640_v32  ;;  %v13691_v19 = vld [vmem:[%s16931_s1 + $0x38] sm:$0xff]   ;;  %v13705_v32 = vld [vmem:[%s16931_s1 + $0x10] sm:$0xff]  }
  0xb9   : > { %12057 = vmatpush3.bf16.msra.mxu1 %v13641_v33  ;;  %11978 = vmatprep.subr.bf16.mxu0 %v13642_v34  ;;  %v13704_v33 = vld [vmem:[%s14132_s13 + $0x80] sm:$0xff]  }
  0xba   : > { %12058 = vmatprep.subr.bf16.mxu1 %v13643_v35  ;;  %11980 = vmatprep.mubr.msk.bf16.mxu0 %vm658_vm0, %v13644_v36  ;;  %v13708_v36 = vld [vmem:[%s14132_s13 + $0x40] sm:$0xff]  }
  0xbb   : > { %12060 = vmatprep.mubr.msk.bf16.mxu1 %vm658_vm0, %v13645_v37  ;;  %v13709_v37 = vld [vmem:[%s14132_s13 + $0x60] sm:$0xff]  }
  0xbc   : > { %11979 = vmatpush3.bf16.msra.mxu0 %v13642_v34  ;;  %v13706_v34 = vld [vmem:[%s16931_s1 + $0x18] sm:$0xff]  }
  0xbd   : > { %12059 = vmatpush3.bf16.msra.mxu1 %v13643_v35  ;;  %11988 = vmatprep.subr.bf16.mxu0 %v13647_v39  ;;  %v13707_v35 = vld [vmem:[%s16931_s1 + $0x18] sm:$0xff]  }
  0xbe   : > { %12068 = vmatprep.subr.bf16.mxu1 %v13649_v40 }
  0xbf   : > { %11981 = vmatmul.mubr.msk.bf16.vlgmr.msra.gmra.mrb[0].mxu0 %vm658_vm0, %v13646_v38  ;;  %v13710_v38 = vld [vmem:[%s16931_s1 + $0x40] sm:$0xff]  }
  0xc0   : > { %12061 = vmatmul.mubr.msk.bf16.vlgmr.msra.gmra.mrb[0].mxu1 %vm658_vm0, %v13648_v41  ;;  %11989 = vmatpush3.bf16.msra.mxu0 %v13647_v39  ;;  %v13711_v39 = vld [vmem:[%s16931_s1 + $0x40] sm:$0xff]   ;;  %v13713_v41 = vld [vmem:[%s16931_s1 + $0x48] sm:$0xff]  }
  0xc1   : > { %12069 = vmatpush3.bf16.msra.mxu1 %v13649_v40  ;;  %11990 = vmatprep.subr.bf16.mxu0 %v13650_v42  ;;  %v13712_v40 = vld [vmem:[%s16931_s1 + $0x48] sm:$0xff]  }
  0xc2   : > { %12070 = vmatprep.subr.bf16.mxu1 %v13651_v43  ;;  %11984 = vmatprep.mubr.msk.bf16.mxu0 %vm658_vm0, %v13652_v44  ;;  %v13716_v44 = vld [vmem:[%s16931_s1 + $0x58] sm:$0xff]  }
  0xc3   : > { %12064 = vmatprep.mubr.msk.bf16.mxu1 %vm658_vm0, %v13653_v45  ;;  %v13717_v45 = vld [vmem:[%s16931_s1 + $0x58] sm:$0xff]  }
  0xc4   : > { %11991 = vmatpush3.bf16.msra.mxu0 %v13650_v42  ;;  %v13714_v42 = vld [vmem:[%s16931_s1 + $0x50] sm:$0xff]  }
  0xc5   : > { %12071 = vmatpush3.bf16.msra.mxu1 %v13651_v43  ;;  %11992 = vmatprep.subr.bf16.mxu0 %v13655_v47  ;;  %v13715_v43 = vld [vmem:[%s16931_s1 + $0x50] sm:$0xff]  }
  0xc6   : > { %12072 = vmatprep.subr.bf16.mxu1 %v13657_v48 }
  0xc7   : > { %11985 = vmatmul.mubr.msk.bf16.gmra.mrb[4].mxu0 %vm658_vm0, %v13654_v46  ;;  %v13718_v46 = vld [vmem:[%s14132_s13 + $0x50] sm:$0xff]  }
  0xc8   : > { %12065 = vmatmul.mubr.msk.bf16.gmra.mrb[4].mxu1 %vm658_vm0, %v13656_v49  ;;  %11993 = vmatpush3.bf16.msra.mxu0 %v13655_v47  ;;  %v13719_v47 = vld [vmem:[%s14132_s13 + $0x70] sm:$0xff]   ;;  %v13721_v49 = vld [vmem:[%s16931_s1 + $0x60] sm:$0xff]  }
  0xc9   : > { %12073 = vmatpush3.bf16.msra.mxu1 %v13657_v48  ;;  %11994 = vmatprep.subr.bf16.mxu0 %v13658_v50  ;;  %v13720_v48 = vld [vmem:[%s14132_s13 + $0x58] sm:$0xff]  }
  0xca   : > { %12074 = vmatprep.subr.bf16.mxu1 %v13659_v51  ;;  %11996 = vmatprep.mubr.msk.bf16.mxu0 %vm658_vm0, %v13660_v52  ;;  %v13724_v52 = vld [vmem:[%s16931_s1 + $0x68] sm:$0xff]  }
  0xcb   : > { %12076 = vmatprep.mubr.msk.bf16.mxu1 %vm658_vm0, %v13661_v53  ;;  %v13725_v53 = vld [vmem:[%s16931_s1 + $0x68] sm:$0xff]  }
  0xcc   : > { %11995 = vmatpush3.bf16.msra.mxu0 %v13658_v50  ;;  %v13723_v50 = vld [vmem:[%s16931_s1 + $0x60] sm:$0xff]  }
  0xcd   : > { %12075 = vmatpush3.bf16.msra.mxu1 %v13659_v51  ;;  %12004 = vmatprep.subr.bf16.mxu0 %v13663_v55  ;;  %v13722_v51 = vld [vmem:[%s14132_s13 + $0x78] sm:$0xff]  }
  0xce   : > { %12084 = vmatprep.subr.bf16.mxu1 %v13665_v56 }
  0xcf   : > { %11997 = vmatmul.mubr.msk.bf16.vlgmr.msra.gmra.mrb[0].mxu0 %vm658_vm0, %v13662_v54  ;;  %v13726_v54 = vld [vmem:[%s14132_s13 + $0x60] sm:$0xff]  }
  0xd0   : > { %12077 = vmatmul.mubr.msk.bf16.vlgmr.msra.gmra.mrb[0].mxu1 %vm658_vm0, %v13664_v57  ;;  %12005 = vmatpush3.bf16.msra.mxu0 %v13663_v55  ;;  %v13727_v55 = vld [vmem:[%s14132_s13 + $0x80] sm:$0xff]   ;;  %v13729_v57 = vld [vmem:[%s16931_s1 + $0x70] sm:$0xff]  }
  0xd1   : > { %12085 = vmatpush3.bf16.msra.mxu1 %v13665_v56  ;;  %12006 = vmatprep.subr.bf16.mxu0 %v13666_v58  ;;  %v13728_v56 = vld [vmem:[%s14132_s13 + $0x68] sm:$0xff]  }
  0xd2   : > { %12086 = vmatprep.subr.bf16.mxu1 %v13667_v59  ;;  %12000 = vmatprep.mubr.msk.bf16.mxu0 %vm658_vm0, %v13668_v60  ;;  %v13732_v60 = vld [vmem:[%s16931_s1 + $0x78] sm:$0xff]  }
  0xd3   : > { %12080 = vmatprep.mubr.msk.bf16.mxu1 %vm658_vm0, %v13669_v61  ;;  %v13733_v61 = vld [vmem:[%s16931_s1 + $0x78] sm:$0xff]  }
  0xd4   : > { %12007 = vmatpush3.bf16.msra.mxu0 %v13666_v58  ;;  %v13731_v58 = vld [vmem:[%s16931_s1 + $0x70] sm:$0xff]  }
  0xd5   : > { %12087 = vmatpush3.bf16.msra.mxu1 %v13667_v59  ;;  %12008 = vmatprep.subr.bf16.mxu0 %v13671_v63  ;;  %v13730_v59 = vld [vmem:[%s14132_s13 + $0x88] sm:$0xff]  }
  0xd6   : > { %12088 = vmatprep.subr.bf16.mxu1 %v13673_v0 }
  0xd7   : > { %12001 = vmatmul.mubr.msk.bf16.gmra.mrb[4].mxu0 %vm658_vm0, %v13670_v62  ;;  %v13734_v62 = vld [vmem:[%s14132_s13 + $0x58] sm:$0xff]  }
  0xd8   : > { %12081 = vmatmul.mubr.msk.bf16.gmra.mrb[4].mxu1 %vm658_vm0, %v13672_v1  ;;  %12009 = vmatpush3.bf16.msra.mxu0 %v13671_v63  ;;  %v13735_v63 = vld [vmem:[%s14132_s13 + $0x78] sm:$0xff]   ;;  %v13737_v1 = vld [vmem:[%s16931_s1 + $0x80] sm:$0xff]  }
  0xd9   : > { %12089 = vmatpush3.bf16.msra.mxu1 %v13673_v0  ;;  %12010 = vmatprep.subr.bf16.mxu0 %v13674_v2  ;;  %v13736_v0 = vld [vmem:[%s14132_s13 + $0x60] sm:$0xff]  }
  0xda   : > { %12090 = vmatprep.subr.bf16.mxu1 %v13675_v3  ;;  %12012 = vmatprep.mubr.msk.bf16.mxu0 %vm658_vm0, %v13676_v4  ;;  %v13740_v4 = vld [vmem:[%s16931_s1 + $0x88] sm:$0xff]  }
  0xdb   : > { %12092 = vmatprep.mubr.msk.bf16.mxu1 %vm658_vm0, %v13677_v5  ;;  %v13741_v5 = vld [vmem:[%s16931_s1 + $0x88] sm:$0xff]  }
  0xdc   : > { %12011 = vmatpush3.bf16.msra.mxu0 %v13674_v2  ;;  %v13739_v2 = vld [vmem:[%s16931_s1 + $0x80] sm:$0xff]  }
  0xdd   : > { %12091 = vmatpush3.bf16.msra.mxu1 %v13675_v3  ;;  %12100 = vmatprep.subr.bf16.mxu0 %v13680_v7  ;;  %v13738_v3 = vld [vmem:[%s14132_s13 + $0x80] sm:$0xff]  }
  0xde   : > { %12180 = vmatprep.subr.bf16.mxu1 %v13681_v8 }
  0xdf   : > { %12013 = vmatmul.mubr.msk.bf16.vlgmr.msra.gmra.mrb[0].mxu0 %vm658_vm0, %v13678_v6  ;;  %v13742_v6 = vld [vmem:[%s14132_s13 + $0x68] sm:$0xff]  }
  0xe0   : > { %12093 = vmatmul.mubr.msk.bf16.vlgmr.msra.gmra.mrb[0].mxu1 %vm658_vm0, %v13679_v9  ;;  %12101 = vmatpush3.bf16.msra.mxu0 %v13680_v7  ;;  %v13743_v7 = vld [vmem:[%s14132_s13 + $0x88] sm:$0xff]   ;;  %v13745_v9 = vld [vmem:[%s16931_s1 + $0x90] sm:$0xff]  }
  0xe1   : > { %12181 = vmatpush3.bf16.msra.mxu1 %v13681_v8  ;;  %12102 = vmatprep.subr.bf16.mxu0 %v13682_v10  ;;  %v13744_v8 = vld [vmem:[%s14132_s13 + $0x70] sm:$0xff]  }
  0xe2   : > { %12182 = vmatprep.subr.bf16.mxu1 %v13683_v11  ;;  %12016 = vmatprep.mubr.msk.bf16.mxu0 %vm658_vm0, %v13684_v12  ;;  %v13748_v12 = vld [vmem:[%s16931_s1 + $0x98] sm:$0xff]  }
  0xe3   : > { %12096 = vmatprep.mubr.msk.bf16.mxu1 %vm658_vm0, %v13685_v13  ;;  %v13749_v13 = vld [vmem:[%s16931_s1 + $0x98] sm:$0xff]  }
  0xe4   : > { %12103 = vmatpush3.bf16.msra.mxu0 %v13682_v10  ;;  %v13747_v10 = vld [vmem:[%s16931_s1 + $0x90] sm:$0xff]  }
  0xe5   : > { %12183 = vmatpush3.bf16.msra.mxu1 %v13683_v11  ;;  %12104 = vmatprep.subr.bf16.mxu0 %v13688_v15  ;;  %v13746_v11 = vld [vmem:[%s14132_s13 + $0x90] sm:$0xff]  }
  0xe6   : > { %12184 = vmatprep.subr.bf16.mxu1 %v13689_v16 }
  0xe7   : > { %12017 = vmatmul.mubr.msk.bf16.gmra.mrb[4].mxu0 %vm658_vm0, %v13686_v14  ;;  %v13750_v14 = vld [vmem:[%s14132_s13 + $0x60] sm:$0xff]  }
  0xe8   : > { %12097 = vmatmul.mubr.msk.bf16.gmra.mrb[4].mxu1 %vm658_vm0, %v13687_v17  ;;  %12105 = vmatpush3.bf16.msra.mxu0 %v13688_v15  ;;  %v13751_v15 = vld [vmem:[%s14132_s13 + $0x80] sm:$0xff]  }
  0xe9   : > { %12185 = vmatpush3.bf16.msra.mxu1 %v13689_v16  ;;  %12106 = vmatprep.subr.bf16.mxu0 %v13690_v18  ;;  %v13752_v16 = vld [vmem:[%s14132_s13 + $0x68] sm:$0xff]   ;;  %v13754_v17 = vld [vmem:[%s16931_s1 + $0x20] sm:$0xff]  }
  0xea   : > { %12186 = vmatprep.subr.bf16.mxu1 %v13691_v19  ;;  %12108 = vmatprep.mubr.msk.bf16.mxu0 %vm658_vm0, %v13692_v20 }
  0xeb   : > { %12188 = vmatprep.mubr.msk.bf16.mxu1 %vm658_vm0, %v13693_v21 }
  0xec   : > { %12107 = vmatpush3.bf16.msra.mxu0 %v13690_v18  ;;  %v13755_v18 = vld [vmem:[%s16931_s1 + $0x20] sm:$0xff]  }
  0xed   : > { %12187 = vmatpush3.bf16.msra.mxu1 %v13691_v19  ;;  %12116 = vmatprep.subr.bf16.mxu0 %v13695_v23  ;;  %v13753_v19 = vld [vmem:[%s14132_s13 + $0x88] sm:$0xff]  }
  0xee   : > { %12196 = vmatprep.subr.bf16.mxu1 %v13697_v24 }
  0xef   : > { %12109 = vmatmul.mubr.msk.bf16.vlgmr.msra.gmra.mrb[8].mxu0 %vm658_vm0, %v13694_v22 }
  0xf0   : > { %12189 = vmatmul.mubr.msk.bf16.vlgmr.msra.gmra.mrb[8].mxu1 %vm658_vm0, %v13696_v25  ;;  %12117 = vmatpush3.bf16.msra.mxu0 %v13695_v23  ;;  %v13759_v23 = vld [vmem:[%s14132_s13 + $0x90] sm:$0xff]  }
  0xf1   : > { %12197 = vmatpush3.bf16.msra.mxu1 %v13697_v24  ;;  %12118 = vmatprep.subr.bf16.mxu0 %v13698_v26  ;;  %v13760_v24 = vld [vmem:[%s14132_s13 + $0x78] sm:$0xff]  }
  0xf2   : > { %12198 = vmatprep.subr.bf16.mxu1 %v13699_v27  ;;  %12112 = vmatprep.mubr.msk.bf16.mxu0 %vm658_vm0, %v13700_v28 }
  0xf3   : > { %12192 = vmatprep.mubr.msk.bf16.mxu1 %vm658_vm0, %v13701_v29 }
  0xf4   : > { %12119 = vmatpush3.bf16.msra.mxu0 %v13698_v26  ;;  %v13763_v26 = vld [vmem:[%s16931_s1 + $0x30] sm:$0xff]  }
  0xf5   : > { %12199 = vmatpush3.bf16.msra.mxu1 %v13699_v27  ;;  %12120 = vmatprep.subr.bf16.mxu0 %v13703_v31  ;;  %v13761_v27 = vld [vmem:[%s14132_s13 + $0x98] sm:$0xff]  }
  0xf6   : > { %12200 = vmatprep.subr.bf16.mxu1 %v13705_v32 }
  0xf7   : > { %12113 = vmatmul.mubr.msk.bf16.gmra.mrb[12].mxu0 %vm658_vm0, %v13702_v30  ;;  %v13766_v30 = vld [vmem:[%s14132_s13 + $0x88] sm:$0xff]  }
  0xf8   : > { %12193 = vmatmul.mubr.msk.bf16.gmra.mrb[12].mxu1 %vm658_vm0, %v13704_v33  ;;  %12121 = vmatpush3.bf16.msra.mxu0 %v13703_v31  ;;  %v13767_v31 = vld [vmem:[%s14132_s13 + $0xa8] sm:$0xff]   ;;  %v13769_v33 = vld [vmem:[%s16931_s1] sm:$0xff]  }
  0xf9   : > { %12201 = vmatpush3.bf16.msra.mxu1 %v13705_v32  ;;  %12122 = vmatprep.subr.bf16.mxu0 %v13706_v34  ;;  %v13768_v32 = vld [vmem:[%s14132_s13 + $0x90] sm:$0xff]  }
  0xfa   : > { %12202 = vmatprep.subr.bf16.mxu1 %v13707_v35  ;;  %12124 = vmatprep.mubr.msk.bf16.mxu0 %vm658_vm0, %v13708_v36  ;;  %v13772_v36 = vld [vmem:[%s16931_s1 + $0x8] sm:$0xff]  }
  0xfb   : > { %12204 = vmatprep.mubr.msk.bf16.mxu1 %vm658_vm0, %v13709_v37  ;;  %v13773_v37 = vld [vmem:[%s16931_s1 + $0x8] sm:$0xff]  }
  0xfc   : > { %12123 = vmatpush3.bf16.msra.mxu0 %v13706_v34  ;;  %v13771_v34 = vld [vmem:[%s16931_s1] sm:$0xff]  }
  0xfd   : > { %12203 = vmatpush3.bf16.msra.mxu1 %v13707_v35  ;;  %12132 = vmatprep.subr.bf16.mxu0 %v13710_v38  ;;  %v13770_v35 = vld [vmem:[%s14132_s13 + $0xb0] sm:$0xff]  }
  0xfe   : > { %12212 = vmatprep.subr.bf16.mxu1 %v13711_v39 }
  0xff   : > { %12125 = vmatmul.mubr.msk.bf16.vlgmr.msra.gmra.mrb[8].mxu0 %vm658_vm0, %v13692_v20  ;;  %v13756_v20 = vld [vmem:[%s16931_s1 + $0x28] sm:$0xff]  }
 0x100   : > { %12205 = vmatmul.mubr.msk.bf16.vlgmr.msra.gmra.mrb[8].mxu1 %vm658_vm0, %v13693_v21  ;;  %12133 = vmatpush3.bf16.msra.mxu0 %v13710_v38  ;;  %v13757_v21 = vld [vmem:[%s16931_s1 + $0x28] sm:$0xff]   ;;  %v13774_v38 = vld [vmem:[%s14132_s13 + $0x98] sm:$0xff]  }
 0x101   : > { %12213 = vmatpush3.bf16.msra.mxu1 %v13711_v39  ;;  %12134 = vmatprep.subr.bf16.mxu0 %v13712_v40  ;;  %v13775_v39 = vld [vmem:[%s14132_s13 + $0xb8] sm:$0xff]  }
 0x102   : > { %12214 = vmatprep.subr.bf16.mxu1 %v13713_v41  ;;  %12128 = vmatprep.mubr.msk.bf16.mxu0 %vm658_vm0, %v13694_v22  ;;  %v13758_v22 = vld [vmem:[%s14132_s13 + $0x70] sm:$0xff]  }
 0x103   : > { %12208 = vmatprep.mubr.msk.bf16.mxu1 %vm658_vm0, %v13696_v25  ;;  %v13762_v25 = vld [vmem:[%s16931_s1 + $0x30] sm:$0xff]  }
 0x104   : > { %12135 = vmatpush3.bf16.msra.mxu0 %v13712_v40  ;;  %v13776_v40 = vld [vmem:[%s14132_s13 + $0xa0] sm:$0xff]  }
 0x105   : > { %12215 = vmatpush3.bf16.msra.mxu1 %v13713_v41  ;;  %12136 = vmatprep.subr.bf16.mxu0 %v13714_v42  ;;  %v13777_v41 = vld [vmem:[%s16931_s1 + $0x10] sm:$0xff]  }
 0x106   : > { %12216 = vmatprep.subr.bf16.mxu1 %v13715_v43 }
 0x107   : > { %12129 = vmatmul.mubr.msk.bf16.gmra.mrb[12].mxu0 %vm658_vm0, %v13700_v28  ;;  %v13764_v28 = vld [vmem:[%s16931_s1 + $0x38] sm:$0xff]  }
 0x108   : > { %12209 = vmatmul.mubr.msk.bf16.gmra.mrb[12].mxu1 %vm658_vm0, %v13701_v29  ;;  %12137 = vmatpush3.bf16.msra.mxu0 %v13714_v42  ;;  %v13765_v29 = vld [vmem:[%s16931_s1 + $0x38] sm:$0xff]   ;;  %v13779_v42 = vld [vmem:[%s16931_s1 + $0x10] sm:$0xff]  }
 0x109   : > { %12217 = vmatpush3.bf16.msra.mxu1 %v13715_v43  ;;  %12138 = vmatprep.subr.bf16.mxu0 %v13716_v44  ;;  %v13778_v43 = vld [vmem:[%s14132_s13 + $0xc0] sm:$0xff]  }
 0x10a   : > { %12218 = vmatprep.subr.bf16.mxu1 %v13717_v45  ;;  %12140 = vmatprep.mubr.msk.bf16.mxu0 %vm658_vm0, %v13718_v46  ;;  %v13782_v46 = vld [vmem:[%s14132_s13 + $0x80] sm:$0xff]  }
 0x10b   : > { %12220 = vmatprep.mubr.msk.bf16.mxu1 %vm658_vm0, %v13719_v47  ;;  %v13783_v47 = vld [vmem:[%s14132_s13 + $0xa0] sm:$0xff]  }
 0x10c   : > { %12139 = vmatpush3.bf16.msra.mxu0 %v13716_v44  ;;  %v13780_v44 = vld [vmem:[%s16931_s1 + $0x18] sm:$0xff]  }
 0x10d   : > { %12219 = vmatpush3.bf16.msra.mxu1 %v13717_v45  ;;  %12148 = vmatprep.subr.bf16.mxu0 %v13721_v49  ;;  %v13781_v45 = vld [vmem:[%s16931_s1 + $0x18] sm:$0xff]  }
 0x10e   : > { %12228 = vmatprep.subr.bf16.mxu1 %v13723_v50 }
 0x10f   : > { %12141 = vmatmul.mubr.msk.bf16.vlgmr.msra.gmra.mrb[8].mxu0 %vm658_vm0, %v13720_v48  ;;  %v13784_v48 = vld [vmem:[%s16931_s1 + $0x40] sm:$0xff]  }
 0x110   : > { %12221 = vmatmul.mubr.msk.bf16.vlgmr.msra.gmra.mrb[8].mxu1 %vm658_vm0, %v13722_v51  ;;  %12149 = vmatpush3.bf16.msra.mxu0 %v13721_v49  ;;  %v13785_v49 = vld [vmem:[%s16931_s1 + $0x40] sm:$0xff]   ;;  %v13787_v51 = vld [vmem:[%s16931_s1 + $0x48] sm:$0xff]  }
 0x111   : > { %12229 = vmatpush3.bf16.msra.mxu1 %v13723_v50  ;;  %12150 = vmatprep.subr.bf16.mxu0 %v13724_v52  ;;  %v13786_v50 = vld [vmem:[%s16931_s1 + $0x48] sm:$0xff]  }
 0x112   : > { %12230 = vmatprep.subr.bf16.mxu1 %v13725_v53  ;;  %12144 = vmatprep.mubr.msk.bf16.mxu0 %vm658_vm0, %v13726_v54  ;;  %v13790_v54 = vld [vmem:[%s16931_s1 + $0x58] sm:$0xff]  }
 0x113   : > { %12224 = vmatprep.mubr.msk.bf16.mxu1 %vm658_vm0, %v13727_v55  ;;  %v13791_v55 = vld [vmem:[%s16931_s1 + $0x58] sm:$0xff]  }
 0x114   : > { %12151 = vmatpush3.bf16.msra.mxu0 %v13724_v52  ;;  %v13788_v52 = vld [vmem:[%s16931_s1 + $0x50] sm:$0xff]  }
 0x115   : > { %12231 = vmatpush3.bf16.msra.mxu1 %v13725_v53  ;;  %12152 = vmatprep.subr.bf16.mxu0 %v13729_v57  ;;  %v13789_v53 = vld [vmem:[%s16931_s1 + $0x50] sm:$0xff]  }
 0x116   : > { %12232 = vmatprep.subr.bf16.mxu1 %v13731_v58 }
 0x117   : > { %12145 = vmatmul.mubr.msk.bf16.gmra.mrb[12].mxu0 %vm658_vm0, %v13728_v56  ;;  %v13792_v56 = vld [vmem:[%s14132_s13 + $0x90] sm:$0xff]  }
 0x118   : > { %12225 = vmatmul.mubr.msk.bf16.gmra.mrb[12].mxu1 %vm658_vm0, %v13730_v59  ;;  %12153 = vmatpush3.bf16.msra.mxu0 %v13729_v57  ;;  %v13793_v57 = vld [vmem:[%s14132_s13 + $0xb0] sm:$0xff]   ;;  %v13795_v59 = vld [vmem:[%s16931_s1 + $0x60] sm:$0xff]  }
 0x119   : > { %12233 = vmatpush3.bf16.msra.mxu1 %v13731_v58  ;;  %12154 = vmatprep.subr.bf16.mxu0 %v13732_v60  ;;  %v13794_v58 = vld [vmem:[%s14132_s13 + $0x98] sm:$0xff]  }
 0x11a   : > { %12234 = vmatprep.subr.bf16.mxu1 %v13733_v61  ;;  %12156 = vmatprep.mubr.msk.bf16.mxu0 %vm658_vm0, %v13734_v62  ;;  %v13798_v62 = vld [vmem:[%s16931_s1 + $0x68] sm:$0xff]  }
 0x11b   : > { %12236 = vmatprep.mubr.msk.bf16.mxu1 %vm658_vm0, %v13735_v63  ;;  %v13799_v63 = vld [vmem:[%s16931_s1 + $0x68] sm:$0xff]  }
 0x11c   : > { %12155 = vmatpush3.bf16.msra.mxu0 %v13732_v60  ;;  %v13797_v60 = vld [vmem:[%s16931_s1 + $0x60] sm:$0xff]  }
 0x11d   : > { %12235 = vmatpush3.bf16.msra.mxu1 %v13733_v61  ;;  %12164 = vmatprep.subr.bf16.mxu0 %v13737_v1  ;;  %v13796_v61 = vld [vmem:[%s14132_s13 + $0xb8] sm:$0xff]  }
 0x11e   : > { %12244 = vmatprep.subr.bf16.mxu1 %v13739_v2 }
 0x11f   : > { %12157 = vmatmul.mubr.msk.bf16.vlgmr.msra.gmra.mrb[8].mxu0 %vm658_vm0, %v13736_v0  ;;  %v13800_v0 = vld [vmem:[%s14132_s13 + $0xa0] sm:$0xff]  }
 0x120   : > { %12237 = vmatmul.mubr.msk.bf16.vlgmr.msra.gmra.mrb[8].mxu1 %vm658_vm0, %v13738_v3  ;;  %12165 = vmatpush3.bf16.msra.mxu0 %v13737_v1  ;;  %v13801_v1 = vld [vmem:[%s14132_s13 + $0xc0] sm:$0xff]   ;;  %v13803_v3 = vld [vmem:[%s16931_s1 + $0x70] sm:$0xff]  }
 0x121   : > { %12245 = vmatpush3.bf16.msra.mxu1 %v13739_v2  ;;  %12166 = vmatprep.subr.bf16.mxu0 %v13740_v4  ;;  %v13802_v2 = vld [vmem:[%s14132_s13 + $0xa8] sm:$0xff]  }
 0x122   : > { %12246 = vmatprep.subr.bf16.mxu1 %v13741_v5  ;;  %12160 = vmatprep.mubr.msk.bf16.mxu0 %vm658_vm0, %v13742_v6  ;;  %v13806_v6 = vld [vmem:[%s16931_s1 + $0x78] sm:$0xff]  }
 0x123   : > { %12240 = vmatprep.mubr.msk.bf16.mxu1 %vm658_vm0, %v13743_v7  ;;  %v13807_v7 = vld [vmem:[%s16931_s1 + $0x78] sm:$0xff]  }
 0x124   : > { %12167 = vmatpush3.bf16.msra.mxu0 %v13740_v4  ;;  %v13805_v4 = vld [vmem:[%s16931_s1 + $0x70] sm:$0xff]  }
 0x125   : > { %12247 = vmatpush3.bf16.msra.mxu1 %v13741_v5  ;;  %12168 = vmatprep.subr.bf16.mxu0 %v13745_v9  ;;  %v13804_v5 = vld [vmem:[%s14132_s13 + $0xc8] sm:$0xff]  }
 0x126   : > { %12248 = vmatprep.subr.bf16.mxu1 %v13747_v10 }
 0x127   : > { %12161 = vmatmul.mubr.msk.bf16.gmra.mrb[12].mxu0 %vm658_vm0, %v13744_v8  ;;  %v13808_v8 = vld [vmem:[%s14132_s13 + $0x98] sm:$0xff]  }
 0x128   : > { %12241 = vmatmul.mubr.msk.bf16.gmra.mrb[12].mxu1 %vm658_vm0, %v13746_v11  ;;  %12169 = vmatpush3.bf16.msra.mxu0 %v13745_v9  ;;  %v13809_v9 = vld [vmem:[%s14132_s13 + $0xb8] sm:$0xff]   ;;  %v13811_v11 = vld [vmem:[%s16931_s1 + $0x80] sm:$0xff]  }
 0x129   : > { %12249 = vmatpush3.bf16.msra.mxu1 %v13747_v10  ;;  %12170 = vmatprep.subr.bf16.mxu0 %v13748_v12  ;;  %v13810_v10 = vld [vmem:[%s14132_s13 + $0xa0] sm:$0xff]  }
 0x12a   : > { %12250 = vmatprep.subr.bf16.mxu1 %v13749_v13  ;;  %12172 = vmatprep.mubr.msk.bf16.mxu0 %vm658_vm0, %v13750_v14  ;;  %v13814_v14 = vld [vmem:[%s16931_s1 + $0x88] sm:$0xff]  }
 0x12b   : > { %12252 = vmatprep.mubr.msk.bf16.mxu1 %vm658_vm0, %v13751_v15  ;;  %v13815_v15 = vld [vmem:[%s16931_s1 + $0x88] sm:$0xff]  }
 0x12c   : > { %12171 = vmatpush3.bf16.msra.mxu0 %v13748_v12  ;;  %v13813_v12 = vld [vmem:[%s16931_s1 + $0x80] sm:$0xff]  }
 0x12d   : > { %12251 = vmatpush3.bf16.msra.mxu1 %v13749_v13  ;;  %12260 = vmatprep.subr.bf16.mxu0 %v13754_v17  ;;  %v13812_v13 = vld [vmem:[%s14132_s13 + $0xc0] sm:$0xff]  }
 0x12e   : > { %12340 = vmatprep.subr.bf16.mxu1 %v13755_v18 }
 0x12f   : > { %12173 = vmatmul.mubr.msk.bf16.vlgmr.msra.gmra.mrb[8].mxu0 %vm658_vm0, %v13752_v16  ;;  %v13816_v16 = vld [vmem:[%s14132_s13 + $0xa8] sm:$0xff]  }
 0x130   : > { %12253 = vmatmul.mubr.msk.bf16.vlgmr.msra.gmra.mrb[8].mxu1 %vm658_vm0, %v13753_v19  ;;  %12261 = vmatpush3.bf16.msra.mxu0 %v13754_v17  ;;  %v13817_v17 = vld [vmem:[%s14132_s13 + $0xc8] sm:$0xff]   ;;  %v13819_v19 = vld [vmem:[%s16931_s1 + $0x90] sm:$0xff]  }
 0x131   : > { %12341 = vmatpush3.bf16.msra.mxu1 %v13755_v18  ;;  %12262 = vmatprep.subr.bf16.mxu0 %v13756_v20  ;;  %v13818_v18 = vld [vmem:[%s14132_s13 + $0xb0] sm:$0xff]  }
 0x132   : > { %12342 = vmatprep.subr.bf16.mxu1 %v13757_v21  ;;  %12176 = vmatprep.mubr.msk.bf16.mxu0 %vm658_vm0, %v13758_v22  ;;  %v13822_v22 = vld [vmem:[%s16931_s1 + $0x98] sm:$0xff]  }
 0x133   : > { %12256 = vmatprep.mubr.msk.bf16.mxu1 %vm658_vm0, %v13759_v23  ;;  %v13823_v23 = vld [vmem:[%s16931_s1 + $0x98] sm:$0xff]  }
 0x134   : > { %12263 = vmatpush3.bf16.msra.mxu0 %v13756_v20  ;;  %v13821_v20 = vld [vmem:[%s16931_s1 + $0x90] sm:$0xff]  }
 0x135   : > { %12343 = vmatpush3.bf16.msra.mxu1 %v13757_v21  ;;  %12264 = vmatprep.subr.bf16.mxu0 %v13762_v25  ;;  %v13820_v21 = vld [vmem:[%s14132_s13 + $0xd0] sm:$0xff]  }
 0x136   : > { %12344 = vmatprep.subr.bf16.mxu1 %v13763_v26 }
 0x137   : > { %12177 = vmatmul.mubr.msk.bf16.gmra.mrb[12].mxu0 %vm658_vm0, %v13760_v24  ;;  %v13824_v24 = vld [vmem:[%s14132_s13 + $0xa0] sm:$0xff]  }
 0x138   : > { %12257 = vmatmul.mubr.msk.bf16.gmra.mrb[12].mxu1 %vm658_vm0, %v13761_v27  ;;  %12265 = vmatpush3.bf16.msra.mxu0 %v13762_v25  ;;  %v13825_v25 = vld [vmem:[%s14132_s13 + $0xc0] sm:$0xff]   ;;  %v13826_v27 = vld [vmem:[%s14132_s13 + $0xa8] sm:$0xff]  }
 0x139   : > { %12345 = vmatpush3.bf16.msra.mxu1 %v13763_v26  ;;  %12266 = vmatprep.subr.bf16.mxu0 %v13764_v28  ;;  %v13828_v26 = vld [vmem:[%s16931_s1 + $0x20] sm:$0xff]  }
 0x13a   : > { %12346 = vmatprep.subr.bf16.mxu1 %v13765_v29  ;;  %12268 = vmatprep.mubr.msk.bf16.mxu0 %vm658_vm0, %v13766_v30 }
 0x13b   : > { %12348 = vmatprep.mubr.msk.bf16.mxu1 %vm658_vm0, %v13767_v31 }
 0x13c   : > { %12267 = vmatpush3.bf16.msra.mxu0 %v13764_v28  ;;  %v13827_v28 = vld [vmem:[%s14132_s13 + $0xc8] sm:$0xff]  }
 0x13d   : > { %12347 = vmatpush3.bf16.msra.mxu1 %v13765_v29  ;;  %12276 = vmatprep.subr.bf16.mxu0 %v13769_v33  ;;  %v13829_v29 = vld [vmem:[%s16931_s1 + $0x28] sm:$0xff]  }
 0x13e   : > { %12356 = vmatprep.subr.bf16.mxu1 %v13771_v34 }
 0x13f   : > { %12269 = vmatmul.mubr.msk.bf16.vlgmr.msra.gmra.mrb[16].mxu0 %vm658_vm0, %v13768_v32 }
 0x140   : > { %12349 = vmatmul.mubr.msk.bf16.vlgmr.msra.gmra.mrb[16].mxu1 %vm658_vm0, %v13770_v35  ;;  %12277 = vmatpush3.bf16.msra.mxu0 %v13769_v33  ;;  %v13834_v33 = vld [vmem:[%s16931_s1 + $0x30] sm:$0xff]  }
 0x141   : > { %12357 = vmatpush3.bf16.msra.mxu1 %v13771_v34  ;;  %12278 = vmatprep.subr.bf16.mxu0 %v13772_v36  ;;  %v13832_v34 = vld [vmem:[%s14132_s13 + $0xb8] sm:$0xff]  }
 0x142   : > { %12358 = vmatprep.subr.bf16.mxu1 %v13773_v37  ;;  %12272 = vmatprep.mubr.msk.bf16.mxu0 %vm658_vm0, %v13774_v38 }
 0x143   : > { %12352 = vmatprep.mubr.msk.bf16.mxu1 %vm658_vm0, %v13775_v39 }
 0x144   : > { %12279 = vmatpush3.bf16.msra.mxu0 %v13772_v36  ;;  %v13833_v36 = vld [vmem:[%s14132_s13 + $0xd8] sm:$0xff]  }
 0x145   : > { %12359 = vmatpush3.bf16.msra.mxu1 %v13773_v37  ;;  %12280 = vmatprep.subr.bf16.mxu0 %v13777_v41  ;;  %v13835_v37 = vld [vmem:[%s16931_s1 + $0x38] sm:$0xff]  }
 0x146   : > { %12360 = vmatprep.subr.bf16.mxu1 %v13779_v42 }
 0x147   : > { %12273 = vmatmul.mubr.msk.bf16.gmra.mrb[20].mxu0 %vm658_vm0, %v13776_v40  ;;  %v14944_v40 = vld [vmem:[%s14132_s13 + $0xd0] sm:$0xff]  }
 0x148   : > { %12353 = vmatmul.mubr.msk.bf16.gmra.mrb[20].mxu1 %vm658_vm0, %v13778_v43  ;;  %12281 = vmatpush3.bf16.msra.mxu0 %v13777_v41  ;;  %v14947_v41 = vld [vmem:[%s14132_s13 + $0xd8] sm:$0xff]   ;;  %v13839_v43 = vld [vmem:[%s16931_s1 + $0x8] sm:$0xff]  }
 0x149   : > { %12361 = vmatpush3.bf16.msra.mxu1 %v13779_v42  ;;  %12282 = vmatprep.subr.bf16.mxu0 %v13780_v44  ;;  %v1289_v42 = vld [vmem:[#allocation3 + $0x8] sm:$0xff] }
 0x14a   : > { %12362 = vmatprep.subr.bf16.mxu1 %v13781_v45  ;;  %12284 = vmatprep.mubr.msk.bf16.mxu0 %vm658_vm0, %v13782_v46  ;;  %v1288_v46 = vld [vmem:[#allocation3] sm:$0xff] }
 0x14b   : > { %12364 = vmatprep.mubr.msk.bf16.mxu1 %vm658_vm0, %v13783_v47  ;;  %v2116_v47 = vld [vmem:[#allocation3 + $0x28] sm:$0xff] }
 0x14c   : > { %12283 = vmatpush3.bf16.msra.mxu0 %v13780_v44  ;;  %v13857_v44 = vld [vmem:[%s16932_s2 + $0x48] sm:$0xff]  }
 0x14d   : > { %12363 = vmatpush3.bf16.msra.mxu1 %v13781_v45  ;;  %12292 = vmatprep.subr.bf16.mxu0 %v13784_v48  ;;  %v1294_v45 = vunpack.c.l.bf16 %v1289_v42 }
 0x14e   : > { %12372 = vmatprep.subr.bf16.mxu1 %v13785_v49 }
 0x14f   : > { %12285 = vmatmul.mubr.msk.bf16.vlgmr.msra.gmra.mrb[16].mxu0 %vm658_vm0, %v13766_v30  ;;  %v13830_v30 = vld [vmem:[%s14132_s13 + $0xb0] sm:$0xff]  }
 0x150   : > { %12365 = vmatmul.mubr.msk.bf16.vlgmr.msra.gmra.mrb[16].mxu1 %vm658_vm0, %v13767_v31  ;;  %12293 = vmatpush3.bf16.msra.mxu0 %v13784_v48  ;;  %v13831_v31 = vld [vmem:[%s14132_s13 + $0xd0] sm:$0xff]  }
 0x151   : > { %12373 = vmatpush3.bf16.msra.mxu1 %v13785_v49  ;;  %12294 = vmatprep.subr.bf16.mxu0 %v13786_v50  ;;  %v13842_v48 = vld [vmem:[%s16931_s1 + $0x10] sm:$0xff]   ;;  %v2115_v49 = vld [vmem:[#allocation3 + $0x20] sm:$0xff] }
 0x152   : > { %12374 = vmatprep.subr.bf16.mxu1 %v13787_v51  ;;  %12288 = vmatprep.mubr.msk.bf16.mxu0 %vm658_vm0, %v13768_v32  ;;  %v16939_v32 = vmov 0.0  }
 0x153   : > { %12368 = vmatprep.mubr.msk.bf16.mxu1 %vm658_vm0, %v13770_v35  ;;  %v13853_v35 = vld [vmem:[%s16932_s2 + $0x40] sm:$0xff]  }
 0x154   : > { %12295 = vmatpush3.bf16.msra.mxu0 %v13786_v50  ;;  %v1295_v50 = vunpack.c.h.bf16 %v1289_v42  ;;  %v1281_v42 = vld [vmem:[#allocation2 + $0x1c8] sm:$0xff] }
 0x155   : > { %12375 = vmatpush3.bf16.msra.mxu1 %v13787_v51  ;;  %12296 = vmatprep.subr.bf16.mxu0 %v13788_v52  ;;  %v13841_v51 = vld [vmem:[%s14132_s13 + $0xe0] sm:$0xff]  }
 0x156   : > { %12376 = vmatprep.subr.bf16.mxu1 %v13789_v53 }
 0x157   : > { %12289 = vmatmul.mubr.msk.bf16.gmra.mrb[20].mxu0 %vm658_vm0, %v13774_v38  ;;  %v14931_v38 = vld [vmem:[%s14132_s13 + $0xc8] sm:$0xff]  }
 0x158   : > { %12369 = vmatmul.mubr.msk.bf16.gmra.mrb[20].mxu1 %vm658_vm0, %v13775_v39  ;;  %12297 = vmatpush3.bf16.msra.mxu0 %v13788_v52  ;;  %v13838_v39 = vld [vmem:[%s16931_s1] sm:$0xff]   ;;  %v1302_v52 = vsub.f32 1.0, %v1294_v45  ;;  %v2101_v45 = vld [vmem:[#allocation2 + $0x50] sm:$0xff] }
 0x159   : > { %12377 = vmatpush3.bf16.msra.mxu1 %v13789_v53  ;;  %12298 = vmatprep.subr.bf16.mxu0 %v13790_v54  ;;  %v1292_v53 = vunpack.c.l.bf16 %v1288_v46 }
 0x15a   : > { %12378 = vmatprep.subr.bf16.mxu1 %v13791_v55  ;;  %12300 = vmatprep.mubr.msk.bf16.mxu0 %vm658_vm0, %v13792_v56  ;;  %v13844_v56 = vld [vmem:[%s14132_s13 + $0xc0] sm:$0xff]  }
 0x15b   : > { %12380 = vmatprep.mubr.msk.bf16.mxu1 %vm658_vm0, %v13793_v57  ;;  %v2119_v57 = vunpack.c.l.bf16 %v2115_v49 }
 0x15c   : > { %12299 = vmatpush3.bf16.msra.mxu0 %v13790_v54  ;;  %v1293_v54 = vunpack.c.h.bf16 %v1288_v46  ;;  %v2109_v46 = vld [vmem:[#allocation2 + $0x210] sm:$0xff] }
 0x15d   : > { %12379 = vmatpush3.bf16.msra.mxu1 %v13791_v55  ;;  %12308 = vmatprep.subr.bf16.mxu0 %v13795_v59  ;;  %v2121_v55 = vunpack.c.l.bf16 %v2116_v47 }
 0x15e   : > { %12388 = vmatprep.subr.bf16.mxu1 %v13797_v60 }
 0x15f   : > { %12301 = vmatmul.mubr.msk.bf16.vlgmr.msra.gmra.mrb[16].mxu0 %vm658_vm0, %v13794_v58  ;;  %v2122_v58 = vunpack.c.h.bf16 %v2116_v47 }
 0x160   : > { %12381 = vmatmul.mubr.msk.bf16.vlgmr.msra.gmra.mrb[16].mxu1 %vm658_vm0, %v13796_v61  ;;  %12309 = vmatpush3.bf16.msra.mxu0 %v13795_v59  ;;  %v13843_v59 = vld [vmem:[%s16931_s1 + $0x18] sm:$0xff]   ;;  %v13845_v61 = vld [vmem:[%s16931_s1 + $0x40] sm:$0xff]  }
 0x161   : > { %12389 = vmatpush3.bf16.msra.mxu1 %v13797_v60  ;;  %12310 = vmatprep.subr.bf16.mxu0 %v13798_v62  ;;  %v1303_v60 = vsub.f32 1.0, %v1295_v50 }
 0x162   : > { %12390 = vmatprep.subr.bf16.mxu1 %v13799_v63  ;;  %12304 = vmatprep.mubr.msk.bf16.mxu0 %vm658_vm0, %v13800_v0  ;;  %v1301_v0 = vsub.f32 1.0, %v1293_v54  ;;  %v2110_v54 = vld [vmem:[#allocation2 + $0x218] sm:$0xff] }
 0x163   : > { %12384 = vmatprep.mubr.msk.bf16.mxu1 %vm658_vm0, %v13801_v1  ;;  %v2129_v1 = vsub.f32 1.0, %v2121_v55 }
 0x164   : > { %12311 = vmatpush3.bf16.msra.mxu0 %v13798_v62  ;;  %v1310_v62 = vmul.f32 0.25, %v1302_v52 }
 0x165   : > { %12391 = vmatpush3.bf16.msra.mxu1 %v13799_v63  ;;  %12312 = vmatprep.subr.bf16.mxu0 %v13803_v3  ;;  %v1300_v63 = vsub.f32 1.0, %v1292_v53  ;;  %v2099_v53 = vld [vmem:[#allocation2 + $0x40] sm:$0xff] }
 0x166   : > { %12392 = vmatprep.subr.bf16.mxu1 %v13805_v4 }
 0x167   : > { %12305 = vmatmul.mubr.msk.bf16.gmra.mrb[20].mxu0 %vm658_vm0, %v13802_v2  ;;  %v13859_v2 = vld [vmem:[%s16932_s2 + $0x50] sm:$0xff]  }
 0x168   : > { %12385 = vmatmul.mubr.msk.bf16.gmra.mrb[20].mxu1 %vm658_vm0, %v13804_v5  ;;  %12313 = vmatpush3.bf16.msra.mxu0 %v13803_v3  ;;  %v2127_v3 = vsub.f32 1.0, %v2119_v57  ;;  %v1334_v5 = vmul.f32 0.15, %v1302_v52  ;;  %v13869_v57 = vld [vmem:[%s16932_s2 + $0x68] sm:$0xff]  }
 0x169   : > { %12393 = vmatpush3.bf16.msra.mxu1 %v13805_v4  ;;  %12314 = vmatprep.subr.bf16.mxu0 %v13806_v6  ;;  %v2130_v4 = vsub.f32 1.0, %v2122_v58 }
 0x16a   : > { %12394 = vmatprep.subr.bf16.mxu1 %v13807_v7  ;;  %12316 = vmatprep.mubr.msk.bf16.mxu0 %vm658_vm0, %v13808_v8  ;;  %v14980_v8 = vmul.f32 0.15, %v1300_v63  ;;  %v2135_v47 = vmul.f32 0.25, %v2127_v3 }
 0x16b   : > { %12396 = vmatprep.mubr.msk.bf16.mxu1 %vm658_vm0, %v13809_v9  ;;  %v14982_v9 = vmul.f32 0.15, %v1301_v0 }
 0x16c   : > { %12315 = vmatpush3.bf16.msra.mxu0 %v13806_v6  ;;  %v1335_v6 = vmul.f32 0.15, %v1303_v60 }
 0x16d   : > { %12395 = vmatpush3.bf16.msra.mxu1 %v13807_v7  ;;  %12324 = vmatprep.subr.bf16.mxu0 %v13811_v11  ;;  %v13846_v7 = vld [vmem:[%s16931_s1 + $0x48] sm:$0xff]  }
 0x16e   : > { %12404 = vmatprep.subr.bf16.mxu1 %v13813_v12 }
 0x16f   : > { %12317 = vmatmul.mubr.msk.bf16.vlgmr.msra.gmra.mrb[16].mxu0 %vm658_vm0, %v13810_v10  ;;  %v14984_v10 = vmul.f32 0.15, %v2129_v1 }
 0x170   : > { %12397 = vmatmul.mubr.msk.bf16.vlgmr.msra.gmra.mrb[16].mxu1 %vm658_vm0, %v13812_v13  ;;  %12325 = vmatpush3.bf16.msra.mxu0 %v13811_v11  ;;  %v2120_v11 = vunpack.c.h.bf16 %v2115_v49  ;;  %v14988_v13 = vmul.f32 0.15, %v2130_v4 }
 0x171   : > { %12405 = vmatpush3.bf16.msra.mxu1 %v13813_v12  ;;  %12326 = vmatprep.subr.bf16.mxu0 %v13814_v14  ;;  %v14986_v12 = vmul.f32 0.15, %v2127_v3 }
 0x172   : > { %12406 = vmatprep.subr.bf16.mxu1 %v13815_v15  ;;  %12320 = vmatprep.mubr.msk.bf16.mxu0 %vm658_vm0, %v13816_v16  ;;  %v1273_v16 = vld [vmem:[#allocation2 + $0x10] sm:$0xff] }
 0x173   : > { %12400 = vmatprep.mubr.msk.bf16.mxu1 %vm658_vm0, %v13817_v17  ;;  %v1308_v17 = vmul.f32 0.25, %v1300_v63  ;;  %v15041_v63 = vld [vmem:[%s16931_s1 + $0x60] sm:$0xff]  }
 0x174   : > { %12327 = vmatpush3.bf16.msra.mxu0 %v13814_v14  ;;  %v1311_v14 = vmul.f32 0.25, %v1303_v60 }
 0x175   : > { %12407 = vmatpush3.bf16.msra.mxu1 %v13815_v15  ;;  %12328 = vmatprep.subr.bf16.mxu0 %v13819_v19  ;;  %v1291_v15 = vld [vmem:[#allocation3 + $0x18] sm:$0xff] }
 0x176   : > { %12408 = vmatprep.subr.bf16.mxu1 %v13821_v20 }
 0x177   : > { %12321 = vmatmul.mubr.msk.bf16.gmra.mrb[20].mxu0 %vm658_vm0, %v13818_v18  ;;  %v13863_v18 = vld [vmem:[%s16932_s2 + $0x58] sm:$0xff]  }
 0x178   : > { %12401 = vmatmul.mubr.msk.bf16.gmra.mrb[20].mxu1 %vm658_vm0, %v13820_v21  ;;  %12329 = vmatpush3.bf16.msra.mxu0 %v13819_v19  ;;  %v13847_v19 = vld [vmem:[%s16931_s1 + $0x50] sm:$0xff]   ;;  %v2128_v21 = vsub.f32 1.0, %v2120_v11 }
 0x179   : > { %12409 = vmatpush3.bf16.msra.mxu1 %v13821_v20  ;;  %12330 = vmatprep.subr.bf16.mxu0 %v13822_v22  ;;  %v1282_v20 = vld [vmem:[#allocation2 + $0x1d0] sm:$0xff] }
 0x17a   : > { %12410 = vmatprep.subr.bf16.mxu1 %v13823_v23  ;;  %12332 = vmatprep.mubr.msk.bf16.mxu0 %vm658_vm0, %v13824_v24  ;;  %v1283_v24 = vld [vmem:[#allocation2 + $0x1d8] sm:$0xff]  ;;  %v2136_v55 = vmul.f32 0.25, %v2128_v21 }
 0x17b   : > { %12412 = vmatprep.mubr.msk.bf16.mxu1 %vm658_vm0, %v13825_v25  ;;  %v1309_v25 = vmul.f32 0.25, %v1301_v0  ;;  %v15026_v52 = vmul.f32 %v1335_v6, %v1283_v24  ;;  %v2108_v6 = vld [vmem:[#allocation2 + $0x208] sm:$0xff]  ;;  %v2113_v24 = vld [vmem:[#allocation2 + $0x230] sm:$0xff] }
 0x17c   : > { %12331 = vmatpush3.bf16.msra.mxu0 %v13822_v22  ;;  %v14998_v22 = vld [vmem:[#allocation3 + $0x38] sm:$0xff] }
 0x17d   : > { %12411 = vmatpush3.bf16.msra.mxu1 %v13823_v23  ;;  %12420 = vmatprep.subr.bf16.mxu0 %v13828_v26  ;;  %v1274_v23 = vld [vmem:[#allocation2 + $0x18] sm:$0xff] }
 0x17e   : > { %12500 = vmatprep.subr.bf16.mxu1 %v16939_v32 }
 0x17f   : > { %12333 = vmatmul.mubr.msk.bf16.vlgmr.msra.gmra.mrb[16].mxu0 %vm658_vm0, %v13826_v27  ;;  %v15002_v27 = vld [vmem:[#allocation3 + $0x10] sm:$0xff] }
 0x180   : > { %12413 = vmatmul.mubr.msk.bf16.vlgmr.msra.gmra.mrb[16].mxu1 %vm658_vm0, %v13827_v28  ;;  %12421 = vmatpush3.bf16.msra.mxu0 %v13828_v26  ;;  %v1298_v26 = vunpack.c.l.bf16 %v1291_v15  ;;  %v1271_v28 = vld [vmem:[#allocation2] sm:$0xff]  ;;  %v1296_v50 = vunpack.c.l.bf16 %v15002_v27  ;;  %v1297_v3 = vunpack.c.h.bf16 %v15002_v27 }
 0x181   : > { %12422 = vmatprep.subr.bf16.mxu0 %v13829_v29  ;;  %12336 = vmatprep.mubr.msk.bf16.mxu0 %vm658_vm0, %v13830_v30  ;;  %v13865_v30 = vld [vmem:[%s16932_s2 + $0x60] sm:$0xff]   ;;  %v15032_v58 = vmul.f32 %v1308_v17, %v1271_v28  ;;  %v1277_v17 = vld [vmem:[#allocation2 + $0x30] sm:$0xff] }
 0x182   : > { %12416 = vmatprep.mubr.msk.bf16.mxu1 %vm658_vm0, %v13831_v31  ;;  %12501 = vmatpush3.bf16.msra.mxu1 %v13853_v35  ;;  %v13849_v31 = vld [vmem:[%s14132_s13 + $0xd0] sm:$0xff]   ;;  %v2125_v35 = vunpack.c.l.bf16 %v14998_v22  ;;  %v1306_v49 = vsub.f32 1.0, %v1298_v26  ;;  %v1304_v11 = vsub.f32 1.0, %v1296_v50  ;;  %v15076_v26 = vld [vmem:[%s16931_s1 + $0x68] sm:$0xff]   ;;  %v1287_v50 = vld [vmem:[#allocation2 + $0x1f8] sm:$0xff] }
 0x183   : > { %12502 = vmatprep.subr.bf16.mxu1 %v16939_v32 }
 0x184   : > { %12423 = vmatpush3.bf16.msra.mxu0 %v13829_v29  ;;  %v2137_v29 = vmul.f32 0.25, %v2129_v1  ;;  %v2133_v60 = vsub.f32 1.0, %v2125_v35  ;;  %v2100_v1 = vld [vmem:[#allocation2 + $0x48] sm:$0xff]  ;;  %v1336_v35 = vmul.f32 0.15, %v1304_v11 }
 0x185   : > { %12424 = vmatprep.subr.bf16.mxu0 %v13834_v33 }
 0x186   : > { %12503 = vmatpush3.bf16.msra.mxu1 %v13857_v44  ;;  %v15021_v44 = vmul.f32 %v1334_v5, %v1282_v20  ;;  %v13854_v20 = vld [vmem:[%s14132_s13 + $0xe0] sm:$0xff]   ;;  %v2165_v28 = vmul.f32 0.15, %v2133_v60 }
 0x187   : > { %12337 = vmatmul.mubr.msk.bf16.gmra.mrb[20].mxu0 %vm658_vm0, %v13832_v34  ;;  %12504 = vmatprep.subr.bf16.mxu1 %v16939_v32  ;;  %v2138_v34 = vmul.f32 0.25, %v2130_v4 }
 0x188   : > { %12417 = vmatmul.mubr.msk.bf16.gmra.mrb[20].mxu1 %vm658_vm0, %v13833_v36  ;;  %12425 = vmatpush3.bf16.msra.mxu0 %v13834_v33  ;;  %v1280_v33 = vld [vmem:[#allocation2 + $0x1c0] sm:$0xff]  ;;  %v15009_v36 = vld [vmem:[#allocation3 + $0x30] sm:$0xff] }
 0x189   : > { %12426 = vmatprep.subr.bf16.mxu0 %v13835_v37  ;;  %12428 = vmatprep.mubr.msk.bf16.mxu0 %vm658_vm0, %v14931_v38  ;;  %v15044_v0 = vmul.f32 %v14980_v8, %v1280_v33  ;;  %v2124_v4 = vunpack.c.h.bf16 %v15009_v36  ;;  %v13850_v8 = vld [vmem:[%s14132_s13 + $0xd8] sm:$0xff]   ;;  %v1284_v33 = vld [vmem:[#allocation2 + $0x1e0] sm:$0xff] }
 0x18a   : > { %12516 = vmatprep.mubr.msk.bf16.mxu1 %vm14064_vm1, %v16939_v32  ;;  %12505 = vmatpush3.bf16.msra.mxu1 %v13859_v2  ;;  %v1338_v2 = vmul.f32 0.15, %v1306_v49 }
 0x18b   : > { %12506 = vmatprep.subr.bf16.mxu1 %v16939_v32 }
 0x18c   : > { %12427 = vmatpush3.bf16.msra.mxu0 %v13835_v37  ;;  %v1299_v37 = vunpack.c.h.bf16 %v1291_v15  ;;  %v15059_v15 = vmul.f32 %v14984_v10, %v2109_v46  ;;  %v2141_v10 = vmul.f32 0.25, %v2133_v60 }
 0x18d   : > { %12436 = vmatprep.subr.bf16.mxu0 %v13838_v39 }
 0x18e   : > { %12507 = vmatpush3.bf16.msra.mxu1 %v13863_v18  ;;  %v1286_v18 = vld [vmem:[#allocation2 + $0x1f0] sm:$0xff] }
 0x18f   : > { %12429 = vmatmul.mubr.msk.bf16.vlgmr.msra.gmra.mrb[24].mxu0 %vm658_vm0, %v14944_v40  ;;  %12508 = vmatprep.subr.bf16.mxu1 %v16939_v32 }
 0x190   : > { %12437 = vmatpush3.bf16.msra.mxu0 %v13838_v39  ;;  %12432 = vmatprep.mubr.msk.bf16.mxu0 %vm658_vm0, %v14947_v41  ;;  %v15017_v39 = vmul.f32 %v1310_v62, %v1273_v16  ;;  %v2126_v62 = vunpack.c.h.bf16 %v14998_v22  ;;  %v15070_v22 = vmul.f32 %v14988_v13, %v2110_v54  ;;  %v15082_v13 = vmul.f32 %v2136_v55, %v2100_v1 }
 0x191   : > { %12438 = vmatprep.subr.bf16.mxu0 %v13839_v43  ;;  %v15099_v55 = vmul.f32 %v2165_v28, %v2113_v24 }
 0x192   : > { %12509 = vmatpush3.bf16.msra.mxu1 %v13865_v30  ;;  %v1305_v30 = vsub.f32 1.0, %v1297_v3  ;;  %v2104_v3 = vld [vmem:[#allocation2 + $0x68] sm:$0xff] }
 0x193   : > { %12510 = vmatprep.subr.bf16.mxu1 %v16939_v32 }
 0x194   : > { %12439 = vmatpush3.bf16.msra.mxu0 %v13839_v43  ;;  %v15019_v43 = vmul.f32 0.15, %v2128_v21  ;;  %v15067_v21 = vmul.f32 %v2135_v47, %v2099_v53  ;;  %v15093_v47 = vmul.f32 %v1338_v2, %v1286_v18  ;;  %v1276_v2 = vld [vmem:[#allocation2 + $0x28] sm:$0xff]  ;;  %v15123_v18 = vmul.f32 0.15, %v1305_v30 }
 0x195   : > { %12440 = vmatprep.subr.bf16.mxu0 %v13842_v48 }
 0x196   : > { %12511 = vmatpush3.bf16.msra.mxu1 %v13869_v57  ;;  %v2114_v57 = vld [vmem:[#allocation2 + $0x238] sm:$0xff] }
 0x197   : > { %12433 = vmatmul.mubr.msk.bf16.gmra.mrb[28].mxu0 %vm658_vm0, %v13841_v51  ;;  %v15024_v51 = vmul.f32 %v1311_v14, %v1274_v23  ;;  %v15056_v14 = vmul.f32 %v2137_v29, %v2101_v45  ;;  %v2105_v23 = vld [vmem:[#allocation2 + $0x70] sm:$0xff]  ;;  %12512 = vmatprep.subr.bf16.mxu1 %v16939_v32  ;;  %v1275_v29 = vld [vmem:[#allocation2 + $0x20] sm:$0xff] }
 0x198   : > { %12441 = vmatpush3.bf16.msra.mxu0 %v13842_v48  ;;  %12444 = vmatprep.mubr.msk.bf16.mxu0 %vm658_vm0, %v13844_v56  ;;  %v2102_v48 = vld [vmem:[#allocation2 + $0x58] sm:$0xff]  ;;  %v2123_v56 = vunpack.c.l.bf16 %v15009_v36 }
 0x199   : > { %12442 = vmatprep.subr.bf16.mxu0 %v13843_v59  ;;  %v15061_v16 = vmul.f32 %v2138_v34, %v2102_v48  ;;  %v1312_v34 = vmul.f32 0.25, %v1304_v11  ;;  %v1278_v36 = vld [vmem:[#allocation2 + $0x38] sm:$0xff]  ;;  %v2103_v48 = vld [vmem:[#allocation2 + $0x60] sm:$0xff] }
 0x19c   : > { %12443 = vmatpush3.bf16.msra.mxu0 %v13843_v59  ;;  %v2107_v59 = vld [vmem:[#allocation2 + $0x200] sm:$0xff] }
 0x19d   : > { %12452 = vmatprep.subr.bf16.mxu0 %v13845_v61  ;;  %v15079_v27 = vmul.f32 %v14986_v12, %v2107_v59  ;;  %v1313_v59 = vmul.f32 0.25, %v1305_v30 }
 0x19f   : > { %12445 = vmatmul.mubr.msk.bf16.vlgmr.msra.gmra.mrb[24].mxu0 %vm658_vm0, %v14931_v38  ;;  %v15015_v38 = vld [vmem:[%s16931_s1 + $0x58] sm:$0xff]  }
 0x1a0   : > { %12453 = vmatpush3.bf16.msra.mxu0 %v13845_v61  ;;  %12448 = vmatprep.mubr.msk.bf16.mxu0 %vm658_vm0, %v14944_v40  ;;  %v1272_v40 = vld [vmem:[#allocation2 + $0x8] sm:$0xff]  ;;  %v1307_v61 = vsub.f32 1.0, %v1299_v37 }
 0x1a1   : > { %12454 = vmatprep.subr.bf16.mxu0 %v13846_v7  ;;  %v15049_v5 = vmul.f32 %v1309_v25, %v1272_v40  ;;  %v2134_v25 = vsub.f32 1.0, %v2126_v62  ;;  %v15086_v40 = vmul.f32 %v15019_v43, %v2108_v6  ;;  %v15097_v43 = vmul.f32 %v2141_v10, %v2105_v23  ;;  %v13855_v10 = vld [vmem:[%s14132_s13 + $0xe8] sm:$0xff]  }
 0x1a2   : > { %v1315_v37 = vmul.f32 0.25, %v1307_v61  ;;  %v1339_v45 = vmul.f32 0.15, %v1307_v61  ;;  %v15103_v61 = vmul.f32 %v1312_v34, %v1275_v29  ;;  %v15105_v62 = vmul.f32 %v1336_v35, %v1284_v33  ;;  %v13860_v29 = vld [vmem:[%s14132_s13 + $0xd8] sm:$0xff]  }
 0x1a3   : > { %v2142_v53 = vmul.f32 0.25, %v2134_v25  ;;  %v2166_v54 = vmul.f32 0.15, %v2134_v25  ;;  %v15130_v25 = vmul.f32 %v1313_v59, %v1276_v2 }
 0x1a4   : > { %12455 = vmatpush3.bf16.msra.mxu0 %v13846_v7  ;;  %v1314_v7 = vmul.f32 0.25, %v1306_v49  ;;  %v2111_v49 = vld [vmem:[#allocation2 + $0x220] sm:$0xff]  ;;  %v15107_v1 = vmul.f32 %v1315_v37, %v1278_v36 }
 0x1a5   : > { %12456 = vmatprep.subr.bf16.mxu0 %v13847_v19 }
 0x1a6   : > { %v15091_v46 = vmul.f32 %v1314_v7, %v1277_v17  ;;  %v15117_v7 = vmul.f32 %v1339_v45, %v1287_v50  ;;  %v15121_v17 = vmul.f32 %v2166_v54, %v2114_v57  ;;  %v13861_v57 = vld [vmem:[%s14132_s13 + $0xe0] sm:$0xff]  }
 0x1a7   : > { %12449 = vmatmul.mubr.msk.bf16.gmra.mrb[28].mxu0 %vm658_vm0, %v14947_v41  ;;  %v15052_v41 = vmul.f32 %v14982_v9, %v1281_v42  ;;  %v13871_v9 = vld [vmem:[%s16932_s2 + $0x70] sm:$0xff]  }
 0x1a8   : > { %12457 = vmatpush3.bf16.msra.mxu0 %v13847_v19  ;;  %12460 = vmatprep.mubr.msk.bf16.mxu0 %vm658_vm0, %v13849_v31  ;;  %v2131_v19 = vsub.f32 1.0, %v2123_v56  ;;  %v2132_v31 = vsub.f32 1.0, %v2124_v4  ;;  %v2106_v56 = vld [vmem:[#allocation2 + $0x78] sm:$0xff]  ;;  %v13856_v4 = vld [vmem:[%s16931_s1 + $0x70] sm:$0xff]  }
 0x1a9   : > { %12458 = vmatprep.subr.bf16.mxu0 %v15015_v38  ;;  %12513 = vmatpush3.bf16.msra.mxu1 %v13871_v9 }
 0x1aa   : > { %v2139_v12 = vmul.f32 0.25, %v2131_v19  ;;  %v2163_v42 = vmul.f32 0.15, %v2131_v19  ;;  %12514 = vmatprep.subr.bf16.mxu1 %v16939_v32  ;;  %v2140_v60 = vmul.f32 0.25, %v2132_v31  ;;  %v15125_v19 = vmul.f32 0.15, %v2132_v31 }
 0x1ac   : > { %12459 = vmatpush3.bf16.msra.mxu0 %v15015_v38  ;;  %v13874_v38 = vld [vmem:[%s16932_s2 + $0x78] sm:$0xff]   ;;  %v15113_v6 = vmul.f32 %v2139_v12, %v2103_v48  ;;  %v15132_v28 = vmul.f32 %v2140_v60, %v2104_v3  ;;  %v13866_v3 = vld [vmem:[%s14132_s13 + $0xe8] sm:$0xff]  }
 0x1ad   : > { %12468 = vmatprep.subr.bf16.mxu0 %v15041_v63  ;;  %12515 = vmatpush3.bf16.msra.mxu1 %v13874_v38 }
 0x1ae   : > { %12544 = vmatprep.subr.bf16.mxu1 %v16939_v32 }
 0x1af   : > { %12461 = vmatmul.mubr.msk.bf16.vlgmr.msra.gmra.mrb[24].mxu0 %vm658_vm0, %v13850_v8  ;;  %v15119_v8 = vmul.f32 %v2142_v53, %v2106_v56 }
 0x1b0   : > { %12469 = vmatpush3.bf16.msra.mxu0 %v15041_v63  ;;  %12464 = vmatprep.mubr.msk.bf16.mxu0 %vm658_vm0, %v13854_v20  ;;  %v15115_v63 = vmul.f32 %v2163_v42, %v2111_v49 }
 0x1b1   : > { %12470 = vmatprep.subr.bf16.mxu0 %v15076_v26 }
 0x1b2   : > { %v12014_v11 = vpop.f32.mrb[0].mxu0 }
 0x1b3   : > { %v1326_v9 = vadd.f32 %v12014_v11, %v15017_v39  ;;  %v1350_v20 = vmul.f32 0.4, %v12014_v11  ;;  %v1232_v23 = vpop.f32.mrb[1].mxu0  ;;  %v12094_v24 = vpop.f32.mrb[0].mxu1 }
 0x1b4   : > { %v1324_v33 = vadd.f32 %v15032_v58, %v1232_v23  ;;  %v1348_v34 = vmul.f32 0.4, %v1232_v23  ;;  %v12015_v30 = vpop.f32.mrb[2].mxu0  ;;  %12471 = vmatpush3.bf16.msra.mxu0 %v15076_v26  ;;  %v2153_v31 = vadd.f32 %v12094_v24, %v15056_v14  ;;  %v2177_v35 = vmul.f32 0.4, %v12094_v24  ;;  %v2060_v36 = vpop.f32.mrb[1].mxu1 }
 0x1b5   : > { %v1358_v39 = vadd.f32 %v1350_v20, %v15021_v44  ;;  %1382 = vst [vmem:[#allocation2 + $0x10] sm:$0xff] %v1326_v9  ;;  %v1327_v37 = vadd.f32 %v12015_v30, %v15024_v51  ;;  %v1351_v12 = vmul.f32 0.4, %v12015_v30  ;;  %v1235_v42 = vpop.f32.mrb[3].mxu0  ;;  %v2151_v45 = vadd.f32 %v15067_v21, %v2060_v36  ;;  %12472 = vmatprep.subr.bf16.mxu0 %v13856_v4  ;;  %v12095_v38 = vpop.f32.mrb[2].mxu1  ;;  %v13858_v58 = vld [vmem:[%s16931_s1 + $0x78] sm:$0xff]  }
 0x1b6   : > { %v1356_v26 = vadd.f32 %v1348_v34, %v15044_v0  ;;  %1380 = vst [vmem:[#allocation2] sm:$0xff] %v1324_v33  ;;  %v1325_v14 = vadd.f32 %v15049_v5, %v1235_v42  ;;  %v1349_v48 = vmul.f32 0.4, %v1235_v42  ;;  %v2185_v44 = vadd.f32 %v2177_v35, %v15059_v15  ;;  %2209 = vst [vmem:[#allocation2 + $0x50] sm:$0xff] %v2153_v31  ;;  %v2063_v51 = vpop.f32.mrb[3].mxu1  ;;  %v13864_v35 = vld [vmem:[%s16931_s1 + $0x88] sm:$0xff]  }
 0x1b7   : > { %v1366_v49 = vadd.f32 %v1358_v39, %v1326_v9  ;;  %1390 = vst [vmem:[#allocation2 + $0x1d0] sm:$0xff] %v1358_v39  ;;  %v1359_v21 = vadd.f32 %v1351_v12, %v15026_v52  ;;  %1383 = vst [vmem:[#allocation2 + $0x18] sm:$0xff] %v1327_v37  ;;  %v2175_v50 = vmul.f32 0.4, %v2060_v36  ;;  %12465 = vmatmul.mubr.msk.bf16.gmra.mrb[28].mxu0 %vm658_vm0, %v13855_v10  ;;  %v2178_v54 = vmul.f32 0.4, %v12095_v38 }
 0x1b8   : > { %2207 = vst [vmem:[#allocation2 + $0x40] sm:$0xff] %v2151_v45  ;;  %v2154_v53 = vadd.f32 %v12095_v38, %v15061_v16  ;;  %v1364_v0 = vadd.f32 %v1356_v26, %v1324_v33  ;;  %1388 = vst [vmem:[#allocation2 + $0x1c0] sm:$0xff] %v1356_v26  ;;  %v1357_v5 = vadd.f32 %v1349_v48, %v15052_v41  ;;  %12473 = vmatpush3.bf16.msra.mxu0 %v13856_v4  ;;  %v13862_v41 = vld [vmem:[%s16931_s1 + $0x80] sm:$0xff]  }
 0x1b9   : > { %1381 = vst [vmem:[#allocation2 + $0x8] sm:$0xff] %v1325_v14  ;;  %v2193_v15 = vadd.f32 %v2185_v44, %v2153_v31  ;;  %2217 = vst [vmem:[#allocation2 + $0x210] sm:$0xff] %v2185_v44  ;;  %12476 = vmatprep.mubr.msk.bf16.mxu0 %vm658_vm0, %v13860_v29  ;;  %vm1374_vm2 = vcmp.gt.f32.partialorder %v1366_v49, 0.3  ;;  %v1367_v52 = vadd.f32 %v1359_v21, %v1327_v37  ;;  %12474 = vmatprep.subr.bf16.mxu0 %v13858_v58  ;;  %v2112_v49 = vld [vmem:[#allocation2 + $0x228] sm:$0xff] }
 0x1ba   : > { %1391 = vst [vmem:[#allocation2 + $0x1d8] sm:$0xff] %v1359_v21  ;;  %v2183_v56 = vadd.f32 %v2175_v50, %v15079_v27  ;;  %2210 = vst [vmem:[#allocation2 + $0x58] sm:$0xff] %v2154_v53  ;;  %v2152_v16 = vadd.f32 %v15082_v13, %v2063_v51  ;;  %v10219_v59 = vsel %vm1374_vm2, 1.0, %v16939_v32  ;;  %vm1372_vm3 = vcmp.gt.f32.partialorder %v1364_v0, 0.3  ;;  %v12018_v2 = vpop.f32.mrb[4].mxu0 }
 0x1bb   : > { %v1365_v60 = vadd.f32 %v1357_v5, %v1325_v14  ;;  %1389 = vst [vmem:[#allocation2 + $0x1c8] sm:$0xff] %v1357_v5  ;;  %vm2201_vm4 = vcmp.gt.f32.partialorder %v2193_v15, 0.3  ;;  %v10217_v4 = vsel %vm1372_vm3, 1.0, %v16939_v32  ;;  %vm1375_vm5 = vcmp.gt.f32.partialorder %v1367_v52, 0.3 }
 0x1bc   : > { %v10316_v27 = vsel %vm2201_vm4, 1.0, %v16939_v32  ;;  %v2191_v13 = vadd.f32 %v2183_v56, %v2151_v45  ;;  %2215 = vst [vmem:[#allocation2 + $0x200] sm:$0xff] %v2183_v56  ;;  %2208 = vst [vmem:[#allocation2 + $0x48] sm:$0xff] %v2152_v16  ;;  %v12098_v11 = vpop.f32.mrb[4].mxu1  ;;  %v1248_v9 = vpop.f32.mrb[5].mxu0  ;;  %v10220_v20 = vsel %vm1375_vm5, 1.0, %v16939_v32  ;;  %v2186_v23 = vadd.f32 %v2178_v54, %v15070_v22  ;;  %12475 = vmatpush3.bf16.msra.mxu0 %v13858_v58 }
 0x1bd   : > { %vm1373_vm6 = vcmp.gt.f32.partialorder %v1365_v60, 0.3  ;;  %v2176_v24 = vmul.f32 0.4, %v2063_v51  ;;  %v2076_v10 = vpop.f32.mrb[5].mxu1  ;;  %v15164_v29 = vpack.c.bf16 %v10220_v20, %v10219_v59  ;;  %v1330_v34 = vadd.f32 %v12018_v2, %v15091_v46  ;;  %v12019_v30 = vpop.f32.mrb[6].mxu0  ;;  %12484 = vmatprep.subr.bf16.mxu0 %v13862_v41 }
 0x1be   : > { %v10218_v33 = vsel %vm1373_vm6, 1.0, %v16939_v32  ;;  %vm2199_vm7 = vcmp.gt.f32.partialorder %v2191_v13, 0.3  ;;  %v12099_v31 = vpop.f32.mrb[6].mxu1  ;;  %v2194_v39 = vadd.f32 %v2186_v23, %v2154_v53  ;;  %2218 = vst [vmem:[#allocation2 + $0x218] sm:$0xff] %v2186_v23  ;;  %v15175_v12 = vpop.f32.mrb[7].mxu0  ;;  %v2157_v45 = vadd.f32 %v12098_v11, %v15097_v43 }
 0x1bf   : > { %v15171_v36 = vpack.c.bf16 %v10218_v33, %v10217_v4  ;;  %v10314_v22 = vsel %vm2199_vm7, 1.0, %v16939_v32  ;;  %v2184_v37 = vadd.f32 %v2176_v24, %v15086_v40  ;;  %v15177_v42 = vpop.f32.mrb[7].mxu1  ;;  %1417 = vst [vmem:[#allocation3 + $0x8] sm:$0xff] %v15164_v29  ;;  %v1354_v46 = vmul.f32 0.4, %v12018_v2  ;;  %1386 = vst [vmem:[#allocation2 + $0x30] sm:$0xff] %v1330_v34  ;;  %12477 = vmatmul.mubr.msk.bf16.vlgmr.msra.gmra.mrb[24].mxu0 %vm658_vm0, %v13861_v57 }
 0x1c0   : > { %v2181_v38 = vmul.f32 0.4, %v12098_v11  ;;  %v1328_v58 = vadd.f32 %v15103_v61, %v1248_v9  ;;  %vm2202_vm8 = vcmp.gt.f32.partialorder %v2194_v39, 0.3  ;;  %v1352_v26 = vmul.f32 0.4, %v1248_v9  ;;  %12485 = vmatpush3.bf16.msra.mxu0 %v13862_v41  ;;  %12480 = vmatprep.mubr.msk.bf16.mxu0 %vm658_vm0, %v13866_v3 }
 0x1c1   : > { %1416 = vst [vmem:[#allocation3] sm:$0xff] %v15171_v36  ;;  %v2192_v40 = vadd.f32 %v2184_v37, %v2152_v16  ;;  %2216 = vst [vmem:[#allocation2 + $0x208] sm:$0xff] %v2184_v37  ;;  %v2155_v14 = vadd.f32 %v15113_v6, %v2076_v10  ;;  %v10317_v48 = vsel %vm2202_vm8, 1.0, %v16939_v32  ;;  %v1362_v43 = vadd.f32 %v1354_v46, %v15093_v47  ;;  %v1285_v51 = vld [vmem:[#allocation2 + $0x1e8] sm:$0xff]  ;;  %v13867_v21 = vld [vmem:[%s14132_s13 + $0xf0] sm:$0xff]  }
 0x1c2   : > { %v2189_v61 = vadd.f32 %v2181_v38, %v15099_v55  ;;  %2213 = vst [vmem:[#allocation2 + $0x70] sm:$0xff] %v2157_v45  ;;  %1384 = vst [vmem:[#allocation2 + $0x20] sm:$0xff] %v1328_v58  ;;  %v2179_v44 = vmul.f32 0.4, %v2076_v10  ;;  %12486 = vmatprep.subr.bf16.mxu0 %v13864_v35  ;;  %v13868_v6 = vld [vmem:[%s16931_s1 + $0x90] sm:$0xff]   ;;  %v2240_v50 = vpack.c.bf16 %v10317_v48, %v10316_v27  ;;  %v13872_v54 = vld [vmem:[%s14132_s13 + $0xe0] sm:$0xff]  }
 0x1c3   : > { %vm2200_vm9 = vcmp.gt.f32.partialorder %v2192_v40, 0.3  ;;  %v1360_v53 = vadd.f32 %v1352_v26, %v15105_v62  ;;  %2211 = vst [vmem:[#allocation2 + $0x60] sm:$0xff] %v2155_v14  ;;  %v1331_v47 = vadd.f32 %v12019_v30, %v15107_v1  ;;  %v1370_v0 = vadd.f32 %v1362_v43, %v1330_v34  ;;  %1394 = vst [vmem:[#allocation2 + $0x1f0] sm:$0xff] %v1362_v43  ;;  %v13870_v41 = vld [vmem:[%s16931_s1 + $0x98] sm:$0xff]   ;;  %v2943_v38 = vld [vmem:[#allocation3 + $0x48] sm:$0xff] }
 0x1c4   : > { %v10315_v55 = vsel %vm2200_vm9, 1.0, %v16939_v32  ;;  %v2197_v5 = vadd.f32 %v2189_v61, %v2157_v45  ;;  %2221 = vst [vmem:[#allocation2 + $0x230] sm:$0xff] %v2189_v61  ;;  %v2187_v15 = vadd.f32 %v2179_v44, %v15115_v63  ;;  %2244 = vst [vmem:[#allocation3 + $0x28] sm:$0xff] %v2240_v50  ;;  %v1355_v16 = vmul.f32 0.4, %v12019_v30  ;;  %12487 = vmatpush3.bf16.msra.mxu0 %v13864_v35  ;;  %v2942_v40 = vld [vmem:[#allocation3 + $0x40] sm:$0xff] }
 0x1c5   : > { %v2239_v52 = vpack.c.bf16 %v10315_v55, %v10314_v22  ;;  %v1368_v56 = vadd.f32 %v1360_v53, %v1328_v58  ;;  %1392 = vst [vmem:[#allocation2 + $0x1e0] sm:$0xff] %v1360_v53  ;;  %1387 = vst [vmem:[#allocation2 + $0x38] sm:$0xff] %v1331_v47  ;;  %v2158_v62 = vadd.f32 %v12099_v31, %v15119_v8  ;;  %v2182_v57 = vmul.f32 0.4, %v12099_v31  ;;  %v3770_v26 = vld [vmem:[#allocation3 + $0x68] sm:$0xff]  ;;  %v3769_v48 = vld [vmem:[#allocation3 + $0x60] sm:$0xff] }
 0x1c6   : > { %vm2205_vm10 = vcmp.gt.f32.partialorder %v2197_v5, 0.3  ;;  %v2195_v1 = vadd.f32 %v2187_v15, %v2155_v14  ;;  %2219 = vst [vmem:[#allocation2 + $0x220] sm:$0xff] %v2187_v15  ;;  %12488 = vmatprep.subr.bf16.mxu0 %v13868_v6  ;;  %vm1378_vm11 = vcmp.gt.f32.partialorder %v1370_v0, 0.3  ;;  %v1363_v63 = vadd.f32 %v1355_v16, %v15117_v7  ;;  %v3772_v53 = vld [vmem:[#allocation3 + $0x78] sm:$0xff] }
 0x1c7   : > { %2243 = vst [vmem:[#allocation3 + $0x20] sm:$0xff] %v2239_v52  ;;  %2214 = vst [vmem:[#allocation2 + $0x78] sm:$0xff] %v2158_v62  ;;  %v1345_v59 = vmul.f32 %v15123_v18, %v1285_v51  ;;  %v2172_v60 = vmul.f32 %v15125_v19, %v2112_v49  ;;  %v10320_v8 = vsel %vm2205_vm10, 1.0, %v16939_v32  ;;  %vm1376_vm12 = vcmp.gt.f32.partialorder %v1368_v56, 0.3  ;;  %12481 = vmatmul.mubr.msk.bf16.gmra.mrb[28].mxu0 %vm658_vm0, %v13867_v21  ;;  %v2944_v0 = vld [vmem:[#allocation3 + $0x50] sm:$0xff] }
 0x1c8   : > { %v2190_v2 = vadd.f32 %v2182_v57, %v15121_v17  ;;  %v1329_v3 = vadd.f32 %v15130_v25, %v15175_v12  ;;  %vm2203_vm13 = vcmp.gt.f32.partialorder %v2195_v1, 0.3  ;;  %v1371_v4 = vadd.f32 %v1363_v63, %v1331_v47  ;;  %1395 = vst [vmem:[#allocation2 + $0x1f8] sm:$0xff] %v1363_v63  ;;  %12489 = vmatpush3.bf16.msra.mxu0 %v13868_v6  ;;  %v13873_v25 = vld [vmem:[%s14132_s13 + $0xe8] sm:$0xff]   ;;  %v3771_v5 = vld [vmem:[#allocation3 + $0x70] sm:$0xff] }
 0x1c9   : > { %v1353_v7 = vmul.f32 0.4, %v15175_v12  ;;  %v2156_v18 = vadd.f32 %v15132_v28, %v15177_v42  ;;  %12492 = vmatprep.mubr.msk.bf16.mxu0 %vm658_vm0, %v13872_v54  ;;  %v2180_v17 = vmul.f32 0.4, %v15177_v42  ;;  %12490 = vmatprep.subr.bf16.mxu0 %v13870_v41  ;;  %v15218_v27 = vadd.bf16 %v15164_v29, %v15171_v36  ;;  %v13875_v29 = vld [vmem:[%s14132_s13 + $0xf0] sm:$0xff]   ;;  %v13876_v12 = vld [vmem:[%s14132_s13 + $0xf8] sm:$0xff]  }
 0x1ca   : > { %v2198_v19 = vadd.f32 %v2190_v2, %v2158_v62  ;;  %2222 = vst [vmem:[#allocation2 + $0x238] sm:$0xff] %v2190_v2  ;;  %1385 = vst [vmem:[#allocation2 + $0x28] sm:$0xff] %v1329_v3  ;;  %v15220_v13 = vadd.bf16 %v2240_v50, %v2239_v52  ;;  %vm1379_vm14 = vcmp.gt.f32.partialorder %v1371_v4, 0.3  ;;  %v10223_v28 = vsel %vm1378_vm11, 1.0, %v16939_v32  ;;  %v2945_v50 = vld [vmem:[#allocation3 + $0x58] sm:$0xff] }
 0x1cb   : > { %16949 = vst [vmem:[#allocation16_spill] sm:$0xff] %v15218_v27  ;;  %v1361_v11 = vadd.f32 %v1353_v7, %v1345_v59  ;;  %2212 = vst [vmem:[#allocation2 + $0x68] sm:$0xff] %v2156_v18  ;;  %v10224_v9 = vsel %vm1379_vm14, 1.0, %v16939_v32  ;;  %v2188_v20 = vadd.f32 %v2180_v17, %v2172_v60  ;;  %v10318_v30 = vsel %vm2203_vm13, 1.0, %v16939_v32 }
 0x1cc   : > { %16950 = vst [vmem:[#allocation17_spill] sm:$0xff] %v15220_v13  ;;  %vm2206_vm15 = vcmp.gt.f32.partialorder %v2198_v19, 0.3  ;;  %v1415_v23 = vpack.c.bf16 %v10224_v9, %v10223_v28  ;;  %12491 = vmatpush3.bf16.msra.mxu0 %v13870_v41  ;;  %v10221_v31 = vsel %vm1376_vm12, 1.0, %v16939_v32  ;;  %v2948_v58 = vunpack.c.l.bf16 %v2943_v38 }
 0x1cd   : > { %v10321_v24 = vsel %vm2206_vm15, 1.0, %v16939_v32  ;;  %v1369_v10 = vadd.f32 %v1361_v11, %v1329_v3  ;;  %1393 = vst [vmem:[#allocation2 + $0x1e8] sm:$0xff] %v1361_v11  ;;  %v2196_v34 = vadd.f32 %v2188_v20, %v2156_v18  ;;  %2220 = vst [vmem:[#allocation2 + $0x228] sm:$0xff] %v2188_v20  ;;  %12588 = vmatprep.subr.bf16.mxu0 %v16939_v32  ;;  %v2949_v14 = vunpack.c.h.bf16 %v2943_v38 }
 0x1ce   : > { %v2242_v33 = vpack.c.bf16 %v10321_v24, %v10320_v8  ;;  %1419 = vst [vmem:[#allocation3 + $0x18] sm:$0xff] %v1415_v23  ;;  %v2946_v43 = vunpack.c.l.bf16 %v2942_v40  ;;  %v2947_v61 = vunpack.c.h.bf16 %v2942_v40  ;;  %v2956_v44 = vsub.f32 1.0, %v2948_v58 }
 0x1cf   : > { %vm1377_vm2 = vcmp.gt.f32.partialorder %v1369_v10, 0.3  ;;  %vm2204_vm3 = vcmp.gt.f32.partialorder %v2196_v34, 0.3  ;;  %12493 = vmatmul.mubr.msk.bf16.vlgmr.msra.gmra.mrb[24].mxu0 %vm658_vm0, %v13873_v25  ;;  %v3775_v51 = vunpack.c.l.bf16 %v3770_v26  ;;  %v3776_v49 = vunpack.c.h.bf16 %v3770_v26 }
 0x1d0   : > { %2246 = vst [vmem:[#allocation3 + $0x38] sm:$0xff] %v2242_v33  ;;  %v10222_v35 = vsel %vm1377_vm2, 1.0, %v16939_v32  ;;  %v10319_v22 = vsel %vm2204_vm3, 1.0, %v16939_v32  ;;  %12496 = vmatprep.mubr.msk.bf16.mxu0 %vm658_vm0, %v13875_v29  ;;  %v3773_v21 = vunpack.c.l.bf16 %v3769_v48  ;;  %v2957_v6 = vsub.f32 1.0, %v2949_v14  ;;  %v2928_v14 = vld [vmem:[#allocation2 + $0x90] sm:$0xff] }
 0x1d1   : > { %v1414_v36 = vpack.c.bf16 %v10222_v35, %v10221_v31  ;;  %v2241_v39 = vpack.c.bf16 %v10319_v22, %v10318_v30  ;;  %v2954_v47 = vsub.f32 1.0, %v2946_v43  ;;  %v2955_v55 = vsub.f32 1.0, %v2947_v61 }
 0x1d2   : > { %v15252_v15 = vmul.f32 0.25, %v2956_v44  ;;  %v3783_v54 = vsub.f32 1.0, %v3775_v51  ;;  %v3784_v52 = vsub.f32 1.0, %v3776_v49  ;;  %v3774_v56 = vunpack.c.h.bf16 %v3769_v48  ;;  %v2936_v51 = vld [vmem:[#allocation2 + $0x250] sm:$0xff]  ;;  %v2926_v49 = vld [vmem:[#allocation2 + $0x80] sm:$0xff] }
 0x1d3   : > { %1418 = vst [vmem:[#allocation3 + $0x10] sm:$0xff] %v1414_v36  ;;  %v15236_v37 = vadd.bf16 %v1415_v23, %v1414_v36  ;;  %2245 = vst [vmem:[#allocation3 + $0x30] sm:$0xff] %v2241_v39  ;;  %v15239_v42 = vadd.bf16 %v2242_v33, %v2241_v39  ;;  %v15254_v16 = vmul.f32 0.15, %v2956_v44  ;;  %v3781_v62 = vsub.f32 1.0, %v3773_v21  ;;  %v2934_v21 = vld [vmem:[#allocation2 + $0x240] sm:$0xff] }
 0x1d4   : > { %v2952_v1 = vunpack.c.l.bf16 %v2945_v50  ;;  %v3779_v57 = vunpack.c.l.bf16 %v3772_v53  ;;  %v15256_v41 = vmul.f32 0.25, %v2957_v6  ;;  %v15258_v63 = vmul.f32 0.15, %v2957_v6  ;;  %v2929_v6 = vld [vmem:[#allocation2 + $0x98] sm:$0xff] }
 0x1d5   : > { %16951 = vst [vmem:[#allocation18_spill] sm:$0xff] %v15236_v37  ;;  %16952 = vst [vmem:[#allocation19_spill] sm:$0xff] %v15239_v42  ;;  %v10823_v46 = vcombine.high %v15218_v27, %v15236_v37  ;;  %v10824_v45 = vcombine.high %v15220_v13, %v15239_v42  ;;  %v2950_v59 = vunpack.c.l.bf16 %v2944_v0  ;;  %v3777_v60 = vunpack.c.l.bf16 %v3771_v5  ;;  %v3765_v37 = vld [vmem:[#allocation2 + $0x2a0] sm:$0xff] }
 0x1d6   : > { %v15260_v8 = vmul.f32 0.25, %v2954_v47  ;;  %v15262_v2 = vmul.f32 0.15, %v2954_v47  ;;  %v15264_v3 = vmul.f32 0.25, %v2955_v55  ;;  %v15266_v4 = vmul.f32 0.15, %v2955_v55 }
 0x1d7   : > { %12517 = vmatmul.mubr.bf16.vlgmr.msra.gmra.mrb[24].mxu1 %v10823_v46  ;;  %12497 = vmatmul.mubr.msk.bf16.gmra.mrb[28].mxu0 %vm658_vm0, %v13876_v12  ;;  %v15268_v7 = vmul.f32 0.25, %v3783_v54  ;;  %v15270_v18 = vmul.f32 0.15, %v3783_v54  ;;  %v15272_v19 = vmul.f32 0.25, %v3784_v52  ;;  %v3782_v17 = vsub.f32 1.0, %v3774_v56  ;;  %v2935_v54 = vld [vmem:[#allocation2 + $0x248] sm:$0xff] }
 0x1d8   : > { %12520 = vmatprep.mubr.msk.bf16.mxu1 %vm14064_vm1, %v16939_v32  ;;  %12604 = vmatprep.mubr.msk.bf16.mxu0 %vm14064_vm1, %v16939_v32  ;;  %v15274_v25 = vmul.f32 0.15, %v3781_v62  ;;  %v15276_v11 = vmul.f32 0.15, %v3784_v52  ;;  %v2960_v28 = vsub.f32 1.0, %v2952_v1  ;;  %v3787_v9 = vsub.f32 1.0, %v3779_v57 }
 0x1d9   : > { %v2958_v20 = vsub.f32 1.0, %v2950_v59  ;;  %v3785_v23 = vsub.f32 1.0, %v3777_v60  ;;  %v2953_v24 = vunpack.c.h.bf16 %v2945_v50  ;;  %v3780_v10 = vunpack.c.h.bf16 %v3772_v53  ;;  %v3755_v52 = vld [vmem:[#allocation2 + $0xd0] sm:$0xff]  ;;  %v3764_v1 = vld [vmem:[#allocation2 + $0x298] sm:$0xff]  ;;  %v3753_v57 = vld [vmem:[#allocation2 + $0xc0] sm:$0xff] }
 0x1da   : > { %v2951_v29 = vunpack.c.h.bf16 %v2944_v0  ;;  %v3778_v33 = vunpack.c.h.bf16 %v3771_v5  ;;  %v15278_v34 = vmul.f32 0.25, %v3781_v62  ;;  %v15280_v30 = vmul.f32 0.25, %v3782_v17  ;;  %v2937_v0 = vld [vmem:[#allocation2 + $0x258] sm:$0xff]  ;;  %v2927_v5 = vld [vmem:[#allocation2 + $0x88] sm:$0xff]  ;;  %v3763_v56 = vld [vmem:[#allocation2 + $0x290] sm:$0xff] }
 0x1db   : > { %v15282_v31 = vmul.f32 0.15, %v3782_v17  ;;  %v15284_v35 = vmul.f32 0.25, %v2960_v28  ;;  %v15286_v36 = vmul.f32 0.15, %v2960_v28  ;;  %v15288_v22 = vmul.f32 0.25, %v3787_v9 }
 0x1dc   : > { %v15290_v39 = vmul.f32 0.15, %v3787_v9  ;;  %v15292_v12 = vmul.f32 0.25, %v2958_v20  ;;  %v2961_v46 = vsub.f32 1.0, %v2953_v24  ;;  %v15294_v38 = vmul.f32 0.15, %v2958_v20 }
 0x1dd   : > { %v15296_v58 = vmul.f32 0.25, %v3785_v23  ;;  %v2959_v40 = vsub.f32 1.0, %v2951_v29  ;;  %v3786_v26 = vsub.f32 1.0, %v3778_v33  ;;  %v15298_v48 = vmul.f32 0.15, %v3785_v23  ;;  %v3756_v62 = vld [vmem:[#allocation2 + $0xd8] sm:$0xff] }
 0x1de   : > { %v15300_v43 = vmul.f32 0.25, %v2961_v46  ;;  %v15302_v61 = vmul.f32 0.15, %v2961_v46  ;;  %v3761_v59 = vld [vmem:[#allocation2 + $0x280] sm:$0xff]  ;;  %v3754_v60 = vld [vmem:[#allocation2 + $0xc8] sm:$0xff]  ;;  %v2972_v20 = vmul.f32 %v15252_v15, %v2928_v14  ;;  %v2932_v23 = vld [vmem:[#allocation2 + $0xb0] sm:$0xff]  ;;  %v2996_v33 = vmul.f32 %v15254_v16, %v2936_v51 }
 0x1df   : > { %12521 = vmatmul.mubr.bf16.gmra.mrb[28].mxu1 %v10824_v45  ;;  %v3788_v45 = vsub.f32 1.0, %v3780_v10  ;;  %v15308_v53 = vmul.f32 0.25, %v2959_v40  ;;  %v15310_v47 = vmul.f32 0.15, %v2959_v40  ;;  %v15312_v55 = vmul.f32 0.25, %v3786_v26  ;;  %v3762_v17 = vld [vmem:[#allocation2 + $0x288] sm:$0xff] }
 0x1e0   : > { %12524 = vmatprep.mubr.msk.bf16.mxu1 %vm14064_vm1, %v16939_v32  ;;  %v2940_v24 = vld [vmem:[#allocation2 + $0x270] sm:$0xff]  ;;  %v2970_v46 = vmul.f32 %v15260_v8, %v2926_v49  ;;  %v2973_v40 = vmul.f32 %v15256_v41, %v2929_v6  ;;  %v2930_v32 = vld [vmem:[#allocation2 + $0xa0] sm:$0xff]  ;;  %v15324_v9 = vmul.f32 %v15258_v63, %v2937_v0  ;;  %v2971_v15 = vmul.f32 %v15264_v3, %v2927_v5  ;;  %v2933_v51 = vld [vmem:[#allocation2 + $0xb8] sm:$0xff] }
 0x1e1   : > { %v15304_v44 = vmul.f32 0.25, %v3788_v45  ;;  %v15306_v50 = vmul.f32 0.15, %v3788_v45  ;;  %16953 = vst [vmem:[#allocation20_spill] sm:$0xff] %v15310_v47  ;;  %v3759_v10 = vld [vmem:[#allocation2 + $0xf0] sm:$0xff]  ;;  %v2994_v45 = vmul.f32 %v15262_v2, %v2934_v21  ;;  %v2938_v47 = vld [vmem:[#allocation2 + $0x260] sm:$0xff]  ;;  %v15328_v14 = vmul.f32 %v15266_v4, %v2935_v54 }
 0x1e2   : > { %v3767_v29 = vld [vmem:[#allocation2 + $0x2b0] sm:$0xff]  ;;  %v3757_v28 = vld [vmem:[#allocation2 + $0xe0] sm:$0xff]  ;;  %v3799_v16 = vmul.f32 %v15268_v7, %v3755_v52  ;;  %v2941_v8 = vld [vmem:[#allocation2 + $0x278] sm:$0xff]  ;;  %v3823_v41 = vmul.f32 %v15270_v18, %v3763_v56  ;;  %v3800_v21 = vmul.f32 %v15272_v19, %v3756_v62  ;;  %v15334_v6 = vmul.f32 %v15276_v11, %v3764_v1 }
 0x1e3   : > { %v3760_v49 = vld [vmem:[#allocation2 + $0xf8] sm:$0xff]  ;;  %v2931_v63 = vld [vmem:[#allocation2 + $0xa8] sm:$0xff]  ;;  %v15336_v42 = vmul.f32 0.15, %v3786_v26  ;;  %v13877_v3 = vld [vmem:[%s16932_s2] sm:$0xff]   ;;  %v3797_v7 = vmul.f32 %v15278_v34, %v3753_v57  ;;  %v15346_v18 = vmul.f32 %v15274_v25, %v3761_v59  ;;  %v15349_v19 = vmul.f32 %v15280_v30, %v3754_v60 }
 0x1e4   : > { %v3768_v2 = vld [vmem:[#allocation2 + $0x2b8] sm:$0xff]  ;;  %v3758_v0 = vld [vmem:[#allocation2 + $0xe8] sm:$0xff]  ;;  %v15352_v11 = vmul.f32 %v15282_v31, %v3762_v17  ;;  %v15355_v26 = vmul.f32 %v15284_v35, %v2932_v23  ;;  %v15358_v5 = vmul.f32 %v15286_v36, %v2940_v24  ;;  %v15361_v54 = vmul.f32 %v15288_v22, %v3759_v10  ;;  %12545 = vmatpush3.bf16.msra.mxu1 %v13877_v3 }
 0x1e5   : > { %v13878_v4 = vld [vmem:[%s16932_s2 + $0x8] sm:$0xff]   ;;  %v15364_v34 = vmul.f32 %v15290_v39, %v3767_v29  ;;  %v15367_v25 = vmul.f32 %v15292_v12, %v2930_v32  ;;  %v15370_v30 = vmul.f32 %v15294_v38, %v2938_v47  ;;  %v15373_v31 = vmul.f32 %v15296_v58, %v3757_v28 }
 0x1e6   : > { %v15376_v35 = vmul.f32 %v15298_v48, %v3765_v37  ;;  %v16954_v36 = vmov 0.0   ;;  %v15380_v52 = vmul.f32 %v15300_v43, %v2933_v51  ;;  %v15383_v39 = vmul.f32 %v15302_v61, %v2941_v8 }
 0x1e7   : > { %12546 = vmatprep.subr.bf16.mxu1 %v16954_v36  ;;  %v15386_v32 = vmul.f32 %v15304_v44, %v3760_v49  ;;  %v15389_v12 = vmul.f32 %v15306_v50, %v3768_v2  ;;  %v15392_v48 = vmul.f32 %v15308_v53, %v2931_v63  ;;  %v15395_v56 = vmul.f32 %v15312_v55, %v3758_v0 }
 0x1e8   : > { %12547 = vmatpush3.bf16.msra.mxu1 %v13878_v4 }
 0x1e9   : > { %12548 = vmatprep.subr.bf16.mxu1 %v16954_v36 }
 0x202   : > { %v12174_v22 = vpop.f32.mrb[8].mxu0 }
 0x203   : > { %v2980_v38 = vadd.f32 %v12174_v22, %v2972_v20  ;;  %v3004_v58 = vmul.f32 0.4, %v12174_v22  ;;  %v2887_v47 = vpop.f32.mrb[9].mxu0  ;;  %v12254_v37 = vpop.f32.mrb[8].mxu1 }
 0x204   : > { %v2978_v43 = vadd.f32 %v2970_v46, %v2887_v47  ;;  %v3002_v62 = vmul.f32 0.4, %v2887_v47  ;;  %v12175_v61 = vpop.f32.mrb[10].mxu0  ;;  %v3807_v1 = vadd.f32 %v12254_v37, %v3799_v16  ;;  %v3831_v57 = vmul.f32 0.4, %v12254_v37  ;;  %v3714_v44 = vpop.f32.mrb[9].mxu1 }
 0x205   : > { %v3012_v59 = vadd.f32 %v3004_v58, %v2996_v33  ;;  %3036 = vst [vmem:[#allocation2 + $0x90] sm:$0xff] %v2980_v38  ;;  %v2981_v50 = vadd.f32 %v12175_v61, %v2973_v40  ;;  %v3005_v60 = vmul.f32 0.4, %v12175_v61  ;;  %v2890_v17 = vpop.f32.mrb[11].mxu0  ;;  %v3805_v28 = vadd.f32 %v3797_v7, %v3714_v44  ;;  %v12255_v20 = vpop.f32.mrb[10].mxu1 }
 0x206   : > { %v3010_v53 = vadd.f32 %v3002_v62, %v2994_v45  ;;  %3034 = vst [vmem:[#allocation2 + $0x80] sm:$0xff] %v2978_v43  ;;  %v2979_v55 = vadd.f32 %v2971_v15, %v2890_v17  ;;  %v3003_v23 = vmul.f32 0.4, %v2890_v17  ;;  %v3839_v24 = vadd.f32 %v3831_v57, %v3823_v41  ;;  %3863 = vst [vmem:[#allocation2 + $0xd0] sm:$0xff] %v3807_v1  ;;  %v3717_v10 = vpop.f32.mrb[11].mxu1 }
 0x207   : > { %v3020_v29 = vadd.f32 %v3012_v59, %v2980_v38  ;;  %3044 = vst [vmem:[#allocation2 + $0x250] sm:$0xff] %v3012_v59  ;;  %v3013_v46 = vadd.f32 %v3005_v60, %v15324_v9  ;;  %3037 = vst [vmem:[#allocation2 + $0x98] sm:$0xff] %v2981_v50  ;;  %v3829_v33 = vmul.f32 0.4, %v3714_v44  ;;  %v3808_v40 = vadd.f32 %v12255_v20, %v3800_v21 }
 0x208   : > { %3861 = vst [vmem:[#allocation2 + $0xc0] sm:$0xff] %v3805_v28  ;;  %v3018_v16 = vadd.f32 %v3010_v53, %v2978_v43  ;;  %3042 = vst [vmem:[#allocation2 + $0x240] sm:$0xff] %v3010_v53  ;;  %v3011_v51 = vadd.f32 %v3003_v23, %v15328_v14  ;;  %v3847_v45 = vadd.f32 %v3839_v24, %v3807_v1  ;;  %v3832_v15 = vmul.f32 0.4, %v12255_v20  ;;  %v2939_v23 = vld [vmem:[#allocation2 + $0x268] sm:$0xff] }
 0x209   : > { %3035 = vst [vmem:[#allocation2 + $0x88] sm:$0xff] %v2979_v55  ;;  %3871 = vst [vmem:[#allocation2 + $0x290] sm:$0xff] %v3839_v24  ;;  %vm3028_vm0 = vcmp.gt.f32.partialorder %v3020_v29, 0.3  ;;  %v3021_v8 = vadd.f32 %v3013_v46, %v2981_v50  ;;  %v3837_v49 = vadd.f32 %v3829_v33, %v15346_v18  ;;  %v3806_v9 = vadd.f32 %v15349_v19, %v3717_v10 }
 0x20a   : > { %3045 = vst [vmem:[#allocation2 + $0x258] sm:$0xff] %v3013_v46  ;;  %3864 = vst [vmem:[#allocation2 + $0xd8] sm:$0xff] %v3808_v40  ;;  %v10413_v2 = vsel %vm3028_vm0, 1.0, %v16954_v36  ;;  %vm3026_vm4 = vcmp.gt.f32.partialorder %v3018_v16, 0.3  ;;  %v3019_v41 = vadd.f32 %v3011_v51, %v2979_v55  ;;  %v12178_v21 = vpop.f32.mrb[12].mxu0  ;;  %v3840_v18 = vadd.f32 %v3832_v15, %v15334_v6 }
 0x20b   : > { %3043 = vst [vmem:[#allocation2 + $0x248] sm:$0xff] %v3011_v51  ;;  %vm3855_vm5 = vcmp.gt.f32.partialorder %v3847_v45, 0.3  ;;  %v10411_v14 = vsel %vm3026_vm4, 1.0, %v16954_v36  ;;  %vm3029_vm6 = vcmp.gt.f32.partialorder %v3021_v8, 0.3  ;;  %v3845_v0 = vadd.f32 %v3837_v49, %v3805_v28 }
 0x20c   : > { %v10510_v63 = vsel %vm3855_vm5, 1.0, %v16954_v36  ;;  %3869 = vst [vmem:[#allocation2 + $0x280] sm:$0xff] %v3837_v49  ;;  %3862 = vst [vmem:[#allocation2 + $0xc8] sm:$0xff] %v3806_v9  ;;  %v12258_v3 = vpop.f32.mrb[12].mxu1  ;;  %v2903_v4 = vpop.f32.mrb[13].mxu0  ;;  %v10414_v7 = vsel %vm3029_vm6, 1.0, %v16954_v36  ;;  %v2984_v47 = vadd.f32 %v12178_v21, %v15355_v26  ;;  %v3848_v1 = vadd.f32 %v3840_v18, %v3808_v40 }
 0x20d   : > { %vm3027_vm7 = vcmp.gt.f32.partialorder %v3019_v41, 0.3  ;;  %v3830_v19 = vmul.f32 0.4, %v3717_v10  ;;  %v3730_v22 = vpop.f32.mrb[13].mxu1  ;;  %v15407_v38 = vpack.c.bf16 %v10414_v7, %v10413_v2  ;;  %v12179_v37 = vpop.f32.mrb[14].mxu0  ;;  %v3811_v50 = vadd.f32 %v12258_v3, %v15361_v54 }
 0x20e   : > { %v10412_v58 = vsel %vm3027_vm7, 1.0, %v16954_v36  ;;  %vm3853_vm8 = vcmp.gt.f32.partialorder %v3845_v0, 0.3  ;;  %v12259_v43 = vpop.f32.mrb[14].mxu1  ;;  %3872 = vst [vmem:[#allocation2 + $0x298] sm:$0xff] %v3840_v18  ;;  %v2906_v6 = vpop.f32.mrb[15].mxu0  ;;  %v2982_v26 = vadd.f32 %v15367_v25, %v2903_v4  ;;  %v3809_v20 = vadd.f32 %v15373_v31, %v3730_v22 }
 0x20f   : > { %v15411_v62 = vpack.c.bf16 %v10412_v58, %v10411_v14  ;;  %v10508_v61 = vsel %vm3853_vm8, 1.0, %v16954_v36  ;;  %v3838_v57 = vadd.f32 %v3830_v19, %v15352_v11  ;;  %v3733_v44 = vpop.f32.mrb[15].mxu1  ;;  %3071 = vst [vmem:[#allocation3 + $0x48] sm:$0xff] %v15407_v38  ;;  %v3008_v59 = vmul.f32 0.4, %v12178_v21  ;;  %3040 = vst [vmem:[#allocation2 + $0xb0] sm:$0xff] %v2984_v47 }
 0x210   : > { %v3835_v60 = vmul.f32 0.4, %v12258_v3  ;;  %vm3856_vm9 = vcmp.gt.f32.partialorder %v3848_v1, 0.3  ;;  %v3006_v28 = vmul.f32 0.4, %v2903_v4  ;;  %v2985_v10 = vadd.f32 %v12179_v37, %v15380_v52 }
 0x211   : > { %3070 = vst [vmem:[#allocation3 + $0x40] sm:$0xff] %v15411_v62  ;;  %v3846_v17 = vadd.f32 %v3838_v57, %v3806_v9  ;;  %3870 = vst [vmem:[#allocation2 + $0x288] sm:$0xff] %v3838_v57  ;;  %v10511_v11 = vsel %vm3856_vm9, 1.0, %v16954_v36  ;;  %v3016_v53 = vadd.f32 %v3008_v59, %v15358_v5  ;;  %v3833_v54 = vmul.f32 0.4, %v3730_v22  ;;  %v16955_v15 = vld [vmem:[#allocation20_spill] sm:$0xff] }
 0x212   : > { %v3843_v55 = vadd.f32 %v3835_v60, %v15364_v34  ;;  %3867 = vst [vmem:[#allocation2 + $0xf0] sm:$0xff] %v3811_v50  ;;  %3038 = vst [vmem:[#allocation2 + $0xa0] sm:$0xff] %v2982_v26  ;;  %v3894_v24 = vpack.c.bf16 %v10511_v11, %v10510_v63  ;;  %v3014_v25 = vadd.f32 %v3006_v28, %v15370_v30  ;;  %v3766_v34 = vld [vmem:[#allocation2 + $0x2a8] sm:$0xff]  ;;  %v3009_v16 = vmul.f32 0.4, %v12179_v37  ;;  %v5423_v58 = vld [vmem:[#allocation3 + $0xa0] sm:$0xff] }
 0x213   : > { %vm3854_vm10 = vcmp.gt.f32.partialorder %v3846_v17, 0.3  ;;  %3865 = vst [vmem:[#allocation2 + $0xe0] sm:$0xff] %v3809_v20  ;;  %v3024_v31 = vadd.f32 %v3016_v53, %v2984_v47  ;;  %3048 = vst [vmem:[#allocation2 + $0x270] sm:$0xff] %v3016_v53  ;;  %v3841_v5 = vadd.f32 %v3833_v54, %v15376_v35  ;;  %v3812_v30 = vadd.f32 %v12259_v43, %v15386_v32  ;;  %v4597_v0 = vld [vmem:[#allocation3 + $0x88] sm:$0xff] }
 0x214   : > { %v10509_v29 = vsel %vm3854_vm10, 1.0, %v16954_v36  ;;  %v3851_v46 = vadd.f32 %v3843_v55, %v3811_v50  ;;  %3875 = vst [vmem:[#allocation2 + $0x2b0] sm:$0xff] %v3843_v55  ;;  %3898 = vst [vmem:[#allocation3 + $0x68] sm:$0xff] %v3894_v24  ;;  %v3022_v40 = vadd.f32 %v3014_v25, %v2982_v26  ;;  %v3836_v52 = vmul.f32 0.4, %v12259_v43 }
 0x215   : > { %v3893_v33 = vpack.c.bf16 %v10509_v29, %v10508_v61  ;;  %3046 = vst [vmem:[#allocation2 + $0x260] sm:$0xff] %v3014_v25  ;;  %3041 = vst [vmem:[#allocation2 + $0xb8] sm:$0xff] %v2985_v10  ;;  %v3849_v51 = vadd.f32 %v3841_v5, %v3809_v20  ;;  %vm3032_vm12 = vcmp.gt.f32.partialorder %v3024_v31, 0.3  ;;  %v3017_v45 = vadd.f32 %v3009_v16, %v15383_v39  ;;  %v4599_v31 = vld [vmem:[#allocation3 + $0x98] sm:$0xff] }
 0x216   : > { %vm3859_vm11 = vcmp.gt.f32.partialorder %v3851_v46, 0.3  ;;  %3873 = vst [vmem:[#allocation2 + $0x2a0] sm:$0xff] %v3841_v5  ;;  %3868 = vst [vmem:[#allocation2 + $0xf8] sm:$0xff] %v3812_v30  ;;  %v2999_v35 = vmul.f32 %v16955_v15, %v2939_v23  ;;  %v3826_v8 = vmul.f32 %v15336_v42, %v3766_v34  ;;  %vm3030_vm13 = vcmp.gt.f32.partialorder %v3022_v40, 0.3 }
 0x217   : > { %3897 = vst [vmem:[#allocation3 + $0x60] sm:$0xff] %v3893_v33  ;;  %v10514_v49 = vsel %vm3859_vm11, 1.0, %v16954_v36  ;;  %v3844_v9 = vadd.f32 %v3836_v52, %v15389_v12  ;;  %v2983_v32 = vadd.f32 %v15392_v48, %v2906_v6  ;;  %vm3857_vm14 = vcmp.gt.f32.partialorder %v3849_v51, 0.3  ;;  %3049 = vst [vmem:[#allocation2 + $0x278] sm:$0xff] %v3017_v45  ;;  %v4596_v12 = vld [vmem:[#allocation3 + $0x80] sm:$0xff] }
 0x218   : > { %v3025_v2 = vadd.f32 %v3017_v45, %v2985_v10  ;;  %v3007_v41 = vmul.f32 0.4, %v2906_v6  ;;  %v3810_v21 = vadd.f32 %v15395_v56, %v3733_v44  ;;  %v3834_v39 = vmul.f32 0.4, %v3733_v44  ;;  %v4598_v40 = vld [vmem:[#allocation3 + $0x90] sm:$0xff] }
 0x219   : > { %v3852_v14 = vadd.f32 %v3844_v9, %v3812_v30  ;;  %3876 = vst [vmem:[#allocation2 + $0x2b8] sm:$0xff] %v3844_v9  ;;  %3039 = vst [vmem:[#allocation2 + $0xa8] sm:$0xff] %v2983_v32  ;;  %v15437_v42 = vadd.bf16 %v15407_v38, %v15411_v62  ;;  %v15439_v63 = vadd.bf16 %v3894_v24, %v3893_v33  ;;  %v10417_v3 = vsel %vm3032_vm12, 1.0, %v16954_v36  ;;  %v5424_v38 = vld [vmem:[#allocation3 + $0xa8] sm:$0xff]  ;;  %v5426_v33 = vld [vmem:[#allocation3 + $0xb8] sm:$0xff] }
 0x21a   : > { %vm3033_vm15 = vcmp.gt.f32.partialorder %v3025_v2, 0.3  ;;  %v3015_v48 = vadd.f32 %v3007_v41, %v2999_v35  ;;  %3866 = vst [vmem:[#allocation2 + $0xe8] sm:$0xff] %v3810_v21  ;;  %v3842_v4 = vadd.f32 %v3834_v39, %v3826_v8  ;;  %v10512_v7 = vsel %vm3857_vm14, 1.0, %v16954_v36  ;;  %v5425_v52 = vld [vmem:[#allocation3 + $0xb0] sm:$0xff]  ;;  %v4584_v24 = vld [vmem:[#allocation2 + $0x120] sm:$0xff] }
 0x21b   : > { %16956 = vst [vmem:[#allocation20_spill] sm:$0xff] %v15437_v42  ;;  %16957 = vst [vmem:[#allocation21_spill] sm:$0xff] %v15439_v63  ;;  %v10418_v56 = vsel %vm3033_vm15, 1.0, %v16954_v36  ;;  %vm3860_vm2 = vcmp.gt.f32.partialorder %v3852_v14, 0.3  ;;  %v4602_v43 = vunpack.c.l.bf16 %v4597_v0  ;;  %v4600_v62 = vunpack.c.l.bf16 %v4596_v12 }
 0x21c   : > { %v3069_v18 = vpack.c.bf16 %v10418_v56, %v10417_v3  ;;  %v10515_v19 = vsel %vm3860_vm2, 1.0, %v16954_v36  ;;  %v3023_v22 = vadd.f32 %v3015_v48, %v2983_v32  ;;  %3047 = vst [vmem:[#allocation2 + $0x268] sm:$0xff] %v3015_v48  ;;  %v3850_v37 = vadd.f32 %v3842_v4, %v3810_v21  ;;  %3874 = vst [vmem:[#allocation2 + $0x2a8] sm:$0xff] %v3842_v4  ;;  %v13879_v21 = vld [vmem:[%s16932_s2 + $0x10] sm:$0xff]  }
 0x21d   : > { %v3896_v47 = vpack.c.bf16 %v10515_v19, %v10514_v49  ;;  %v4603_v61 = vunpack.c.h.bf16 %v4597_v0  ;;  %v10415_v1 = vsel %vm3030_vm13, 1.0, %v16954_v36  ;;  %v4601_v59 = vunpack.c.h.bf16 %v4596_v12  ;;  %12549 = vmatpush3.bf16.msra.mxu1 %v13879_v21  ;;  %v4583_v21 = vld [vmem:[#allocation2 + $0x118] sm:$0xff] }
 0x21e   : > { %3073 = vst [vmem:[#allocation3 + $0x58] sm:$0xff] %v3069_v18  ;;  %vm3031_vm3 = vcmp.gt.f32.partialorder %v3023_v22, 0.3  ;;  %vm3858_vm0 = vcmp.gt.f32.partialorder %v3850_v37, 0.3  ;;  %v5429_v60 = vunpack.c.l.bf16 %v5424_v38  ;;  %v5427_v26 = vunpack.c.l.bf16 %v5423_v58  ;;  %12550 = vmatprep.subr.bf16.mxu1 %v16954_v36 }
 0x21f   : > { %3900 = vst [vmem:[#allocation3 + $0x78] sm:$0xff] %v3896_v47  ;;  %v10416_v57 = vsel %vm3031_vm3, 1.0, %v16954_v36  ;;  %v10513_v44 = vsel %vm3858_vm0, 1.0, %v16954_v36  ;;  %v5430_v17 = vunpack.c.h.bf16 %v5424_v38  ;;  %v4610_v20 = vsub.f32 1.0, %v4602_v43 }
 0x220   : > { %v3068_v6 = vpack.c.bf16 %v10416_v57, %v10415_v1  ;;  %v3895_v50 = vpack.c.bf16 %v10513_v44, %v10512_v7  ;;  %v4608_v11 = vsub.f32 1.0, %v4600_v62  ;;  %v4611_v53 = vsub.f32 1.0, %v4603_v61  ;;  %v13880_v44 = vld [vmem:[%s16932_s2 + $0x18] sm:$0xff]  }
 0x221   : > { %v5428_v54 = vunpack.c.h.bf16 %v5423_v58  ;;  %v4609_v10 = vsub.f32 1.0, %v4601_v59  ;;  %v5437_v29 = vsub.f32 1.0, %v5429_v60  ;;  %v5435_v5 = vsub.f32 1.0, %v5427_v26  ;;  %12551 = vmatpush3.bf16.msra.mxu1 %v13880_v44  ;;  %v5413_v44 = vld [vmem:[#allocation2 + $0x170] sm:$0xff] }
 0x222   : > { %3072 = vst [vmem:[#allocation3 + $0x50] sm:$0xff] %v3068_v6  ;;  %v15451_v28 = vadd.bf16 %v3069_v18, %v3068_v6  ;;  %3899 = vst [vmem:[#allocation3 + $0x70] sm:$0xff] %v3895_v50  ;;  %v15453_v55 = vadd.bf16 %v3896_v47, %v3895_v50  ;;  %v5438_v34 = vsub.f32 1.0, %v5430_v17  ;;  %v15465_v16 = vmul.f32 0.25, %v4610_v20  ;;  %12552 = vmatprep.subr.bf16.mxu1 %v16954_v36 }
 0x223   : > { %v15467_v30 = vmul.f32 0.15, %v4610_v20  ;;  %v5436_v51 = vsub.f32 1.0, %v5428_v54  ;;  %v15469_v45 = vmul.f32 0.15, %v4608_v11  ;;  %v15471_v15 = vmul.f32 0.25, %v4608_v11 }
 0x224   : > { %16958 = vst [vmem:[#allocation22_spill] sm:$0xff] %v15451_v28  ;;  %16959 = vst [vmem:[#allocation23_spill] sm:$0xff] %v15453_v55  ;;  %v10825_v23 = vcombine.high %v15437_v42, %v15451_v28  ;;  %v10826_v25 = vcombine.high %v15439_v63, %v15453_v55  ;;  %v15473_v35 = vmul.f32 0.25, %v4611_v53  ;;  %v15475_v8 = vmul.f32 0.15, %v4611_v53  ;;  %v4592_v55 = vld [vmem:[#allocation2 + $0x2e0] sm:$0xff] }
 0x225   : > { %v4606_v49 = vunpack.c.l.bf16 %v4599_v31  ;;  %v15477_v9 = vmul.f32 0.25, %v4609_v10  ;;  %v15479_v32 = vmul.f32 0.15, %v4609_v10  ;;  %v5433_v2 = vunpack.c.l.bf16 %v5426_v33  ;;  %v5411_v63 = vld [vmem:[#allocation2 + $0x160] sm:$0xff] }
 0x226   : > { %12525 = vmatmul.mubr.bf16.gmra.mrb[32].mxu1 %v10825_v23  ;;  %v4604_v41 = vunpack.c.l.bf16 %v4598_v40  ;;  %v15484_v14 = vmul.f32 0.25, %v5437_v29  ;;  %v15486_v39 = vmul.f32 0.15, %v5437_v29  ;;  %v15488_v0 = vmul.f32 0.25, %v5435_v5  ;;  %v5419_v28 = vld [vmem:[#allocation2 + $0x320] sm:$0xff] }
 0x227   : > { %12528 = vmatprep.mubr.msk.bf16.mxu1 %vm14064_vm1, %v16954_v36  ;;  %v15490_v12 = vmul.f32 0.15, %v5435_v5  ;;  %v5431_v48 = vunpack.c.l.bf16 %v5425_v52  ;;  %v4607_v3 = vunpack.c.h.bf16 %v4599_v31  ;;  %v4614_v56 = vsub.f32 1.0, %v4606_v49  ;;  %v13881_v5 = vld [vmem:[%s16932_s2 + $0x20] sm:$0xff]   ;;  %v4590_v49 = vld [vmem:[#allocation2 + $0x2d0] sm:$0xff] }
 0x228   : > { %v5434_v4 = vunpack.c.h.bf16 %v5426_v33  ;;  %v4605_v7 = vunpack.c.h.bf16 %v4598_v40  ;;  %v5432_v18 = vunpack.c.h.bf16 %v5425_v52  ;;  %v15493_v19 = vmul.f32 0.15, %v5438_v34  ;;  %12553 = vmatpush3.bf16.msra.mxu1 %v13881_v5  ;;  %v13883_v40 = vld [vmem:[%s16932_s2 + $0x30] sm:$0xff]  }
 0x229   : > { %v5441_v22 = vsub.f32 1.0, %v5433_v2  ;;  %v4612_v38 = vsub.f32 1.0, %v4604_v41  ;;  %v15497_v58 = vmul.f32 0.25, %v5438_v34  ;;  %v15499_v47 = vmul.f32 0.25, %v5436_v51  ;;  %v13882_v34 = vld [vmem:[%s16932_s2 + $0x28] sm:$0xff]   ;;  %12554 = vmatprep.subr.bf16.mxu1 %v16954_v36  ;;  %v4582_v52 = vld [vmem:[#allocation2 + $0x110] sm:$0xff] }
 0x22a   : > { %v15501_v37 = vmul.f32 0.15, %v5436_v51  ;;  %v5439_v43 = vsub.f32 1.0, %v5431_v48  ;;  %v4615_v62 = vsub.f32 1.0, %v4607_v3  ;;  %v15503_v61 = vmul.f32 0.25, %v4614_v56  ;;  %v13884_v51 = vld [vmem:[%s16932_s2 + $0x38] sm:$0xff]  }
 0x22b   : > { %v5442_v1 = vsub.f32 1.0, %v5434_v4  ;;  %v4613_v57 = vsub.f32 1.0, %v4605_v7  ;;  %v5440_v6 = vsub.f32 1.0, %v5432_v18  ;;  %v15508_v59 = vmul.f32 0.15, %v4614_v56  ;;  %v4580_v2 = vld [vmem:[#allocation2 + $0x100] sm:$0xff] }
 0x22c   : > { %v15510_v50 = vmul.f32 0.25, %v5441_v22  ;;  %v15512_v60 = vmul.f32 0.15, %v5441_v22  ;;  %v15514_v26 = vmul.f32 0.25, %v4612_v38  ;;  %v15516_v17 = vmul.f32 0.15, %v4612_v38  ;;  %12555 = vmatpush3.bf16.msra.mxu1 %v13882_v34 }
 0x22d   : > { %v15518_v20 = vmul.f32 0.25, %v5439_v43  ;;  %v15520_v11 = vmul.f32 0.15, %v5439_v43  ;;  %v15522_v53 = vmul.f32 0.25, %v4615_v62  ;;  %v15525_v54 = vmul.f32 0.15, %v4615_v62  ;;  %12556 = vmatprep.subr.bf16.mxu1 %v16954_v36 }
 0x22e   : > { %12529 = vmatmul.mubr.bf16.gmra.mrb[36].mxu1 %v10826_v25  ;;  %v15527_v23 = vmul.f32 0.15, %v5442_v1  ;;  %v15529_v25 = vmul.f32 0.25, %v5442_v1  ;;  %v15531_v10 = vmul.f32 0.25, %v4613_v57  ;;  %v15533_v29 = vmul.f32 0.15, %v4613_v57 }
 0x22f   : > { %12532 = vmatprep.mubr.msk.bf16.mxu1 %vm14064_vm1, %v16954_v36  ;;  %v15535_v31 = vmul.f32 0.15, %v5440_v6  ;;  %v15544_v33 = vmul.f32 0.25, %v5440_v6  ;;  %v4588_v41 = vld [vmem:[#allocation2 + $0x2c0] sm:$0xff]  ;;  %v4591_v48 = vld [vmem:[#allocation2 + $0x2d8] sm:$0xff]  ;;  %v4581_v3 = vld [vmem:[#allocation2 + $0x108] sm:$0xff]  ;;  %v4626_v34 = vmul.f32 %v15465_v16, %v4582_v52  ;;  %v4627_v42 = vmul.f32 %v15473_v35, %v4583_v21 }
 0x230   : > { %12557 = vmatpush3.bf16.msra.mxu1 %v13883_v40  ;;  %v4589_v56 = vld [vmem:[#allocation2 + $0x2c8] sm:$0xff]  ;;  %v5409_v4 = vld [vmem:[#allocation2 + $0x150] sm:$0xff]  ;;  %v5407_v18 = vld [vmem:[#allocation2 + $0x140] sm:$0xff]  ;;  %v4650_v40 = vmul.f32 %v15467_v30, %v4590_v49  ;;  %v4648_v46 = vmul.f32 %v15469_v45, %v4588_v41  ;;  %v4651_v13 = vmul.f32 %v15475_v8, %v4591_v48  ;;  %v4625_v27 = vmul.f32 %v15477_v9, %v4581_v3 }
 0x231   : > { %16960 = vst [vmem:[#allocation24_spill] sm:$0xff] %v15535_v31  ;;  %12558 = vmatprep.subr.bf16.mxu1 %v16954_v36  ;;  %v5417_v7 = vld [vmem:[#allocation2 + $0x310] sm:$0xff]  ;;  %v5415_v22 = vld [vmem:[#allocation2 + $0x300] sm:$0xff]  ;;  %v5410_v38 = vld [vmem:[#allocation2 + $0x158] sm:$0xff]  ;;  %v15563_v31 = vmul.f32 %v15479_v32, %v4589_v56 }
 0x232   : > { %v5418_v43 = vld [vmem:[#allocation2 + $0x318] sm:$0xff]  ;;  %v5408_v62 = vld [vmem:[#allocation2 + $0x148] sm:$0xff]  ;;  %v4586_v57 = vld [vmem:[#allocation2 + $0x130] sm:$0xff]  ;;  %v5477_v45 = vmul.f32 %v15486_v39, %v5417_v7  ;;  %v15569_v41 = vmul.f32 %v15490_v12, %v5415_v22  ;;  %v5454_v9 = vmul.f32 %v15497_v58, %v5410_v38  ;;  %v15595_v58 = vmul.f32 %v15516_v17, %v4592_v55 }
 0x233   : > { %v5416_v1 = vld [vmem:[#allocation2 + $0x308] sm:$0xff]  ;;  %v4594_v6 = vld [vmem:[#allocation2 + $0x2f0] sm:$0xff]  ;;  %v4587_v16 = vld [vmem:[#allocation2 + $0x138] sm:$0xff]  ;;  %v15573_v32 = vmul.f32 %v15493_v19, %v5418_v43  ;;  %v5452_v21 = vmul.f32 %v15499_v47, %v5408_v62  ;;  %v15592_v19 = vmul.f32 %v15514_v26, %v4584_v24  ;;  %v15598_v47 = vmul.f32 %v15518_v20, %v5411_v63 }
 0x234   : > { %12559 = vmatpush3.bf16.msra.mxu1 %v13884_v51  ;;  %v5421_v5 = vld [vmem:[#allocation2 + $0x330] sm:$0xff]  ;;  %v4624_v51 = vmul.f32 %v15471_v15, %v4580_v2  ;;  %v4595_v52 = vld [vmem:[#allocation2 + $0x2f8] sm:$0xff]  ;;  %v5453_v15 = vmul.f32 %v15484_v14, %v5409_v4  ;;  %v5451_v2 = vmul.f32 %v15488_v0, %v5407_v18  ;;  %v4585_v35 = vld [vmem:[#allocation2 + $0x128] sm:$0xff]  ;;  %v15577_v48 = vmul.f32 %v15501_v37, %v5416_v1 }
 0x235   : > { %12660 = vmatprep.subr.bf16.mxu1 %v16954_v36  ;;  %v5414_v30 = vld [vmem:[#allocation2 + $0x178] sm:$0xff]  ;;  %v5412_v8 = vld [vmem:[#allocation2 + $0x168] sm:$0xff]  ;;  %v15580_v14 = vmul.f32 %v15503_v61, %v4586_v57  ;;  %v15583_v39 = vmul.f32 %v15508_v59, %v4594_v6  ;;  %v15586_v0 = vmul.f32 %v15510_v50, %v5413_v44  ;;  %v15589_v12 = vmul.f32 %v15512_v60, %v5421_v5 }
 0x236   : > { %v5422_v49 = vld [vmem:[#allocation2 + $0x338] sm:$0xff]  ;;  %v15601_v37 = vmul.f32 %v15520_v11, %v5419_v28  ;;  %v15604_v59 = vmul.f32 %v15522_v53, %v4587_v16  ;;  %v15607_v50 = vmul.f32 %v15525_v54, %v4595_v52  ;;  %v15610_v60 = vmul.f32 %v15529_v25, %v5414_v30 }
 0x237   : > { %v15613_v24 = vmul.f32 %v15527_v23, %v5422_v49  ;;  %v15616_v28 = vmul.f32 %v15531_v10, %v4585_v35  ;;  %v15619_v20 = vmul.f32 %v15544_v33, %v5412_v8 }
 0x252   : > { %v12334_v61 = vpop.f32.mrb[16].mxu0 }
 0x253   : > { %v4634_v55 = vadd.f32 %v12334_v61, %v4626_v34  ;;  %v4658_v26 = vmul.f32 0.4, %v12334_v61  ;;  %v4541_v63 = vpop.f32.mrb[17].mxu0  ;;  %v12414_v17 = vpop.f32.mrb[16].mxu1 }
 0x254   : > { %v4632_v11 = vadd.f32 %v4624_v51, %v4541_v63  ;;  %v4656_v53 = vmul.f32 0.4, %v4541_v63  ;;  %v12335_v54 = vpop.f32.mrb[18].mxu0  ;;  %v5461_v3 = vadd.f32 %v12414_v17, %v5453_v15  ;;  %v5485_v56 = vmul.f32 0.4, %v12414_v17  ;;  %v5368_v25 = vpop.f32.mrb[17].mxu1 }
 0x255   : > { %v4666_v4 = vadd.f32 %v4658_v26, %v4650_v40  ;;  %4690 = vst [vmem:[#allocation2 + $0x110] sm:$0xff] %v4634_v55  ;;  %v4635_v23 = vadd.f32 %v12335_v54, %v4627_v42  ;;  %v4659_v7 = vmul.f32 0.4, %v12335_v54  ;;  %v4544_v18 = vpop.f32.mrb[19].mxu0  ;;  %v5459_v22 = vadd.f32 %v5451_v2, %v5368_v25  ;;  %v12415_v38 = vpop.f32.mrb[18].mxu1 }
 0x256   : > { %v4664_v43 = vadd.f32 %v4656_v53, %v4648_v46  ;;  %4688 = vst [vmem:[#allocation2 + $0x100] sm:$0xff] %v4632_v11  ;;  %v4633_v10 = vadd.f32 %v4625_v27, %v4544_v18  ;;  %v4657_v62 = vmul.f32 0.4, %v4544_v18  ;;  %v5493_v1 = vadd.f32 %v5485_v56, %v5477_v45  ;;  %5517 = vst [vmem:[#allocation2 + $0x150] sm:$0xff] %v5461_v3  ;;  %v5371_v33 = vpop.f32.mrb[19].mxu1 }
 0x257   : > { %v4674_v57 = vadd.f32 %v4666_v4, %v4634_v55  ;;  %4698 = vst [vmem:[#allocation2 + $0x2d0] sm:$0xff] %v4666_v4  ;;  %v4667_v6 = vadd.f32 %v4659_v7, %v4651_v13  ;;  %4691 = vst [vmem:[#allocation2 + $0x118] sm:$0xff] %v4635_v23  ;;  %v5483_v44 = vmul.f32 0.4, %v5368_v25  ;;  %v5462_v5 = vadd.f32 %v12415_v38, %v5454_v9 }
 0x258   : > { %5515 = vst [vmem:[#allocation2 + $0x140] sm:$0xff] %v5459_v22  ;;  %v4672_v34 = vadd.f32 %v4664_v43, %v4632_v11  ;;  %4696 = vst [vmem:[#allocation2 + $0x2c0] sm:$0xff] %v4664_v43  ;;  %v4665_v42 = vadd.f32 %v4657_v62, %v15563_v31  ;;  %v5501_v40 = vadd.f32 %v5493_v1, %v5461_v3  ;;  %v5486_v46 = vmul.f32 0.4, %v12415_v38  ;;  %v4593_v43 = vld [vmem:[#allocation2 + $0x2e8] sm:$0xff] }
 0x259   : > { %4689 = vst [vmem:[#allocation2 + $0x108] sm:$0xff] %v4633_v10  ;;  %5525 = vst [vmem:[#allocation2 + $0x310] sm:$0xff] %v5493_v1  ;;  %vm4682_vm4 = vcmp.gt.f32.partialorder %v4674_v57, 0.3  ;;  %v4675_v27 = vadd.f32 %v4667_v6, %v4635_v23  ;;  %v5491_v51 = vadd.f32 %v5483_v44, %v15569_v41  ;;  %v5460_v16 = vadd.f32 %v5452_v21, %v5371_v33 }
 0x25a   : > { %4699 = vst [vmem:[#allocation2 + $0x2d8] sm:$0xff] %v4667_v6  ;;  %5518 = vst [vmem:[#allocation2 + $0x158] sm:$0xff] %v5462_v5  ;;  %v10607_v13 = vsel %vm4682_vm4, 1.0, %v16954_v36  ;;  %vm4680_vm5 = vcmp.gt.f32.partialorder %v4672_v34, 0.3  ;;  %v4673_v52 = vadd.f32 %v4665_v42, %v4633_v10  ;;  %v12338_v30 = vpop.f32.mrb[20].mxu0  ;;  %v5494_v35 = vadd.f32 %v5486_v46, %v15573_v32 }
 0x25b   : > { %4697 = vst [vmem:[#allocation2 + $0x2c8] sm:$0xff] %v4665_v42  ;;  %vm5509_vm6 = vcmp.gt.f32.partialorder %v5501_v40, 0.3  ;;  %v10605_v31 = vsel %vm4680_vm5, 1.0, %v16954_v36  ;;  %vm4683_vm7 = vcmp.gt.f32.partialorder %v4675_v27, 0.3  ;;  %v5499_v15 = vadd.f32 %v5491_v51, %v5459_v22 }
 0x25c   : > { %v10704_v49 = vsel %vm5509_vm6, 1.0, %v16954_v36  ;;  %5523 = vst [vmem:[#allocation2 + $0x300] sm:$0xff] %v5491_v51  ;;  %5516 = vst [vmem:[#allocation2 + $0x148] sm:$0xff] %v5460_v16  ;;  %v12418_v45 = vpop.f32.mrb[20].mxu1  ;;  %v4557_v2 = vpop.f32.mrb[21].mxu0  ;;  %v10608_v41 = vsel %vm4683_vm7, 1.0, %v16954_v36  ;;  %v4638_v55 = vadd.f32 %v12338_v30, %v15580_v14  ;;  %v5502_v53 = vadd.f32 %v5494_v35, %v5462_v5 }
 0x25d   : > { %vm4681_vm8 = vcmp.gt.f32.partialorder %v4673_v52, 0.3  ;;  %v5484_v8 = vmul.f32 0.4, %v5371_v33  ;;  %v5384_v9 = vpop.f32.mrb[21].mxu1  ;;  %v15628_v21 = vpack.c.bf16 %v10608_v41, %v10607_v13  ;;  %v12339_v26 = vpop.f32.mrb[22].mxu0  ;;  %v5465_v25 = vadd.f32 %v12418_v45, %v15586_v0 }
 0x25e   : > { %v10606_v61 = vsel %vm4681_vm8, 1.0, %v16954_v36  ;;  %vm5507_vm9 = vcmp.gt.f32.partialorder %v5499_v15, 0.3  ;;  %v12419_v63 = vpop.f32.mrb[22].mxu1  ;;  %5526 = vst [vmem:[#allocation2 + $0x318] sm:$0xff] %v5494_v35  ;;  %v4560_v32 = vpop.f32.mrb[23].mxu0  ;;  %v4636_v14 = vadd.f32 %v15592_v19, %v4557_v2  ;;  %v5463_v18 = vadd.f32 %v15598_v47, %v5384_v9 }
 0x25f   : > { %v15632_v17 = vpack.c.bf16 %v10606_v61, %v10605_v31  ;;  %v10702_v11 = vsel %vm5507_vm9, 1.0, %v16954_v36  ;;  %v5492_v54 = vadd.f32 %v5484_v8, %v15577_v48  ;;  %v5387_v3 = vpop.f32.mrb[23].mxu1  ;;  %4725 = vst [vmem:[#allocation3 + $0x88] sm:$0xff] %v15628_v21  ;;  %v4662_v56 = vmul.f32 0.4, %v12338_v30  ;;  %4694 = vst [vmem:[#allocation2 + $0x130] sm:$0xff] %v4638_v55 }
 0x260   : > { %v5489_v4 = vmul.f32 0.4, %v12418_v45  ;;  %vm5510_vm10 = vcmp.gt.f32.partialorder %v5502_v53, 0.3  ;;  %v4660_v7 = vmul.f32 0.4, %v4557_v2  ;;  %v4639_v62 = vadd.f32 %v12339_v26, %v15604_v59 }
 0x261   : > { %4724 = vst [vmem:[#allocation3 + $0x80] sm:$0xff] %v15632_v17  ;;  %v5500_v23 = vadd.f32 %v5492_v54, %v5460_v16  ;;  %5524 = vst [vmem:[#allocation2 + $0x308] sm:$0xff] %v5492_v54  ;;  %v10705_v48 = vsel %vm5510_vm10, 1.0, %v16954_v36  ;;  %v4670_v22 = vadd.f32 %v4662_v56, %v15583_v39  ;;  %v5487_v0 = vmul.f32 0.4, %v5384_v9  ;;  %v16961_v42 = vld [vmem:[#allocation24_spill] sm:$0xff] }
 0x262   : > { %v5497_v38 = vadd.f32 %v5489_v4, %v15589_v12  ;;  %5521 = vst [vmem:[#allocation2 + $0x170] sm:$0xff] %v5465_v25  ;;  %4692 = vst [vmem:[#allocation2 + $0x120] sm:$0xff] %v4636_v14  ;;  %v5548_v10 = vpack.c.bf16 %v10705_v48, %v10704_v49  ;;  %v4668_v19 = vadd.f32 %v4660_v7, %v15595_v58  ;;  %v5420_v12 = vld [vmem:[#allocation2 + $0x328] sm:$0xff]  ;;  %v4663_v44 = vmul.f32 0.4, %v12339_v26  ;;  %v13892_v56 = vld [vmem:[%s16933_s3 + $0x50] sm:$0xff]  }
 0x263   : > { %vm5508_vm11 = vcmp.gt.f32.partialorder %v5500_v23, 0.3  ;;  %5519 = vst [vmem:[#allocation2 + $0x160] sm:$0xff] %v5463_v18  ;;  %v4678_v47 = vadd.f32 %v4670_v22, %v4638_v55  ;;  %4702 = vst [vmem:[#allocation2 + $0x2f0] sm:$0xff] %v4670_v22  ;;  %v5495_v39 = vadd.f32 %v5487_v0, %v15601_v37  ;;  %v5466_v58 = vadd.f32 %v12419_v63, %v15610_v60  ;;  %v6251_v4 = vld [vmem:[#allocation3 + $0xc8] sm:$0xff] }
 0x264   : > { %v10703_v1 = vsel %vm5508_vm11, 1.0, %v16954_v36  ;;  %v5505_v33 = vadd.f32 %v5497_v38, %v5465_v25  ;;  %5529 = vst [vmem:[#allocation2 + $0x330] sm:$0xff] %v5497_v38  ;;  %5552 = vst [vmem:[#allocation3 + $0xa8] sm:$0xff] %v5548_v10  ;;  %v4676_v6 = vadd.f32 %v4668_v19, %v4636_v14  ;;  %v5490_v59 = vmul.f32 0.4, %v12419_v63  ;;  %v13894_v25 = vld [vmem:[%s16933_s3 + $0x58] sm:$0xff]  }
 0x265   : > { %v5547_v57 = vpack.c.bf16 %v10703_v1, %v10702_v11  ;;  %4700 = vst [vmem:[#allocation2 + $0x2e0] sm:$0xff] %v4668_v19  ;;  %4695 = vst [vmem:[#allocation2 + $0x138] sm:$0xff] %v4639_v62  ;;  %v5503_v5 = vadd.f32 %v5495_v39, %v5463_v18  ;;  %vm4686_vm13 = vcmp.gt.f32.partialorder %v4678_v47, 0.3  ;;  %v4671_v34 = vadd.f32 %v4663_v44, %v15607_v50  ;;  %v6250_v14 = vld [vmem:[#allocation3 + $0xc0] sm:$0xff]  ;;  %v6253_v18 = vld [vmem:[#allocation3 + $0xd8] sm:$0xff] }
 0x266   : > { %vm5513_vm12 = vcmp.gt.f32.partialorder %v5505_v33, 0.3  ;;  %5527 = vst [vmem:[#allocation2 + $0x320] sm:$0xff] %v5495_v39  ;;  %5522 = vst [vmem:[#allocation2 + $0x178] sm:$0xff] %v5466_v58  ;;  %v4653_v37 = vmul.f32 %v15533_v29, %v4593_v43  ;;  %v5480_v40 = vmul.f32 %v16961_v42, %v5420_v12  ;;  %vm4684_vm14 = vcmp.gt.f32.partialorder %v4676_v6, 0.3 }
 0x267   : > { %5551 = vst [vmem:[#allocation3 + $0xa0] sm:$0xff] %v5547_v57  ;;  %v10708_v46 = vsel %vm5513_vm12, 1.0, %v16954_v36  ;;  %v5498_v27 = vadd.f32 %v5490_v59, %v15613_v24  ;;  %v4637_v60 = vadd.f32 %v15616_v28, %v4560_v32  ;;  %vm5511_vm15 = vcmp.gt.f32.partialorder %v5503_v5, 0.3  ;;  %4703 = vst [vmem:[#allocation2 + $0x2f8] sm:$0xff] %v4671_v34  ;;  %v6252_v43 = vld [vmem:[#allocation3 + $0xd0] sm:$0xff] }
 0x268   : > { %v4679_v51 = vadd.f32 %v4671_v34, %v4639_v62  ;;  %v4661_v16 = vmul.f32 0.4, %v4560_v32  ;;  %v5464_v13 = vadd.f32 %v15619_v20, %v5387_v3  ;;  %v5488_v50 = vmul.f32 0.4, %v5387_v3  ;;  %v13889_v32 = vld [vmem:[%s16933_s3 + $0x40] sm:$0xff]   ;;  %v13890_v3 = vld [vmem:[%s16933_s3 + $0x48] sm:$0xff]  }
 0x269   : > { %v5506_v52 = vadd.f32 %v5498_v27, %v5466_v58  ;;  %5530 = vst [vmem:[#allocation2 + $0x338] sm:$0xff] %v5498_v27  ;;  %4693 = vst [vmem:[#allocation2 + $0x128] sm:$0xff] %v4637_v60  ;;  %v15658_v29 = vadd.bf16 %v15628_v21, %v15632_v17  ;;  %v15660_v30 = vadd.bf16 %v5548_v10, %v5547_v57  ;;  %v10611_v28 = vsel %vm4686_vm13, 1.0, %v16954_v36  ;;  %v6236_v39 = vld [vmem:[#allocation2 + $0x190] sm:$0xff]  ;;  %v6234_v6 = vld [vmem:[#allocation2 + $0x180] sm:$0xff] }
 0x26a   : > { %vm4687_vm2 = vcmp.gt.f32.partialorder %v4679_v51, 0.3  ;;  %v4669_v24 = vadd.f32 %v4661_v16, %v4653_v37  ;;  %5520 = vst [vmem:[#allocation2 + $0x168] sm:$0xff] %v5464_v13  ;;  %v5496_v20 = vadd.f32 %v5488_v50, %v5480_v40  ;;  %v10706_v49 = vsel %vm5511_vm15, 1.0, %v16954_v36  ;;  %12589 = vmatpush3.bf16.msra.mxu0 %v13889_v32  ;;  %v6244_v12 = vld [vmem:[#allocation2 + $0x350] sm:$0xff]  ;;  %v6242_v5 = vld [vmem:[#allocation2 + $0x340] sm:$0xff] }
 0x26b   : > { %v10612_v31 = vsel %vm4687_vm2, 1.0, %v16954_v36  ;;  %vm5514_vm3 = vcmp.gt.f32.partialorder %v5506_v52, 0.3  ;;  %v10609_v8 = vsel %vm4684_vm14, 1.0, %v16954_v36  ;;  %12590 = vmatprep.subr.bf16.mxu0 %v16954_v36  ;;  %v6256_v23 = vunpack.c.l.bf16 %v6251_v4  ;;  %v6237_v40 = vld [vmem:[#allocation2 + $0x198] sm:$0xff]  ;;  %v6243_v52 = vld [vmem:[#allocation2 + $0x348] sm:$0xff] }
 0x26c   : > { %v4723_v15 = vpack.c.bf16 %v10612_v31, %v10611_v28  ;;  %v10709_v45 = vsel %vm5514_vm3, 1.0, %v16954_v36  ;;  %v4677_v2 = vadd.f32 %v4669_v24, %v4637_v60  ;;  %4701 = vst [vmem:[#allocation2 + $0x2e8] sm:$0xff] %v4669_v24  ;;  %v5504_v35 = vadd.f32 %v5496_v20, %v5464_v13  ;;  %5528 = vst [vmem:[#allocation2 + $0x328] sm:$0xff] %v5496_v20  ;;  %v6235_v13 = vld [vmem:[#allocation2 + $0x188] sm:$0xff]  ;;  %v6240_v31 = vld [vmem:[#allocation2 + $0x1b0] sm:$0xff] }
 0x26d   : > { %v5550_v41 = vpack.c.bf16 %v10709_v45, %v10708_v46  ;;  %v6254_v7 = vunpack.c.l.bf16 %v6250_v14  ;;  %v6257_v48 = vunpack.c.h.bf16 %v6251_v4  ;;  %v6255_v22 = vunpack.c.h.bf16 %v6250_v14  ;;  %v6245_v46 = vld [vmem:[#allocation2 + $0x358] sm:$0xff] }
 0x26e   : > { %4727 = vst [vmem:[#allocation3 + $0x98] sm:$0xff] %v4723_v15  ;;  %vm4685_vm0 = vcmp.gt.f32.partialorder %v4677_v2, 0.3  ;;  %vm5512_vm4 = vcmp.gt.f32.partialorder %v5504_v35, 0.3  ;;  %12591 = vmatpush3.bf16.msra.mxu0 %v13890_v3  ;;  %v6264_v38 = vsub.f32 1.0, %v6256_v23  ;;  %v6260_v0 = vunpack.c.l.bf16 %v6253_v18 }
 0x26f   : > { %5554 = vst [vmem:[#allocation3 + $0xb8] sm:$0xff] %v5550_v41  ;;  %v10610_v9 = vsel %vm4685_vm0, 1.0, %v16954_v36  ;;  %v10707_v61 = vsel %vm5512_vm4, 1.0, %v16954_v36  ;;  %12592 = vmatprep.subr.bf16.mxu0 %v16954_v36  ;;  %v6262_v10 = vsub.f32 1.0, %v6254_v7  ;;  %v6265_v19 = vsub.f32 1.0, %v6257_v48  ;;  %v6238_v3 = vld [vmem:[#allocation2 + $0x1a0] sm:$0xff] }
 0x270   : > { %v4722_v21 = vpack.c.bf16 %v10610_v9, %v10609_v8  ;;  %v5549_v55 = vpack.c.bf16 %v10707_v61, %v10706_v49  ;;  %v6263_v62 = vsub.f32 1.0, %v6255_v22  ;;  %v6258_v1 = vunpack.c.l.bf16 %v6252_v43  ;;  %v6248_v9 = vld [vmem:[#allocation2 + $0x370] sm:$0xff] }
 0x271   : > { %v6272_v47 = vmul.f32 0.25, %v6264_v38  ;;  %v6268_v33 = vsub.f32 1.0, %v6260_v0  ;;  %v6296_v57 = vmul.f32 0.15, %v6264_v38  ;;  %v6270_v44 = vmul.f32 0.25, %v6262_v10  ;;  %v6246_v0 = vld [vmem:[#allocation2 + $0x360] sm:$0xff] }
 0x272   : > { %4726 = vst [vmem:[#allocation3 + $0x90] sm:$0xff] %v4722_v21  ;;  %v15672_v26 = vadd.bf16 %v4723_v15, %v4722_v21  ;;  %5553 = vst [vmem:[#allocation3 + $0xb0] sm:$0xff] %v5549_v55  ;;  %v15674_v63 = vadd.bf16 %v5550_v41, %v5549_v55  ;;  %12593 = vmatpush3.bf16.msra.mxu0 %v13892_v56  ;;  %v6261_v58 = vunpack.c.h.bf16 %v6253_v18  ;;  %v6294_v59 = vmul.f32 0.15, %v6262_v10 }
 0x273   : > { %12594 = vmatprep.subr.bf16.mxu0 %v16954_v36  ;;  %v6273_v34 = vmul.f32 0.25, %v6265_v19  ;;  %v6297_v37 = vmul.f32 0.15, %v6265_v19  ;;  %v6259_v42 = vunpack.c.h.bf16 %v6252_v43  ;;  %v6271_v27 = vmul.f32 0.25, %v6263_v62  ;;  %v6241_v43 = vld [vmem:[#allocation2 + $0x1b8] sm:$0xff] }
 0x274   : > { %v10827_v17 = vcombine.high %v15658_v29, %v15672_v26  ;;  %v10842_v11 = vcombine.low %v15658_v29, %v15672_v26  ;;  %v10828_v53 = vcombine.high %v15660_v30, %v15674_v63  ;;  %v10843_v54 = vcombine.low %v15660_v30, %v15674_v63  ;;  %v13896_v29 = vld [vmem:[%s16933_s3 + $0x1b0] sm:$0xff]   ;;  %v13897_v30 = vld [vmem:[%s16933_s3 + $0x68] sm:$0xff]   ;;  %v13899_v63 = vld [vmem:[%s16933_s3 + $0x1b8] sm:$0xff]  }
 0x275   : > { %v6295_v60 = vmul.f32 0.15, %v6263_v62  ;;  %v6266_v51 = vsub.f32 1.0, %v6258_v1  ;;  %v6280_v16 = vmul.f32 %v6272_v47, %v6236_v39  ;;  %v6276_v50 = vmul.f32 0.25, %v6268_v33  ;;  %v6249_v47 = vld [vmem:[#allocation2 + $0x378] sm:$0xff]  ;;  %v13898_v26 = vld [vmem:[%s16933_s3 + $0x70] sm:$0xff]  }
 0x276   : > { %12533 = vmatmul.mubr.bf16.gmra.mrb[40].mxu1 %v10827_v17  ;;  %12595 = vmatpush3.bf16.msra.mxu0 %v13894_v25  ;;  %v6304_v24 = vmul.f32 %v6296_v57, %v6244_v12  ;;  %v6278_v28 = vmul.f32 %v6270_v44, %v6234_v6  ;;  %v6269_v20 = vsub.f32 1.0, %v6261_v58  ;;  %v6302_v49 = vmul.f32 %v6294_v59, %v6242_v5  ;;  %v6247_v58 = vld [vmem:[#allocation2 + $0x368] sm:$0xff] }
 0x277   : > { %12536 = vmatprep.mubr.msk.bf16.mxu1 %vm14064_vm1, %v16954_v36  ;;  %12596 = vmatprep.subr.bf16.mxu0 %v16954_v36  ;;  %v6281_v15 = vmul.f32 %v6273_v34, %v6237_v40  ;;  %v6305_v45 = vmul.f32 %v6297_v37, %v6245_v46  ;;  %v6267_v2 = vsub.f32 1.0, %v6259_v42  ;;  %v6279_v35 = vmul.f32 %v6271_v27, %v6235_v13 }
 0x278   : > { %v6303_v8 = vmul.f32 %v6295_v60, %v6243_v52  ;;  %v6300_v21 = vmul.f32 0.15, %v6268_v33  ;;  %v6274_v61 = vmul.f32 0.25, %v6266_v51  ;;  %v6284_v32 = vmul.f32 %v6276_v50, %v6240_v31  ;;  %v6239_v33 = vld [vmem:[#allocation2 + $0x1a8] sm:$0xff] }
 0x279   : > { %v6298_v56 = vmul.f32 0.15, %v6266_v51  ;;  %v6277_v23 = vmul.f32 0.25, %v6269_v20  ;;  %v6301_v7 = vmul.f32 0.15, %v6269_v20  ;;  %v6275_v10 = vmul.f32 0.25, %v6267_v2 }
 0x27a   : > { %v6299_v39 = vmul.f32 0.15, %v6267_v2  ;;  %v6308_v6 = vmul.f32 %v6300_v21, %v6248_v9  ;;  %v6282_v44 = vmul.f32 %v6274_v61, %v6238_v3 }
 0x27b   : > { %v6306_v34 = vmul.f32 %v6298_v56, %v6246_v0  ;;  %v6285_v37 = vmul.f32 %v6277_v23, %v6241_v43  ;;  %v6309_v40 = vmul.f32 %v6301_v7, %v6249_v47  ;;  %v6283_v46 = vmul.f32 %v6275_v10, %v6239_v33  ;;  %v13885_v10 = vld [vmem:[%s16933_s3 + $0x180] sm:$0xff]   ;;  %v13886_v47 = vld [vmem:[%s16933_s3 + $0x188] sm:$0xff]   ;;  %v13887_v33 = vld [vmem:[%s16933_s3 + $0x190] sm:$0xff]  }
 0x27e   : > { %12537 = vmatmul.mubr.bf16.gmra.mrb[44].mxu1 %v10828_v53 }
 0x27f   : > { %12540 = vmatprep.mubr.msk.bf16.mxu1 %vm14064_vm1, %v16954_v36 }
 0x2a2   : > { %v12494_v41 = vpop.f32.mrb[24].mxu0 }
 0x2a3   : > { %v6288_v55 = vadd.f32 %v12494_v41, %v6280_v16  ;;  %v6312_v17 = vmul.f32 0.4, %v12494_v41  ;;  %v6195_v53 = vpop.f32.mrb[25].mxu0  ;;  %v6307_v16 = vmul.f32 %v6299_v39, %v6247_v58  ;;  %v16965_v39 = vld [vmem:[#allocation17_spill] sm:$0xff]  ;;  %v16968_v58 = vld [vmem:[#allocation20_spill] sm:$0xff] }
 0x2a4   : > { %v6286_v25 = vadd.f32 %v6278_v28, %v6195_v53  ;;  %v6310_v4 = vmul.f32 0.4, %v6195_v53  ;;  %v12495_v14 = vpop.f32.mrb[26].mxu0 }
 0x2a5   : > { %v6320_v18 = vadd.f32 %v6312_v17, %v6304_v24  ;;  %6344 = vst [vmem:[#allocation2 + $0x190] sm:$0xff] %v6288_v55  ;;  %v6289_v48 = vadd.f32 %v12495_v14, %v6281_v15  ;;  %v6313_v22 = vmul.f32 0.4, %v12495_v14  ;;  %v6198_v38 = vpop.f32.mrb[27].mxu0 }
 0x2a6   : > { %v6318_v19 = vadd.f32 %v6310_v4, %v6302_v49  ;;  %6342 = vst [vmem:[#allocation2 + $0x180] sm:$0xff] %v6286_v25  ;;  %v6287_v62 = vadd.f32 %v6279_v35, %v6198_v38  ;;  %v6311_v1 = vmul.f32 0.4, %v6198_v38 }
 0x2a7   : > { %v6328_v12 = vadd.f32 %v6320_v18, %v6288_v55  ;;  %6352 = vst [vmem:[#allocation2 + $0x350] sm:$0xff] %v6320_v18  ;;  %v6321_v57 = vadd.f32 %v6313_v22, %v6305_v45  ;;  %6345 = vst [vmem:[#allocation2 + $0x198] sm:$0xff] %v6289_v48 }
 0x2a8   : > { %v6326_v5 = vadd.f32 %v6318_v19, %v6286_v25  ;;  %6350 = vst [vmem:[#allocation2 + $0x340] sm:$0xff] %v6318_v19  ;;  %v6319_v59 = vadd.f32 %v6311_v1, %v6303_v8  ;;  %6343 = vst [vmem:[#allocation2 + $0x188] sm:$0xff] %v6287_v62  ;;  %v16962_v19 = vld [vmem:[#allocation16_spill] sm:$0xff] }
 0x2a9   : > { %vm6336_vm5 = vcmp.gt.f32.partialorder %v6328_v12, 0.3  ;;  %v6329_v42 = vadd.f32 %v6321_v57, %v6289_v48  ;;  %6353 = vst [vmem:[#allocation2 + $0x358] sm:$0xff] %v6321_v57  ;;  %v16966_v12 = vld [vmem:[#allocation19_spill] sm:$0xff] }
 0x2aa   : > { %v10801_v27 = vsel %vm6336_vm5, 1.0, %v16954_v36  ;;  %vm6334_vm6 = vcmp.gt.f32.partialorder %v6326_v5, 0.3  ;;  %v6327_v60 = vadd.f32 %v6319_v59, %v6287_v62  ;;  %6351 = vst [vmem:[#allocation2 + $0x348] sm:$0xff] %v6319_v59  ;;  %v12498_v51 = vpop.f32.mrb[28].mxu0  ;;  %v16963_v62 = vld [vmem:[#allocation18_spill] sm:$0xff]  ;;  %v16967_v57 = vcombine.low %v16965_v39, %v16966_v12 }
 0x2ab   : > { %v10799_v13 = vsel %vm6334_vm6, 1.0, %v16954_v36  ;;  %vm6337_vm7 = vcmp.gt.f32.partialorder %v6329_v42, 0.3  ;;  %v6292_v52 = vadd.f32 %v12498_v51, %v6284_v32  ;;  %v6316_v50 = vmul.f32 0.4, %v12498_v51  ;;  %v6211_v24 = vpop.f32.mrb[29].mxu0 }
 0x2ac   : > { %v10802_v28 = vsel %vm6337_vm7, 1.0, %v16954_v36  ;;  %vm6335_vm8 = vcmp.gt.f32.partialorder %v6327_v60, 0.3  ;;  %v6290_v31 = vadd.f32 %v6282_v44, %v6211_v24  ;;  %v6314_v20 = vmul.f32 0.4, %v6211_v24  ;;  %v12499_v49 = vpop.f32.mrb[30].mxu0 }
 0x2ad   : > { %v6375_v15 = vpack.c.bf16 %v10802_v28, %v10801_v27  ;;  %v10800_v45 = vsel %vm6335_vm8, 1.0, %v16954_v36  ;;  %v6324_v2 = vadd.f32 %v6316_v50, %v6308_v6  ;;  %6348 = vst [vmem:[#allocation2 + $0x1b0] sm:$0xff] %v6292_v52  ;;  %v6293_v41 = vadd.f32 %v12499_v49, %v6285_v37  ;;  %v6214_v35 = vpop.f32.mrb[31].mxu0  ;;  %v13888_v6 = vld [vmem:[%s16933_s3 + $0x198] sm:$0xff]   ;;  %v13891_v44 = vld [vmem:[%s16933_s3 + $0x1a0] sm:$0xff]   ;;  %v16971_v37 = vld [vmem:[#allocation21_spill] sm:$0xff] }
 0x2ae   : > { %v6374_v8 = vpack.c.bf16 %v10800_v45, %v10799_v13  ;;  %v6322_v9 = vadd.f32 %v6314_v20, %v6306_v34  ;;  %6346 = vst [vmem:[#allocation2 + $0x1a0] sm:$0xff] %v6290_v31  ;;  %v6317_v21 = vmul.f32 0.4, %v12499_v49  ;;  %v6291_v61 = vadd.f32 %v6283_v46, %v6214_v35  ;;  %v16969_v5 = vld [vmem:[#allocation22_spill] sm:$0xff]  ;;  %v13893_v34 = vld [vmem:[%s16933_s3 + $0x1a8] sm:$0xff]   ;;  %v16972_v42 = vld [vmem:[#allocation23_spill] sm:$0xff] }
 0x2af   : > { %6379 = vst [vmem:[#allocation3 + $0xc8] sm:$0xff] %v6375_v15  ;;  %v6332_v55 = vadd.f32 %v6324_v2, %v6292_v52  ;;  %6356 = vst [vmem:[#allocation2 + $0x370] sm:$0xff] %v6324_v2  ;;  %v6315_v17 = vmul.f32 0.4, %v6214_v35  ;;  %v16964_v1 = vcombine.low %v16962_v19, %v16963_v62  ;;  %v16970_v59 = vcombine.low %v16968_v58, %v16969_v5  ;;  %v13895_v46 = vld [vmem:[%s16933_s3 + $0x60] sm:$0xff]   ;;  %v6816_v49 = vld [vmem:[#allocation4 + $0x70] sm:$0xff] }
 0x2b0   : > { %6349 = vst [vmem:[#allocation2 + $0x1b8] sm:$0xff] %v6293_v41  ;;  %6378 = vst [vmem:[#allocation3 + $0xc0] sm:$0xff] %v6374_v8  ;;  %v6330_v53 = vadd.f32 %v6322_v9, %v6290_v31  ;;  %v6325_v32 = vadd.f32 %v6317_v21, %v6309_v40  ;;  %v6422_v3 = vadd.bf16 %v6375_v15, %v6374_v8  ;;  %12597 = vmatpush3.bf16.msra.mxu0 %v13895_v46  ;;  %v6801_v24 = vld [vmem:[#allocation4] sm:$0xff]  ;;  %v6802_v15 = vld [vmem:[#allocation4 + $0x8] sm:$0xff] }
 0x2b1   : > { %6354 = vst [vmem:[#allocation2 + $0x360] sm:$0xff] %v6322_v9  ;;  %6347 = vst [vmem:[#allocation2 + $0x1a8] sm:$0xff] %v6291_v61  ;;  %v6323_v56 = vadd.f32 %v6315_v17, %v6307_v16  ;;  %vm6340_vm9 = vcmp.gt.f32.partialorder %v6332_v55, 0.3  ;;  %v16973_v40 = vcombine.low %v16971_v37, %v16972_v42  ;;  %12598 = vmatprep.subr.bf16.mxu0 %v16954_v36  ;;  %v6831_v16 = vld [vmem:[#allocation5 + $0x8] sm:$0xff]  ;;  %v6832_v35 = vld [vmem:[#allocation5 + $0x10] sm:$0xff] }
 0x2b2   : > { %v6333_v25 = vadd.f32 %v6325_v32, %v6293_v41  ;;  %6357 = vst [vmem:[#allocation2 + $0x378] sm:$0xff] %v6325_v32  ;;  %vm6338_vm10 = vcmp.gt.f32.partialorder %v6330_v53, 0.3  ;;  %v10805_v14 = vsel %vm6340_vm9, 1.0, %v16954_v36  ;;  %v6839_v50 = vunpack.c.l.bf16 %v6831_v16  ;;  %v6817_v8 = vld [vmem:[#allocation4 + $0x78] sm:$0xff]  ;;  %v6819_v39 = vld [vmem:[#allocation4 + $0x88] sm:$0xff] }
 0x2b3   : > { %v6331_v4 = vadd.f32 %v6323_v56, %v6291_v61  ;;  %6355 = vst [vmem:[#allocation2 + $0x368] sm:$0xff] %v6323_v56  ;;  %v10803_v7 = vsel %vm6338_vm10, 1.0, %v16954_v36  ;;  %v6840_v20 = vunpack.c.h.bf16 %v6831_v16  ;;  %v6841_v17 = vunpack.c.l.bf16 %v6832_v35 }
 0x2b4   : > { %vm6341_vm11 = vcmp.gt.f32.partialorder %v6333_v25, 0.3  ;;  %12599 = vmatpush3.bf16.msra.mxu0 %v13897_v30  ;;  %v6853_v41 = vsub.f32 1.0, %v6839_v50 }
 0x2b5   : > { %v10806_v23 = vsel %vm6341_vm11, 1.0, %v16954_v36  ;;  %vm6339_vm12 = vcmp.gt.f32.partialorder %v6331_v4, 0.3  ;;  %12600 = vmatprep.subr.bf16.mxu0 %v16954_v36  ;;  %v6854_v61 = vsub.f32 1.0, %v6840_v20  ;;  %v6855_v62 = vsub.f32 1.0, %v6841_v17 }
 0x2b6   : > { %v6377_v18 = vpack.c.bf16 %v10806_v23, %v10805_v14  ;;  %v10804_v48 = vsel %vm6339_vm12, 1.0, %v16954_v36  ;;  %v6867_v25 = vmul.f32 0.25, %v6853_v41  ;;  %v6803_v14 = vld [vmem:[#allocation4 + $0x10] sm:$0xff]  ;;  %v6909_v23 = vmul.f32 0.15, %v6853_v41  ;;  %v6834_v41 = vld [vmem:[#allocation5 + $0x20] sm:$0xff] }
 0x2b7   : > { %v6376_v22 = vpack.c.bf16 %v10804_v48, %v10803_v7  ;;  %v6842_v7 = vunpack.c.h.bf16 %v6832_v35  ;;  %v6910_v19 = vmul.f32 0.15, %v6854_v61  ;;  %v6911_v37 = vmul.f32 0.15, %v6855_v62  ;;  %v13901_v35 = vld [vmem:[%s16933_s3 + $0x140] sm:$0xff]  }
 0x2b8   : > { %6381 = vst [vmem:[#allocation3 + $0xd8] sm:$0xff] %v6377_v18  ;;  %12601 = vmatpush3.bf16.msra.mxu0 %v13898_v26 }
 0x2b9   : > { %6380 = vst [vmem:[#allocation3 + $0xd0] sm:$0xff] %v6376_v22  ;;  %v6423_v38 = vadd.bf16 %v6377_v18, %v6376_v22  ;;  %12602 = vmatprep.subr.bf16.mxu0 %v16954_v36  ;;  %v6856_v12 = vsub.f32 1.0, %v6842_v7 }
 0x2bb   : > { %v10829_v0 = vcombine.high %v6422_v3, %v6423_v38  ;;  %v10844_v43 = vcombine.low %v6422_v3, %v6423_v38 }
 0x2bd   : > { %12541 = vmatmul.mubr.bf16.gmra.mrb[48].mxu1 %v10829_v0  ;;  %v6868_v0 = vmul.f32 0.25, %v6854_v61 }
 0x2be   : > { %12560 = vmatprep.mubr.msk.bf16.mxu1 %vm14064_vm1, %v16954_v36 }
 0x2c5   : > { %12561 = vmatmul.mubr.bf16.vlgmr.msra.gmra.mrb[24].mxu1 %v16964_v1 }
 0x2c6   : > { %12564 = vmatprep.mubr.msk.bf16.mxu1 %vm14064_vm1, %v16954_v36  ;;  %12661 = vmatpush3.bf16.msra.mxu1 %v13885_v10  ;;  %v6804_v10 = vld [vmem:[#allocation4 + $0x18] sm:$0xff] }
 0x2c7   : > { %12662 = vmatprep.subr.bf16.mxu1 %v16954_v36  ;;  %v6882_v58 = vmul.f32 %v6868_v0, %v6804_v10  ;;  %v13936_v10 = vld [vmem:[%s16933_s3 + $0x210] sm:$0xff]  }
 0x2ca   : > { %12663 = vmatpush3.bf16.msra.mxu1 %v13886_v47 }
 0x2cb   : > { %12664 = vmatprep.subr.bf16.mxu1 %v16954_v36 }
 0x2cd   : > { %12565 = vmatmul.mubr.bf16.gmra.mrb[28].mxu1 %v16967_v57  ;;  %v6833_v57 = vld [vmem:[#allocation5 + $0x18] sm:$0xff] }
 0x2ce   : > { %12568 = vmatprep.mubr.msk.bf16.mxu1 %vm14064_vm1, %v16954_v36  ;;  %12665 = vmatpush3.bf16.msra.mxu1 %v13887_v33  ;;  %v6881_v33 = vmul.f32 %v6867_v25, %v6803_v14  ;;  %v14065_v14 = vmov 1.0|1.0  }
 0x2cf   : > { %12666 = vmatprep.subr.bf16.mxu1 %v16954_v36 }
 0x2d2   : > { %12667 = vmatpush3.bf16.msra.mxu1 %v13888_v6 }
 0x2d3   : > { %12668 = vmatprep.subr.bf16.mxu1 %v16954_v36 }
 0x2d5   : > { %12569 = vmatmul.mubr.bf16.gmra.mrb[32].mxu1 %v16970_v59  ;;  %v6924_v59 = vmul.f32 %v6910_v19, %v6819_v39  ;;  %v6822_v39 = vld [vmem:[#allocation4 + $0xa0] sm:$0xff] }
 0x2d6   : > { %12572 = vmatprep.mubr.msk.bf16.mxu1 %vm14064_vm1, %v16954_v36  ;;  %12669 = vmatpush3.bf16.msra.mxu1 %v13891_v44 }
 0x2d7   : > { %12670 = vmatprep.subr.bf16.mxu1 %v16954_v36 }
 0x2da   : > { %12671 = vmatpush3.bf16.msra.mxu1 %v13893_v34  ;;  %v6869_v34 = vmul.f32 0.25, %v6855_v62 }
 0x2db   : > { %12672 = vmatprep.subr.bf16.mxu1 %v16954_v36 }
 0x2dd   : > { %12573 = vmatmul.mubr.bf16.gmra.mrb[36].mxu1 %v16973_v40 }
 0x2de   : > { %12576 = vmatprep.mubr.msk.bf16.mxu1 %vm14064_vm1, %v16954_v36  ;;  %12673 = vmatpush3.bf16.msra.mxu1 %v13896_v29  ;;  %v6843_v29 = vunpack.c.l.bf16 %v6833_v57 }
 0x2df   : > { %12674 = vmatprep.subr.bf16.mxu1 %v16954_v36 }
 0x2e2   : > { %12675 = vmatpush3.bf16.msra.mxu1 %v13899_v63  ;;  %v13921_v63 = vld [vmem:[%s16933_s3 + $0x88] sm:$0xff]  }
 0x2e3   : > { %12696 = vmatprep.subr.bf16.mxu1 %v16954_v36 }
 0x2e5   : > { %12577 = vmatmul.mubr.bf16.gmra.mrb[40].mxu1 %v10842_v11  ;;  %v13900_v11 = vld [vmem:[%s16933_s3 + $0x78] sm:$0xff]  }
 0x2e6   : > { %12580 = vmatprep.mubr.msk.bf16.mxu1 %vm14064_vm1, %v16954_v36  ;;  %12603 = vmatpush3.bf16.msra.mxu0 %v13900_v11 }
 0x2e7   : > { %12624 = vmatprep.subr.bf16.mxu0 %v16954_v36 }
 0x2ed   : > { %12581 = vmatmul.mubr.bf16.gmra.mrb[44].mxu1 %v10843_v54  ;;  %v6830_v54 = vld [vmem:[#allocation5] sm:$0xff] }
 0x2ee   : > { %12584 = vmatprep.mubr.msk.bf16.mxu1 %vm14064_vm1, %v16954_v36  ;;  %v6837_v27 = vunpack.c.l.bf16 %v6830_v54  ;;  %v6838_v60 = vunpack.c.h.bf16 %v6830_v54  ;;  %v6805_v54 = vld [vmem:[#allocation4 + $0x20] sm:$0xff] }
 0x2f0   : > { %v6851_v51 = vsub.f32 1.0, %v6837_v27  ;;  %v6852_v13 = vsub.f32 1.0, %v6838_v60  ;;  %v6870_v27 = vmul.f32 0.25, %v6856_v12  ;;  %v6844_v60 = vunpack.c.h.bf16 %v6833_v57  ;;  %v13905_v57 = vld [vmem:[%s16933_s3 + $0x8] sm:$0xff]  }
 0x2f2   : > { %v6865_v52 = vmul.f32 0.25, %v6851_v51  ;;  %v6907_v28 = vmul.f32 0.15, %v6851_v51  ;;  %v6866_v31 = vmul.f32 0.25, %v6852_v13  ;;  %v6908_v2 = vmul.f32 0.15, %v6852_v13 }
 0x2f4   : > { %v6879_v45 = vmul.f32 %v6865_v52, %v6801_v24  ;;  %v6921_v9 = vmul.f32 %v6907_v28, %v6816_v49  ;;  %v6880_v21 = vmul.f32 %v6866_v31, %v6802_v15  ;;  %v6922_v56 = vmul.f32 %v6908_v2, %v6817_v8  ;;  %v6820_v24 = vld [vmem:[#allocation4 + $0x90] sm:$0xff]  ;;  %v6806_v28 = vld [vmem:[#allocation4 + $0x28] sm:$0xff] }
 0x2f5   : > { %12585 = vmatmul.mubr.bf16.gmra.mrb[48].mxu1 %v10844_v43  ;;  %v6818_v43 = vld [vmem:[#allocation4 + $0x80] sm:$0xff]  ;;  %v6912_v31 = vmul.f32 0.15, %v6856_v12  ;;  %v6883_v15 = vmul.f32 %v6869_v34, %v6805_v54  ;;  %v6857_v2 = vsub.f32 1.0, %v6843_v29  ;;  %v6858_v8 = vsub.f32 1.0, %v6844_v60  ;;  %v6808_v12 = vld [vmem:[#allocation4 + $0x38] sm:$0xff] }
 0x2f6   : > { %12676 = vmatprep.mubr.msk.bf16.mxu1 %vm14064_vm1, %v16954_v36  ;;  %v6923_v44 = vmul.f32 %v6909_v23, %v6818_v43  ;;  %v6884_v61 = vmul.f32 %v6870_v27, %v6806_v28  ;;  %v6846_v43 = vunpack.c.h.bf16 %v6834_v41  ;;  %v6835_v34 = vld [vmem:[#allocation5 + $0x28] sm:$0xff] }
 0x2f7   : > { %v6871_v23 = vmul.f32 0.25, %v6857_v2  ;;  %v6872_v0 = vmul.f32 0.25, %v6858_v8  ;;  %v6847_v60 = vunpack.c.l.bf16 %v6835_v34 }
 0x398   : > { %v6746_v55 = vpop.f32.mrb[24].mxu1 }
 0x399   : > { %v6893_v53 = vadd.f32 %v6879_v45, %v6746_v55  ;;  %v6935_v32 = vmul.f32 0.4, %v6746_v55  ;;  %v12562_v3 = vpop.f32.mrb[25].mxu1  ;;  %v6821_v45 = vld [vmem:[#allocation4 + $0x98] sm:$0xff] }
 0x39a   : > { %v6749_v4 = vpop.f32.mrb[26].mxu1  ;;  %v6926_v17 = vmul.f32 %v6912_v31, %v6821_v45  ;;  %v6845_v3 = vunpack.c.l.bf16 %v6834_v41  ;;  %v13968_v31 = vld [vmem:[%s16934_s4 + $0x58] sm:$0xff]  }
 0x39b   : > { %v6949_v18 = vadd.f32 %v6935_v32, %v6921_v9  ;;  %7019 = vst [vmem:[#allocation4] sm:$0xff] %v6893_v53  ;;  %v6894_v48 = vadd.f32 %v6880_v21, %v6749_v4  ;;  %v6936_v22 = vmul.f32 0.4, %v6749_v4  ;;  %v12563_v38 = vpop.f32.mrb[27].mxu1  ;;  %v6925_v21 = vmul.f32 %v6911_v37, %v6820_v24  ;;  %v13903_v32 = vld [vmem:[%s16933_s3] sm:$0xff]   ;;  %v6823_v37 = vld [vmem:[#allocation4 + $0xa8] sm:$0xff] }
 0x39c   : > { %v6807_v38 = vld [vmem:[#allocation4 + $0x30] sm:$0xff] }
 0x39d   : > { %v6963_v1 = vadd.f32 %v6949_v18, %v6893_v53  ;;  %7033 = vst [vmem:[#allocation4 + $0x70] sm:$0xff] %v6949_v18  ;;  %v6950_v47 = vadd.f32 %v6936_v22, %v6922_v56  ;;  %7020 = vst [vmem:[#allocation4 + $0x8] sm:$0xff] %v6894_v48  ;;  %v6913_v53 = vmul.f32 0.15, %v6857_v2  ;;  %v13902_v22 = vld [vmem:[%s16933_s3 + $0x148] sm:$0xff]   ;;  %v6848_v2 = vunpack.c.h.bf16 %v6835_v34  ;;  %v13910_v34 = vld [vmem:[%s16933_s3 + $0x20] sm:$0xff]  }
 0x39f   : > { %vm6977_vm13 = vcmp.gt.f32.partialorder %v6963_v1, 0.3  ;;  %v6964_v6 = vadd.f32 %v6950_v47, %v6894_v48  ;;  %7034 = vst [vmem:[#allocation4 + $0x78] sm:$0xff] %v6950_v47  ;;  %v6927_v29 = vmul.f32 %v6913_v53, %v6822_v39  ;;  %v6861_v53 = vsub.f32 1.0, %v6847_v60 }
 0x3a0   : > { %v6754_v5 = vpop.f32.mrb[28].mxu1  ;;  %v10853_v30 = vsel %vm6977_vm13, 1.0, %v16954_v36 }
 0x3a1   : > { %vm6978_vm14 = vcmp.gt.f32.partialorder %v6964_v6, 0.3  ;;  %v6895_v42 = vadd.f32 %v6881_v33, %v6754_v5  ;;  %v6937_v40 = vmul.f32 0.4, %v6754_v5  ;;  %v12566_v46 = vpop.f32.mrb[29].mxu1  ;;  %v6859_v6 = vsub.f32 1.0, %v6845_v3 }
 0x3a2   : > { %v10854_v26 = vsel %vm6978_vm14, 1.0, %v16954_v36  ;;  %vm15800_vm15 = vmpackc.low %vm6978_vm14, %vm6977_vm13  ;;  %v6757_v11 = vpop.f32.mrb[30].mxu1  ;;  %v6885_v5 = vmul.f32 %v6871_v23, %v6807_v38  ;;  %v13909_v23 = vld [vmem:[%s16933_s3 + $0x160] sm:$0xff]  }
 0x3a3   : > { %v7047_v51 = vpack.c.bf16 %v10854_v26, %v10853_v30  ;;  %v6951_v16 = vadd.f32 %v6937_v40, %v6923_v44  ;;  %7021 = vst [vmem:[#allocation4 + $0x10] sm:$0xff] %v6895_v42  ;;  %v6896_v13 = vadd.f32 %v6882_v58, %v6757_v11  ;;  %v6938_v52 = vmul.f32 0.4, %v6757_v11  ;;  %v12567_v50 = vpop.f32.mrb[31].mxu1  ;;  %v13952_v11 = vld [vmem:[%s16933_s3 + $0x250] sm:$0xff]  }
 0x3a4   : > { %v6860_v40 = vsub.f32 1.0, %v6846_v43  ;;  %v6886_v30 = vmul.f32 %v6872_v0, %v6808_v12  ;;  %v6873_v54 = vmul.f32 0.25, %v6859_v6  ;;  %v6915_v27 = vmul.f32 0.15, %v6859_v6  ;;  %v13907_v50 = vld [vmem:[%s16933_s3 + $0x10] sm:$0xff]   ;;  %v13956_v43 = vld [vmem:[%s16933_s3 + $0x118] sm:$0xff]  }
 0x3a5   : > { %7054 = vst [vmem:[#allocation5] sm:$0xff] %v7047_v51  ;;  %v6965_v20 = vadd.f32 %v6951_v16, %v6895_v42  ;;  %7035 = vst [vmem:[#allocation4 + $0x80] sm:$0xff] %v6951_v16  ;;  %v6952_v49 = vadd.f32 %v6938_v52, %v6924_v59  ;;  %v6914_v59 = vmul.f32 0.15, %v6858_v8  ;;  %v13904_v42 = vld [vmem:[%s16933_s3 + $0x150] sm:$0xff]  }
 0x3a6   : > { %7022 = vst [vmem:[#allocation4 + $0x18] sm:$0xff] %v6896_v13  ;;  %v6874_v45 = vmul.f32 0.25, %v6860_v40  ;;  %v6811_v12 = vld [vmem:[#allocation4 + $0x50] sm:$0xff] }
 0x3a7   : > { %vm6979_vm2 = vcmp.gt.f32.partialorder %v6965_v20, 0.3  ;;  %v6966_v9 = vadd.f32 %v6952_v49, %v6896_v13  ;;  %7036 = vst [vmem:[#allocation4 + $0x88] sm:$0xff] %v6952_v49  ;;  %v6928_v52 = vmul.f32 %v6914_v59, %v6823_v37  ;;  %v6809_v49 = vld [vmem:[#allocation4 + $0x40] sm:$0xff]  ;;  %v13911_v37 = vld [vmem:[%s16933_s3 + $0x168] sm:$0xff]  }
 0x3a8   : > { %vm10907_vm3 = vmpackc.low %vm6979_vm2, %vm6978_vm14  ;;  %v6762_v55 = vpop.f32.mrb[32].mxu1  ;;  %v10855_v7 = vsel %vm6979_vm2, 1.0, %v16954_v36 }
 0x3a9   : > { %vm6980_vm0 = vcmp.gt.f32.partialorder %v6966_v9, 0.3  ;;  %v6897_v56 = vadd.f32 %v6883_v15, %v6762_v55  ;;  %v6939_v25 = vmul.f32 0.4, %v6762_v55  ;;  %v12570_v4 = vpop.f32.mrb[33].mxu1  ;;  %12605 = vmatmul.mubr.msk.bf16.vlgmr.msra.gmra.mrb[32].mxu0 %vm10907_vm3, %v14065_v14  ;;  %12677 = vmatmul.mubr.msk.bf16.vlgmr.msra.gmra.mrb[52].mxu1 %vm10907_vm3, %v14065_v14  ;;  %v13906_v15 = vld [vmem:[%s16933_s3 + $0x158] sm:$0xff]  }
 0x3aa   : > { %v10856_v18 = vsel %vm6980_vm0, 1.0, %v16954_v36  ;;  %v6765_v48 = vpop.f32.mrb[34].mxu1  ;;  %12697 = vmatpush3.bf16.msra.mxu1 %v13901_v35  ;;  %12608 = vmatprep.mubr.msk.bf16.mxu0 %vm14064_vm1, %v16954_v36  ;;  %vm15825_vm4 = vmpackc.low %vm6980_vm0, %vm6979_vm2  ;;  %v6810_v55 = vld [vmem:[#allocation4 + $0x48] sm:$0xff]  ;;  %v13908_v4 = vld [vmem:[%s16933_s3 + $0x18] sm:$0xff]  }
 0x3ab   : > { %v7048_v19 = vpack.c.bf16 %v10856_v18, %v10855_v7  ;;  %v6953_v62 = vadd.f32 %v6939_v25, %v6925_v21  ;;  %7023 = vst [vmem:[#allocation4 + $0x20] sm:$0xff] %v6897_v56  ;;  %v6898_v1 = vadd.f32 %v6884_v61, %v6765_v48  ;;  %v6940_v47 = vmul.f32 0.4, %v6765_v48  ;;  %v12571_v33 = vpop.f32.mrb[35].mxu1  ;;  %12698 = vmatprep.subr.bf16.mxu1 %v16954_v36  ;;  %v6824_v61 = vld [vmem:[#allocation4 + $0xb0] sm:$0xff]  ;;  %v6825_v25 = vld [vmem:[#allocation4 + $0xb8] sm:$0xff] }
 0x3ac   : > { %12680 = vmatprep.mubr.msk.bf16.mxu1 %vm14064_vm1, %v16954_v36  ;;  %12625 = vmatpush3.bf16.msra.mxu0 %v13903_v32  ;;  %v6862_v7 = vsub.f32 1.0, %v6848_v2  ;;  %v6836_v18 = vld [vmem:[#allocation5 + $0x30] sm:$0xff]  ;;  %v6888_v38 = vmul.f32 %v6874_v45, %v6810_v55 }
 0x3ad   : > { %7055 = vst [vmem:[#allocation5 + $0x8] sm:$0xff] %v7048_v19  ;;  %v6967_v44 = vadd.f32 %v6953_v62, %v6897_v56  ;;  %7037 = vst [vmem:[#allocation4 + $0x90] sm:$0xff] %v6953_v62  ;;  %v6954_v58 = vadd.f32 %v6940_v47, %v6926_v17  ;;  %12626 = vmatprep.subr.bf16.mxu0 %v16954_v36  ;;  %v6916_v17 = vmul.f32 0.15, %v6860_v40  ;;  %v6875_v62 = vmul.f32 0.25, %v6861_v53  ;;  %v13913_v45 = vld [vmem:[%s16933_s3 + $0x170] sm:$0xff]  }
 0x3ae   : > { %7024 = vst [vmem:[#allocation4 + $0x28] sm:$0xff] %v6898_v1  ;;  %12699 = vmatpush3.bf16.msra.mxu1 %v13902_v22  ;;  %v6887_v56 = vmul.f32 %v6873_v54, %v6809_v49  ;;  %v6929_v22 = vmul.f32 %v6915_v27, %v6824_v61  ;;  %v6876_v59 = vmul.f32 0.25, %v6862_v7  ;;  %v6826_v54 = vld [vmem:[#allocation4 + $0xc0] sm:$0xff]  ;;  %v6812_v27 = vld [vmem:[#allocation4 + $0x58] sm:$0xff]  ;;  %v6918_v60 = vmul.f32 0.15, %v6862_v7 }
 0x3af   : > { %vm6981_vm5 = vcmp.gt.f32.partialorder %v6967_v44, 0.3  ;;  %v15839_v46 = vadd.f32 %v6954_v58, %v6898_v1  ;;  %7038 = vst [vmem:[#allocation4 + $0x98] sm:$0xff] %v6954_v58  ;;  %12700 = vmatprep.subr.bf16.mxu1 %v16954_v36  ;;  %v6930_v19 = vmul.f32 %v6916_v17, %v6825_v25  ;;  %v6917_v1 = vmul.f32 0.15, %v6861_v53  ;;  %v13969_v58 = vld [vmem:[%s16934_s4 + $0x60] sm:$0xff]  }
 0x3b0   : > { %v6770_v26 = vpop.f32.mrb[36].mxu1  ;;  %vm15844_vm6 = vmpackc.low %vm6981_vm5, %vm6980_vm0  ;;  %12627 = vmatpush3.bf16.msra.mxu0 %v13905_v57  ;;  %v10857_v24 = vsel %vm6981_vm5, 1.0, %v16954_v36  ;;  %v6849_v57 = vunpack.c.l.bf16 %v6836_v18 }
 0x3b1   : > { %vm6982_vm7 = vcmp.gt.f32.partialorder %v15839_v46, 0.3  ;;  %v6899_v51 = vadd.f32 %v6885_v5, %v6770_v26  ;;  %v6941_v16 = vmul.f32 0.4, %v6770_v26  ;;  %v12574_v13 = vpop.f32.mrb[37].mxu1  ;;  %12609 = vmatmul.mubr.msk.bf16.gmra.mrb[36].mxu0 %vm15844_vm6, %v14065_v14  ;;  %12681 = vmatmul.mubr.msk.bf16.gmra.mrb[56].mxu1 %vm15844_vm6, %v14065_v14  ;;  %v6931_v49 = vmul.f32 %v6917_v1, %v6826_v54 }
 0x3b2   : > { %v10858_v28 = vsel %vm6982_vm7, 1.0, %v16954_v36  ;;  %vm15866_vm8 = vmpackc.low %vm6982_vm7, %vm6981_vm5  ;;  %v6773_v20 = vpop.f32.mrb[38].mxu1  ;;  %12701 = vmatpush3.bf16.msra.mxu1 %v13904_v42  ;;  %12612 = vmatprep.mubr.msk.bf16.mxu0 %vm14064_vm1, %v16954_v36  ;;  %v6850_v42 = vunpack.c.h.bf16 %v6836_v18  ;;  %v6889_v13 = vmul.f32 %v6875_v62, %v6811_v12  ;;  %v13916_v12 = vld [vmem:[%s16933_s3 + $0x38] sm:$0xff]  }
 0x3b3   : > { %v7049_v41 = vpack.c.bf16 %v10858_v28, %v10857_v24  ;;  %v6955_v35 = vadd.f32 %v6941_v16, %v6927_v29  ;;  %7025 = vst [vmem:[#allocation4 + $0x30] sm:$0xff] %v6899_v51  ;;  %v6900_v8 = vadd.f32 %v6886_v30, %v6773_v20  ;;  %v6942_v9 = vmul.f32 0.4, %v6773_v20  ;;  %v12575_v21 = vpop.f32.mrb[39].mxu1  ;;  %12684 = vmatprep.mubr.msk.bf16.mxu1 %vm14064_vm1, %v16954_v36  ;;  %v13912_v24 = vld [vmem:[%s16933_s3 + $0x28] sm:$0xff]  }
 0x3b4   : > { %12702 = vmatprep.subr.bf16.mxu1 %v16954_v36  ;;  %12628 = vmatprep.subr.bf16.mxu0 %v16954_v36  ;;  %v6864_v28 = vsub.f32 1.0, %v6850_v42 }
 0x3b5   : > { %7056 = vst [vmem:[#allocation5 + $0x10] sm:$0xff] %v7049_v41  ;;  %v6969_v32 = vadd.f32 %v6955_v35, %v6899_v51  ;;  %7039 = vst [vmem:[#allocation4 + $0xa0] sm:$0xff] %v6955_v35  ;;  %v6956_v3 = vadd.f32 %v6942_v9, %v6928_v52  ;;  %12629 = vmatpush3.bf16.msra.mxu0 %v13907_v50  ;;  %v6827_v52 = vld [vmem:[#allocation4 + $0xc8] sm:$0xff]  ;;  %v6863_v50 = vsub.f32 1.0, %v6849_v57 }
 0x3b6   : > { %7026 = vst [vmem:[#allocation4 + $0x38] sm:$0xff] %v6900_v8  ;;  %12703 = vmatpush3.bf16.msra.mxu1 %v13906_v15  ;;  %12630 = vmatprep.subr.bf16.mxu0 %v16954_v36  ;;  %v6890_v15 = vmul.f32 %v6876_v59, %v6812_v27  ;;  %v6932_v35 = vmul.f32 %v6918_v60, %v6827_v52  ;;  %v6878_v25 = vmul.f32 0.25, %v6864_v28  ;;  %v13960_v41 = vld [vmem:[%s16933_s3 + $0x128] sm:$0xff]   ;;  %v13964_v59 = vld [vmem:[%s16933_s3 + $0x138] sm:$0xff]  }
 0x3b7   : > { %vm6983_vm9 = vcmp.gt.f32.partialorder %v6969_v32, 0.3  ;;  %v6970_v48 = vadd.f32 %v6956_v3, %v6900_v8  ;;  %7040 = vst [vmem:[#allocation4 + $0xa8] sm:$0xff] %v6956_v3  ;;  %12704 = vmatprep.subr.bf16.mxu1 %v16954_v36  ;;  %v6919_v8 = vmul.f32 0.15, %v6863_v50  ;;  %v6877_v55 = vmul.f32 0.25, %v6863_v50 }
 0x3b8   : > { %v6778_v0 = vpop.f32.mrb[40].mxu1  ;;  %vm15890_vm10 = vmpackc.low %vm6983_vm9, %vm6982_vm7  ;;  %v10859_v6 = vsel %vm6983_vm9, 1.0, %v16954_v36  ;;  %v13917_v50 = vld [vmem:[%s16933_s3 + $0x1c0] sm:$0xff]   ;;  %v13970_v32 = vld [vmem:[%s16934_s4 + $0x68] sm:$0xff]  }
 0x3b9   : > { %vm6984_vm11 = vcmp.gt.f32.partialorder %v6970_v48, 0.3  ;;  %v6901_v47 = vadd.f32 %v6887_v56, %v6778_v0  ;;  %v6943_v33 = vmul.f32 0.4, %v6778_v0  ;;  %v12578_v39 = vpop.f32.mrb[41].mxu1  ;;  %12613 = vmatmul.mubr.msk.bf16.gmra.mrb[40].mxu0 %vm15890_vm10, %v14065_v14  ;;  %12685 = vmatmul.mubr.msk.bf16.gmra.mrb[60].mxu1 %vm15890_vm10, %v14065_v14  ;;  %v6813_v56 = vld [vmem:[#allocation4 + $0x60] sm:$0xff] }
 0x3ba   : > { %v10860_v44 = vsel %vm6984_vm11, 1.0, %v16954_v36  ;;  %vm15906_vm12 = vmpackc.low %vm6984_vm11, %vm6983_vm9  ;;  %v6781_v5 = vpop.f32.mrb[42].mxu1  ;;  %12631 = vmatpush3.bf16.msra.mxu0 %v13908_v4  ;;  %12705 = vmatpush3.bf16.msra.mxu1 %v13909_v23  ;;  %v13914_v4 = vld [vmem:[%s16933_s3 + $0x30] sm:$0xff]   ;;  %v6829_v39 = vld [vmem:[#allocation4 + $0xd8] sm:$0xff] }
 0x3bb   : > { %v7050_v40 = vpack.c.bf16 %v10860_v44, %v10859_v6  ;;  %v6957_v46 = vadd.f32 %v6943_v33, %v6929_v22  ;;  %7027 = vst [vmem:[#allocation4 + $0x40] sm:$0xff] %v6901_v47  ;;  %v6902_v29 = vadd.f32 %v6888_v38, %v6781_v5  ;;  %v6944_v30 = vmul.f32 0.4, %v6781_v5  ;;  %v12579_v26 = vpop.f32.mrb[43].mxu1  ;;  %12616 = vmatprep.mubr.msk.bf16.mxu0 %vm14064_vm1, %v16954_v36  ;;  %v13915_v38 = vld [vmem:[%s16933_s3 + $0x178] sm:$0xff]   ;;  %v6828_v0 = vld [vmem:[#allocation4 + $0xd0] sm:$0xff] }
 0x3bc   : > { %12688 = vmatprep.mubr.msk.bf16.mxu1 %vm14064_vm1, %v16954_v36  ;;  %12632 = vmatprep.subr.bf16.mxu0 %v16954_v36  ;;  %v6920_v33 = vmul.f32 0.15, %v6864_v28  ;;  %v6933_v6 = vmul.f32 %v6919_v8, %v6828_v0  ;;  %v13919_v28 = vld [vmem:[%s16933_s3 + $0x80] sm:$0xff]   ;;  %v13920_v8 = vld [vmem:[%s16933_s3 + $0x1d0] sm:$0xff]   ;;  %v13938_v0 = vld [vmem:[%s16933_s3 + $0x218] sm:$0xff]  }
 0x3bd   : > { %12706 = vmatprep.subr.bf16.mxu1 %v16954_v36  ;;  %7057 = vst [vmem:[#allocation5 + $0x18] sm:$0xff] %v7050_v40  ;;  %v6971_v51 = vadd.f32 %v6957_v46, %v6901_v47  ;;  %7041 = vst [vmem:[#allocation4 + $0xb0] sm:$0xff] %v6957_v46  ;;  %v6958_v16 = vadd.f32 %v6944_v30, %v6930_v19  ;;  %v6814_v19 = vld [vmem:[#allocation4 + $0x68] sm:$0xff]  ;;  %v6891_v47 = vmul.f32 %v6877_v55, %v6813_v56  ;;  %v13925_v55 = vld [vmem:[%s16933_s3 + $0x1e0] sm:$0xff]  }
 0x3be   : > { %7028 = vst [vmem:[#allocation4 + $0x48] sm:$0xff] %v6902_v29  ;;  %12633 = vmatpush3.bf16.msra.mxu0 %v13910_v34  ;;  %12707 = vmatpush3.bf16.msra.mxu1 %v13911_v37  ;;  %v6892_v44 = vmul.f32 %v6878_v25, %v6814_v19  ;;  %v6934_v40 = vmul.f32 %v6920_v33, %v6829_v39  ;;  %v13929_v56 = vld [vmem:[%s16933_s3 + $0x1f0] sm:$0xff]   ;;  %v13940_v19 = vld [vmem:[%s16933_s3 + $0xd8] sm:$0xff]   ;;  %v13944_v33 = vld [vmem:[%s16933_s3 + $0xe8] sm:$0xff]  }
 0x3bf   : > { %vm6985_vm13 = vcmp.gt.f32.partialorder %v6971_v51, 0.3  ;;  %v6972_v20 = vadd.f32 %v6958_v16, %v6902_v29  ;;  %7042 = vst [vmem:[#allocation4 + $0xb8] sm:$0xff] %v6958_v16  ;;  %12634 = vmatprep.subr.bf16.mxu0 %v16954_v36  ;;  %12708 = vmatprep.subr.bf16.mxu1 %v16954_v36  ;;  %v13930_v25 = vld [vmem:[%s16933_s3 + $0xb0] sm:$0xff]  }
 0x3c0   : > { %v6786_v2 = vpop.f32.mrb[44].mxu1  ;;  %vm15932_vm14 = vmpackc.low %vm6985_vm13, %vm6984_vm11  ;;  %v10861_v17 = vsel %vm6985_vm13, 1.0, %v16954_v36  ;;  %v13945_v39 = vld [vmem:[%s16933_s3 + $0x230] sm:$0xff]  }
 0x3c1   : > { %vm6986_vm2 = vcmp.gt.f32.partialorder %v6972_v20, 0.3  ;;  %v6903_v9 = vadd.f32 %v6889_v13, %v6786_v2  ;;  %v6945_v21 = vmul.f32 0.4, %v6786_v2  ;;  %v12582_v61 = vpop.f32.mrb[45].mxu1  ;;  %12617 = vmatmul.mubr.msk.bf16.gmra.mrb[44].mxu0 %vm15932_vm14, %v14065_v14  ;;  %12689 = vmatmul.mubr.msk.bf16.gmra.mrb[64].mxu1 %vm15932_vm14, %v14065_v14  ;;  %v13971_v26 = vld [vmem:[%s16934_s4 + $0x70] sm:$0xff]  }
 0x3c2   : > { %v10862_v53 = vsel %vm6986_vm2, 1.0, %v16954_v36  ;;  %vm15948_vm3 = vmpackc.low %vm6986_vm2, %vm6985_vm13  ;;  %v6789_v3 = vpop.f32.mrb[46].mxu1  ;;  %12635 = vmatpush3.bf16.msra.mxu0 %v13912_v24  ;;  %12620 = vmatprep.mubr.msk.bf16.mxu0 %vm14064_vm1, %v16954_v36  ;;  %v13924_v61 = vld [vmem:[%s16933_s3 + $0x98] sm:$0xff]   ;;  %v8712_v2 = vld [vmem:[#allocation7 + $0x28] sm:$0xff] }
 0x3c3   : > { %v7051_v23 = vpack.c.bf16 %v10862_v53, %v10861_v17  ;;  %v6959_v7 = vadd.f32 %v6945_v21, %v6931_v49  ;;  %7029 = vst [vmem:[#allocation4 + $0x50] sm:$0xff] %v6903_v9  ;;  %v6904_v18 = vadd.f32 %v6890_v15, %v6789_v3  ;;  %v6946_v48 = vmul.f32 0.4, %v6789_v3  ;;  %v12583_v22 = vpop.f32.mrb[47].mxu1  ;;  %12692 = vmatprep.mubr.msk.bf16.mxu1 %vm14064_vm1, %v16954_v36  ;;  %v13922_v21 = vld [vmem:[%s16933_s3 + $0x1d8] sm:$0xff]   ;;  %v13926_v17 = vld [vmem:[%s16933_s3 + $0xa0] sm:$0xff]  }
 0x3c4   : > { %12709 = vmatpush3.bf16.msra.mxu1 %v13913_v45  ;;  %12636 = vmatprep.subr.bf16.mxu0 %v16954_v36  ;;  %v13918_v45 = vld [vmem:[%s16933_s3 + $0x1c8] sm:$0xff]   ;;  %v13986_v20 = vld [vmem:[%s16935_s5 + $0x18] sm:$0xff]  }
 0x3c5   : > { %12710 = vmatprep.subr.bf16.mxu1 %v16954_v36  ;;  %7058 = vst [vmem:[#allocation5 + $0x20] sm:$0xff] %v7051_v23  ;;  %v6973_v62 = vadd.f32 %v6959_v7, %v6903_v9  ;;  %7043 = vst [vmem:[#allocation4 + $0xc0] sm:$0xff] %v6959_v7  ;;  %v6960_v1 = vadd.f32 %v6946_v48, %v6932_v35  ;;  %v13923_v9 = vld [vmem:[%s16933_s3 + $0x90] sm:$0xff]   ;;  %v13927_v53 = vld [vmem:[%s16933_s3 + $0x1e8] sm:$0xff]  }
 0x3c6   : > { %7030 = vst [vmem:[#allocation4 + $0x58] sm:$0xff] %v6904_v18  ;;  %12637 = vmatpush3.bf16.msra.mxu0 %v13914_v4  ;;  %v13928_v3 = vld [vmem:[%s16933_s3 + $0xa8] sm:$0xff]   ;;  %v13931_v4 = vld [vmem:[%s16933_s3 + $0x1f8] sm:$0xff]   ;;  %v13933_v7 = vld [vmem:[%s16933_s3 + $0x200] sm:$0xff]  }
 0x3c7   : > { %vm6987_vm0 = vcmp.gt.f32.partialorder %v6973_v62, 0.3  ;;  %v6974_v57 = vadd.f32 %v6960_v1, %v6904_v18  ;;  %7044 = vst [vmem:[#allocation4 + $0xc8] sm:$0xff] %v6960_v1  ;;  %12638 = vmatprep.subr.bf16.mxu0 %v16954_v36  ;;  %v13932_v23 = vld [vmem:[%s16933_s3 + $0xb8] sm:$0xff]   ;;  %v13935_v18 = vld [vmem:[%s16933_s3 + $0xc0] sm:$0xff]   ;;  %v13934_v48 = vld [vmem:[%s16933_s3 + $0x208] sm:$0xff]  }
 0x3c8   : > { %12711 = vmatpush3.bf16.msra.mxu1 %v13915_v38  ;;  %v6794_v5 = vpop.f32.mrb[48].mxu1  ;;  %vm15970_vm5 = vmpackc.low %vm6987_vm0, %vm6986_vm2  ;;  %v10863_v46 = vsel %vm6987_vm0, 1.0, %v16954_v36  ;;  %v13937_v22 = vld [vmem:[%s16933_s3 + $0xc8] sm:$0xff]   ;;  %v13939_v38 = vld [vmem:[%s16933_s3 + $0xd0] sm:$0xff]  }
 0x3c9   : > { %12768 = vmatprep.subr.bf16.mxu1 %v16954_v36  ;;  %vm6988_vm7 = vcmp.gt.f32.partialorder %v6974_v57, 0.3  ;;  %v6905_v34 = vadd.f32 %v6891_v47, %v6794_v5  ;;  %v6947_v37 = vmul.f32 0.4, %v6794_v5  ;;  %v12586_v42 = vpop.f32.mrb[49].mxu1  ;;  %12621 = vmatmul.mubr.msk.bf16.gmra.mrb[48].mxu0 %vm15970_vm5, %v14065_v14  ;;  %v13941_v62 = vld [vmem:[%s16933_s3 + $0x220] sm:$0xff]  }
 0x3ca   : > { %12693 = vmatmul.mubr.msk.bf16.gmra.mrb[68].mxu1 %vm15970_vm5, %v14065_v14  ;;  %v10864_v29 = vsel %vm6988_vm7, 1.0, %v16954_v36  ;;  %v6797_v30 = vpop.f32.mrb[50].mxu1  ;;  %12639 = vmatpush3.bf16.msra.mxu0 %v13916_v12  ;;  %vm15989_vm9 = vmpackc.low %vm6988_vm7, %vm6987_vm0  ;;  %v13942_v1 = vld [vmem:[%s16933_s3 + $0xe0] sm:$0xff]   ;;  %v13943_v47 = vld [vmem:[%s16933_s3 + $0x228] sm:$0xff]  }
 0x3cb   : > { %12640 = vmatprep.mubr.msk.bf16.mxu0 %vm14064_vm1, %v16954_v36  ;;  %v7052_v54 = vpack.c.bf16 %v10864_v29, %v10863_v46  ;;  %v6961_v27 = vadd.f32 %v6947_v37, %v6933_v6  ;;  %7031 = vst [vmem:[#allocation4 + $0x60] sm:$0xff] %v6905_v34  ;;  %v6906_v60 = vadd.f32 %v6892_v44, %v6797_v30  ;;  %v6948_v51 = vmul.f32 0.4, %v6797_v30  ;;  %v12587_v16 = vpop.f32.mrb[51].mxu1  ;;  %v13946_v12 = vld [vmem:[%s16933_s3 + $0xf0] sm:$0xff]   ;;  %v13947_v57 = vld [vmem:[%s16933_s3 + $0x238] sm:$0xff]  }
 0x3cc   : > { %12712 = vmatprep.mubr.msk.bf16.mxu1 %vm14064_vm1, %v16954_v36  ;;  %12732 = vmatprep.subr.bf16.mxu0 %v16954_v36  ;;  %v13948_v6 = vld [vmem:[%s16933_s3 + $0xf8] sm:$0xff]   ;;  %v13949_v44 = vld [vmem:[%s16933_s3 + $0x240] sm:$0xff]   ;;  %v13953_v37 = vld [vmem:[%s16933_s3 + $0x108] sm:$0xff]  }
 0x3cd   : > { %7059 = vst [vmem:[#allocation5 + $0x28] sm:$0xff] %v7052_v54  ;;  %v6975_v13 = vadd.f32 %v6961_v27, %v6905_v34  ;;  %7045 = vst [vmem:[#allocation4 + $0xd0] sm:$0xff] %v6961_v27  ;;  %v6962_v52 = vadd.f32 %v6948_v51, %v6934_v40  ;;  %v13951_v5 = vld [vmem:[%s16933_s3 + $0x100] sm:$0xff]   ;;  %v13950_v34 = vld [vmem:[%s16933_s3 + $0x248] sm:$0xff]  }
 0x3ce   : > { %7032 = vst [vmem:[#allocation4 + $0x68] sm:$0xff] %v6906_v60  ;;  %v13955_v42 = vld [vmem:[%s16933_s3 + $0x110] sm:$0xff]   ;;  %v13954_v40 = vld [vmem:[%s16933_s3 + $0x258] sm:$0xff]   ;;  %v13957_v46 = vld [vmem:[%s16933_s3 + $0x260] sm:$0xff]  }
 0x3cf   : > { %vm6989_vm11 = vcmp.gt.f32.partialorder %v6975_v13, 0.3  ;;  %v6976_v24 = vadd.f32 %v6962_v52, %v6906_v60  ;;  %7046 = vst [vmem:[#allocation4 + $0xd8] sm:$0xff] %v6962_v52  ;;  %v13958_v29 = vld [vmem:[%s16933_s3 + $0x120] sm:$0xff]   ;;  %v13959_v30 = vld [vmem:[%s16933_s3 + $0x268] sm:$0xff]   ;;  %v13961_v54 = vld [vmem:[%s16933_s3 + $0x270] sm:$0xff]  }
 0x3d0   : > { %vm16003_vm13 = vmpackc.low %vm6989_vm11, %vm6988_vm7  ;;  %v10865_v49 = vsel %vm6989_vm11, 1.0, %v16954_v36  ;;  %v13962_v27 = vld [vmem:[%s16933_s3 + $0x130] sm:$0xff]   ;;  %v13963_v60 = vld [vmem:[%s16933_s3 + $0x278] sm:$0xff]  }
 0x3d1   : > { %vm6990_vm2 = vcmp.gt.f32.partialorder %v6976_v24, 0.3  ;;  %12641 = vmatmul.mubr.msk.bf16.vlgmr.msra.gmra.mrb[32].mxu0 %vm15800_vm15, %v14065_v14  ;;  %v13965_v51 = vld [vmem:[%s16934_s4 + $0x40] sm:$0xff]   ;;  %v13966_v16 = vld [vmem:[%s16934_s4 + $0x48] sm:$0xff]   ;;  %v13967_v13 = vld [vmem:[%s16934_s4 + $0x50] sm:$0xff]  }
 0x3d2   : > { %12713 = vmatmul.mubr.msk.bf16.vlgmr.msra.gmra.mrb[52].mxu1 %vm15800_vm15, %v14065_v14  ;;  %v10866_v15 = vsel %vm6990_vm2, 1.0, %v16954_v36  ;;  %12644 = vmatprep.mubr.msk.bf16.mxu0 %vm14064_vm1, %v16954_v36  ;;  %vm16020_vm0 = vmpackc.low %vm6990_vm2, %vm6989_vm11  ;;  %v13972_v52 = vld [vmem:[%s16934_s4 + $0x78] sm:$0xff]   ;;  %v13982_v24 = vld [vmem:[%s16935_s5 + $0x8] sm:$0xff]  }
 0x3d3   : > { %12769 = vmatpush3.bf16.msra.mxu1 %v13917_v50  ;;  %v7053_v35 = vpack.c.bf16 %v10866_v15, %v10865_v49  ;;  %12716 = vmatprep.mubr.msk.bf16.mxu1 %vm14064_vm1, %v16954_v36  ;;  %v13981_v50 = vld [vmem:[%s16935_s5] sm:$0xff]   ;;  %v13990_v15 = vld [vmem:[%s16935_s5 + $0x28] sm:$0xff]  }
 0x3d4   : > { %12770 = vmatprep.subr.bf16.mxu1 %v16954_v36  ;;  %12733 = vmatpush3.bf16.msra.mxu0 %v13919_v28  ;;  %v13984_v28 = vld [vmem:[%s16935_s5 + $0x10] sm:$0xff]   ;;  %v13988_v49 = vld [vmem:[%s16935_s5 + $0x20] sm:$0xff]  }
 0x3d5   : > { %7060 = vst [vmem:[#allocation5 + $0x30] sm:$0xff] %v7053_v35  ;;  %12734 = vmatprep.subr.bf16.mxu0 %v16954_v36 }
 0x3d7   : > { %12771 = vmatpush3.bf16.msra.mxu1 %v13918_v45  ;;  %v8527_v45 = vld [vmem:[#allocation7] sm:$0xff] }
 0x3d8   : > { %12772 = vmatprep.subr.bf16.mxu1 %v16954_v36  ;;  %12735 = vmatpush3.bf16.msra.mxu0 %v13921_v63  ;;  %v8532_v35 = vunpack.c.l.bf16 %v8527_v45  ;;  %v8533_v63 = vunpack.c.h.bf16 %v8527_v45 }
 0x3d9   : > { %12645 = vmatmul.mubr.msk.bf16.gmra.mrb[36].mxu0 %vm15825_vm4, %v14065_v14  ;;  %12736 = vmatprep.subr.bf16.mxu0 %v16954_v36 }
 0x3da   : > { %12717 = vmatmul.mubr.msk.bf16.gmra.mrb[56].mxu1 %vm15825_vm4, %v14065_v14  ;;  %12648 = vmatprep.mubr.msk.bf16.mxu0 %vm14064_vm1, %v16954_v36 }
 0x3db   : > { %12773 = vmatpush3.bf16.msra.mxu1 %v13920_v8  ;;  %12720 = vmatprep.mubr.msk.bf16.mxu1 %vm14064_vm1, %v16954_v36  ;;  %v8717_v8 = vunpack.c.l.bf16 %v8712_v2 }
 0x3dc   : > { %12774 = vmatprep.subr.bf16.mxu1 %v16954_v36  ;;  %12737 = vmatpush3.bf16.msra.mxu0 %v13923_v9  ;;  %v8542_v9 = vsub.f32 1.0, %v8532_v35 }
 0x3dd   : > { %12738 = vmatprep.subr.bf16.mxu0 %v16954_v36 }
 0x3df   : > { %12775 = vmatpush3.bf16.msra.mxu1 %v13922_v21  ;;  %v8718_v21 = vunpack.c.h.bf16 %v8712_v2  ;;  %v8509_v2 = vld [vmem:[#allocation6 + $0x18] sm:$0xff] }
 0x3e0   : > { %12776 = vmatprep.subr.bf16.mxu1 %v16954_v36  ;;  %12739 = vmatpush3.bf16.msra.mxu0 %v13924_v61  ;;  %v8528_v61 = vld [vmem:[#allocation7 + $0x8] sm:$0xff] }
 0x3e1   : > { %12649 = vmatmul.mubr.msk.bf16.gmra.mrb[40].mxu0 %vm15866_vm8, %v14065_v14  ;;  %12740 = vmatprep.subr.bf16.mxu0 %v16954_v36 }
 0x3e2   : > { %12721 = vmatmul.mubr.msk.bf16.gmra.mrb[60].mxu1 %vm15866_vm8, %v14065_v14  ;;  %12652 = vmatprep.mubr.msk.bf16.mxu0 %vm14064_vm1, %v16954_v36 }
 0x3e3   : > { %12777 = vmatpush3.bf16.msra.mxu1 %v13925_v55  ;;  %12724 = vmatprep.mubr.msk.bf16.mxu1 %vm14064_vm1, %v16954_v36  ;;  %v8543_v55 = vsub.f32 1.0, %v8533_v63 }
 0x3e4   : > { %12778 = vmatprep.subr.bf16.mxu1 %v16954_v36  ;;  %12741 = vmatpush3.bf16.msra.mxu0 %v13926_v17  ;;  %v8713_v17 = vld [vmem:[#allocation7 + $0x30] sm:$0xff] }
 0x3e5   : > { %12742 = vmatprep.subr.bf16.mxu0 %v16954_v36 }
 0x3e7   : > { %12779 = vmatpush3.bf16.msra.mxu1 %v13927_v53  ;;  %v8727_v53 = vsub.f32 1.0, %v8717_v8 }
 0x3e8   : > { %12780 = vmatprep.subr.bf16.mxu1 %v16954_v36  ;;  %12743 = vmatpush3.bf16.msra.mxu0 %v13928_v3  ;;  %v8534_v3 = vunpack.c.l.bf16 %v8528_v61 }
 0x3e9   : > { %12653 = vmatmul.mubr.msk.bf16.gmra.mrb[44].mxu0 %vm15906_vm12, %v14065_v14  ;;  %12744 = vmatprep.subr.bf16.mxu0 %v16954_v36 }
 0x3ea   : > { %12725 = vmatmul.mubr.msk.bf16.gmra.mrb[64].mxu1 %vm15906_vm12, %v14065_v14  ;;  %12656 = vmatprep.mubr.msk.bf16.mxu0 %vm14064_vm1, %v16954_v36 }
 0x3eb   : > { %12728 = vmatprep.mubr.msk.bf16.mxu1 %vm14064_vm1, %v16954_v36  ;;  %12781 = vmatpush3.bf16.msra.mxu1 %v13929_v56  ;;  %v8552_v56 = vmul.f32 0.25, %v8542_v9 }
 0x3ec   : > { %12782 = vmatprep.subr.bf16.mxu1 %v16954_v36  ;;  %12745 = vmatpush3.bf16.msra.mxu0 %v13930_v25  ;;  %v8728_v25 = vsub.f32 1.0, %v8718_v21 }
 0x3ed   : > { %12746 = vmatprep.subr.bf16.mxu0 %v16954_v36 }
 0x3ef   : > { %12783 = vmatpush3.bf16.msra.mxu1 %v13931_v4  ;;  %v8719_v4 = vunpack.c.l.bf16 %v8713_v17 }
 0x3f0   : > { %12840 = vmatprep.subr.bf16.mxu1 %v16954_v36  ;;  %12747 = vmatpush3.bf16.msra.mxu0 %v13932_v23  ;;  %v8506_v23 = vld [vmem:[#allocation6] sm:$0xff] }
 0x3f1   : > { %12657 = vmatmul.mubr.msk.bf16.gmra.mrb[48].mxu0 %vm15948_vm3, %v14065_v14  ;;  %12804 = vmatprep.subr.bf16.mxu0 %v16954_v36 }
 0x3f2   : > { %12729 = vmatmul.mubr.msk.bf16.gmra.mrb[68].mxu1 %vm15948_vm3, %v14065_v14  ;;  %12748 = vmatprep.mubr.msk.bf16.mxu0 %vm14064_vm1, %v16954_v36 }
 0x3f3   : > { %12784 = vmatprep.mubr.msk.bf16.mxu1 %vm14064_vm1, %v16954_v36 }
 0x3f9   : > { %12749 = vmatmul.mubr.msk.bf16.vlgmr.msra.gmra.mrb[32].mxu0 %vm15825_vm4, %v14065_v14 }
 0x3fa   : > { %12785 = vmatmul.mubr.msk.bf16.vlgmr.msra.gmra.mrb[52].mxu1 %vm15825_vm4, %v14065_v14  ;;  %12752 = vmatprep.mubr.msk.bf16.mxu0 %vm14064_vm1, %v16954_v36 }
 0x3fb   : > { %12841 = vmatpush3.bf16.msra.mxu1 %v13933_v7  ;;  %12788 = vmatprep.mubr.msk.bf16.mxu1 %vm14064_vm1, %v16954_v36  ;;  %v8517_v7 = vld [vmem:[#allocation6 + $0xa0] sm:$0xff] }
 0x3fc   : > { %12842 = vmatprep.subr.bf16.mxu1 %v16954_v36  ;;  %12805 = vmatpush3.bf16.msra.mxu0 %v13935_v18  ;;  %v8582_v18 = vmul.f32 0.15, %v8542_v9 }
 0x3fd   : > { %12806 = vmatprep.subr.bf16.mxu0 %v16954_v36 }
 0x3ff   : > { %12843 = vmatpush3.bf16.msra.mxu1 %v13934_v48  ;;  %v8507_v48 = vld [vmem:[#allocation6 + $0x8] sm:$0xff] }
 0x400   : > { %12844 = vmatprep.subr.bf16.mxu1 %v16954_v36  ;;  %12807 = vmatpush3.bf16.msra.mxu0 %v13937_v22  ;;  %v8553_v22 = vmul.f32 0.25, %v8543_v55 }
 0x401   : > { %12753 = vmatmul.mubr.msk.bf16.gmra.mrb[36].mxu0 %vm15866_vm8, %v14065_v14  ;;  %12808 = vmatprep.subr.bf16.mxu0 %v16954_v36 }
 0x402   : > { %12789 = vmatmul.mubr.msk.bf16.gmra.mrb[56].mxu1 %vm15866_vm8, %v14065_v14  ;;  %12756 = vmatprep.mubr.msk.bf16.mxu0 %vm14064_vm1, %v16954_v36 }
 0x403   : > { %12845 = vmatpush3.bf16.msra.mxu1 %v13936_v10  ;;  %12792 = vmatprep.mubr.msk.bf16.mxu1 %vm14064_vm1, %v16954_v36  ;;  %v8535_v10 = vunpack.c.h.bf16 %v8528_v61  ;;  %v8520_v61 = vld [vmem:[#allocation6 + $0xb8] sm:$0xff] }
 0x404   : > { %12846 = vmatprep.subr.bf16.mxu1 %v16954_v36  ;;  %12809 = vmatpush3.bf16.msra.mxu0 %v13939_v38  ;;  %v8737_v38 = vmul.f32 0.25, %v8727_v53 }
 0x405   : > { %12810 = vmatprep.subr.bf16.mxu0 %v16954_v36 }
 0x407   : > { %12847 = vmatpush3.bf16.msra.mxu1 %v13938_v0  ;;  %v8767_v0 = vmul.f32 0.15, %v8727_v53 }
 0x408   : > { %12848 = vmatprep.subr.bf16.mxu1 %v16954_v36  ;;  %12811 = vmatpush3.bf16.msra.mxu0 %v13940_v19  ;;  %v8583_v19 = vmul.f32 0.15, %v8543_v55 }
 0x409   : > { %12757 = vmatmul.mubr.msk.bf16.gmra.mrb[40].mxu0 %vm15906_vm12, %v14065_v14  ;;  %12812 = vmatprep.subr.bf16.mxu0 %v16954_v36 }
 0x40a   : > { %12793 = vmatmul.mubr.msk.bf16.gmra.mrb[60].mxu1 %vm15906_vm12, %v14065_v14  ;;  %12760 = vmatprep.mubr.msk.bf16.mxu0 %vm14064_vm1, %v16954_v36 }
 0x40b   : > { %12849 = vmatpush3.bf16.msra.mxu1 %v13941_v62  ;;  %12796 = vmatprep.mubr.msk.bf16.mxu1 %vm14064_vm1, %v16954_v36  ;;  %v8529_v62 = vld [vmem:[#allocation7 + $0x10] sm:$0xff] }
 0x40c   : > { %12850 = vmatprep.subr.bf16.mxu1 %v16954_v36  ;;  %12813 = vmatpush3.bf16.msra.mxu0 %v13942_v1  ;;  %v8692_v1 = vld [vmem:[#allocation6 + $0x50] sm:$0xff] }
 0x40d   : > { %12814 = vmatprep.subr.bf16.mxu0 %v16954_v36 }
 0x40f   : > { %12851 = vmatpush3.bf16.msra.mxu1 %v13943_v47  ;;  %v8702_v47 = vld [vmem:[#allocation6 + $0xf0] sm:$0xff] }
 0x410   : > { %12852 = vmatprep.subr.bf16.mxu1 %v16954_v36  ;;  %12815 = vmatpush3.bf16.msra.mxu0 %v13944_v33  ;;  %v8518_v33 = vld [vmem:[#allocation6 + $0xa8] sm:$0xff] }
 0x411   : > { %12761 = vmatmul.mubr.msk.bf16.gmra.mrb[44].mxu0 %vm15948_vm3, %v14065_v14  ;;  %12816 = vmatprep.subr.bf16.mxu0 %v16954_v36 }
 0x412   : > { %12797 = vmatmul.mubr.msk.bf16.gmra.mrb[64].mxu1 %vm15948_vm3, %v14065_v14  ;;  %12764 = vmatprep.mubr.msk.bf16.mxu0 %vm14064_vm1, %v16954_v36 }
 0x413   : > { %12800 = vmatprep.mubr.msk.bf16.mxu1 %vm14064_vm1, %v16954_v36  ;;  %12853 = vmatpush3.bf16.msra.mxu1 %v13945_v39  ;;  %v8544_v39 = vsub.f32 1.0, %v8534_v3 }
 0x414   : > { %12854 = vmatprep.subr.bf16.mxu1 %v16954_v36  ;;  %12817 = vmatpush3.bf16.msra.mxu0 %v13946_v12  ;;  %v16455_v12 = vmul.f32 %v8552_v56, %v8506_v23  ;;  %v8695_v56 = vld [vmem:[#allocation6 + $0x68] sm:$0xff] }
 0x415   : > { %12818 = vmatprep.subr.bf16.mxu0 %v16954_v36 }
 0x417   : > { %12855 = vmatpush3.bf16.msra.mxu1 %v13947_v57  ;;  %v8738_v57 = vmul.f32 0.25, %v8728_v25 }
 0x418   : > { %12912 = vmatprep.subr.bf16.mxu1 %v16954_v36  ;;  %12819 = vmatpush3.bf16.msra.mxu0 %v13948_v6  ;;  %v8729_v6 = vsub.f32 1.0, %v8719_v4 }
 0x419   : > { %12765 = vmatmul.mubr.msk.bf16.gmra.mrb[48].mxu0 %vm15989_vm9, %v14065_v14  ;;  %12876 = vmatprep.subr.bf16.mxu0 %v16954_v36 }
 0x41a   : > { %12801 = vmatmul.mubr.msk.bf16.gmra.mrb[68].mxu1 %vm15989_vm9, %v14065_v14  ;;  %12820 = vmatprep.mubr.msk.bf16.mxu0 %vm14064_vm1, %v16954_v36 }
 0x41b   : > { %12856 = vmatprep.mubr.msk.bf16.mxu1 %vm14064_vm1, %v16954_v36 }
 0x421   : > { %12821 = vmatmul.mubr.msk.bf16.vlgmr.msra.gmra.mrb[32].mxu0 %vm15844_vm6, %v14065_v14 }
 0x422   : > { %12857 = vmatmul.mubr.msk.bf16.vlgmr.msra.gmra.mrb[52].mxu1 %vm15844_vm6, %v14065_v14  ;;  %12824 = vmatprep.mubr.msk.bf16.mxu0 %vm14064_vm1, %v16954_v36 }
 0x423   : > { %12913 = vmatpush3.bf16.msra.mxu1 %v13949_v44  ;;  %12860 = vmatprep.mubr.msk.bf16.mxu1 %vm14064_vm1, %v16954_v36  ;;  %v8720_v44 = vunpack.c.h.bf16 %v8713_v17 }
 0x424   : > { %12914 = vmatprep.subr.bf16.mxu1 %v16954_v36  ;;  %12877 = vmatpush3.bf16.msra.mxu0 %v13951_v5  ;;  %v8714_v5 = vld [vmem:[#allocation7 + $0x38] sm:$0xff] }
 0x425   : > { %12878 = vmatprep.subr.bf16.mxu0 %v16954_v36 }
 0x427   : > { %12915 = vmatpush3.bf16.msra.mxu1 %v13950_v34  ;;  %v16457_v34 = vmul.f32 %v8582_v18, %v8517_v7  ;;  %v8705_v7 = vld [vmem:[#allocation6 + $0x108] sm:$0xff]  ;;  %v8510_v18 = vld [vmem:[#allocation6 + $0x20] sm:$0xff] }
 0x428   : > { %12916 = vmatprep.subr.bf16.mxu1 %v16954_v36  ;;  %12879 = vmatpush3.bf16.msra.mxu0 %v13953_v37  ;;  %v16459_v37 = vmul.f32 %v8553_v22, %v8507_v48  ;;  %v8521_v48 = vld [vmem:[#allocation6 + $0xc0] sm:$0xff] }
 0x429   : > { %12825 = vmatmul.mubr.msk.bf16.gmra.mrb[36].mxu0 %vm15890_vm10, %v14065_v14  ;;  %12880 = vmatprep.subr.bf16.mxu0 %v16954_v36 }
 0x42a   : > { %12861 = vmatmul.mubr.msk.bf16.gmra.mrb[56].mxu1 %vm15890_vm10, %v14065_v14  ;;  %12828 = vmatprep.mubr.msk.bf16.mxu0 %vm14064_vm1, %v16954_v36 }
 0x42b   : > { %12917 = vmatpush3.bf16.msra.mxu1 %v13952_v11  ;;  %12864 = vmatprep.mubr.msk.bf16.mxu1 %vm14064_vm1, %v16954_v36  ;;  %v8693_v11 = vld [vmem:[#allocation6 + $0x58] sm:$0xff] }
 0x42c   : > { %12918 = vmatprep.subr.bf16.mxu1 %v16954_v36  ;;  %12881 = vmatpush3.bf16.msra.mxu0 %v13955_v42  ;;  %v8545_v42 = vsub.f32 1.0, %v8535_v10 }
 0x42d   : > { %12882 = vmatprep.subr.bf16.mxu0 %v16954_v36 }
 0x42e   : > { %v8585_v35 = vmul.f32 0.15, %v8545_v42 }
 0x42f   : > { %12919 = vmatpush3.bf16.msra.mxu1 %v13954_v40  ;;  %v8536_v40 = vunpack.c.l.bf16 %v8529_v62 }
 0x430   : > { %12920 = vmatprep.subr.bf16.mxu1 %v16954_v36  ;;  %12883 = vmatpush3.bf16.msra.mxu0 %v13956_v43  ;;  %v16461_v43 = vmul.f32 %v8737_v38, %v8692_v1  ;;  %v8706_v1 = vld [vmem:[#allocation6 + $0x110] sm:$0xff] }
 0x431   : > { %12829 = vmatmul.mubr.msk.bf16.gmra.mrb[40].mxu0 %vm15932_vm14, %v14065_v14  ;;  %12884 = vmatprep.subr.bf16.mxu0 %v16954_v36 }
 0x432   : > { %12865 = vmatmul.mubr.msk.bf16.gmra.mrb[60].mxu1 %vm15932_vm14, %v14065_v14  ;;  %12832 = vmatprep.mubr.msk.bf16.mxu0 %vm14064_vm1, %v16954_v36 }
 0x433   : > { %12921 = vmatpush3.bf16.msra.mxu1 %v13957_v46  ;;  %12868 = vmatprep.mubr.msk.bf16.mxu1 %vm14064_vm1, %v16954_v36  ;;  %v16463_v46 = vmul.f32 %v8767_v0, %v8702_v47  ;;  %v16484_v0 = vmul.f32 %v8585_v35, %v8520_v61  ;;  %v8511_v47 = vld [vmem:[#allocation6 + $0x28] sm:$0xff]  ;;  %v8698_v35 = vld [vmem:[#allocation6 + $0x80] sm:$0xff] }
 0x434   : > { %12922 = vmatprep.subr.bf16.mxu1 %v16954_v36  ;;  %12885 = vmatpush3.bf16.msra.mxu0 %v13958_v29  ;;  %v16465_v29 = vmul.f32 %v8583_v19, %v8518_v33 }
 0x435   : > { %12886 = vmatprep.subr.bf16.mxu0 %v16954_v36 }
 0x437   : > { %12923 = vmatpush3.bf16.msra.mxu1 %v13959_v30  ;;  %v8768_v30 = vmul.f32 0.15, %v8728_v25 }
 0x438   : > { %12924 = vmatprep.subr.bf16.mxu1 %v16954_v36  ;;  %12887 = vmatpush3.bf16.msra.mxu0 %v13960_v41  ;;  %v8530_v41 = vld [vmem:[#allocation7 + $0x18] sm:$0xff] }
 0x439   : > { %12833 = vmatmul.mubr.msk.bf16.gmra.mrb[44].mxu0 %vm15970_vm5, %v14065_v14  ;;  %12888 = vmatprep.subr.bf16.mxu0 %v16954_v36  ;;  %v8539_v8 = vunpack.c.h.bf16 %v8530_v41 }
 0x43a   : > { %12869 = vmatmul.mubr.msk.bf16.gmra.mrb[64].mxu1 %vm15970_vm5, %v14065_v14  ;;  %12836 = vmatprep.mubr.msk.bf16.mxu0 %vm14064_vm1, %v16954_v36 }
 0x43b   : > { %12872 = vmatprep.mubr.msk.bf16.mxu1 %vm14064_vm1, %v16954_v36  ;;  %12925 = vmatpush3.bf16.msra.mxu1 %v13961_v54  ;;  %v8703_v54 = vld [vmem:[#allocation6 + $0xf8] sm:$0xff] }
 0x43c   : > { %12926 = vmatprep.subr.bf16.mxu1 %v16954_v36  ;;  %12889 = vmatpush3.bf16.msra.mxu0 %v13962_v27  ;;  %v8554_v27 = vmul.f32 0.25, %v8544_v39  ;;  %v16471_v45 = vmul.f32 %v8768_v30, %v8703_v54  ;;  %v8697_v30 = vld [vmem:[#allocation6 + $0x78] sm:$0xff] }
 0x43d   : > { %12890 = vmatprep.subr.bf16.mxu0 %v16954_v36 }
 0x43f   : > { %12927 = vmatpush3.bf16.msra.mxu1 %v13963_v60  ;;  %v8584_v60 = vmul.f32 0.15, %v8544_v39  ;;  %v8549_v39 = vsub.f32 1.0, %v8539_v8  ;;  %v8524_v8 = vld [vmem:[#allocation6 + $0xd8] sm:$0xff] }
 0x440   : > { %13024 = vmatprep.subr.bf16.mxu1 %v16954_v36  ;;  %12891 = vmatpush3.bf16.msra.mxu0 %v13964_v59  ;;  %v8721_v59 = vunpack.c.l.bf16 %v8714_v5 }
 0x441   : > { %12837 = vmatmul.mubr.msk.bf16.gmra.mrb[48].mxu0 %vm16003_vm13, %v14065_v14  ;;  %12948 = vmatprep.subr.bf16.mxu0 %v16954_v36 }
 0x442   : > { %12873 = vmatmul.mubr.msk.bf16.gmra.mrb[68].mxu1 %vm16003_vm13, %v14065_v14  ;;  %12892 = vmatprep.mubr.msk.bf16.mxu0 %vm14064_vm1, %v16954_v36  ;;  %v8731_v55 = vsub.f32 1.0, %v8721_v59 }
 0x443   : > { %12928 = vmatprep.mubr.msk.bf16.mxu1 %vm14064_vm1, %v16954_v36 }
 0x449   : > { %12893 = vmatmul.mubr.msk.bf16.vlgmr.msra.gmra.mrb[32].mxu0 %vm15866_vm8, %v14065_v14 }
 0x44a   : > { %12929 = vmatmul.mubr.msk.bf16.vlgmr.msra.gmra.mrb[52].mxu1 %vm15866_vm8, %v14065_v14  ;;  %12896 = vmatprep.mubr.msk.bf16.mxu0 %vm14064_vm1, %v16954_v36 }
 0x44b   : > { %12932 = vmatprep.mubr.msk.bf16.mxu1 %vm14064_vm1, %v16954_v36  ;;  %12949 = vmatpush3.bf16.msra.mxu0 %v13965_v51  ;;  %v8537_v51 = vunpack.c.h.bf16 %v8529_v62  ;;  %v8696_v62 = vld [vmem:[#allocation6 + $0x70] sm:$0xff] }
 0x44c   : > { %12950 = vmatprep.subr.bf16.mxu0 %v16954_v36  ;;  %13025 = vmatpush3.bf16.msra.mxu1 %v13981_v50  ;;  %v8694_v50 = vld [vmem:[#allocation6 + $0x60] sm:$0xff] }
 0x44d   : > { %13026 = vmatprep.subr.bf16.mxu1 %v16954_v36  ;;  %v8547_v17 = vsub.f32 1.0, %v8537_v51 }
 0x44f   : > { %12951 = vmatpush3.bf16.msra.mxu0 %v13966_v16  ;;  %v16467_v16 = vld [vmem:[#allocation7 + $0x40] sm:$0xff] }
 0x450   : > { %12952 = vmatprep.subr.bf16.mxu0 %v16954_v36  ;;  %13027 = vmatpush3.bf16.msra.mxu1 %v13982_v24  ;;  %v8704_v24 = vld [vmem:[#allocation6 + $0x100] sm:$0xff]  ;;  %v8723_v63 = vunpack.c.l.bf16 %v16467_v16 }
 0x451   : > { %12897 = vmatmul.mubr.msk.bf16.gmra.mrb[36].mxu0 %vm15906_vm12, %v14065_v14  ;;  %13028 = vmatprep.subr.bf16.mxu1 %v16954_v36 }
 0x452   : > { %12933 = vmatmul.mubr.msk.bf16.gmra.mrb[56].mxu1 %vm15906_vm12, %v14065_v14  ;;  %12900 = vmatprep.mubr.msk.bf16.mxu0 %vm14064_vm1, %v16954_v36  ;;  %v8733_v33 = vsub.f32 1.0, %v8723_v63  ;;  %v8513_v63 = vld [vmem:[#allocation6 + $0x38] sm:$0xff] }
 0x453   : > { %12936 = vmatprep.mubr.msk.bf16.mxu1 %vm14064_vm1, %v16954_v36  ;;  %12953 = vmatpush3.bf16.msra.mxu0 %v13967_v13  ;;  %v16469_v13 = vmul.f32 %v8738_v57, %v8693_v11  ;;  %v8741_v57 = vmul.f32 0.25, %v8731_v55 }
 0x454   : > { %12954 = vmatprep.subr.bf16.mxu0 %v16954_v36  ;;  %13029 = vmatpush3.bf16.msra.mxu1 %v13984_v28  ;;  %v8555_v28 = vmul.f32 0.25, %v8545_v42  ;;  %v8773_v61 = vmul.f32 0.15, %v8733_v33 }
 0x455   : > { %13030 = vmatprep.subr.bf16.mxu1 %v16954_v36 }
 0x456   : > { %v16482_v23 = vmul.f32 %v8555_v28, %v8509_v2  ;;  %v8559_v28 = vmul.f32 0.25, %v8549_v39 }
 0x457   : > { %12955 = vmatpush3.bf16.msra.mxu0 %v13968_v31  ;;  %v8508_v31 = vld [vmem:[#allocation6 + $0x10] sm:$0xff] }
 0x458   : > { %12956 = vmatprep.subr.bf16.mxu0 %v16954_v36  ;;  %13031 = vmatpush3.bf16.msra.mxu1 %v13986_v20  ;;  %v8546_v20 = vsub.f32 1.0, %v8536_v40  ;;  %v16474_v9 = vmul.f32 %v8554_v27, %v8508_v31  ;;  %v8522_v40 = vld [vmem:[#allocation6 + $0xc8] sm:$0xff]  ;;  %v8724_v27 = vunpack.c.h.bf16 %v16467_v16 }
 0x459   : > { %12901 = vmatmul.mubr.msk.bf16.gmra.mrb[40].mxu0 %vm15948_vm3, %v14065_v14  ;;  %13032 = vmatprep.subr.bf16.mxu1 %v16954_v36 }
 0x45a   : > { %12937 = vmatmul.mubr.msk.bf16.gmra.mrb[60].mxu1 %vm15948_vm3, %v14065_v14  ;;  %12904 = vmatprep.mubr.msk.bf16.mxu0 %vm14064_vm1, %v16954_v36  ;;  %v8556_v22 = vmul.f32 0.25, %v8546_v20  ;;  %v8586_v19 = vmul.f32 0.15, %v8546_v20  ;;  %v8589_v20 = vmul.f32 0.15, %v8549_v39 }
 0x45b   : > { %12940 = vmatprep.mubr.msk.bf16.mxu1 %vm14064_vm1, %v16954_v36  ;;  %12957 = vmatpush3.bf16.msra.mxu0 %v13969_v58  ;;  %v8519_v58 = vld [vmem:[#allocation6 + $0xb0] sm:$0xff] }
 0x45c   : > { %12958 = vmatprep.subr.bf16.mxu0 %v16954_v36  ;;  %13033 = vmatpush3.bf16.msra.mxu1 %v13988_v49  ;;  %v8722_v49 = vunpack.c.h.bf16 %v8714_v5  ;;  %v16476_v21 = vmul.f32 %v8584_v60, %v8519_v58  ;;  %v8587_v5 = vmul.f32 0.15, %v8547_v17  ;;  %v16491_v60 = vmul.f32 %v8556_v22, %v8510_v18  ;;  %v8531_v58 = vld [vmem:[#allocation7 + $0x20] sm:$0xff] }
 0x45d   : > { %13034 = vmatprep.subr.bf16.mxu1 %v16954_v36 }
 0x45e   : > { %v8732_v10 = vsub.f32 1.0, %v8722_v49  ;;  %v16497_v49 = vmul.f32 %v8741_v57, %v8696_v62  ;;  %v16503_v2 = vmul.f32 %v8587_v5, %v8522_v40  ;;  %v16518_v62 = vmul.f32 %v8589_v20, %v8524_v8 }
 0x45f   : > { %12959 = vmatpush3.bf16.msra.mxu0 %v13970_v32  ;;  %v8739_v32 = vmul.f32 0.25, %v8729_v6 }
 0x460   : > { %12960 = vmatprep.subr.bf16.mxu0 %v16954_v36  ;;  %13035 = vmatpush3.bf16.msra.mxu1 %v13990_v15  ;;  %v8538_v15 = vunpack.c.l.bf16 %v8530_v41  ;;  %v8707_v41 = vld [vmem:[#allocation6 + $0x118] sm:$0xff]  ;;  %v8772_v54 = vmul.f32 0.15, %v8732_v10  ;;  %v8742_v59 = vmul.f32 0.25, %v8732_v10 }
 0x461   : > { %12905 = vmatmul.mubr.msk.bf16.gmra.mrb[44].mxu0 %vm15989_vm9, %v14065_v14  ;;  %13036 = vmatprep.subr.bf16.mxu1 %v16954_v36  ;;  %v16478_v53 = vmul.f32 %v8739_v32, %v8694_v50  ;;  %v16493_v32 = vld [vmem:[#allocation7 + $0x48] sm:$0xff]  ;;  %v8523_v50 = vld [vmem:[#allocation6 + $0xd0] sm:$0xff] }
 0x462   : > { %12941 = vmatmul.mubr.msk.bf16.gmra.mrb[64].mxu1 %vm15989_vm9, %v14065_v14  ;;  %12908 = vmatprep.mubr.msk.bf16.mxu0 %vm14064_vm1, %v16954_v36  ;;  %v8548_v38 = vsub.f32 1.0, %v8538_v15 }
 0x463   : > { %12944 = vmatprep.mubr.msk.bf16.mxu1 %vm14064_vm1, %v16954_v36  ;;  %12961 = vmatpush3.bf16.msra.mxu0 %v13971_v26  ;;  %v8769_v26 = vmul.f32 0.15, %v8729_v6  ;;  %v8771_v6 = vmul.f32 0.15, %v8731_v55  ;;  %v8734_v55 = vsub.f32 1.0, %v8724_v27 }
 0x464   : > { %12962 = vmatprep.subr.bf16.mxu0 %v16954_v36  ;;  %v8558_v51 = vmul.f32 0.25, %v8548_v38  ;;  %v8588_v31 = vmul.f32 0.15, %v8548_v38 }
 0x465   : > { %v16480_v3 = vmul.f32 %v8769_v26, %v8704_v24  ;;  %v16495_v26 = vmul.f32 %v8586_v19, %v8521_v48  ;;  %v8743_v24 = vmul.f32 0.25, %v8733_v33  ;;  %v16499_v15 = vmul.f32 %v8771_v6, %v8706_v1  ;;  %v8708_v48 = vld [vmem:[#allocation6 + $0x120] sm:$0xff] }
 0x466   : > { %v16512_v18 = vmul.f32 %v8588_v31, %v8523_v50  ;;  %v16516_v19 = vmul.f32 %v8559_v28, %v8513_v63  ;;  %v8541_v1 = vunpack.c.h.bf16 %v8531_v58  ;;  %v8774_v28 = vmul.f32 0.15, %v8734_v55 }
 0x467   : > { %12963 = vmatpush3.bf16.msra.mxu0 %v13972_v52  ;;  %v8730_v52 = vsub.f32 1.0, %v8720_v44  ;;  %v8557_v44 = vmul.f32 0.25, %v8547_v17  ;;  %v8540_v17 = vunpack.c.l.bf16 %v8531_v58  ;;  %v16514_v38 = vmul.f32 %v8743_v24, %v8698_v35 }
 0x468   : > { %12976 = vmatprep.subr.bf16.mxu0 %v16954_v36  ;;  %v16528_v20 = vsub.f32 1.0, %v8541_v1 }
 0x469   : > { %12909 = vmatmul.mubr.msk.bf16.gmra.mrb[48].mxu0 %vm16020_vm0, %v14065_v14  ;;  %v8740_v25 = vmul.f32 0.25, %v8730_v52  ;;  %v8770_v4 = vmul.f32 0.15, %v8730_v52  ;;  %v8512_v52 = vld [vmem:[#allocation6 + $0x30] sm:$0xff]  ;;  %v16501_v16 = vmul.f32 %v8557_v44, %v8511_v47 }
 0x46a   : > { %12945 = vmatmul.mubr.msk.bf16.gmra.mrb[68].mxu1 %vm16020_vm0, %v14065_v14  ;;  %12964 = vmatprep.mubr.msk.bf16.mxu0 %vm14064_vm1, %v16954_v36 }
 0x46b   : > { %13040 = vmatprep.mubr.msk.bf16.mxu1 %vm14064_vm1, %v16954_v36  ;;  %v16486_v11 = vmul.f32 %v8740_v25, %v8695_v56  ;;  %v16488_v42 = vmul.f32 %v8770_v4, %v8705_v7  ;;  %v8725_v56 = vunpack.c.l.bf16 %v16493_v32  ;;  %v16506_v25 = vmul.f32 %v8742_v59, %v8697_v30 }
 0x46c   : > { %v16508_v4 = vmul.f32 %v8772_v54, %v8707_v41  ;;  %v16510_v7 = vmul.f32 %v8558_v51, %v8512_v52  ;;  %v16522_v30 = vmul.f32 %v8773_v61, %v8708_v48  ;;  %v8744_v41 = vmul.f32 0.25, %v8734_v55  ;;  %v8699_v52 = vld [vmem:[#allocation6 + $0x88] sm:$0xff] }
 0x46d   : > { %v8550_v54 = vsub.f32 1.0, %v8540_v17  ;;  %v8735_v27 = vsub.f32 1.0, %v8725_v56  ;;  %v8709_v17 = vld [vmem:[#allocation6 + $0x128] sm:$0xff] }
 0x46e   : > { %v16533_v8 = vmul.f32 %v8744_v41, %v8699_v52  ;;  %v16542_v41 = vmul.f32 %v8774_v28, %v8709_v17 }
 0x46f   : > { %v8560_v61 = vmul.f32 0.25, %v8550_v54  ;;  %v8745_v56 = vmul.f32 0.25, %v8735_v27 }
 0x51c   : > { %v8309_v22 = vpop.f32.mrb[32].mxu0 }
 0x51d   : > { %v8457_v10 = vpop.f32.mrb[52].mxu1  ;;  %v8572_v47 = vadd.f32 %v16455_v12, %v8309_v22  ;;  %v8602_v33 = vmul.f32 0.4, %v8309_v22  ;;  %v12894_v6 = vpop.f32.mrb[33].mxu0 }
 0x51e   : > { %v8757_v39 = vadd.f32 %v16461_v43, %v8457_v10  ;;  %v8787_v57 = vmul.f32 0.4, %v8457_v10  ;;  %v12930_v44 = vpop.f32.mrb[53].mxu1  ;;  %v8312_v5 = vpop.f32.mrb[34].mxu0 }
 0x51f   : > { %v8460_v40 = vpop.f32.mrb[54].mxu1  ;;  %v8612_v59 = vadd.f32 %v8602_v33, %v16457_v34  ;;  %8662 = vst [vmem:[#allocation6] sm:$0xff] %v8572_v47  ;;  %v8573_v12 = vadd.f32 %v16459_v37, %v8312_v5  ;;  %v8603_v31 = vmul.f32 0.4, %v8312_v5  ;;  %v12895_v43 = vpop.f32.mrb[35].mxu0 }
 0x520   : > { %v8797_v51 = vadd.f32 %v8787_v57, %v16463_v46  ;;  %8847 = vst [vmem:[#allocation6 + $0x50] sm:$0xff] %v8757_v39  ;;  %v12931_v58 = vpop.f32.mrb[55].mxu1  ;;  %v8758_v50 = vadd.f32 %v16469_v13, %v8460_v40  ;;  %v8788_v24 = vmul.f32 0.4, %v8460_v40  ;;  %v8726_v46 = vunpack.c.h.bf16 %v16493_v32 }
 0x521   : > { %v8622_v35 = vadd.f32 %v8612_v59, %v8572_v47  ;;  %8672 = vst [vmem:[#allocation6 + $0xa0] sm:$0xff] %v8612_v59  ;;  %v8613_v34 = vadd.f32 %v8603_v31, %v16465_v29  ;;  %8663 = vst [vmem:[#allocation6 + $0x8] sm:$0xff] %v8573_v12  ;;  %v8590_v13 = vmul.f32 0.15, %v8550_v54 }
 0x522   : > { %v8807_v63 = vadd.f32 %v8797_v51, %v8757_v39  ;;  %8857 = vst [vmem:[#allocation6 + $0xf0] sm:$0xff] %v8797_v51  ;;  %v8798_v37 = vadd.f32 %v8788_v24, %v16471_v45  ;;  %8848 = vst [vmem:[#allocation6 + $0x58] sm:$0xff] %v8758_v50  ;;  %v16537_v45 = vmul.f32 0.15, %v8735_v27  ;;  %v8525_v24 = vld [vmem:[#allocation6 + $0xe0] sm:$0xff] }
 0x523   : > { %vm8632_vm15 = vcmp.gt.f32.partialorder %v8622_v35, 0.3  ;;  %v8623_v55 = vadd.f32 %v8613_v34, %v8573_v12  ;;  %8673 = vst [vmem:[#allocation6 + $0xa8] sm:$0xff] %v8613_v34  ;;  %v8514_v12 = vld [vmem:[#allocation6 + $0x40] sm:$0xff]  ;;  %v8700_v34 = vld [vmem:[#allocation6 + $0x90] sm:$0xff] }
 0x524   : > { %vm8817_vm4 = vcmp.gt.f32.partialorder %v8807_v63, 0.3  ;;  %v11191_v48 = vsel %vm8632_vm15, 1.0, %v16954_v36  ;;  %v8808_v22 = vadd.f32 %v8798_v37, %v8758_v50  ;;  %8858 = vst [vmem:[#allocation6 + $0xf8] sm:$0xff] %v8798_v37  ;;  %v8317_v10 = vpop.f32.mrb[36].mxu0 }
 0x525   : > { %v11201_v29 = vsel %vm8817_vm4, 1.0, %v16954_v36  ;;  %v8465_v1 = vpop.f32.mrb[56].mxu1  ;;  %vm8633_vm6 = vcmp.gt.f32.partialorder %v8623_v55, 0.3  ;;  %v8574_v47 = vadd.f32 %v16474_v9, %v8317_v10  ;;  %v8604_v33 = vmul.f32 0.4, %v8317_v10 }
 0x526   : > { %v8759_v39 = vadd.f32 %v16478_v53, %v8465_v1  ;;  %v12898_v57 = vpop.f32.mrb[37].mxu0  ;;  %v12934_v6 = vpop.f32.mrb[57].mxu1  ;;  %v11192_v44 = vsel %vm8633_vm6, 1.0, %v16954_v36  ;;  %vm8818_vm8 = vcmp.gt.f32.partialorder %v8808_v22, 0.3  ;;  %v16553_v55 = vmul.f32 %v8560_v61, %v8514_v12 }
 0x527   : > { %v8789_v5 = vmul.f32 0.4, %v8465_v1  ;;  %v8320_v40 = vpop.f32.mrb[38].mxu0  ;;  %v8682_v54 = vpack.c.bf16 %v11192_v44, %v11191_v48  ;;  %v16544_v59 = vadd.f32 %v11192_v44, %v11191_v48  ;;  %v11202_v27 = vsel %vm8818_vm8, 1.0, %v16954_v36  ;;  %8664 = vst [vmem:[#allocation6 + $0x10] sm:$0xff] %v8574_v47  ;;  %v8468_v9 = vpop.f32.mrb[58].mxu1 }
 0x528   : > { %v8614_v51 = vadd.f32 %v8604_v33, %v16476_v21  ;;  %8849 = vst [vmem:[#allocation6 + $0x60] sm:$0xff] %v8759_v39  ;;  %v12899_v53 = vpop.f32.mrb[39].mxu0  ;;  %v8867_v31 = vpack.c.bf16 %v11202_v27, %v11201_v29  ;;  %v16548_v43 = vadd.f32 %v11202_v27, %v11201_v29  ;;  %v8575_v52 = vadd.f32 %v16482_v23, %v8320_v40  ;;  %v12935_v50 = vpop.f32.mrb[59].mxu1  ;;  %v8710_v29 = vld [vmem:[#allocation6 + $0x130] sm:$0xff] }
 0x529   : > { %v8799_v58 = vadd.f32 %v8789_v5, %v16480_v3  ;;  %8687 = vst [vmem:[#allocation7] sm:$0xff] %v8682_v54  ;;  %v8605_v35 = vmul.f32 0.4, %v8320_v40  ;;  %v8760_v21 = vadd.f32 %v16486_v11, %v8468_v9  ;;  %v8790_v63 = vmul.f32 0.4, %v8468_v9  ;;  %v8515_v53 = vld [vmem:[#allocation6 + $0x48] sm:$0xff] }
 0x52a   : > { %v8624_v28 = vadd.f32 %v8614_v51, %v8574_v47  ;;  %8674 = vst [vmem:[#allocation6 + $0xb0] sm:$0xff] %v8614_v51  ;;  %8872 = vst [vmem:[#allocation7 + $0x28] sm:$0xff] %v8867_v31  ;;  %v8561_v3 = vmul.f32 0.25, %v16528_v20  ;;  %v16557_v23 = vmul.f32 0.15, %v16528_v20  ;;  %v16561_v11 = vmul.f32 %v8590_v13, %v8525_v24 }
 0x52b   : > { %v8809_v37 = vadd.f32 %v8799_v58, %v8759_v39  ;;  %8859 = vst [vmem:[#allocation6 + $0x100] sm:$0xff] %v8799_v58  ;;  %8665 = vst [vmem:[#allocation6 + $0x18] sm:$0xff] %v8575_v52  ;;  %v8615_v17 = vadd.f32 %v8605_v35, %v16484_v0  ;;  %v8800_v48 = vadd.f32 %v8790_v63, %v16488_v42  ;;  %v8736_v20 = vsub.f32 1.0, %v8726_v46 }
 0x52c   : > { %vm8634_vm10 = vcmp.gt.f32.partialorder %v8624_v28, 0.3  ;;  %8850 = vst [vmem:[#allocation6 + $0x68] sm:$0xff] %v8760_v21  ;;  %v8325_v10 = vpop.f32.mrb[40].mxu0  ;;  %v16564_v1 = vmul.f32 %v8745_v56, %v8700_v34  ;;  %v16572_v40 = vmul.f32 %v16537_v45, %v8710_v29  ;;  %v16589_v63 = vmul.f32 %v8561_v3, %v8515_v53  ;;  %v13974_v3 = vld [vmem:[%s16934_s4 + $0x8] sm:$0xff]  }
 0x52d   : > { %v11193_v22 = vsel %vm8634_vm10, 1.0, %v16954_v36  ;;  %vm8819_vm12 = vcmp.gt.f32.partialorder %v8809_v37, 0.3  ;;  %v8473_v61 = vpop.f32.mrb[60].mxu1  ;;  %v8625_v33 = vadd.f32 %v8615_v17, %v8575_v52  ;;  %8675 = vst [vmem:[#allocation6 + $0xb8] sm:$0xff] %v8615_v17  ;;  %v8810_v0 = vadd.f32 %v8800_v48, %v8760_v21  ;;  %8860 = vst [vmem:[#allocation6 + $0x108] sm:$0xff] %v8800_v48 }
 0x52e   : > { %v11203_v47 = vsel %vm8819_vm12, 1.0, %v16954_v36  ;;  %v8576_v42 = vadd.f32 %v16491_v60, %v8325_v10  ;;  %v12902_v13 = vpop.f32.mrb[41].mxu0  ;;  %v12938_v39 = vpop.f32.mrb[61].mxu1  ;;  %v8606_v57 = vmul.f32 0.4, %v8325_v10  ;;  %v8761_v6 = vadd.f32 %v16497_v49, %v8473_v61 }
 0x52f   : > { %v8791_v44 = vmul.f32 0.4, %v8473_v61  ;;  %v8328_v5 = vpop.f32.mrb[42].mxu0  ;;  %v8476_v56 = vpop.f32.mrb[62].mxu1  ;;  %vm8635_vm14 = vcmp.gt.f32.partialorder %v8625_v33, 0.3 }
 0x530   : > { %vm8820_vm3 = vcmp.gt.f32.partialorder %v8810_v0, 0.3  ;;  %8666 = vst [vmem:[#allocation6 + $0x20] sm:$0xff] %v8576_v42  ;;  %v8577_v32 = vadd.f32 %v16501_v16, %v8328_v5  ;;  %v8607_v46 = vmul.f32 0.4, %v8328_v5  ;;  %v11194_v54 = vsel %vm8635_vm14, 1.0, %v16954_v36 }
 0x531   : > { %v11204_v60 = vsel %vm8820_vm3, 1.0, %v16954_v36  ;;  %v8616_v27 = vadd.f32 %v8606_v57, %v16495_v26  ;;  %v8801_v49 = vadd.f32 %v8791_v44, %v16499_v15  ;;  %8851 = vst [vmem:[#allocation6 + $0x70] sm:$0xff] %v8761_v6  ;;  %v12903_v51 = vpop.f32.mrb[43].mxu0  ;;  %v12939_v9 = vpop.f32.mrb[63].mxu1  ;;  %v8683_v45 = vpack.c.bf16 %v11194_v54, %v11193_v22  ;;  %v8526_v16 = vld [vmem:[#allocation6 + $0xe8] sm:$0xff]  ;;  %v8701_v5 = vld [vmem:[#allocation6 + $0x98] sm:$0xff] }
 0x532   : > { %v16579_v12 = vadd.f32 %v11194_v54, %v11193_v22  ;;  %v8868_v31 = vpack.c.bf16 %v11204_v60, %v11203_v47  ;;  %v8902_v58 = vadd.f32 %v11204_v60, %v11203_v47  ;;  %8667 = vst [vmem:[#allocation6 + $0x28] sm:$0xff] %v8577_v32  ;;  %v8617_v24 = vadd.f32 %v8607_v46, %v16503_v2  ;;  %v13973_v15 = vld [vmem:[%s16934_s4] sm:$0xff]  }
 0x533   : > { %v8626_v52 = vadd.f32 %v8616_v27, %v8576_v42  ;;  %8676 = vst [vmem:[#allocation6 + $0xc0] sm:$0xff] %v8616_v27  ;;  %v8811_v50 = vadd.f32 %v8801_v49, %v8761_v6  ;;  %8861 = vst [vmem:[#allocation6 + $0x110] sm:$0xff] %v8801_v49  ;;  %v8762_v26 = vadd.f32 %v16506_v25, %v8476_v56  ;;  %v8792_v21 = vmul.f32 0.4, %v8476_v56  ;;  %v8711_v56 = vld [vmem:[#allocation6 + $0x138] sm:$0xff] }
 0x534   : > { %8688 = vst [vmem:[#allocation7 + $0x8] sm:$0xff] %v8683_v45  ;;  %v8882_v28 = vpack.c.bf16 %v16579_v12, %v16544_v59  ;;  %8873 = vst [vmem:[#allocation7 + $0x30] sm:$0xff] %v8868_v31  ;;  %v8906_v35 = vpack.c.bf16 %v8902_v58, %v16548_v43  ;;  %v8627_v34 = vadd.f32 %v8617_v24, %v8577_v32  ;;  %v8333_v2 = vpop.f32.mrb[44].mxu0  ;;  %v8746_v22 = vmul.f32 0.25, %v8736_v20  ;;  %v13989_v59 = vld [vmem:[%s16935_s5 + $0x58] sm:$0xff]   ;;  %v13991_v12 = vld [vmem:[%s16935_s5 + $0x60] sm:$0xff]  }
 0x535   : > { %vm8636_vm5 = vcmp.gt.f32.partialorder %v8626_v52, 0.3  ;;  %vm8821_vm7 = vcmp.gt.f32.partialorder %v8811_v50, 0.3  ;;  %8677 = vst [vmem:[#allocation6 + $0xc8] sm:$0xff] %v8617_v24  ;;  %8852 = vst [vmem:[#allocation6 + $0x78] sm:$0xff] %v8762_v26  ;;  %v16592_v37 = vmul.f32 %v16557_v23, %v8526_v16  ;;  %v8802_v17 = vadd.f32 %v8792_v21, %v16508_v4 }
 0x536   : > { %v8481_v25 = vpop.f32.mrb[64].mxu1  ;;  %12965 = vmatmul.mubr.bf16.vlgmr.msra.gmra.mrb[52].mxu0 %v8906_v35  ;;  %v8578_v48 = vadd.f32 %v16510_v7, %v8333_v2  ;;  %v12906_v29 = vpop.f32.mrb[45].mxu0  ;;  %v8776_v10 = vmul.f32 0.15, %v8736_v20  ;;  %vm8637_vm9 = vcmp.gt.f32.partialorder %v8627_v34, 0.3  ;;  %v8756_v31 = vmul.f32 %v8746_v22, %v8701_v5 }
 0x537   : > { %v12942_v43 = vpop.f32.mrb[65].mxu1  ;;  %v8608_v61 = vmul.f32 0.4, %v8333_v2  ;;  %v8763_v47 = vadd.f32 %v16514_v38, %v8481_v25  ;;  %v8793_v33 = vmul.f32 0.4, %v8481_v25  ;;  %12977 = vmatpush3.bf16.msra.mxu0 %v13973_v15  ;;  %12968 = vmatprep.mubr.msk.bf16.mxu0 %vm14064_vm1, %v16954_v36  ;;  %v11195_v4 = vsel %vm8636_vm5, 1.0, %v16954_v36 }
 0x538   : > { %v11205_v7 = vsel %vm8821_vm7, 1.0, %v16954_v36  ;;  %v11196_v23 = vsel %vm8637_vm9, 1.0, %v16954_v36  ;;  %v8812_v0 = vadd.f32 %v8802_v17, %v8762_v26  ;;  %8862 = vst [vmem:[#allocation6 + $0x118] sm:$0xff] %v8802_v17  ;;  %8668 = vst [vmem:[#allocation6 + $0x30] sm:$0xff] %v8578_v48  ;;  %v8336_v20 = vpop.f32.mrb[46].mxu0  ;;  %v8484_v42 = vpop.f32.mrb[66].mxu1  ;;  %12978 = vmatprep.subr.bf16.mxu0 %v16954_v36  ;;  %v8786_v58 = vmul.f32 %v8776_v10, %v8711_v56 }
 0x539   : > { %v8684_v38 = vpack.c.bf16 %v11196_v23, %v11195_v4  ;;  %v8618_v13 = vadd.f32 %v8608_v61, %v16512_v18  ;;  %v8803_v39 = vadd.f32 %v8793_v33, %v16522_v30  ;;  %8853 = vst [vmem:[#allocation6 + $0x80] sm:$0xff] %v8763_v47  ;;  %v8579_v57 = vadd.f32 %v16516_v19, %v8336_v20  ;;  %v12907_v6 = vpop.f32.mrb[47].mxu0  ;;  %v12943_v44 = vpop.f32.mrb[67].mxu1  ;;  %v13975_v19 = vld [vmem:[%s16934_s4 + $0x10] sm:$0xff]   ;;  %v13976_v26 = vld [vmem:[%s16934_s4 + $0x18] sm:$0xff]  }
 0x53a   : > { %vm8822_vm11 = vcmp.gt.f32.partialorder %v8812_v0, 0.3  ;;  %v8609_v32 = vmul.f32 0.4, %v8336_v20  ;;  %v8764_v46 = vadd.f32 %v16533_v8, %v8484_v42  ;;  %v8794_v54 = vmul.f32 0.4, %v8484_v42 }
 0x53b   : > { %8689 = vst [vmem:[#allocation7 + $0x10] sm:$0xff] %v8684_v38  ;;  %v11206_v60 = vsel %vm8822_vm11, 1.0, %v16954_v36  ;;  %v8628_v27 = vadd.f32 %v8618_v13, %v8578_v48  ;;  %8678 = vst [vmem:[#allocation6 + $0xd0] sm:$0xff] %v8618_v13  ;;  %v8813_v18 = vadd.f32 %v8803_v39, %v8763_v47  ;;  %12979 = vmatpush3.bf16.msra.mxu0 %v13974_v3  ;;  %v13978_v6 = vld [vmem:[%s16934_s4 + $0x28] sm:$0xff]  }
 0x53c   : > { %8863 = vst [vmem:[#allocation6 + $0x120] sm:$0xff] %v8803_v39  ;;  %8669 = vst [vmem:[#allocation6 + $0x38] sm:$0xff] %v8579_v57  ;;  %v16616_v30 = vadd.f32 %v11196_v23, %v11195_v4  ;;  %v8869_v49 = vpack.c.bf16 %v11206_v60, %v11205_v7  ;;  %v8619_v51 = vadd.f32 %v8609_v32, %v16518_v62  ;;  %12980 = vmatprep.subr.bf16.mxu0 %v16954_v36  ;;  %v8341_v53 = vpop.f32.mrb[48].mxu0 }
 0x53d   : > { %v8804_v8 = vadd.f32 %v8794_v54, %v16542_v41  ;;  %8854 = vst [vmem:[#allocation6 + $0x88] sm:$0xff] %v8764_v46  ;;  %v16621_v9 = vadd.f32 %v11206_v60, %v11205_v7  ;;  %vm8638_vm13 = vcmp.gt.f32.partialorder %v8628_v27, 0.3  ;;  %vm8823_vm2 = vcmp.gt.f32.partialorder %v8813_v18, 0.3  ;;  %v8489_v45 = vpop.f32.mrb[68].mxu1 }
 0x53e   : > { %8874 = vst [vmem:[#allocation7 + $0x38] sm:$0xff] %v8869_v49  ;;  %v11197_v16 = vsel %vm8638_vm13, 1.0, %v16954_v36  ;;  %v11207_v52 = vsel %vm8823_vm2, 1.0, %v16954_v36  ;;  %v8629_v50 = vadd.f32 %v8619_v51, %v8579_v57  ;;  %8679 = vst [vmem:[#allocation6 + $0xd8] sm:$0xff] %v8619_v51  ;;  %v12910_v41 = vpop.f32.mrb[49].mxu0  ;;  %v12946_v24 = vpop.f32.mrb[69].mxu1  ;;  %v8580_v15 = vadd.f32 %v16553_v55, %v8341_v53 }
 0x53f   : > { %v8814_v62 = vadd.f32 %v8804_v8, %v8764_v46  ;;  %8864 = vst [vmem:[#allocation6 + $0x128] sm:$0xff] %v8804_v8  ;;  %v8610_v35 = vmul.f32 0.4, %v8341_v53  ;;  %v8765_v21 = vadd.f32 %v16564_v1, %v8489_v45  ;;  %v8795_v34 = vmul.f32 0.4, %v8489_v45  ;;  %12981 = vmatpush3.bf16.msra.mxu0 %v13975_v19  ;;  %v8344_v2 = vpop.f32.mrb[50].mxu0 }
 0x540   : > { %v8492_v25 = vpop.f32.mrb[70].mxu1  ;;  %vm8639_vm0 = vcmp.gt.f32.partialorder %v8629_v50, 0.3  ;;  %v8581_v17 = vadd.f32 %v16589_v63, %v8344_v2  ;;  %v8611_v48 = vmul.f32 0.4, %v8344_v2  ;;  %12982 = vmatprep.subr.bf16.mxu0 %v16954_v36  ;;  %8670 = vst [vmem:[#allocation6 + $0x40] sm:$0xff] %v8580_v15 }
 0x541   : > { %vm8824_vm15 = vcmp.gt.f32.partialorder %v8814_v62, 0.3  ;;  %v11198_v29 = vsel %vm8639_vm0, 1.0, %v16954_v36  ;;  %v8620_v55 = vadd.f32 %v8610_v35, %v16561_v11  ;;  %v8805_v1 = vadd.f32 %v8795_v34, %v16572_v40  ;;  %8855 = vst [vmem:[#allocation6 + $0x90] sm:$0xff] %v8765_v21  ;;  %v12911_v3 = vpop.f32.mrb[51].mxu0  ;;  %v12947_v22 = vpop.f32.mrb[71].mxu1 }
 0x542   : > { %v11208_v43 = vsel %vm8824_vm15, 1.0, %v16954_v36  ;;  %v8685_v10 = vpack.c.bf16 %v11198_v29, %v11197_v16  ;;  %v8621_v47 = vadd.f32 %v8611_v48, %v16592_v37  ;;  %8671 = vst [vmem:[#allocation6 + $0x48] sm:$0xff] %v8581_v17  ;;  %v8766_v63 = vadd.f32 %v8756_v31, %v8492_v25  ;;  %v13977_v40 = vld [vmem:[%s16934_s4 + $0x20] sm:$0xff]   ;;  %v13979_v54 = vld [vmem:[%s16934_s4 + $0x30] sm:$0xff]   ;;  %v13980_v27 = vld [vmem:[%s16934_s4 + $0x38] sm:$0xff]  }
 0x543   : > { %v8870_v61 = vpack.c.bf16 %v11208_v43, %v11207_v52  ;;  %v8630_v33 = vadd.f32 %v8620_v55, %v8580_v15  ;;  %8680 = vst [vmem:[#allocation6 + $0xe0] sm:$0xff] %v8620_v55  ;;  %v8815_v4 = vadd.f32 %v8805_v1, %v8765_v21  ;;  %8865 = vst [vmem:[#allocation6 + $0x130] sm:$0xff] %v8805_v1  ;;  %v8796_v7 = vmul.f32 0.4, %v8492_v25  ;;  %v13983_v18 = vld [vmem:[%s16935_s5 + $0x40] sm:$0xff]   ;;  %v13985_v19 = vld [vmem:[%s16935_s5 + $0x48] sm:$0xff]  }
 0x544   : > { %12983 = vmatpush3.bf16.msra.mxu0 %v13976_v26  ;;  %v8904_v23 = vadd.f32 %v11208_v43, %v11207_v52  ;;  %8690 = vst [vmem:[#allocation7 + $0x18] sm:$0xff] %v8685_v10  ;;  %v8631_v11 = vadd.f32 %v8621_v47, %v8581_v17  ;;  %8681 = vst [vmem:[#allocation6 + $0xe8] sm:$0xff] %v8621_v47  ;;  %v8880_v37 = vadd.f32 %v11198_v29, %v11197_v16  ;;  %v13992_v49 = vld [vmem:[%s16935_s5 + $0x68] sm:$0xff]   ;;  %v13993_v51 = vld [vmem:[%s16935_s5 + $0x30] sm:$0xff]  }
 0x545   : > { %8875 = vst [vmem:[#allocation7 + $0x40] sm:$0xff] %v8870_v61  ;;  %8856 = vst [vmem:[#allocation6 + $0x98] sm:$0xff] %v8766_v63  ;;  %12984 = vmatprep.subr.bf16.mxu0 %v16954_v36  ;;  %vm8640_vm4 = vcmp.gt.f32.partialorder %v8630_v33, 0.3  ;;  %v8806_v0 = vadd.f32 %v8796_v7, %v8786_v58  ;;  %vm8825_vm8 = vcmp.gt.f32.partialorder %v8815_v4, 0.3  ;;  %13037 = vmatpush3.bf16.msra.mxu1 %v13993_v51 }
 0x546   : > { %v8907_v20 = vpack.c.bf16 %v8904_v23, %v16621_v9  ;;  %vm8641_vm6 = vcmp.gt.f32.partialorder %v8631_v11, 0.3  ;;  %v8883_v42 = vpack.c.bf16 %v8880_v37, %v16616_v30  ;;  %v11199_v38 = vsel %vm8640_vm4, 1.0, %v16954_v36  ;;  %v13987_v30 = vld [vmem:[%s16935_s5 + $0x50] sm:$0xff]   ;;  %13038 = vmatprep.subr.bf16.mxu1 %v16954_v36  ;;  %v13995_v9 = vld [vmem:[%s16935_s5 + $0x38] sm:$0xff]   ;;  %v11413_v52 = vld [vmem:[#allocation9 + $0x8] sm:$0xff]  }
 0x547   : > { %v11200_v13 = vsel %vm8641_vm6, 1.0, %v16954_v36  ;;  %v8816_v39 = vadd.f32 %v8806_v0, %v8766_v63  ;;  %8866 = vst [vmem:[#allocation6 + $0x138] sm:$0xff] %v8806_v0  ;;  %v11209_v5 = vsel %vm8825_vm8, 1.0, %v16954_v36  ;;  %v13994_v8 = vld [vmem:[%s16935_s5 + $0x70] sm:$0xff]   ;;  %v13996_v53 = vld [vmem:[%s16935_s5 + $0x78] sm:$0xff]   ;;  %v11405_v41 = vunpack.c.l.bf16 %v11413_v52  ;;  %v9134_v24 = vld [vmem:[#allocation8] sm:$0xff] }
 0x548   : > { %12969 = vmatmul.mubr.bf16.gmra.mrb[56].mxu0 %v8907_v20  ;;  %v8686_v57 = vpack.c.bf16 %v11200_v13, %v11199_v38  ;;  %v8881_v44 = vadd.f32 %v11200_v13, %v11199_v38  ;;  %v11400_v45 = vld [vmem:[#allocation9] sm:$0xff]   ;;  %v11406_v35 = vunpack.c.h.bf16 %v11413_v52  ;;  %v9140_v21 = vld [vmem:[#allocation8 + $0x28] sm:$0xff]  ;;  %v9149_v29 = vld [vmem:[#allocation9 + $0x10] sm:$0xf] }
 0x549   : > { %12985 = vmatpush3.bf16.msra.mxu0 %v13977_v40  ;;  %12972 = vmatprep.mubr.msk.bf16.mxu0 %vm14064_vm1, %v16954_v36  ;;  %vm8826_vm10 = vcmp.gt.f32.partialorder %v8816_v39, 0.3  ;;  %v11401_v31 = vunpack.c.l.bf16 %v11400_v45  ;;  %v11402_v58 = vunpack.c.h.bf16 %v11400_v45  ;;  %v9135_v34 = vld [vmem:[#allocation8 + $0x8] sm:$0xff]  ;;  %v9141_v17 = vld [vmem:[#allocation8 + $0x30] sm:$0xff]  ;;  %v9157_v48 = vsub.f32 1.0, %v11405_v41  ;;  %v9137_v38 = vld [vmem:[#allocation8 + $0x18] sm:$0xff] }
 0x54a   : > { %12986 = vmatprep.subr.bf16.mxu0 %v16954_v36  ;;  %8691 = vst [vmem:[#allocation7 + $0x20] sm:$0xff] %v8686_v57  ;;  %v11210_v56 = vsel %vm8826_vm10, 1.0, %v16954_v36  ;;  %13039 = vmatpush3.bf16.msra.mxu1 %v13995_v9  ;;  %v9158_v1 = vsub.f32 1.0, %v11406_v35  ;;  %v9154_v33 = vunpack.c.l.bf16 %v9149_v29  ;;  %v9136_v7 = vld [vmem:[#allocation8 + $0x10] sm:$0xff]  ;;  %v9144_v52 = vld [vmem:[#allocation8 + $0x48] sm:$0xff] }
 0x54b   : > { %v8871_v32 = vpack.c.bf16 %v11210_v56, %v11209_v5  ;;  %v8905_v46 = vadd.f32 %v11210_v56, %v11209_v5  ;;  %13044 = vmatprep.subr.bf16.mxu1 %v16954_v36  ;;  %v9155_v16 = vsub.f32 1.0, %v11401_v31  ;;  %v9156_v50 = vsub.f32 1.0, %v11402_v58  ;;  %v13997_v56 = vld [vmem:[%s16935_s5 + $0x80] sm:$0xff]   ;;  %v14000_v29 = vld [vmem:[%s16935_s5 + $0x98] sm:$0xff]  }
 0x54c   : > { %v9162_v63 = vmul.f32 0.25, %v9157_v48  ;;  %v9177_v23 = vmul.f32 0.15, %v9157_v48  ;;  %v9163_v20 = vmul.f32 0.25, %v9158_v1  ;;  %v9178_v13 = vmul.f32 0.15, %v9158_v1 }
 0x54d   : > { %12987 = vmatpush3.bf16.msra.mxu0 %v13978_v6  ;;  %8876 = vst [vmem:[#allocation7 + $0x48] sm:$0xff] %v8871_v32  ;;  %v8908_v60 = vpack.c.bf16 %v8905_v46, %v8905_v46  ;;  %v9160_v62 = vmul.f32 0.25, %v9155_v16  ;;  %v9175_v26 = vmul.f32 0.15, %v9155_v16  ;;  %v9161_v15 = vmul.f32 0.25, %v9156_v50 }
 0x54e   : > { %12988 = vmatprep.subr.bf16.mxu0 %v16954_v36  ;;  %v9176_v2 = vmul.f32 0.15, %v9156_v50  ;;  %v9167_v6 = vmul.f32 %v9162_v63, %v9136_v7  ;;  %v9159_v5 = vsub.f32 1.0, %v9154_v33  ;;  %v14003_v63 = vld [vmem:[%s16935_s5 + $0xb0] sm:$0xff]   ;;  %v14004_v33 = vld [vmem:[%s16935_s5 + $0xb8] sm:$0xff]   ;;  %v14006_v7 = vld [vmem:[%s16935_s5 + $0xc8] sm:$0xff]  }
 0x54f   : > { %v9165_v25 = vmul.f32 %v9160_v62, %v9134_v24  ;;  %v9180_v43 = vmul.f32 %v9175_v26, %v9140_v21  ;;  %v9166_v55 = vmul.f32 %v9161_v15, %v9135_v34  ;;  %v13999_v24 = vld [vmem:[%s16935_s5 + $0x90] sm:$0xff]  }
 0x550   : > { %12973 = vmatmul.mubr.bf16.gmra.mrb[60].mxu0 %v8908_v60  ;;  %v9181_v22 = vmul.f32 %v9176_v2, %v9141_v17  ;;  %v9179_v9 = vmul.f32 0.15, %v9159_v5 }
 0x551   : > { %12989 = vmatpush3.bf16.msra.mxu0 %v13979_v54  ;;  %12992 = vmatprep.mubr.msk.bf16.mxu0 %vm14064_vm1, %v16954_v36  ;;  %v9168_v54 = vmul.f32 %v9163_v20, %v9137_v38  ;;  %v14012_v20 = vld [vmem:[%s16935_s5 + $0xf8] sm:$0xff]   ;;  %v14014_v38 = vld [vmem:[%s16935_s5 + $0x108] sm:$0xff]  }
 0x552   : > { %12990 = vmatprep.subr.bf16.mxu0 %v16954_v36  ;;  %v9184_v15 = vmul.f32 %v9179_v9, %v9144_v52 }
 0x555   : > { %12991 = vmatpush3.bf16.msra.mxu0 %v13980_v27 }
 0x556   : > { %13004 = vmatprep.subr.bf16.mxu0 %v16954_v36 }
 0x558   : > { %12993 = vmatmul.mubr.bf16.vlgmr.msra.gmra.mrb[52].mxu0 %v8882_v28  ;;  %v8884_v28 = vpack.c.bf16 %v8881_v44, %v8881_v44  ;;  %v9143_v44 = vld [vmem:[#allocation8 + $0x40] sm:$0xff] }
 0x559   : > { %12996 = vmatprep.mubr.msk.bf16.mxu0 %vm14064_vm1, %v16954_v36  ;;  %13005 = vmatpush3.bf16.msra.mxu0 %v13983_v18  ;;  %v9183_v27 = vmul.f32 %v9178_v13, %v9143_v44  ;;  %v13998_v18 = vld [vmem:[%s16935_s5 + $0x88] sm:$0xff]   ;;  %v14015_v13 = vld [vmem:[%s16935_s5 + $0x110] sm:$0xff]  }
 0x55a   : > { %13006 = vmatprep.subr.bf16.mxu0 %v16954_v36  ;;  %v14019_v44 = vld [vmem:[%s16935_s5 + $0x130] sm:$0xff]  }
 0x55d   : > { %13007 = vmatpush3.bf16.msra.mxu0 %v13985_v19 }
 0x55e   : > { %13008 = vmatprep.subr.bf16.mxu0 %v16954_v36 }
 0x560   : > { %12997 = vmatmul.mubr.bf16.gmra.mrb[56].mxu0 %v8883_v42  ;;  %v9142_v42 = vld [vmem:[#allocation8 + $0x38] sm:$0xff] }
 0x561   : > { %13000 = vmatprep.mubr.msk.bf16.mxu0 %vm14064_vm1, %v16954_v36  ;;  %13009 = vmatpush3.bf16.msra.mxu0 %v13987_v30  ;;  %v9182_v46 = vmul.f32 %v9177_v23, %v9142_v42  ;;  %v14007_v23 = vld [vmem:[%s16935_s5 + $0xd0] sm:$0xff]   ;;  %v14013_v42 = vld [vmem:[%s16935_s5 + $0x100] sm:$0xff]  }
 0x562   : > { %13010 = vmatprep.subr.bf16.mxu0 %v16954_v36 }
 0x565   : > { %13011 = vmatpush3.bf16.msra.mxu0 %v13989_v59 }
 0x566   : > { %13012 = vmatprep.subr.bf16.mxu0 %v16954_v36 }
 0x568   : > { %13001 = vmatmul.mubr.bf16.gmra.mrb[60].mxu0 %v8884_v28 }
 0x569   : > { %13013 = vmatpush3.bf16.msra.mxu0 %v13991_v12  ;;  %13020 = vmatprep.mubr.msk.bf16.mxu0 %vm14064_vm1, %v16954_v36  ;;  %v9164_v12 = vmul.f32 0.25, %v9159_v5  ;;  %v14021_v5 = vld [vmem:[%s16936_s6] sm:$0xff]  }
 0x56a   : > { %13014 = vmatprep.subr.bf16.mxu0 %v16954_v36 }
 0x56d   : > { %13015 = vmatpush3.bf16.msra.mxu0 %v13992_v49 }
 0x56e   : > { %13016 = vmatprep.subr.bf16.mxu0 %v16954_v36 }
 0x571   : > { %13017 = vmatpush3.bf16.msra.mxu0 %v13994_v8  ;;  %v9138_v8 = vld [vmem:[#allocation8 + $0x20] sm:$0xff] }
 0x572   : > { %13018 = vmatprep.subr.bf16.mxu0 %v16954_v36  ;;  %v9169_v41 = vmul.f32 %v9164_v12, %v9138_v8 }
 0x575   : > { %13019 = vmatpush3.bf16.msra.mxu0 %v13996_v53 }
 0x576   : > { %13104 = vmatprep.subr.bf16.mxu0 %v16954_v36 }
 0x62b   : > { %v9112_v3 = vpop.f32.mrb[52].mxu0 }
 0x62c   : > { %v9170_v10 = vadd.f32 %v9165_v25, %v9112_v3  ;;  %v9185_v61 = vmul.f32 0.4, %v9112_v3  ;;  %v12994_v47 = vpop.f32.mrb[53].mxu0 }
 0x62d   : > { %v9115_v4 = vpop.f32.mrb[54].mxu0  ;;  %v14002_v47 = vld [vmem:[%s16935_s5 + $0xa8] sm:$0xff]  }
 0x62e   : > { %v9190_v11 = vadd.f32 %v9185_v61, %v9180_v43  ;;  %9215 = vst [vmem:[#allocation8] sm:$0xff] %v9170_v10  ;;  %v9171_v40 = vadd.f32 %v9166_v55, %v9115_v4  ;;  %v9186_v37 = vmul.f32 0.4, %v9115_v4  ;;  %v12995_v0 = vpop.f32.mrb[55].mxu0  ;;  %v14005_v4 = vld [vmem:[%s16935_s5 + $0xc0] sm:$0xff]  }
 0x62f   : > { %v14011_v0 = vld [vmem:[%s16935_s5 + $0xf0] sm:$0xff]  }
 0x630   : > { %v9195_v39 = vadd.f32 %v9190_v11, %v9170_v10  ;;  %9220 = vst [vmem:[#allocation8 + $0x28] sm:$0xff] %v9190_v11  ;;  %v9191_v57 = vadd.f32 %v9186_v37, %v9181_v22  ;;  %9216 = vst [vmem:[#allocation8 + $0x8] sm:$0xff] %v9171_v40  ;;  %v14001_v22 = vld [vmem:[%s16935_s5 + $0xa0] sm:$0xff]   ;;  %v14008_v11 = vld [vmem:[%s16935_s5 + $0xd8] sm:$0xff]  }
 0x631   : > { %v14010_v37 = vld [vmem:[%s16935_s5 + $0xe8] sm:$0xff]  }
 0x632   : > { %vm9200_vm12 = vcmp.gt.f32.partialorder %v9195_v39, 0.3  ;;  %v9196_v32 = vadd.f32 %v9191_v57, %v9171_v40  ;;  %9221 = vst [vmem:[#allocation8 + $0x30] sm:$0xff] %v9191_v57  ;;  %v14009_v40 = vld [vmem:[%s16935_s5 + $0xe0] sm:$0xff]   ;;  %v14016_v39 = vld [vmem:[%s16935_s5 + $0x118] sm:$0xff]  }
 0x633   : > { %vm11287_vm14 = vmpackc.low %vm9200_vm12, %vm9200_vm12  ;;  %v9120_v60 = vpop.f32.mrb[56].mxu0  ;;  %v11243_v28 = vsel %vm9200_vm12, 1.0, %v16954_v36  ;;  %v14017_v57 = vld [vmem:[%s16935_s5 + $0x120] sm:$0xff]  }
 0x634   : > { %vm9201_vm3 = vcmp.gt.f32.partialorder %v9196_v32, 0.3  ;;  %v9172_v19 = vadd.f32 %v9167_v6, %v9120_v60  ;;  %v9187_v30 = vmul.f32 0.4, %v9120_v60  ;;  %v12998_v59 = vpop.f32.mrb[57].mxu0  ;;  %13041 = vmatmul.mubr.msk.bf16.vlgmr.msra.gmra.mrb[72].mxu1 %vm11287_vm14, %v14065_v14  ;;  %v14018_v6 = vld [vmem:[%s16935_s5 + $0x128] sm:$0xff]  }
 0x635   : > { %v11244_v49 = vsel %vm9201_vm3, 1.0, %v16954_v36  ;;  %vm11277_vm5 = vmpackc.low %vm9201_vm3, %vm9201_vm3  ;;  %13045 = vmatpush3.bf16.msra.mxu1 %v13997_v56  ;;  %v9123_v51 = vpop.f32.mrb[58].mxu0  ;;  %13060 = vmatprep.mubr.msk.bf16.mxu1 %vm14064_vm1, %v16954_v36  ;;  %v14020_v56 = vld [vmem:[%s16935_s5 + $0x138] sm:$0xff]   ;;  %v14022_v32 = vld [vmem:[%s16936_s6 + $0x8] sm:$0xff]  }
 0x636   : > { %v11408_v53 = vpack.c.bf16 %v11244_v49, %v11243_v28  ;;  %v9192_v45 = vadd.f32 %v9187_v30, %v9182_v46  ;;  %9217 = vst [vmem:[#allocation8 + $0x10] sm:$0xff] %v9172_v19  ;;  %v9173_v31 = vadd.f32 %v9168_v54, %v9123_v51  ;;  %v9188_v58 = vmul.f32 0.4, %v9123_v51  ;;  %v12999_v16 = vpop.f32.mrb[59].mxu0  ;;  %13021 = vmatmul.mubr.msk.bf16.vlgmr.msra.gmra.mrb[64].mxu0 %vm11277_vm5, %v14065_v14  ;;  %v14023_v46 = vld [vmem:[%s16936_s6 + $0x10] sm:$0xff]   ;;  %v14024_v54 = vld [vmem:[%s16936_s6 + $0x18] sm:$0xff]  }
 0x637   : > { %13046 = vmatprep.subr.bf16.mxu1 %v16954_v36  ;;  %13120 = vmatprep.mubr.msk.bf16.mxu0 %vm14064_vm1, %v16954_v36  ;;  %v14025_v60 = vld [vmem:[%s16936_s6 + $0x20] sm:$0xff]   ;;  %v9785_v49 = vld [vmem:[#allocation11] sm:$0xf] }
 0x638   : > { %11409 = vst [vmem:[#allocation9] sm:$0xff] %v11408_v53   ;;  %v9197_v50 = vadd.f32 %v9192_v45, %v9172_v19  ;;  %9222 = vst [vmem:[#allocation8 + $0x38] sm:$0xff] %v9192_v45  ;;  %v9193_v62 = vadd.f32 %v9188_v58, %v9183_v27  ;;  %13105 = vmatpush3.bf16.msra.mxu0 %v14021_v5  ;;  %v14026_v27 = vld [vmem:[%s16936_s6 + $0x28] sm:$0xff]   ;;  %v14028_v19 = vld [vmem:[%s16936_s6 + $0x38] sm:$0xff]   ;;  %v9786_v51 = vunpack.c.l.bf16 %v9785_v49 }
 0x639   : > { %9218 = vst [vmem:[#allocation8 + $0x18] sm:$0xff] %v9173_v31  ;;  %13047 = vmatpush3.bf16.msra.mxu1 %v13998_v18  ;;  %13106 = vmatprep.subr.bf16.mxu0 %v16954_v36  ;;  %v14027_v18 = vld [vmem:[%s16936_s6 + $0x30] sm:$0xff]  }
 0x63a   : > { %vm9202_vm7 = vcmp.gt.f32.partialorder %v9197_v50, 0.3  ;;  %v16731_v26 = vadd.f32 %v9193_v62, %v9173_v31  ;;  %9223 = vst [vmem:[#allocation8 + $0x40] sm:$0xff] %v9193_v62  ;;  %13048 = vmatprep.subr.bf16.mxu1 %v16954_v36  ;;  %v9787_v8 = vsub.f32 1.0, %v9786_v51  ;;  %v9782_v53 = vld [vmem:[#allocation10] sm:$0xff]  ;;  %v9784_v31 = vld [vmem:[#allocation10 + $0x8] sm:$0xff] }
 0x63b   : > { %v9128_v35 = vpop.f32.mrb[60].mxu0  ;;  %v11245_v25 = vsel %vm9202_vm7, 1.0, %v16954_v36  ;;  %vm11313_vm13 = vmpackc.low %vm9202_vm7, %vm9202_vm7 }
 0x63c   : > { %vm9203_vm9 = vcmp.gt.f32.partialorder %v16731_v26, 0.3  ;;  %v9174_v21 = vadd.f32 %v9169_v41, %v9128_v35  ;;  %v9189_v34 = vmul.f32 0.4, %v9128_v35  ;;  %v13002_v2 = vpop.f32.mrb[61].mxu0  ;;  %13107 = vmatpush3.bf16.msra.mxu0 %v14022_v32  ;;  %v9788_v9 = vmul.f32 0.25, %v9787_v8 }
 0x63d   : > { %v11246_v17 = vsel %vm9203_vm9, 1.0, %v16954_v36  ;;  %13049 = vmatpush3.bf16.msra.mxu1 %v13999_v24  ;;  %v9131_v48 = vpop.f32.mrb[62].mxu0  ;;  %vm11339_vm2 = vmpackc.low %vm9203_vm9, %vm9203_vm9  ;;  %13108 = vmatprep.subr.bf16.mxu0 %v16954_v36  ;;  %v9791_v45 = vmul.f32 0.15, %v9787_v8  ;;  %v10032_v32 = vld [vmem:[#allocation14] sm:$0xff] }
 0x63e   : > { %v11411_v43 = vpack.c.bf16 %v11246_v17, %v11245_v25  ;;  %v9194_v55 = vadd.f32 %v9189_v34, %v9184_v15  ;;  %9219 = vst [vmem:[#allocation8 + $0x20] sm:$0xff] %v9174_v21  ;;  %v13003_v1 = vpop.f32.mrb[63].mxu0  ;;  %13050 = vmatprep.subr.bf16.mxu1 %v16954_v36  ;;  %v9789_v58 = vmul.f32 %v9788_v9, %v9782_v53  ;;  %v14029_v34 = vld [vmem:[%s16937_s7] sm:$0xff]   ;;  %v14030_v17 = vld [vmem:[%s16937_s7 + $0x8] sm:$0xff]   ;;  %v14031_v48 = vld [vmem:[%s16937_s7 + $0x10] sm:$0xff]  }
 0x63f   : > { %v9792_v50 = vmul.f32 %v9791_v45, %v9784_v31  ;;  %v14035_v1 = vld [vmem:[%s16937_s7 + $0x30] sm:$0xff]  }
 0x640   : > { %11414 = vst [vmem:[#allocation9 + $0x8] sm:$0xff] %v11411_v43   ;;  %v16744_v3 = vadd.f32 %v9194_v55, %v9174_v21  ;;  %9224 = vst [vmem:[#allocation8 + $0x48] sm:$0xff] %v9194_v55  ;;  %13109 = vmatpush3.bf16.msra.mxu0 %v14023_v46  ;;  %v14033_v43 = vld [vmem:[%s16937_s7 + $0x20] sm:$0xff]   ;;  %v14034_v55 = vld [vmem:[%s16937_s7 + $0x28] sm:$0xff]  }
 0x641   : > { %13051 = vmatpush3.bf16.msra.mxu1 %v14000_v29  ;;  %13110 = vmatprep.subr.bf16.mxu0 %v16954_v36  ;;  %v14032_v29 = vld [vmem:[%s16937_s7 + $0x18] sm:$0xff]  }
 0x642   : > { %vm9204_vm11 = vcmp.gt.f32.partialorder %v16744_v3, 0.3  ;;  %13052 = vmatprep.subr.bf16.mxu1 %v16954_v36  ;;  %v14036_v3 = vld [vmem:[%s16937_s7 + $0x38] sm:$0xff]  }
 0x643   : > { %v11247_v10 = vsel %vm9204_vm11, 1.0, %v16954_v36  ;;  %vm11365_vm0 = vmpackc.low %vm9204_vm11, %vm9204_vm11 }
 0x644   : > { %v11398_v61 = vpack.c.bf16 %v11247_v10, %v11247_v10  ;;  %13111 = vmatpush3.bf16.msra.mxu0 %v14024_v54  ;;  %v10034_v54 = vld [vmem:[#allocation14 + $0x8] sm:$0xff] }
 0x645   : > { %13053 = vmatpush3.bf16.msra.mxu1 %v14001_v22  ;;  %13112 = vmatprep.subr.bf16.mxu0 %v16954_v36  ;;  %v9910_v22 = vld [vmem:[#allocation13] sm:$0xf] }
 0x646   : > { %9250 = vst [vmem:[#allocation9 + $0x10] sm:$0xf] %v11398_v61  ;;  %13054 = vmatprep.subr.bf16.mxu1 %v16954_v36  ;;  %v9911_v10 = vunpack.c.l.bf16 %v9910_v22 }
 0x648   : > { %13113 = vmatpush3.bf16.msra.mxu0 %v14025_v60  ;;  %v9912_v61 = vsub.f32 1.0, %v9911_v10 }
 0x649   : > { %13055 = vmatpush3.bf16.msra.mxu1 %v14002_v47  ;;  %13114 = vmatprep.subr.bf16.mxu0 %v16954_v36 }
 0x64a   : > { %13056 = vmatprep.subr.bf16.mxu1 %v16954_v36  ;;  %v9913_v47 = vmul.f32 0.25, %v9912_v61 }
 0x64c   : > { %13115 = vmatpush3.bf16.msra.mxu0 %v14026_v27 }
 0x64d   : > { %13057 = vmatpush3.bf16.msra.mxu1 %v14003_v63  ;;  %13116 = vmatprep.subr.bf16.mxu0 %v16954_v36  ;;  %v9907_v63 = vld [vmem:[#allocation12] sm:$0xff] }
 0x64e   : > { %13058 = vmatprep.subr.bf16.mxu1 %v16954_v36 }
 0x650   : > { %13117 = vmatpush3.bf16.msra.mxu0 %v14027_v18 }
 0x651   : > { %13059 = vmatpush3.bf16.msra.mxu1 %v14004_v33  ;;  %13118 = vmatprep.subr.bf16.mxu0 %v16954_v36  ;;  %v9916_v33 = vmul.f32 0.15, %v9912_v61 }
 0x652   : > { %13064 = vmatprep.subr.bf16.mxu1 %v16954_v36 }
 0x654   : > { %13061 = vmatmul.mubr.msk.bf16.vlgmr.msra.gmra.mrb[72].mxu1 %vm11313_vm13, %v14065_v14  ;;  %13119 = vmatpush3.bf16.msra.mxu0 %v14028_v19 }
 0x655   : > { %13065 = vmatpush3.bf16.msra.mxu1 %v14005_v4  ;;  %13080 = vmatprep.mubr.msk.bf16.mxu1 %vm14064_vm1, %v16954_v36  ;;  %v9909_v4 = vld [vmem:[#allocation12 + $0x8] sm:$0xff] }
 0x656   : > { %13066 = vmatprep.subr.bf16.mxu1 %v16954_v36  ;;  %13124 = vmatprep.subr.bf16.mxu0 %v16954_v36 }
 0x659   : > { %13067 = vmatpush3.bf16.msra.mxu1 %v14006_v7  ;;  %v9914_v7 = vmul.f32 %v9913_v47, %v9907_v63 }
 0x65a   : > { %13068 = vmatprep.subr.bf16.mxu1 %v16954_v36 }
 0x65d   : > { %13069 = vmatpush3.bf16.msra.mxu1 %v14007_v23  ;;  %v9917_v23 = vmul.f32 %v9916_v33, %v9909_v4 }
 0x65e   : > { %13070 = vmatprep.subr.bf16.mxu1 %v16954_v36 }
 0x661   : > { %13071 = vmatpush3.bf16.msra.mxu1 %v14008_v11 }
 0x662   : > { %13072 = vmatprep.subr.bf16.mxu1 %v16954_v36 }
 0x665   : > { %13073 = vmatpush3.bf16.msra.mxu1 %v14009_v40 }
 0x666   : > { %13074 = vmatprep.subr.bf16.mxu1 %v16954_v36 }
 0x669   : > { %13075 = vmatpush3.bf16.msra.mxu1 %v14010_v37 }
 0x66a   : > { %13076 = vmatprep.subr.bf16.mxu1 %v16954_v36 }
 0x66d   : > { %13077 = vmatpush3.bf16.msra.mxu1 %v14011_v0 }
 0x66e   : > { %13078 = vmatprep.subr.bf16.mxu1 %v16954_v36 }
 0x671   : > { %13079 = vmatpush3.bf16.msra.mxu1 %v14012_v20 }
 0x672   : > { %13084 = vmatprep.subr.bf16.mxu1 %v16954_v36 }
 0x674   : > { %13081 = vmatmul.mubr.msk.bf16.vlgmr.msra.gmra.mrb[72].mxu1 %vm11339_vm2, %v14065_v14 }
 0x675   : > { %13085 = vmatpush3.bf16.msra.mxu1 %v14013_v42  ;;  %13100 = vmatprep.mubr.msk.bf16.mxu1 %vm14064_vm1, %v16954_v36 }
 0x676   : > { %13086 = vmatprep.subr.bf16.mxu1 %v16954_v36 }
 0x679   : > { %13087 = vmatpush3.bf16.msra.mxu1 %v14014_v38 }
 0x67a   : > { %13088 = vmatprep.subr.bf16.mxu1 %v16954_v36 }
 0x67d   : > { %13089 = vmatpush3.bf16.msra.mxu1 %v14015_v13 }
 0x67e   : > { %13090 = vmatprep.subr.bf16.mxu1 %v16954_v36 }
 0x681   : > { %13091 = vmatpush3.bf16.msra.mxu1 %v14016_v39 }
 0x682   : > { %13092 = vmatprep.subr.bf16.mxu1 %v16954_v36 }
 0x685   : > { %13093 = vmatpush3.bf16.msra.mxu1 %v14017_v57 }
 0x686   : > { %13094 = vmatprep.subr.bf16.mxu1 %v16954_v36 }
 0x689   : > { %13095 = vmatpush3.bf16.msra.mxu1 %v14018_v6  ;;  %v10035_v6 = vld [vmem:[#allocation15] sm:$0xf] }
 0x68a   : > { %13096 = vmatprep.subr.bf16.mxu1 %v16954_v36 }
 0x68d   : > { %13097 = vmatpush3.bf16.msra.mxu1 %v14019_v44  ;;  %v10036_v44 = vunpack.c.l.bf16 %v10035_v6 }
 0x68e   : > { %13098 = vmatprep.subr.bf16.mxu1 %v16954_v36 }
 0x68f   : > { %v10037_v5 = vsub.f32 1.0, %v10036_v44 }
 0x691   : > { %13099 = vmatpush3.bf16.msra.mxu1 %v14020_v56  ;;  %v10038_v56 = vmul.f32 0.25, %v10037_v5  ;;  %v10041_v46 = vmul.f32 0.15, %v10037_v5 }
 0x693   : > { %v10039_v60 = vmul.f32 %v10038_v56, %v10032_v32  ;;  %v10042_v27 = vmul.f32 %v10041_v46, %v10034_v54 }
 0x694   : > { %13101 = vmatmul.mubr.msk.bf16.vlgmr.msra.gmra.mrb[72].mxu1 %vm11365_vm0, %v14065_v14 }
 0x709   : > { %v9368_v30 = vpop.f32.mrb[64].mxu0 }
 0x70a   : > { %v13022_v59 = vpop.f32.mrb[65].mxu0 }
 0x70b   : > { %v9371_v12 = vpop.f32.mrb[66].mxu0 }
 0x70c   : > { %v13023_v28 = vpop.f32.mrb[67].mxu0 }
 0x767   : > { %v9775_v16 = vpop.f32.mrb[72].mxu1 }
 0x768   : > { %v13144_v52 = vadd.f32 %v9775_v16, %v9368_v30  ;;  %v13102_v62 = vpop.f32.mrb[73].mxu1 }
 0x769   : > { %v9778_v41 = vpop.f32.mrb[74].mxu1 }
 0x76a   : > { %v9790_v24 = vadd.f32 %v13144_v52, %v9789_v58  ;;  %v9793_v26 = vmul.f32 0.4, %v13144_v52  ;;  %v13103_v15 = vpop.f32.mrb[75].mxu1 }
 0x76c   : > { %v9794_v35 = vadd.f32 %v9793_v26, %v9792_v50  ;;  %9797 = vst [vmem:[#allocation10] sm:$0xff] %v9790_v24 }
 0x76e   : > { %v9795_v21 = vadd.f32 %v9794_v35, %v9790_v24  ;;  %9798 = vst [vmem:[#allocation10 + $0x8] sm:$0xff] %v9794_v35 }
 0x770   : > { %vm9796_vm15 = vcmp.gt.f32.partialorder %v9795_v21, 0.3 }
 0x771   : > { %v11367_v2 = vsel %vm9796_vm15, 1.0, %v16954_v36  ;;  %vm11376_vm4 = vmpackc.low %vm9796_vm15, %vm9796_vm15 }
 0x772   : > { %v9801_v25 = vpack.c.bf16 %v11367_v2, %v11367_v2  ;;  %13121 = vmatmul.mubr.msk.bf16.vlgmr.msra.gmra.mrb[68].mxu0 %vm11376_vm4, %v14065_v14 }
 0x773   : > { %13125 = vmatpush3.bf16.msra.mxu0 %v14029_v34  ;;  %13140 = vmatprep.mubr.msk.bf16.mxu0 %vm14064_vm1, %v16954_v36 }
 0x774   : > { %9802 = vst [vmem:[#allocation11] sm:$0xf] %v9801_v25  ;;  %13126 = vmatprep.subr.bf16.mxu0 %v16954_v36 }
 0x777   : > { %13127 = vmatpush3.bf16.msra.mxu0 %v14030_v17 }
 0x778   : > { %13128 = vmatprep.subr.bf16.mxu0 %v16954_v36 }
 0x77b   : > { %13129 = vmatpush3.bf16.msra.mxu0 %v14031_v48 }
 0x77c   : > { %13130 = vmatprep.subr.bf16.mxu0 %v16954_v36 }
 0x77f   : > { %13131 = vmatpush3.bf16.msra.mxu0 %v14032_v29 }
 0x780   : > { %13132 = vmatprep.subr.bf16.mxu0 %v16954_v36 }
 0x783   : > { %13133 = vmatpush3.bf16.msra.mxu0 %v14033_v43 }
 0x784   : > { %13134 = vmatprep.subr.bf16.mxu0 %v16954_v36 }
 0x787   : > { %13135 = vmatpush3.bf16.msra.mxu0 %v14034_v55 }
 0x788   : > { %13136 = vmatprep.subr.bf16.mxu0 %v16954_v36 }
 0x78b   : > { %13137 = vmatpush3.bf16.msra.mxu0 %v14035_v1 }
 0x78c   : > { %13138 = vmatprep.subr.bf16.mxu0 %v16954_v36 }
 0x78f   : > { %13139 = vmatpush3.bf16.msra.mxu0 %v14036_v3 }
 0x845   : > { %v9901_v11 = vpop.f32.mrb[68].mxu0 }
 0x846   : > { %v9915_v40 = vadd.f32 %v9914_v7, %v9901_v11  ;;  %v9918_v37 = vmul.f32 0.4, %v9901_v11  ;;  %v13122_v0 = vpop.f32.mrb[69].mxu0 }
 0x847   : > { %v9904_v20 = vpop.f32.mrb[70].mxu0 }
 0x848   : > { %v9919_v42 = vadd.f32 %v9918_v37, %v9917_v23  ;;  %9922 = vst [vmem:[#allocation12] sm:$0xff] %v9915_v40  ;;  %v13123_v38 = vpop.f32.mrb[71].mxu0 }
 0x84a   : > { %v9920_v13 = vadd.f32 %v9919_v42, %v9915_v40  ;;  %9923 = vst [vmem:[#allocation12 + $0x8] sm:$0xff] %v9919_v42 }
 0x84c   : > { %vm9921_vm1 = vcmp.gt.f32.partialorder %v9920_v13, 0.3 }
 0x84d   : > { %v11378_v39 = vsel %vm9921_vm1, 1.0, %v16954_v36  ;;  %vm11387_vm6 = vmpackc.low %vm9921_vm1, %vm9921_vm1 }
 0x84e   : > { %v9926_v57 = vpack.c.bf16 %v11378_v39, %v11378_v39  ;;  %13141 = vmatmul.mubr.msk.bf16.vlgmr.msra.gmra.mrb[72].mxu0 %vm11387_vm6, %v14065_v14  ;;  %v10053_v14 = vld [vmem:[%s16938_s8] sm:$0xff] }
 0x850   : > { %9927 = vst [vmem:[#allocation13] sm:$0xf] %v9926_v57 }
 0x921   : > { %v10026_v18 = vpop.f32.mrb[72].mxu0 }
 0x922   : > { %v10040_v19 = vadd.f32 %v10039_v60, %v10026_v18  ;;  %v10043_v30 = vmul.f32 0.4, %v10026_v18  ;;  %v13142_v59 = vpop.f32.mrb[73].mxu0 }
 0x923   : > { %v10029_v12 = vpop.f32.mrb[74].mxu0 }
 0x924   : > { %v10044_v28 = vadd.f32 %v10043_v30, %v10042_v27  ;;  %10049 = vst [vmem:[#allocation14] sm:$0xff] %v10040_v19  ;;  %v13143_v49 = vpop.f32.mrb[75].mxu0 }
 0x926   : > { %v10045_v51 = vadd.f32 %v10044_v28, %v10040_v19  ;;  %10050 = vst [vmem:[#allocation14 + $0x8] sm:$0xff] %v10044_v28 }
 0x928   : > { %vm10046_vm8 = vcmp.gt.f32.partialorder %v10045_v51, 0.3 }
 0x929   : > { %v11389_v8 = vsel %vm10046_vm8, 1.0, %v16954_v36 }
 0x92a   : > { %v10051_v9 = vpack.c.bf16 %v11389_v8, %v11389_v8  ;;  %v10054_v53 = vadd.f32 %v11389_v8, %v10053_v14 }
 0x92c   : > { %10052 = vst [vmem:[#allocation15] sm:$0xf] %v10051_v9  ;;  %10055 = vst [vmem:[%s16938_s8] sm:$0xff] %v10054_v53 }
 0x92d PF: > { %s18_s29 = sadd.s32 1, %s14059_s29   ;;  %s16998_s27 = smov %s14055_s28 }
 0x92e   : > { %p15_p6 = scmp.ge.s32.totalorder %s18_s29, 10   ;;  %s16999_s28 = smov %s17001_s30 }
 0x930   :  { %17 = sbr.rel (!%p15_p6) target bundleno = 2 (0x2), region = 112 }

</bundles_post_ra>
